<compile_context>
chip_gen: v6e
topology: v6e:2x2x1
jax: 0.10.0
libtpu: 0.0.40
codegen_flags: <defaults>
</compile_context>

<pallas_src>
import functools

import jax
import jax.numpy as jnp
from jax.experimental import pallas as pl
from jax.experimental.pallas import tpu as pltpu

LANE = 128
MXU_DTYPE = jnp.bfloat16     # matmul operand dtype (f32 accumulation on the MXU)
ACT_DTYPE = jnp.float32      # VMEM-resident activations / epilogue math
X0 = -1                      # id of the kernel-input activation (stem conv input)


# --------------------------- weight preparation ------------------------------

def _cpad(c):
    return ((c + LANE - 1) // LANE) * LANE


def _prep_conv_w(w, cin_p, cout_p):
    """torch Conv1d weight (Cout, Cin, K) -> (K*Cin_p, Cout_p) bf16, zero-padded."""
    cout, cin, k = w.shape
    w = jnp.transpose(w, (2, 1, 0))                      # (K, Cin, Cout)
    w = jnp.pad(w, ((0, 0), (0, cin_p - cin), (0, cout_p - cout)))
    return w.reshape(k * cin_p, cout_p).astype(MXU_DTYPE)


def _prep_bn(bn, cout_p):
    """Folded-BN scale/shift (1, C) f32, zero-padded so padded channels stay 0."""
    s, b = bn
    s = jnp.pad(s, ((0, 0), (0, cout_p - s.shape[1]))).astype(jnp.float32)
    b = jnp.pad(b, ((0, 0), (0, cout_p - b.shape[1]))).astype(jnp.float32)
    return s, b


# ------------------------------- plan build -----------------------------------

def prepare_model(params, L_seq):
    """Flatten weights into kernel order and build the static execution plan.

    Activations are tracked as {id: dict(L=valid_len, pad=stored L-padding, C=lanes)}.
    id == X0 is the kernel input; ids 0..n-1 are VMEM scratch buffers of shape
    (L + 2*pad, C) per batch element (the grid runs over batch).
    """
    weights, plan, order = [], [], []
    acts = {X0: dict(L=L_seq, pad=3, C=_cpad(params['conv1_w'].shape[1]))}

    def new_act(L, pad, C):
        i = len(order)
        acts[i] = dict(L=L, pad=pad, C=C)
        order.append(i)
        return i

    def add_conv(src, w, bn, stride, pad, relu, res, out_pad):
        cout, cin, K = w.shape
        cin_p, cout_p = _cpad(cin), _cpad(cout)
        weights.append(_prep_conv_w(w, cin_p, cout_p))
        s, b = _prep_bn(bn, cout_p)
        weights.append(s)
        weights.append(b)
        L_out = (acts[src]['L'] + 2 * pad - K) // stride + 1
        dst = new_act(L_out, out_pad, cout_p)
        plan.append(dict(op='conv', src=src, dst=dst, K=K, cin=cin_p,
                         stride=stride, pad=pad, relu=relu, res=res))
        return dst

    # --- stem: Conv1d(100,64,7,s2,p3)+BN+ReLU, then MaxPool1d(3,2,1) ---
    a1 = add_conv(X0, params['conv1_w'], params['bn1'],
                  stride=2, pad=3, relu=True, res=None, out_pad=1)
    L_pool = (acts[a1]['L'] + 2 - 3) // 2 + 1
    p1 = new_act(L_pool, 1, acts[a1]['C'])
    plan.append(dict(op='maxpool', src=a1, dst=p1))
    x = p1

    # --- residual layers (BasicBlock stacks) ---
    n_layers = len(params['layers'])
    for li, layer in enumerate(params['layers']):
        for bi, blk in enumerate(layer):
            s = blk['stride']
            last = (li == n_layers - 1) and (bi == len(layer) - 1)
            out_pad = 0 if last else 1
            if 'wd' in blk:     # downsample branch: conv1x1(stride) + BN
                identity = add_conv(x, blk['wd'], blk['bnd'], stride=s, pad=0,
                                    relu=False, res=None, out_pad=0)
            else:
                identity = x
            h = add_conv(x, blk['w1'], blk['bn1'], stride=s, pad=1,
                         relu=True, res=None, out_pad=1)
            x = add_conv(h, blk['w2'], blk['bn2'], stride=1, pad=1,
                         relu=True, res=identity, out_pad=out_pad)

    # --- head: AvgPool1d(4) + Flatten + Dropout(identity) + Linear + Sigmoid ---
    assert acts[x]['L'] == 4, "AvgPool1d(4) head expects spatial length 4"
    num_classes = params['fc_w'].shape[1]
    ncp = _cpad(num_classes)
    c_head = acts[x]['C']
    fc_w = jnp.pad(params['fc_w'],
                   ((0, c_head - params['fc_w'].shape[0]),
                    (0, ncp - num_classes))).astype(MXU_DTYPE)
    fc_b = jnp.pad(params['fc_b'],
                   ((0, 0), (0, ncp - num_classes))).astype(jnp.float32)
    weights.append(fc_w)
    weights.append(fc_b)
    plan.append(dict(op='head', src=x))

    scratch_shapes = [
        pltpu.VMEM((acts[i]['L'] + 2 * acts[i]['pad'], acts[i]['C']), ACT_DTYPE)
        for i in order
    ]
    return weights, plan, acts, scratch_shapes, num_classes, ncp


# --------------------------------- kernel -------------------------------------

def _resnet_kernel(*refs, plan, acts, n_weights):
    x0_ref = refs[0]
    w_refs = refs[1:1 + n_weights]
    out_ref = refs[1 + n_weights]
    scratch = refs[2 + n_weights:]
    wi = iter(w_refs)

    def act_ref(i):
        return x0_ref if i == X0 else scratch[i]

    def read(src, start, size, stride):
        r = act_ref(src)
        if stride == 1:
            return r[pl.ds(start, size), :]
        return r[pl.ds(start, size, stride), :]        # strided sublane read

    for op in plan:
        kind = op['op']
        if kind == 'conv':
            w_ref = next(wi); s_ref = next(wi); b_ref = next(wi)
            src, dst = op['src'], op['dst']
            m_s, m_d = acts[src], acts[dst]
            K, stride, pad, cin = op['K'], op['stride'], op['pad'], op['cin']
            L_out, dst_pad = m_d['L'], m_d['pad']
            d_ref = scratch[dst]
            if dst_pad > 0:                            # keep conv L-padding rows zero
                d_ref[...] = jnp.zeros(d_ref.shape, d_ref.dtype)
            # K-tap conv-as-matmul accumulation (no im2col), bf16 MXU / f32 acc.
            acc = None
            for k in range(K):
                xk = read(src, m_s['pad'] - pad + k, L_out, stride).astype(MXU_DTYPE)
                wk = w_ref[pl.ds(k * cin, cin), :]
                d = jnp.dot(xk, wk, preferred_element_type=jnp.float32)
                acc = d if acc is None else acc + d
            y = acc * s_ref[...] + b_ref[...]          # folded BatchNorm (f32 epilogue)
            if op['res'] is not None:                  # residual add
                rm = acts[op['res']]
                y = y + read(op['res'], rm['pad'], L_out, 1)
            if op['relu']:
                y = jnp.maximum(y, 0.0)
            d_ref[pl.ds(dst_pad, L_out), :] = y.astype(d_ref.dtype)

        elif kind == 'maxpool':
            # MaxPool1d(3, stride=2, padding=1); the source is post-ReLU (>=0) and
            # its padding rows are 0, so zero padding is exactly equivalent to
            # PyTorch's -inf padding here.
            src, dst = op['src'], op['dst']
            m_s, m_d = acts[src], acts[dst]
            L_out, dst_pad = m_d['L'], m_d['pad']
            d_ref = scratch[dst]
            if dst_pad > 0:
                d_ref[...] = jnp.zeros(d_ref.shape, d_ref.dtype)
            m = None
            for k in range(3):
                xk = read(src, m_s['pad'] - 1 + k, L_out, 2)
                m = xk if m is None else jnp.maximum(m, xk)
            d_ref[pl.ds(dst_pad, L_out), :] = m

        else:  # head: AvgPool1d over full length + Linear + Sigmoid
            fcw_ref = next(wi); fcb_ref = next(wi)
            m_s = acts[op['src']]
            xa = read(op['src'], m_s['pad'], m_s['L'], 1)            # (4, 256) f32
            xm = jnp.mean(xa, axis=0, keepdims=True)                  # (1, 256)
            y = jnp.dot(xm.astype(MXU_DTYPE), fcw_ref[...],
                        preferred_element_type=jnp.float32) + fcb_ref[...]
            y = jax.nn.sigmoid(y)                                     # (1, ncp)
            out_ref[...] = jnp.broadcast_to(y, out_ref.shape)


# --------------------------------- wrapper -------------------------------------

def build_forward(params, B, L_seq):
    weights, plan, acts, scratch_shapes, num_classes, ncp = prepare_model(params, L_seq)

    rows0 = acts[X0]['L'] + 2 * acts[X0]['pad']        # 64 + 6 = 70
    rows0_p = ((rows0 + 7) // 8) * 8                   # sublane-align the x0 block
    c0 = acts[X0]['C']
    emb_w = params['emb']
    max_norm = params['max_norm']
    emb_dim = emb_w.shape[1]

    # rough, advisory cost estimate
    flops = 0
    for op in plan:
        if op['op'] == 'conv':
            m_d = acts[op['dst']]
            flops += 2 * B * m_d['L'] * op['K'] * op['cin'] * m_d['C']
    flops += 2 * B * acts[plan[-1]['src']]['C'] * ncp
    bytes_accessed = (sum(int(w.size) * w.dtype.itemsize for w in weights)
                      + B * rows0_p * c0 * 4 + B * 8 * ncp * 4)
    transcendentals = B * ncp

    kern = functools.partial(_resnet_kernel, plan=plan, acts=acts,
                             n_weights=len(weights))

    _wmap = lambda b: (0, 0)                           # weights: same block every step
    in_specs = [pl.BlockSpec((rows0_p, c0), lambda b: (b, 0))]
    in_specs += [pl.BlockSpec(w.shape, _wmap) for w in weights]
    out_specs = pl.BlockSpec((8, ncp), lambda b: (b, 0))

    call = pl.pallas_call(
        kern,
        out_shape=jax.ShapeDtypeStruct((B * 8, ncp), jnp.float32),
        grid=(B,),
        in_specs=in_specs,
        out_specs=out_specs,
        scratch_shapes=scratch_shapes,
        compiler_params=pltpu.CompilerParams(
            dimension_semantics=("parallel",),         # batch across TCs on v7x
            vmem_limit_bytes=32 * 1024 * 1024),
        cost_estimate=pl.CostEstimate(flops=int(flops),
                                      transcendentals=int(transcendentals),
                                      bytes_accessed=int(bytes_accessed)),
    )

    @jax.jit
    def forward(tokens):
        # TODO(synk): embedding gather + max_norm renorm + torch's raw .view
        # scramble kept as tiny XLA glue (gather has no clean in-kernel path);
        # the renorm matches eval-time outputs but not torch's in-place weight
        # mutation side effect. Dropout(0.5) is identity (inference semantics).
        e = jnp.take(emb_w, tokens, axis=0)                            # (B, L, 100)
        n = jnp.sqrt(jnp.sum(e * e, axis=-1, keepdims=True))
        e = e * jnp.where(n > max_norm, max_norm / (n + 1e-7), 1.0)
        x = e.reshape(B, emb_dim, L_seq)        # torch .view: raw reshape, NOT transpose
        x = jnp.transpose(x, (0, 2, 1))         # kernel layout: channels-last (B, L, C)
        pad_lo = acts[X0]['pad']
        pad_hi = rows0_p - L_seq - pad_lo
        x = jnp.pad(x, ((0, 0), (pad_lo, pad_hi), (0, c0 - emb_dim)))
        x = x.reshape(B * rows0_p, c0).astype(ACT_DTYPE)

        out = call(x, *weights)                                        # (B*8, ncp)
        out = out.reshape(B, 8, ncp)[:, 0, :num_classes]
        if num_classes == 1:
            out = out.reshape(-1)
        return out

    return forward


# ----------------------------- parameter init ----------------------------------

def init_params(key, unique_words, size_token, num_classes=2):
    kit = iter(jax.random.split(key, 128))

    def nxt():
        return next(kit)

    def conv_w(cout, cin, k):
        return (0.05 * jax.random.normal(nxt(), (cout, cin, k))).astype(jnp.float32)

    def bn_params(c):
        gamma = 1.0 + 0.1 * jax.random.normal(nxt(), (c,))
        beta = 0.1 * jax.random.normal(nxt(), (c,))
        rmean = 0.1 * jax.random.normal(nxt(), (c,))
        rvar = 1.0 + 0.1 * jnp.abs(jax.random.normal(nxt(), (c,)))
        scale = gamma / jnp.sqrt(rvar + 1e-5)          # eval-mode BN folding
        shift = beta - rmean * scale
        return (scale.reshape(1, c).astype(jnp.float32),
                shift.reshape(1, c).astype(jnp.float32))

    p = {'max_norm': float(size_token)}
    p['emb'] = jax.random.normal(nxt(), (unique_words, 100)).astype(jnp.float32)
    p['conv1_w'] = conv_w(64, 100, 7)
    p['bn1'] = bn_params(64)

    # (in_planes_at_entry, out_channels, num_blocks, first_stride) for layer1..3
    cfg = [(64, 64, 2, 1), (64, 128, 2, 2), (128, 256, 2, 2)]
    layers = []
    inplanes = 64
    for (_, cout, nblocks, stride) in cfg:
        blocks = []
        for bi in range(nblocks):
            s = stride if bi == 0 else 1
            cin = inplanes if bi == 0 else cout
            blk = {'stride': s,
                   'w1': conv_w(cout, cin, 3), 'bn1': bn_params(cout),
                   'w2': conv_w(cout, cout, 3), 'bn2': bn_params(cout)}
            if bi == 0 and (s != 1 or cin != cout):
                blk['wd'] = conv_w(cout, cin, 1)
                blk['bnd'] = bn_params(cout)
            blocks.append(blk)
        layers.append(blocks)
        inplanes = cout
    p['layers'] = layers
    p['fc_w'] = (0.05 * jax.random.normal(nxt(), (256, num_classes))).astype(jnp.float32)
    p['fc_b'] = (0.05 * jax.random.normal(nxt(), (1, num_classes))).astype(jnp.float32)
    return p


if __name__ == "__main__":
    key = jax.random.PRNGKey(0)
    pkey, dkey = jax.random.split(key)

    B, L = 2, 64                 # token ids: (batch, sequence)
    unique_words = 50
    size_token = 3.0             # embedding max_norm
    num_classes = 2

    params = init_params(pkey, unique_words, size_token, num_classes)
    tokens = jax.random.randint(dkey, (B, L), 0, unique_words, dtype=jnp.int32)

    forward = build_forward(params, B, L)
    out = jax.block_until_ready(forward(tokens))
    assert out.shape == (B, num_classes)
    assert bool(jnp.all(jnp.isfinite(out)))
    print("KERNEL_OK")
</pallas_src>

<mosaic_0001>
module attributes {stable_mosaic.version = 11 : i64} {
  func.func @_resnet_kernel(%arg0: i32, %arg1: memref<72x128xf32, #tpu.memory_space<vmem>>, %arg2: memref<896x128xbf16, #tpu.memory_space<vmem>>, %arg3: memref<1x128xf32, #tpu.memory_space<vmem>>, %arg4: memref<1x128xf32, #tpu.memory_space<vmem>>, %arg5: memref<384x128xbf16, #tpu.memory_space<vmem>>, %arg6: memref<1x128xf32, #tpu.memory_space<vmem>>, %arg7: memref<1x128xf32, #tpu.memory_space<vmem>>, %arg8: memref<384x128xbf16, #tpu.memory_space<vmem>>, %arg9: memref<1x128xf32, #tpu.memory_space<vmem>>, %arg10: memref<1x128xf32, #tpu.memory_space<vmem>>, %arg11: memref<384x128xbf16, #tpu.memory_space<vmem>>, %arg12: memref<1x128xf32, #tpu.memory_space<vmem>>, %arg13: memref<1x128xf32, #tpu.memory_space<vmem>>, %arg14: memref<384x128xbf16, #tpu.memory_space<vmem>>, %arg15: memref<1x128xf32, #tpu.memory_space<vmem>>, %arg16: memref<1x128xf32, #tpu.memory_space<vmem>>, %arg17: memref<128x128xbf16, #tpu.memory_space<vmem>>, %arg18: memref<1x128xf32, #tpu.memory_space<vmem>>, %arg19: memref<1x128xf32, #tpu.memory_space<vmem>>, %arg20: memref<384x128xbf16, #tpu.memory_space<vmem>>, %arg21: memref<1x128xf32, #tpu.memory_space<vmem>>, %arg22: memref<1x128xf32, #tpu.memory_space<vmem>>, %arg23: memref<384x128xbf16, #tpu.memory_space<vmem>>, %arg24: memref<1x128xf32, #tpu.memory_space<vmem>>, %arg25: memref<1x128xf32, #tpu.memory_space<vmem>>, %arg26: memref<384x128xbf16, #tpu.memory_space<vmem>>, %arg27: memref<1x128xf32, #tpu.memory_space<vmem>>, %arg28: memref<1x128xf32, #tpu.memory_space<vmem>>, %arg29: memref<384x128xbf16, #tpu.memory_space<vmem>>, %arg30: memref<1x128xf32, #tpu.memory_space<vmem>>, %arg31: memref<1x128xf32, #tpu.memory_space<vmem>>, %arg32: memref<128x256xbf16, #tpu.memory_space<vmem>>, %arg33: memref<1x256xf32, #tpu.memory_space<vmem>>, %arg34: memref<1x256xf32, #tpu.memory_space<vmem>>, %arg35: memref<384x256xbf16, #tpu.memory_space<vmem>>, %arg36: memref<1x256xf32, #tpu.memory_space<vmem>>, %arg37: memref<1x256xf32, #tpu.memory_space<vmem>>, %arg38: memref<768x256xbf16, #tpu.memory_space<vmem>>, %arg39: memref<1x256xf32, #tpu.memory_space<vmem>>, %arg40: memref<1x256xf32, #tpu.memory_space<vmem>>, %arg41: memref<768x256xbf16, #tpu.memory_space<vmem>>, %arg42: memref<1x256xf32, #tpu.memory_space<vmem>>, %arg43: memref<1x256xf32, #tpu.memory_space<vmem>>, %arg44: memref<768x256xbf16, #tpu.memory_space<vmem>>, %arg45: memref<1x256xf32, #tpu.memory_space<vmem>>, %arg46: memref<1x256xf32, #tpu.memory_space<vmem>>, %arg47: memref<256x128xbf16, #tpu.memory_space<vmem>>, %arg48: memref<1x128xf32, #tpu.memory_space<vmem>>, %arg49: memref<8x128xf32, #tpu.memory_space<vmem>>, %arg50: memref<34x128xf32, #tpu.memory_space<vmem>>, %arg51: memref<18x128xf32, #tpu.memory_space<vmem>>, %arg52: memref<18x128xf32, #tpu.memory_space<vmem>>, %arg53: memref<18x128xf32, #tpu.memory_space<vmem>>, %arg54: memref<18x128xf32, #tpu.memory_space<vmem>>, %arg55: memref<18x128xf32, #tpu.memory_space<vmem>>, %arg56: memref<8x128xf32, #tpu.memory_space<vmem>>, %arg57: memref<10x128xf32, #tpu.memory_space<vmem>>, %arg58: memref<10x128xf32, #tpu.memory_space<vmem>>, %arg59: memref<10x128xf32, #tpu.memory_space<vmem>>, %arg60: memref<10x128xf32, #tpu.memory_space<vmem>>, %arg61: memref<4x256xf32, #tpu.memory_space<vmem>>, %arg62: memref<6x256xf32, #tpu.memory_space<vmem>>, %arg63: memref<6x256xf32, #tpu.memory_space<vmem>>, %arg64: memref<6x256xf32, #tpu.memory_space<vmem>>, %arg65: memref<4x256xf32, #tpu.memory_space<vmem>>) attributes {dimension_semantics = [#tpu.dimension_semantics<parallel>], iteration_bounds = array<i64: 2>, scalar_prefetch = 0 : i64, scratch_operands = 16 : i64, tpu.core_type = #tpu.core_type<tc>, window_params = [{transform_indices = @transform_0, window_bounds = array<i64: 72, 128>}, {pipeline_mode = #tpu.pipeline_mode<synchronous>, transform_indices = @transform_1, window_bounds = array<i64: 896, 128>}, {pipeline_mode = #tpu.pipeline_mode<synchronous>, transform_indices = @transform_2, window_bounds = array<i64: 1, 128>}, {pipeline_mode = #tpu.pipeline_mode<synchronous>, transform_indices = @transform_3, window_bounds = array<i64: 1, 128>}, {pipeline_mode = #tpu.pipeline_mode<synchronous>, transform_indices = @transform_4, window_bounds = array<i64: 384, 128>}, {pipeline_mode = #tpu.pipeline_mode<synchronous>, transform_indices = @transform_5, window_bounds = array<i64: 1, 128>}, {pipeline_mode = #tpu.pipeline_mode<synchronous>, transform_indices = @transform_6, window_bounds = array<i64: 1, 128>}, {pipeline_mode = #tpu.pipeline_mode<synchronous>, transform_indices = @transform_7, window_bounds = array<i64: 384, 128>}, {pipeline_mode = #tpu.pipeline_mode<synchronous>, transform_indices = @transform_8, window_bounds = array<i64: 1, 128>}, {pipeline_mode = #tpu.pipeline_mode<synchronous>, transform_indices = @transform_9, window_bounds = array<i64: 1, 128>}, {pipeline_mode = #tpu.pipeline_mode<synchronous>, transform_indices = @transform_10, window_bounds = array<i64: 384, 128>}, {pipeline_mode = #tpu.pipeline_mode<synchronous>, transform_indices = @transform_11, window_bounds = array<i64: 1, 128>}, {pipeline_mode = #tpu.pipeline_mode<synchronous>, transform_indices = @transform_12, window_bounds = array<i64: 1, 128>}, {pipeline_mode = #tpu.pipeline_mode<synchronous>, transform_indices = @transform_13, window_bounds = array<i64: 384, 128>}, {pipeline_mode = #tpu.pipeline_mode<synchronous>, transform_indices = @transform_14, window_bounds = array<i64: 1, 128>}, {pipeline_mode = #tpu.pipeline_mode<synchronous>, transform_indices = @transform_15, window_bounds = array<i64: 1, 128>}, {pipeline_mode = #tpu.pipeline_mode<synchronous>, transform_indices = @transform_16, window_bounds = array<i64: 128, 128>}, {pipeline_mode = #tpu.pipeline_mode<synchronous>, transform_indices = @transform_17, window_bounds = array<i64: 1, 128>}, {pipeline_mode = #tpu.pipeline_mode<synchronous>, transform_indices = @transform_18, window_bounds = array<i64: 1, 128>}, {pipeline_mode = #tpu.pipeline_mode<synchronous>, transform_indices = @transform_19, window_bounds = array<i64: 384, 128>}, {pipeline_mode = #tpu.pipeline_mode<synchronous>, transform_indices = @transform_20, window_bounds = array<i64: 1, 128>}, {pipeline_mode = #tpu.pipeline_mode<synchronous>, transform_indices = @transform_21, window_bounds = array<i64: 1, 128>}, {pipeline_mode = #tpu.pipeline_mode<synchronous>, transform_indices = @transform_22, window_bounds = array<i64: 384, 128>}, {pipeline_mode = #tpu.pipeline_mode<synchronous>, transform_indices = @transform_23, window_bounds = array<i64: 1, 128>}, {pipeline_mode = #tpu.pipeline_mode<synchronous>, transform_indices = @transform_24, window_bounds = array<i64: 1, 128>}, {pipeline_mode = #tpu.pipeline_mode<synchronous>, transform_indices = @transform_25, window_bounds = array<i64: 384, 128>}, {pipeline_mode = #tpu.pipeline_mode<synchronous>, transform_indices = @transform_26, window_bounds = array<i64: 1, 128>}, {pipeline_mode = #tpu.pipeline_mode<synchronous>, transform_indices = @transform_27, window_bounds = array<i64: 1, 128>}, {pipeline_mode = #tpu.pipeline_mode<synchronous>, transform_indices = @transform_28, window_bounds = array<i64: 384, 128>}, {pipeline_mode = #tpu.pipeline_mode<synchronous>, transform_indices = @transform_29, window_bounds = array<i64: 1, 128>}, {pipeline_mode = #tpu.pipeline_mode<synchronous>, transform_indices = @transform_30, window_bounds = array<i64: 1, 128>}, {pipeline_mode = #tpu.pipeline_mode<synchronous>, transform_indices = @transform_31, window_bounds = array<i64: 128, 256>}, {pipeline_mode = #tpu.pipeline_mode<synchronous>, transform_indices = @transform_32, window_bounds = array<i64: 1, 256>}, {pipeline_mode = #tpu.pipeline_mode<synchronous>, transform_indices = @transform_33, window_bounds = array<i64: 1, 256>}, {pipeline_mode = #tpu.pipeline_mode<synchronous>, transform_indices = @transform_34, window_bounds = array<i64: 384, 256>}, {pipeline_mode = #tpu.pipeline_mode<synchronous>, transform_indices = @transform_35, window_bounds = array<i64: 1, 256>}, {pipeline_mode = #tpu.pipeline_mode<synchronous>, transform_indices = @transform_36, window_bounds = array<i64: 1, 256>}, {pipeline_mode = #tpu.pipeline_mode<synchronous>, transform_indices = @transform_37, window_bounds = array<i64: 768, 256>}, {pipeline_mode = #tpu.pipeline_mode<synchronous>, transform_indices = @transform_38, window_bounds = array<i64: 1, 256>}, {pipeline_mode = #tpu.pipeline_mode<synchronous>, transform_indices = @transform_39, window_bounds = array<i64: 1, 256>}, {pipeline_mode = #tpu.pipeline_mode<synchronous>, transform_indices = @transform_40, window_bounds = array<i64: 768, 256>}, {pipeline_mode = #tpu.pipeline_mode<synchronous>, transform_indices = @transform_41, window_bounds = array<i64: 1, 256>}, {pipeline_mode = #tpu.pipeline_mode<synchronous>, transform_indices = @transform_42, window_bounds = array<i64: 1, 256>}, {pipeline_mode = #tpu.pipeline_mode<synchronous>, transform_indices = @transform_43, window_bounds = array<i64: 768, 256>}, {pipeline_mode = #tpu.pipeline_mode<synchronous>, transform_indices = @transform_44, window_bounds = array<i64: 1, 256>}, {pipeline_mode = #tpu.pipeline_mode<synchronous>, transform_indices = @transform_45, window_bounds = array<i64: 1, 256>}, {pipeline_mode = #tpu.pipeline_mode<synchronous>, transform_indices = @transform_46, window_bounds = array<i64: 256, 128>}, {pipeline_mode = #tpu.pipeline_mode<synchronous>, transform_indices = @transform_47, window_bounds = array<i64: 1, 128>}, {transform_indices = @transform_48, window_bounds = array<i64: 8, 128>}]} {
    %cst = arith.constant 0.000000e+00 : f32
    %0 = vector.broadcast %cst : f32 to vector<34x128xf32>
    %c0 = arith.constant 0 : index
    %c0_0 = arith.constant 0 : index
    %1 = vector.load %arg50[%c0, %c0_0] : memref<34x128xf32, #tpu.memory_space<vmem>>, vector<34x128xf32>
    tpu.vector_store %arg50[%c0, %c0_0], %0 {strides = array<i32>} : memref<34x128xf32, #tpu.memory_space<vmem>>, vector<34x128xf32>,
    %c0_1 = arith.constant 0 : index
    %c0_2 = arith.constant 0 : index
    %2 = tpu.strided_load %arg1[%c0_1, %c0_2] {strides = array<i32: 2, 1>} : memref<72x128xf32, #tpu.memory_space<vmem>>, vector<32x128xf32>
    %3 = arith.truncf %2 : vector<32x128xf32> to vector<32x128xbf16>
    %c0_3 = arith.constant 0 : index
    %c0_4 = arith.constant 0 : index
    %4 = vector.load %arg2[%c0_3, %c0_4] : memref<896x128xbf16, #tpu.memory_space<vmem>>, vector<128x128xbf16>
    %cst_5 = arith.constant dense<0.000000e+00> : vector<32x128xf32>
    %5 = tpu.matmul %3, %4, %cst_5 {dimension_numbers = #tpu.dot_dimension_numbers<[1], [0], [0], [1], [0, 0, 1, 1], [], []>} : vector<32x128xbf16>, vector<128x128xbf16>, vector<32x128xf32> -> vector<32x128xf32>
    %c1 = arith.constant 1 : index
    %c0_6 = arith.constant 0 : index
    %6 = tpu.strided_load %arg1[%c1, %c0_6] {strides = array<i32: 2, 1>} : memref<72x128xf32, #tpu.memory_space<vmem>>, vector<32x128xf32>
    %7 = arith.truncf %6 : vector<32x128xf32> to vector<32x128xbf16>
    %c128 = arith.constant 128 : index
    %c0_7 = arith.constant 0 : index
    %8 = vector.load %arg2[%c128, %c0_7] : memref<896x128xbf16, #tpu.memory_space<vmem>>, vector<128x128xbf16>
    %cst_8 = arith.constant dense<0.000000e+00> : vector<32x128xf32>
    %9 = tpu.matmul %7, %8, %cst_8 {dimension_numbers = #tpu.dot_dimension_numbers<[1], [0], [0], [1], [0, 0, 1, 1], [], []>} : vector<32x128xbf16>, vector<128x128xbf16>, vector<32x128xf32> -> vector<32x128xf32>
    %10 = arith.addf %5, %9 : vector<32x128xf32>
    %c2 = arith.constant 2 : index
    %c0_9 = arith.constant 0 : index
    %11 = tpu.strided_load %arg1[%c2, %c0_9] {strides = array<i32: 2, 1>} : memref<72x128xf32, #tpu.memory_space<vmem>>, vector<32x128xf32>
    %12 = arith.truncf %11 : vector<32x128xf32> to vector<32x128xbf16>
    %c256 = arith.constant 256 : index
    %c0_10 = arith.constant 0 : index
    %13 = vector.load %arg2[%c256, %c0_10] : memref<896x128xbf16, #tpu.memory_space<vmem>>, vector<128x128xbf16>
    %cst_11 = arith.constant dense<0.000000e+00> : vector<32x128xf32>
    %14 = tpu.matmul %12, %13, %cst_11 {dimension_numbers = #tpu.dot_dimension_numbers<[1], [0], [0], [1], [0, 0, 1, 1], [], []>} : vector<32x128xbf16>, vector<128x128xbf16>, vector<32x128xf32> -> vector<32x128xf32>
    %15 = arith.addf %10, %14 : vector<32x128xf32>
    %c3 = arith.constant 3 : index
    %c0_12 = arith.constant 0 : index
    %16 = tpu.strided_load %arg1[%c3, %c0_12] {strides = array<i32: 2, 1>} : memref<72x128xf32, #tpu.memory_space<vmem>>, vector<32x128xf32>
    %17 = arith.truncf %16 : vector<32x128xf32> to vector<32x128xbf16>
    %c384 = arith.constant 384 : index
    %c0_13 = arith.constant 0 : index
    %18 = vector.load %arg2[%c384, %c0_13] : memref<896x128xbf16, #tpu.memory_space<vmem>>, vector<128x128xbf16>
    %cst_14 = arith.constant dense<0.000000e+00> : vector<32x128xf32>
    %19 = tpu.matmul %17, %18, %cst_14 {dimension_numbers = #tpu.dot_dimension_numbers<[1], [0], [0], [1], [0, 0, 1, 1], [], []>} : vector<32x128xbf16>, vector<128x128xbf16>, vector<32x128xf32> -> vector<32x128xf32>
    %20 = arith.addf %15, %19 : vector<32x128xf32>
    %c4 = arith.constant 4 : index
    %c0_15 = arith.constant 0 : index
    %21 = tpu.strided_load %arg1[%c4, %c0_15] {strides = array<i32: 2, 1>} : memref<72x128xf32, #tpu.memory_space<vmem>>, vector<32x128xf32>
    %22 = arith.truncf %21 : vector<32x128xf32> to vector<32x128xbf16>
    %c512 = arith.constant 512 : index
    %c0_16 = arith.constant 0 : index
    %23 = vector.load %arg2[%c512, %c0_16] : memref<896x128xbf16, #tpu.memory_space<vmem>>, vector<128x128xbf16>
    %cst_17 = arith.constant dense<0.000000e+00> : vector<32x128xf32>
    %24 = tpu.matmul %22, %23, %cst_17 {dimension_numbers = #tpu.dot_dimension_numbers<[1], [0], [0], [1], [0, 0, 1, 1], [], []>} : vector<32x128xbf16>, vector<128x128xbf16>, vector<32x128xf32> -> vector<32x128xf32>
    %25 = arith.addf %20, %24 : vector<32x128xf32>
    %c5 = arith.constant 5 : index
    %c0_18 = arith.constant 0 : index
    %26 = tpu.strided_load %arg1[%c5, %c0_18] {strides = array<i32: 2, 1>} : memref<72x128xf32, #tpu.memory_space<vmem>>, vector<32x128xf32>
    %27 = arith.truncf %26 : vector<32x128xf32> to vector<32x128xbf16>
    %c640 = arith.constant 640 : index
    %c0_19 = arith.constant 0 : index
    %28 = vector.load %arg2[%c640, %c0_19] : memref<896x128xbf16, #tpu.memory_space<vmem>>, vector<128x128xbf16>
    %cst_20 = arith.constant dense<0.000000e+00> : vector<32x128xf32>
    %29 = tpu.matmul %27, %28, %cst_20 {dimension_numbers = #tpu.dot_dimension_numbers<[1], [0], [0], [1], [0, 0, 1, 1], [], []>} : vector<32x128xbf16>, vector<128x128xbf16>, vector<32x128xf32> -> vector<32x128xf32>
    %30 = arith.addf %25, %29 : vector<32x128xf32>
    %c6 = arith.constant 6 : index
    %c0_21 = arith.constant 0 : index
    %31 = tpu.strided_load %arg1[%c6, %c0_21] {strides = array<i32: 2, 1>} : memref<72x128xf32, #tpu.memory_space<vmem>>, vector<32x128xf32>
    %32 = arith.truncf %31 : vector<32x128xf32> to vector<32x128xbf16>
    %c768 = arith.constant 768 : index
    %c0_22 = arith.constant 0 : index
    %33 = vector.load %arg2[%c768, %c0_22] : memref<896x128xbf16, #tpu.memory_space<vmem>>, vector<128x128xbf16>
    %cst_23 = arith.constant dense<0.000000e+00> : vector<32x128xf32>
    %34 = tpu.matmul %32, %33, %cst_23 {dimension_numbers = #tpu.dot_dimension_numbers<[1], [0], [0], [1], [0, 0, 1, 1], [], []>} : vector<32x128xbf16>, vector<128x128xbf16>, vector<32x128xf32> -> vector<32x128xf32>
    %35 = arith.addf %30, %34 : vector<32x128xf32>
    %c0_24 = arith.constant 0 : index
    %c0_25 = arith.constant 0 : index
    %36 = vector.load %arg3[%c0_24, %c0_25] : memref<1x128xf32, #tpu.memory_space<vmem>>, vector<1x128xf32>
    %37 = vector.broadcast %36 : vector<1x128xf32> to vector<32x128xf32>
    %38 = arith.mulf %35, %37 : vector<32x128xf32>
    %c0_26 = arith.constant 0 : index
    %c0_27 = arith.constant 0 : index
    %39 = vector.load %arg4[%c0_26, %c0_27] : memref<1x128xf32, #tpu.memory_space<vmem>>, vector<1x128xf32>
    %40 = vector.broadcast %39 : vector<1x128xf32> to vector<32x128xf32>
    %41 = arith.addf %38, %40 : vector<32x128xf32>
    %cst_28 = arith.constant 0.000000e+00 : f32
    %42 = vector.broadcast %cst_28 : f32 to vector<32x128xf32>
    %43 = arith.maximumf %41, %42 : vector<32x128xf32>
    %c1_29 = arith.constant 1 : index
    %c0_30 = arith.constant 0 : index
    %44 = vector.load %arg50[%c1_29, %c0_30] : memref<34x128xf32, #tpu.memory_space<vmem>>, vector<32x128xf32>
    tpu.vector_store %arg50[%c1_29, %c0_30], %43 {strides = array<i32>} : memref<34x128xf32, #tpu.memory_space<vmem>>, vector<32x128xf32>,
    %cst_31 = arith.constant 0.000000e+00 : f32
    %45 = vector.broadcast %cst_31 : f32 to vector<18x128xf32>
    %c0_32 = arith.constant 0 : index
    %c0_33 = arith.constant 0 : index
    %46 = vector.load %arg51[%c0_32, %c0_33] : memref<18x128xf32, #tpu.memory_space<vmem>>, vector<18x128xf32>
    tpu.vector_store %arg51[%c0_32, %c0_33], %45 {strides = array<i32>} : memref<18x128xf32, #tpu.memory_space<vmem>>, vector<18x128xf32>,
    %c0_34 = arith.constant 0 : index
    %c0_35 = arith.constant 0 : index
    %47 = tpu.strided_load %arg50[%c0_34, %c0_35] {strides = array<i32: 2, 1>} : memref<34x128xf32, #tpu.memory_space<vmem>>, vector<16x128xf32>
    %c1_36 = arith.constant 1 : index
    %c0_37 = arith.constant 0 : index
    %48 = tpu.strided_load %arg50[%c1_36, %c0_37] {strides = array<i32: 2, 1>} : memref<34x128xf32, #tpu.memory_space<vmem>>, vector<16x128xf32>
    %49 = arith.maximumf %47, %48 : vector<16x128xf32>
    %c2_38 = arith.constant 2 : index
    %c0_39 = arith.constant 0 : index
    %50 = tpu.strided_load %arg50[%c2_38, %c0_39] {strides = array<i32: 2, 1>} : memref<34x128xf32, #tpu.memory_space<vmem>>, vector<16x128xf32>
    %51 = arith.maximumf %49, %50 : vector<16x128xf32>
    %c1_40 = arith.constant 1 : index
    %c0_41 = arith.constant 0 : index
    %52 = vector.load %arg51[%c1_40, %c0_41] : memref<18x128xf32, #tpu.memory_space<vmem>>, vector<16x128xf32>
    tpu.vector_store %arg51[%c1_40, %c0_41], %51 {strides = array<i32>} : memref<18x128xf32, #tpu.memory_space<vmem>>, vector<16x128xf32>,
    %cst_42 = arith.constant 0.000000e+00 : f32
    %53 = vector.broadcast %cst_42 : f32 to vector<18x128xf32>
    %c0_43 = arith.constant 0 : index
    %c0_44 = arith.constant 0 : index
    %54 = vector.load %arg52[%c0_43, %c0_44] : memref<18x128xf32, #tpu.memory_space<vmem>>, vector<18x128xf32>
    tpu.vector_store %arg52[%c0_43, %c0_44], %53 {strides = array<i32>} : memref<18x128xf32, #tpu.memory_space<vmem>>, vector<18x128xf32>,
    %c0_45 = arith.constant 0 : index
    %c0_46 = arith.constant 0 : index
    %55 = vector.load %arg51[%c0_45, %c0_46] : memref<18x128xf32, #tpu.memory_space<vmem>>, vector<16x128xf32>
    %56 = arith.truncf %55 : vector<16x128xf32> to vector<16x128xbf16>
    %c0_47 = arith.constant 0 : index
    %c0_48 = arith.constant 0 : index
    %57 = vector.load %arg5[%c0_47, %c0_48] : memref<384x128xbf16, #tpu.memory_space<vmem>>, vector<128x128xbf16>
    %cst_49 = arith.constant dense<0.000000e+00> : vector<16x128xf32>
    %58 = tpu.matmul %56, %57, %cst_49 {dimension_numbers = #tpu.dot_dimension_numbers<[1], [0], [0], [1], [0, 0, 1, 1], [], []>} : vector<16x128xbf16>, vector<128x128xbf16>, vector<16x128xf32> -> vector<16x128xf32>
    %c1_50 = arith.constant 1 : index
    %c0_51 = arith.constant 0 : index
    %59 = vector.load %arg51[%c1_50, %c0_51] : memref<18x128xf32, #tpu.memory_space<vmem>>, vector<16x128xf32>
    %60 = arith.truncf %59 : vector<16x128xf32> to vector<16x128xbf16>
    %c128_52 = arith.constant 128 : index
    %c0_53 = arith.constant 0 : index
    %61 = vector.load %arg5[%c128_52, %c0_53] : memref<384x128xbf16, #tpu.memory_space<vmem>>, vector<128x128xbf16>
    %cst_54 = arith.constant dense<0.000000e+00> : vector<16x128xf32>
    %62 = tpu.matmul %60, %61, %cst_54 {dimension_numbers = #tpu.dot_dimension_numbers<[1], [0], [0], [1], [0, 0, 1, 1], [], []>} : vector<16x128xbf16>, vector<128x128xbf16>, vector<16x128xf32> -> vector<16x128xf32>
    %63 = arith.addf %58, %62 : vector<16x128xf32>
    %c2_55 = arith.constant 2 : index
    %c0_56 = arith.constant 0 : index
    %64 = vector.load %arg51[%c2_55, %c0_56] : memref<18x128xf32, #tpu.memory_space<vmem>>, vector<16x128xf32>
    %65 = arith.truncf %64 : vector<16x128xf32> to vector<16x128xbf16>
    %c256_57 = arith.constant 256 : index
    %c0_58 = arith.constant 0 : index
    %66 = vector.load %arg5[%c256_57, %c0_58] : memref<384x128xbf16, #tpu.memory_space<vmem>>, vector<128x128xbf16>
    %cst_59 = arith.constant dense<0.000000e+00> : vector<16x128xf32>
    %67 = tpu.matmul %65, %66, %cst_59 {dimension_numbers = #tpu.dot_dimension_numbers<[1], [0], [0], [1], [0, 0, 1, 1], [], []>} : vector<16x128xbf16>, vector<128x128xbf16>, vector<16x128xf32> -> vector<16x128xf32>
    %68 = arith.addf %63, %67 : vector<16x128xf32>
    %c0_60 = arith.constant 0 : index
    %c0_61 = arith.constant 0 : index
    %69 = vector.load %arg6[%c0_60, %c0_61] : memref<1x128xf32, #tpu.memory_space<vmem>>, vector<1x128xf32>
    %70 = vector.broadcast %69 : vector<1x128xf32> to vector<16x128xf32>
    %71 = arith.mulf %68, %70 : vector<16x128xf32>
    %c0_62 = arith.constant 0 : index
    %c0_63 = arith.constant 0 : index
    %72 = vector.load %arg7[%c0_62, %c0_63] : memref<1x128xf32, #tpu.memory_space<vmem>>, vector<1x128xf32>
    %73 = vector.broadcast %72 : vector<1x128xf32> to vector<16x128xf32>
    %74 = arith.addf %71, %73 : vector<16x128xf32>
    %cst_64 = arith.constant 0.000000e+00 : f32
    %75 = vector.broadcast %cst_64 : f32 to vector<16x128xf32>
    %76 = arith.maximumf %74, %75 : vector<16x128xf32>
    %c1_65 = arith.constant 1 : index
    %c0_66 = arith.constant 0 : index
    %77 = vector.load %arg52[%c1_65, %c0_66] : memref<18x128xf32, #tpu.memory_space<vmem>>, vector<16x128xf32>
    tpu.vector_store %arg52[%c1_65, %c0_66], %76 {strides = array<i32>} : memref<18x128xf32, #tpu.memory_space<vmem>>, vector<16x128xf32>,
    %cst_67 = arith.constant 0.000000e+00 : f32
    %78 = vector.broadcast %cst_67 : f32 to vector<18x128xf32>
    %c0_68 = arith.constant 0 : index
    %c0_69 = arith.constant 0 : index
    %79 = vector.load %arg53[%c0_68, %c0_69] : memref<18x128xf32, #tpu.memory_space<vmem>>, vector<18x128xf32>
    tpu.vector_store %arg53[%c0_68, %c0_69], %78 {strides = array<i32>} : memref<18x128xf32, #tpu.memory_space<vmem>>, vector<18x128xf32>,
    %c0_70 = arith.constant 0 : index
    %c0_71 = arith.constant 0 : index
    %80 = vector.load %arg52[%c0_70, %c0_71] : memref<18x128xf32, #tpu.memory_space<vmem>>, vector<16x128xf32>
    %81 = arith.truncf %80 : vector<16x128xf32> to vector<16x128xbf16>
    %c0_72 = arith.constant 0 : index
    %c0_73 = arith.constant 0 : index
    %82 = vector.load %arg8[%c0_72, %c0_73] : memref<384x128xbf16, #tpu.memory_space<vmem>>, vector<128x128xbf16>
    %cst_74 = arith.constant dense<0.000000e+00> : vector<16x128xf32>
    %83 = tpu.matmul %81, %82, %cst_74 {dimension_numbers = #tpu.dot_dimension_numbers<[1], [0], [0], [1], [0, 0, 1, 1], [], []>} : vector<16x128xbf16>, vector<128x128xbf16>, vector<16x128xf32> -> vector<16x128xf32>
    %c1_75 = arith.constant 1 : index
    %c0_76 = arith.constant 0 : index
    %84 = vector.load %arg52[%c1_75, %c0_76] : memref<18x128xf32, #tpu.memory_space<vmem>>, vector<16x128xf32>
    %85 = arith.truncf %84 : vector<16x128xf32> to vector<16x128xbf16>
    %c128_77 = arith.constant 128 : index
    %c0_78 = arith.constant 0 : index
    %86 = vector.load %arg8[%c128_77, %c0_78] : memref<384x128xbf16, #tpu.memory_space<vmem>>, vector<128x128xbf16>
    %cst_79 = arith.constant dense<0.000000e+00> : vector<16x128xf32>
    %87 = tpu.matmul %85, %86, %cst_79 {dimension_numbers = #tpu.dot_dimension_numbers<[1], [0], [0], [1], [0, 0, 1, 1], [], []>} : vector<16x128xbf16>, vector<128x128xbf16>, vector<16x128xf32> -> vector<16x128xf32>
    %88 = arith.addf %83, %87 : vector<16x128xf32>
    %c2_80 = arith.constant 2 : index
    %c0_81 = arith.constant 0 : index
    %89 = vector.load %arg52[%c2_80, %c0_81] : memref<18x128xf32, #tpu.memory_space<vmem>>, vector<16x128xf32>
    %90 = arith.truncf %89 : vector<16x128xf32> to vector<16x128xbf16>
    %c256_82 = arith.constant 256 : index
    %c0_83 = arith.constant 0 : index
    %91 = vector.load %arg8[%c256_82, %c0_83] : memref<384x128xbf16, #tpu.memory_space<vmem>>, vector<128x128xbf16>
    %cst_84 = arith.constant dense<0.000000e+00> : vector<16x128xf32>
    %92 = tpu.matmul %90, %91, %cst_84 {dimension_numbers = #tpu.dot_dimension_numbers<[1], [0], [0], [1], [0, 0, 1, 1], [], []>} : vector<16x128xbf16>, vector<128x128xbf16>, vector<16x128xf32> -> vector<16x128xf32>
    %93 = arith.addf %88, %92 : vector<16x128xf32>
    %c0_85 = arith.constant 0 : index
    %c0_86 = arith.constant 0 : index
    %94 = vector.load %arg9[%c0_85, %c0_86] : memref<1x128xf32, #tpu.memory_space<vmem>>, vector<1x128xf32>
    %95 = vector.broadcast %94 : vector<1x128xf32> to vector<16x128xf32>
    %96 = arith.mulf %93, %95 : vector<16x128xf32>
    %c0_87 = arith.constant 0 : index
    %c0_88 = arith.constant 0 : index
    %97 = vector.load %arg10[%c0_87, %c0_88] : memref<1x128xf32, #tpu.memory_space<vmem>>, vector<1x128xf32>
    %98 = vector.broadcast %97 : vector<1x128xf32> to vector<16x128xf32>
    %99 = arith.addf %96, %98 : vector<16x128xf32>
    %c1_89 = arith.constant 1 : index
    %c0_90 = arith.constant 0 : index
    %100 = vector.load %arg51[%c1_89, %c0_90] : memref<18x128xf32, #tpu.memory_space<vmem>>, vector<16x128xf32>
    %101 = arith.addf %99, %100 : vector<16x128xf32>
    %cst_91 = arith.constant 0.000000e+00 : f32
    %102 = vector.broadcast %cst_91 : f32 to vector<16x128xf32>
    %103 = arith.maximumf %101, %102 : vector<16x128xf32>
    %c1_92 = arith.constant 1 : index
    %c0_93 = arith.constant 0 : index
    %104 = vector.load %arg53[%c1_92, %c0_93] : memref<18x128xf32, #tpu.memory_space<vmem>>, vector<16x128xf32>
    tpu.vector_store %arg53[%c1_92, %c0_93], %103 {strides = array<i32>} : memref<18x128xf32, #tpu.memory_space<vmem>>, vector<16x128xf32>,
    %cst_94 = arith.constant 0.000000e+00 : f32
    %105 = vector.broadcast %cst_94 : f32 to vector<18x128xf32>
    %c0_95 = arith.constant 0 : index
    %c0_96 = arith.constant 0 : index
    %106 = vector.load %arg54[%c0_95, %c0_96] : memref<18x128xf32, #tpu.memory_space<vmem>>, vector<18x128xf32>
    tpu.vector_store %arg54[%c0_95, %c0_96], %105 {strides = array<i32>} : memref<18x128xf32, #tpu.memory_space<vmem>>, vector<18x128xf32>,
    %c0_97 = arith.constant 0 : index
    %c0_98 = arith.constant 0 : index
    %107 = vector.load %arg53[%c0_97, %c0_98] : memref<18x128xf32, #tpu.memory_space<vmem>>, vector<16x128xf32>
    %108 = arith.truncf %107 : vector<16x128xf32> to vector<16x128xbf16>
    %c0_99 = arith.constant 0 : index
    %c0_100 = arith.constant 0 : index
    %109 = vector.load %arg11[%c0_99, %c0_100] : memref<384x128xbf16, #tpu.memory_space<vmem>>, vector<128x128xbf16>
    %cst_101 = arith.constant dense<0.000000e+00> : vector<16x128xf32>
    %110 = tpu.matmul %108, %109, %cst_101 {dimension_numbers = #tpu.dot_dimension_numbers<[1], [0], [0], [1], [0, 0, 1, 1], [], []>} : vector<16x128xbf16>, vector<128x128xbf16>, vector<16x128xf32> -> vector<16x128xf32>
    %c1_102 = arith.constant 1 : index
    %c0_103 = arith.constant 0 : index
    %111 = vector.load %arg53[%c1_102, %c0_103] : memref<18x128xf32, #tpu.memory_space<vmem>>, vector<16x128xf32>
    %112 = arith.truncf %111 : vector<16x128xf32> to vector<16x128xbf16>
    %c128_104 = arith.constant 128 : index
    %c0_105 = arith.constant 0 : index
    %113 = vector.load %arg11[%c128_104, %c0_105] : memref<384x128xbf16, #tpu.memory_space<vmem>>, vector<128x128xbf16>
    %cst_106 = arith.constant dense<0.000000e+00> : vector<16x128xf32>
    %114 = tpu.matmul %112, %113, %cst_106 {dimension_numbers = #tpu.dot_dimension_numbers<[1], [0], [0], [1], [0, 0, 1, 1], [], []>} : vector<16x128xbf16>, vector<128x128xbf16>, vector<16x128xf32> -> vector<16x128xf32>
    %115 = arith.addf %110, %114 : vector<16x128xf32>
    %c2_107 = arith.constant 2 : index
    %c0_108 = arith.constant 0 : index
    %116 = vector.load %arg53[%c2_107, %c0_108] : memref<18x128xf32, #tpu.memory_space<vmem>>, vector<16x128xf32>
    %117 = arith.truncf %116 : vector<16x128xf32> to vector<16x128xbf16>
    %c256_109 = arith.constant 256 : index
    %c0_110 = arith.constant 0 : index
    %118 = vector.load %arg11[%c256_109, %c0_110] : memref<384x128xbf16, #tpu.memory_space<vmem>>, vector<128x128xbf16>
    %cst_111 = arith.constant dense<0.000000e+00> : vector<16x128xf32>
    %119 = tpu.matmul %117, %118, %cst_111 {dimension_numbers = #tpu.dot_dimension_numbers<[1], [0], [0], [1], [0, 0, 1, 1], [], []>} : vector<16x128xbf16>, vector<128x128xbf16>, vector<16x128xf32> -> vector<16x128xf32>
    %120 = arith.addf %115, %119 : vector<16x128xf32>
    %c0_112 = arith.constant 0 : index
    %c0_113 = arith.constant 0 : index
    %121 = vector.load %arg12[%c0_112, %c0_113] : memref<1x128xf32, #tpu.memory_space<vmem>>, vector<1x128xf32>
    %122 = vector.broadcast %121 : vector<1x128xf32> to vector<16x128xf32>
    %123 = arith.mulf %120, %122 : vector<16x128xf32>
    %c0_114 = arith.constant 0 : index
    %c0_115 = arith.constant 0 : index
    %124 = vector.load %arg13[%c0_114, %c0_115] : memref<1x128xf32, #tpu.memory_space<vmem>>, vector<1x128xf32>
    %125 = vector.broadcast %124 : vector<1x128xf32> to vector<16x128xf32>
    %126 = arith.addf %123, %125 : vector<16x128xf32>
    %cst_116 = arith.constant 0.000000e+00 : f32
    %127 = vector.broadcast %cst_116 : f32 to vector<16x128xf32>
    %128 = arith.maximumf %126, %127 : vector<16x128xf32>
    %c1_117 = arith.constant 1 : index
    %c0_118 = arith.constant 0 : index
    %129 = vector.load %arg54[%c1_117, %c0_118] : memref<18x128xf32, #tpu.memory_space<vmem>>, vector<16x128xf32>
    tpu.vector_store %arg54[%c1_117, %c0_118], %128 {strides = array<i32>} : memref<18x128xf32, #tpu.memory_space<vmem>>, vector<16x128xf32>,
    %cst_119 = arith.constant 0.000000e+00 : f32
    %130 = vector.broadcast %cst_119 : f32 to vector<18x128xf32>
    %c0_120 = arith.constant 0 : index
    %c0_121 = arith.constant 0 : index
    %131 = vector.load %arg55[%c0_120, %c0_121] : memref<18x128xf32, #tpu.memory_space<vmem>>, vector<18x128xf32>
    tpu.vector_store %arg55[%c0_120, %c0_121], %130 {strides = array<i32>} : memref<18x128xf32, #tpu.memory_space<vmem>>, vector<18x128xf32>,
    %c0_122 = arith.constant 0 : index
    %c0_123 = arith.constant 0 : index
    %132 = vector.load %arg54[%c0_122, %c0_123] : memref<18x128xf32, #tpu.memory_space<vmem>>, vector<16x128xf32>
    %133 = arith.truncf %132 : vector<16x128xf32> to vector<16x128xbf16>
    %c0_124 = arith.constant 0 : index
    %c0_125 = arith.constant 0 : index
    %134 = vector.load %arg14[%c0_124, %c0_125] : memref<384x128xbf16, #tpu.memory_space<vmem>>, vector<128x128xbf16>
    %cst_126 = arith.constant dense<0.000000e+00> : vector<16x128xf32>
    %135 = tpu.matmul %133, %134, %cst_126 {dimension_numbers = #tpu.dot_dimension_numbers<[1], [0], [0], [1], [0, 0, 1, 1], [], []>} : vector<16x128xbf16>, vector<128x128xbf16>, vector<16x128xf32> -> vector<16x128xf32>
    %c1_127 = arith.constant 1 : index
    %c0_128 = arith.constant 0 : index
    %136 = vector.load %arg54[%c1_127, %c0_128] : memref<18x128xf32, #tpu.memory_space<vmem>>, vector<16x128xf32>
    %137 = arith.truncf %136 : vector<16x128xf32> to vector<16x128xbf16>
    %c128_129 = arith.constant 128 : index
    %c0_130 = arith.constant 0 : index
    %138 = vector.load %arg14[%c128_129, %c0_130] : memref<384x128xbf16, #tpu.memory_space<vmem>>, vector<128x128xbf16>
    %cst_131 = arith.constant dense<0.000000e+00> : vector<16x128xf32>
    %139 = tpu.matmul %137, %138, %cst_131 {dimension_numbers = #tpu.dot_dimension_numbers<[1], [0], [0], [1], [0, 0, 1, 1], [], []>} : vector<16x128xbf16>, vector<128x128xbf16>, vector<16x128xf32> -> vector<16x128xf32>
    %140 = arith.addf %135, %139 : vector<16x128xf32>
    %c2_132 = arith.constant 2 : index
    %c0_133 = arith.constant 0 : index
    %141 = vector.load %arg54[%c2_132, %c0_133] : memref<18x128xf32, #tpu.memory_space<vmem>>, vector<16x128xf32>
    %142 = arith.truncf %141 : vector<16x128xf32> to vector<16x128xbf16>
    %c256_134 = arith.constant 256 : index
    %c0_135 = arith.constant 0 : index
    %143 = vector.load %arg14[%c256_134, %c0_135] : memref<384x128xbf16, #tpu.memory_space<vmem>>, vector<128x128xbf16>
    %cst_136 = arith.constant dense<0.000000e+00> : vector<16x128xf32>
    %144 = tpu.matmul %142, %143, %cst_136 {dimension_numbers = #tpu.dot_dimension_numbers<[1], [0], [0], [1], [0, 0, 1, 1], [], []>} : vector<16x128xbf16>, vector<128x128xbf16>, vector<16x128xf32> -> vector<16x128xf32>
    %145 = arith.addf %140, %144 : vector<16x128xf32>
    %c0_137 = arith.constant 0 : index
    %c0_138 = arith.constant 0 : index
    %146 = vector.load %arg15[%c0_137, %c0_138] : memref<1x128xf32, #tpu.memory_space<vmem>>, vector<1x128xf32>
    %147 = vector.broadcast %146 : vector<1x128xf32> to vector<16x128xf32>
    %148 = arith.mulf %145, %147 : vector<16x128xf32>
    %c0_139 = arith.constant 0 : index
    %c0_140 = arith.constant 0 : index
    %149 = vector.load %arg16[%c0_139, %c0_140] : memref<1x128xf32, #tpu.memory_space<vmem>>, vector<1x128xf32>
    %150 = vector.broadcast %149 : vector<1x128xf32> to vector<16x128xf32>
    %151 = arith.addf %148, %150 : vector<16x128xf32>
    %c1_141 = arith.constant 1 : index
    %c0_142 = arith.constant 0 : index
    %152 = vector.load %arg53[%c1_141, %c0_142] : memref<18x128xf32, #tpu.memory_space<vmem>>, vector<16x128xf32>
    %153 = arith.addf %151, %152 : vector<16x128xf32>
    %cst_143 = arith.constant 0.000000e+00 : f32
    %154 = vector.broadcast %cst_143 : f32 to vector<16x128xf32>
    %155 = arith.maximumf %153, %154 : vector<16x128xf32>
    %c1_144 = arith.constant 1 : index
    %c0_145 = arith.constant 0 : index
    %156 = vector.load %arg55[%c1_144, %c0_145] : memref<18x128xf32, #tpu.memory_space<vmem>>, vector<16x128xf32>
    tpu.vector_store %arg55[%c1_144, %c0_145], %155 {strides = array<i32>} : memref<18x128xf32, #tpu.memory_space<vmem>>, vector<16x128xf32>,
    %c1_146 = arith.constant 1 : index
    %c0_147 = arith.constant 0 : index
    %157 = tpu.strided_load %arg55[%c1_146, %c0_147] {strides = array<i32: 2, 1>} : memref<18x128xf32, #tpu.memory_space<vmem>>, vector<8x128xf32>
    %158 = arith.truncf %157 : vector<8x128xf32> to vector<8x128xbf16>
    %c0_148 = arith.constant 0 : index
    %c0_149 = arith.constant 0 : index
    %159 = vector.load %arg17[%c0_148, %c0_149] : memref<128x128xbf16, #tpu.memory_space<vmem>>, vector<128x128xbf16>
    %cst_150 = arith.constant dense<0.000000e+00> : vector<8x128xf32>
    %160 = tpu.matmul %158, %159, %cst_150 {dimension_numbers = #tpu.dot_dimension_numbers<[1], [0], [0], [1], [0, 0, 1, 1], [], []>} : vector<8x128xbf16>, vector<128x128xbf16>, vector<8x128xf32> -> vector<8x128xf32>
    %c0_151 = arith.constant 0 : index
    %c0_152 = arith.constant 0 : index
    %161 = vector.load %arg18[%c0_151, %c0_152] : memref<1x128xf32, #tpu.memory_space<vmem>>, vector<1x128xf32>
    %162 = vector.broadcast %161 : vector<1x128xf32> to vector<8x128xf32>
    %163 = arith.mulf %160, %162 : vector<8x128xf32>
    %c0_153 = arith.constant 0 : index
    %c0_154 = arith.constant 0 : index
    %164 = vector.load %arg19[%c0_153, %c0_154] : memref<1x128xf32, #tpu.memory_space<vmem>>, vector<1x128xf32>
    %165 = vector.broadcast %164 : vector<1x128xf32> to vector<8x128xf32>
    %166 = arith.addf %163, %165 : vector<8x128xf32>
    %c0_155 = arith.constant 0 : index
    %c0_156 = arith.constant 0 : index
    %167 = vector.load %arg56[%c0_155, %c0_156] : memref<8x128xf32, #tpu.memory_space<vmem>>, vector<8x128xf32>
    tpu.vector_store %arg56[%c0_155, %c0_156], %166 {strides = array<i32>} : memref<8x128xf32, #tpu.memory_space<vmem>>, vector<8x128xf32>,
    %cst_157 = arith.constant 0.000000e+00 : f32
    %168 = vector.broadcast %cst_157 : f32 to vector<10x128xf32>
    %c0_158 = arith.constant 0 : index
    %c0_159 = arith.constant 0 : index
    %169 = vector.load %arg57[%c0_158, %c0_159] : memref<10x128xf32, #tpu.memory_space<vmem>>, vector<10x128xf32>
    tpu.vector_store %arg57[%c0_158, %c0_159], %168 {strides = array<i32>} : memref<10x128xf32, #tpu.memory_space<vmem>>, vector<10x128xf32>,
    %c0_160 = arith.constant 0 : index
    %c0_161 = arith.constant 0 : index
    %170 = tpu.strided_load %arg55[%c0_160, %c0_161] {strides = array<i32: 2, 1>} : memref<18x128xf32, #tpu.memory_space<vmem>>, vector<8x128xf32>
    %171 = arith.truncf %170 : vector<8x128xf32> to vector<8x128xbf16>
    %c0_162 = arith.constant 0 : index
    %c0_163 = arith.constant 0 : index
    %172 = vector.load %arg20[%c0_162, %c0_163] : memref<384x128xbf16, #tpu.memory_space<vmem>>, vector<128x128xbf16>
    %cst_164 = arith.constant dense<0.000000e+00> : vector<8x128xf32>
    %173 = tpu.matmul %171, %172, %cst_164 {dimension_numbers = #tpu.dot_dimension_numbers<[1], [0], [0], [1], [0, 0, 1, 1], [], []>} : vector<8x128xbf16>, vector<128x128xbf16>, vector<8x128xf32> -> vector<8x128xf32>
    %c1_165 = arith.constant 1 : index
    %c0_166 = arith.constant 0 : index
    %174 = tpu.strided_load %arg55[%c1_165, %c0_166] {strides = array<i32: 2, 1>} : memref<18x128xf32, #tpu.memory_space<vmem>>, vector<8x128xf32>
    %175 = arith.truncf %174 : vector<8x128xf32> to vector<8x128xbf16>
    %c128_167 = arith.constant 128 : index
    %c0_168 = arith.constant 0 : index
    %176 = vector.load %arg20[%c128_167, %c0_168] : memref<384x128xbf16, #tpu.memory_space<vmem>>, vector<128x128xbf16>
    %cst_169 = arith.constant dense<0.000000e+00> : vector<8x128xf32>
    %177 = tpu.matmul %175, %176, %cst_169 {dimension_numbers = #tpu.dot_dimension_numbers<[1], [0], [0], [1], [0, 0, 1, 1], [], []>} : vector<8x128xbf16>, vector<128x128xbf16>, vector<8x128xf32> -> vector<8x128xf32>
    %178 = arith.addf %173, %177 : vector<8x128xf32>
    %c2_170 = arith.constant 2 : index
    %c0_171 = arith.constant 0 : index
    %179 = tpu.strided_load %arg55[%c2_170, %c0_171] {strides = array<i32: 2, 1>} : memref<18x128xf32, #tpu.memory_space<vmem>>, vector<8x128xf32>
    %180 = arith.truncf %179 : vector<8x128xf32> to vector<8x128xbf16>
    %c256_172 = arith.constant 256 : index
    %c0_173 = arith.constant 0 : index
    %181 = vector.load %arg20[%c256_172, %c0_173] : memref<384x128xbf16, #tpu.memory_space<vmem>>, vector<128x128xbf16>
    %cst_174 = arith.constant dense<0.000000e+00> : vector<8x128xf32>
    %182 = tpu.matmul %180, %181, %cst_174 {dimension_numbers = #tpu.dot_dimension_numbers<[1], [0], [0], [1], [0, 0, 1, 1], [], []>} : vector<8x128xbf16>, vector<128x128xbf16>, vector<8x128xf32> -> vector<8x128xf32>
    %183 = arith.addf %178, %182 : vector<8x128xf32>
    %c0_175 = arith.constant 0 : index
    %c0_176 = arith.constant 0 : index
    %184 = vector.load %arg21[%c0_175, %c0_176] : memref<1x128xf32, #tpu.memory_space<vmem>>, vector<1x128xf32>
    %185 = vector.broadcast %184 : vector<1x128xf32> to vector<8x128xf32>
    %186 = arith.mulf %183, %185 : vector<8x128xf32>
    %c0_177 = arith.constant 0 : index
    %c0_178 = arith.constant 0 : index
    %187 = vector.load %arg22[%c0_177, %c0_178] : memref<1x128xf32, #tpu.memory_space<vmem>>, vector<1x128xf32>
    %188 = vector.broadcast %187 : vector<1x128xf32> to vector<8x128xf32>
    %189 = arith.addf %186, %188 : vector<8x128xf32>
    %cst_179 = arith.constant 0.000000e+00 : f32
    %190 = vector.broadcast %cst_179 : f32 to vector<8x128xf32>
    %191 = arith.maximumf %189, %190 : vector<8x128xf32>
    %c1_180 = arith.constant 1 : index
    %c0_181 = arith.constant 0 : index
    %192 = vector.load %arg57[%c1_180, %c0_181] : memref<10x128xf32, #tpu.memory_space<vmem>>, vector<8x128xf32>
    tpu.vector_store %arg57[%c1_180, %c0_181], %191 {strides = array<i32>} : memref<10x128xf32, #tpu.memory_space<vmem>>, vector<8x128xf32>,
    %cst_182 = arith.constant 0.000000e+00 : f32
    %193 = vector.broadcast %cst_182 : f32 to vector<10x128xf32>
    %c0_183 = arith.constant 0 : index
    %c0_184 = arith.constant 0 : index
    %194 = vector.load %arg58[%c0_183, %c0_184] : memref<10x128xf32, #tpu.memory_space<vmem>>, vector<10x128xf32>
    tpu.vector_store %arg58[%c0_183, %c0_184], %193 {strides = array<i32>} : memref<10x128xf32, #tpu.memory_space<vmem>>, vector<10x128xf32>,
    %c0_185 = arith.constant 0 : index
    %c0_186 = arith.constant 0 : index
    %195 = vector.load %arg57[%c0_185, %c0_186] : memref<10x128xf32, #tpu.memory_space<vmem>>, vector<8x128xf32>
    %196 = arith.truncf %195 : vector<8x128xf32> to vector<8x128xbf16>
    %c0_187 = arith.constant 0 : index
    %c0_188 = arith.constant 0 : index
    %197 = vector.load %arg23[%c0_187, %c0_188] : memref<384x128xbf16, #tpu.memory_space<vmem>>, vector<128x128xbf16>
    %cst_189 = arith.constant dense<0.000000e+00> : vector<8x128xf32>
    %198 = tpu.matmul %196, %197, %cst_189 {dimension_numbers = #tpu.dot_dimension_numbers<[1], [0], [0], [1], [0, 0, 1, 1], [], []>} : vector<8x128xbf16>, vector<128x128xbf16>, vector<8x128xf32> -> vector<8x128xf32>
    %c1_190 = arith.constant 1 : index
    %c0_191 = arith.constant 0 : index
    %199 = vector.load %arg57[%c1_190, %c0_191] : memref<10x128xf32, #tpu.memory_space<vmem>>, vector<8x128xf32>
    %200 = arith.truncf %199 : vector<8x128xf32> to vector<8x128xbf16>
    %c128_192 = arith.constant 128 : index
    %c0_193 = arith.constant 0 : index
    %201 = vector.load %arg23[%c128_192, %c0_193] : memref<384x128xbf16, #tpu.memory_space<vmem>>, vector<128x128xbf16>
    %cst_194 = arith.constant dense<0.000000e+00> : vector<8x128xf32>
    %202 = tpu.matmul %200, %201, %cst_194 {dimension_numbers = #tpu.dot_dimension_numbers<[1], [0], [0], [1], [0, 0, 1, 1], [], []>} : vector<8x128xbf16>, vector<128x128xbf16>, vector<8x128xf32> -> vector<8x128xf32>
    %203 = arith.addf %198, %202 : vector<8x128xf32>
    %c2_195 = arith.constant 2 : index
    %c0_196 = arith.constant 0 : index
    %204 = vector.load %arg57[%c2_195, %c0_196] : memref<10x128xf32, #tpu.memory_space<vmem>>, vector<8x128xf32>
    %205 = arith.truncf %204 : vector<8x128xf32> to vector<8x128xbf16>
    %c256_197 = arith.constant 256 : index
    %c0_198 = arith.constant 0 : index
    %206 = vector.load %arg23[%c256_197, %c0_198] : memref<384x128xbf16, #tpu.memory_space<vmem>>, vector<128x128xbf16>
    %cst_199 = arith.constant dense<0.000000e+00> : vector<8x128xf32>
    %207 = tpu.matmul %205, %206, %cst_199 {dimension_numbers = #tpu.dot_dimension_numbers<[1], [0], [0], [1], [0, 0, 1, 1], [], []>} : vector<8x128xbf16>, vector<128x128xbf16>, vector<8x128xf32> -> vector<8x128xf32>
    %208 = arith.addf %203, %207 : vector<8x128xf32>
    %c0_200 = arith.constant 0 : index
    %c0_201 = arith.constant 0 : index
    %209 = vector.load %arg24[%c0_200, %c0_201] : memref<1x128xf32, #tpu.memory_space<vmem>>, vector<1x128xf32>
    %210 = vector.broadcast %209 : vector<1x128xf32> to vector<8x128xf32>
    %211 = arith.mulf %208, %210 : vector<8x128xf32>
    %c0_202 = arith.constant 0 : index
    %c0_203 = arith.constant 0 : index
    %212 = vector.load %arg25[%c0_202, %c0_203] : memref<1x128xf32, #tpu.memory_space<vmem>>, vector<1x128xf32>
    %213 = vector.broadcast %212 : vector<1x128xf32> to vector<8x128xf32>
    %214 = arith.addf %211, %213 : vector<8x128xf32>
    %c0_204 = arith.constant 0 : index
    %c0_205 = arith.constant 0 : index
    %215 = vector.load %arg56[%c0_204, %c0_205] : memref<8x128xf32, #tpu.memory_space<vmem>>, vector<8x128xf32>
    %216 = arith.addf %214, %215 : vector<8x128xf32>
    %cst_206 = arith.constant 0.000000e+00 : f32
    %217 = vector.broadcast %cst_206 : f32 to vector<8x128xf32>
    %218 = arith.maximumf %216, %217 : vector<8x128xf32>
    %c1_207 = arith.constant 1 : index
    %c0_208 = arith.constant 0 : index
    %219 = vector.load %arg58[%c1_207, %c0_208] : memref<10x128xf32, #tpu.memory_space<vmem>>, vector<8x128xf32>
    tpu.vector_store %arg58[%c1_207, %c0_208], %218 {strides = array<i32>} : memref<10x128xf32, #tpu.memory_space<vmem>>, vector<8x128xf32>,
    %cst_209 = arith.constant 0.000000e+00 : f32
    %220 = vector.broadcast %cst_209 : f32 to vector<10x128xf32>
    %c0_210 = arith.constant 0 : index
    %c0_211 = arith.constant 0 : index
    %221 = vector.load %arg59[%c0_210, %c0_211] : memref<10x128xf32, #tpu.memory_space<vmem>>, vector<10x128xf32>
    tpu.vector_store %arg59[%c0_210, %c0_211], %220 {strides = array<i32>} : memref<10x128xf32, #tpu.memory_space<vmem>>, vector<10x128xf32>,
    %c0_212 = arith.constant 0 : index
    %c0_213 = arith.constant 0 : index
    %222 = vector.load %arg58[%c0_212, %c0_213] : memref<10x128xf32, #tpu.memory_space<vmem>>, vector<8x128xf32>
    %223 = arith.truncf %222 : vector<8x128xf32> to vector<8x128xbf16>
    %c0_214 = arith.constant 0 : index
    %c0_215 = arith.constant 0 : index
    %224 = vector.load %arg26[%c0_214, %c0_215] : memref<384x128xbf16, #tpu.memory_space<vmem>>, vector<128x128xbf16>
    %cst_216 = arith.constant dense<0.000000e+00> : vector<8x128xf32>
    %225 = tpu.matmul %223, %224, %cst_216 {dimension_numbers = #tpu.dot_dimension_numbers<[1], [0], [0], [1], [0, 0, 1, 1], [], []>} : vector<8x128xbf16>, vector<128x128xbf16>, vector<8x128xf32> -> vector<8x128xf32>
    %c1_217 = arith.constant 1 : index
    %c0_218 = arith.constant 0 : index
    %226 = vector.load %arg58[%c1_217, %c0_218] : memref<10x128xf32, #tpu.memory_space<vmem>>, vector<8x128xf32>
    %227 = arith.truncf %226 : vector<8x128xf32> to vector<8x128xbf16>
    %c128_219 = arith.constant 128 : index
    %c0_220 = arith.constant 0 : index
    %228 = vector.load %arg26[%c128_219, %c0_220] : memref<384x128xbf16, #tpu.memory_space<vmem>>, vector<128x128xbf16>
    %cst_221 = arith.constant dense<0.000000e+00> : vector<8x128xf32>
    %229 = tpu.matmul %227, %228, %cst_221 {dimension_numbers = #tpu.dot_dimension_numbers<[1], [0], [0], [1], [0, 0, 1, 1], [], []>} : vector<8x128xbf16>, vector<128x128xbf16>, vector<8x128xf32> -> vector<8x128xf32>
    %230 = arith.addf %225, %229 : vector<8x128xf32>
    %c2_222 = arith.constant 2 : index
    %c0_223 = arith.constant 0 : index
    %231 = vector.load %arg58[%c2_222, %c0_223] : memref<10x128xf32, #tpu.memory_space<vmem>>, vector<8x128xf32>
    %232 = arith.truncf %231 : vector<8x128xf32> to vector<8x128xbf16>
    %c256_224 = arith.constant 256 : index
    %c0_225 = arith.constant 0 : index
    %233 = vector.load %arg26[%c256_224, %c0_225] : memref<384x128xbf16, #tpu.memory_space<vmem>>, vector<128x128xbf16>
    %cst_226 = arith.constant dense<0.000000e+00> : vector<8x128xf32>
    %234 = tpu.matmul %232, %233, %cst_226 {dimension_numbers = #tpu.dot_dimension_numbers<[1], [0], [0], [1], [0, 0, 1, 1], [], []>} : vector<8x128xbf16>, vector<128x128xbf16>, vector<8x128xf32> -> vector<8x128xf32>
    %235 = arith.addf %230, %234 : vector<8x128xf32>
    %c0_227 = arith.constant 0 : index
    %c0_228 = arith.constant 0 : index
    %236 = vector.load %arg27[%c0_227, %c0_228] : memref<1x128xf32, #tpu.memory_space<vmem>>, vector<1x128xf32>
    %237 = vector.broadcast %236 : vector<1x128xf32> to vector<8x128xf32>
    %238 = arith.mulf %235, %237 : vector<8x128xf32>
    %c0_229 = arith.constant 0 : index
    %c0_230 = arith.constant 0 : index
    %239 = vector.load %arg28[%c0_229, %c0_230] : memref<1x128xf32, #tpu.memory_space<vmem>>, vector<1x128xf32>
    %240 = vector.broadcast %239 : vector<1x128xf32> to vector<8x128xf32>
    %241 = arith.addf %238, %240 : vector<8x128xf32>
    %cst_231 = arith.constant 0.000000e+00 : f32
    %242 = vector.broadcast %cst_231 : f32 to vector<8x128xf32>
    %243 = arith.maximumf %241, %242 : vector<8x128xf32>
    %c1_232 = arith.constant 1 : index
    %c0_233 = arith.constant 0 : index
    %244 = vector.load %arg59[%c1_232, %c0_233] : memref<10x128xf32, #tpu.memory_space<vmem>>, vector<8x128xf32>
    tpu.vector_store %arg59[%c1_232, %c0_233], %243 {strides = array<i32>} : memref<10x128xf32, #tpu.memory_space<vmem>>, vector<8x128xf32>,
    %cst_234 = arith.constant 0.000000e+00 : f32
    %245 = vector.broadcast %cst_234 : f32 to vector<10x128xf32>
    %c0_235 = arith.constant 0 : index
    %c0_236 = arith.constant 0 : index
    %246 = vector.load %arg60[%c0_235, %c0_236] : memref<10x128xf32, #tpu.memory_space<vmem>>, vector<10x128xf32>
    tpu.vector_store %arg60[%c0_235, %c0_236], %245 {strides = array<i32>} : memref<10x128xf32, #tpu.memory_space<vmem>>, vector<10x128xf32>,
    %c0_237 = arith.constant 0 : index
    %c0_238 = arith.constant 0 : index
    %247 = vector.load %arg59[%c0_237, %c0_238] : memref<10x128xf32, #tpu.memory_space<vmem>>, vector<8x128xf32>
    %248 = arith.truncf %247 : vector<8x128xf32> to vector<8x128xbf16>
    %c0_239 = arith.constant 0 : index
    %c0_240 = arith.constant 0 : index
    %249 = vector.load %arg29[%c0_239, %c0_240] : memref<384x128xbf16, #tpu.memory_space<vmem>>, vector<128x128xbf16>
    %cst_241 = arith.constant dense<0.000000e+00> : vector<8x128xf32>
    %250 = tpu.matmul %248, %249, %cst_241 {dimension_numbers = #tpu.dot_dimension_numbers<[1], [0], [0], [1], [0, 0, 1, 1], [], []>} : vector<8x128xbf16>, vector<128x128xbf16>, vector<8x128xf32> -> vector<8x128xf32>
    %c1_242 = arith.constant 1 : index
    %c0_243 = arith.constant 0 : index
    %251 = vector.load %arg59[%c1_242, %c0_243] : memref<10x128xf32, #tpu.memory_space<vmem>>, vector<8x128xf32>
    %252 = arith.truncf %251 : vector<8x128xf32> to vector<8x128xbf16>
    %c128_244 = arith.constant 128 : index
    %c0_245 = arith.constant 0 : index
    %253 = vector.load %arg29[%c128_244, %c0_245] : memref<384x128xbf16, #tpu.memory_space<vmem>>, vector<128x128xbf16>
    %cst_246 = arith.constant dense<0.000000e+00> : vector<8x128xf32>
    %254 = tpu.matmul %252, %253, %cst_246 {dimension_numbers = #tpu.dot_dimension_numbers<[1], [0], [0], [1], [0, 0, 1, 1], [], []>} : vector<8x128xbf16>, vector<128x128xbf16>, vector<8x128xf32> -> vector<8x128xf32>
    %255 = arith.addf %250, %254 : vector<8x128xf32>
    %c2_247 = arith.constant 2 : index
    %c0_248 = arith.constant 0 : index
    %256 = vector.load %arg59[%c2_247, %c0_248] : memref<10x128xf32, #tpu.memory_space<vmem>>, vector<8x128xf32>
    %257 = arith.truncf %256 : vector<8x128xf32> to vector<8x128xbf16>
    %c256_249 = arith.constant 256 : index
    %c0_250 = arith.constant 0 : index
    %258 = vector.load %arg29[%c256_249, %c0_250] : memref<384x128xbf16, #tpu.memory_space<vmem>>, vector<128x128xbf16>
    %cst_251 = arith.constant dense<0.000000e+00> : vector<8x128xf32>
    %259 = tpu.matmul %257, %258, %cst_251 {dimension_numbers = #tpu.dot_dimension_numbers<[1], [0], [0], [1], [0, 0, 1, 1], [], []>} : vector<8x128xbf16>, vector<128x128xbf16>, vector<8x128xf32> -> vector<8x128xf32>
    %260 = arith.addf %255, %259 : vector<8x128xf32>
    %c0_252 = arith.constant 0 : index
    %c0_253 = arith.constant 0 : index
    %261 = vector.load %arg30[%c0_252, %c0_253] : memref<1x128xf32, #tpu.memory_space<vmem>>, vector<1x128xf32>
    %262 = vector.broadcast %261 : vector<1x128xf32> to vector<8x128xf32>
    %263 = arith.mulf %260, %262 : vector<8x128xf32>
    %c0_254 = arith.constant 0 : index
    %c0_255 = arith.constant 0 : index
    %264 = vector.load %arg31[%c0_254, %c0_255] : memref<1x128xf32, #tpu.memory_space<vmem>>, vector<1x128xf32>
    %265 = vector.broadcast %264 : vector<1x128xf32> to vector<8x128xf32>
    %266 = arith.addf %263, %265 : vector<8x128xf32>
    %c1_256 = arith.constant 1 : index
    %c0_257 = arith.constant 0 : index
    %267 = vector.load %arg58[%c1_256, %c0_257] : memref<10x128xf32, #tpu.memory_space<vmem>>, vector<8x128xf32>
    %268 = arith.addf %266, %267 : vector<8x128xf32>
    %cst_258 = arith.constant 0.000000e+00 : f32
    %269 = vector.broadcast %cst_258 : f32 to vector<8x128xf32>
    %270 = arith.maximumf %268, %269 : vector<8x128xf32>
    %c1_259 = arith.constant 1 : index
    %c0_260 = arith.constant 0 : index
    %271 = vector.load %arg60[%c1_259, %c0_260] : memref<10x128xf32, #tpu.memory_space<vmem>>, vector<8x128xf32>
    tpu.vector_store %arg60[%c1_259, %c0_260], %270 {strides = array<i32>} : memref<10x128xf32, #tpu.memory_space<vmem>>, vector<8x128xf32>,
    %c1_261 = arith.constant 1 : index
    %c0_262 = arith.constant 0 : index
    %272 = tpu.strided_load %arg60[%c1_261, %c0_262] {strides = array<i32: 2, 1>} : memref<10x128xf32, #tpu.memory_space<vmem>>, vector<4x128xf32>
    %273 = arith.truncf %272 : vector<4x128xf32> to vector<4x128xbf16>
    %c0_263 = arith.constant 0 : index
    %c0_264 = arith.constant 0 : index
    %274 = vector.load %arg32[%c0_263, %c0_264] : memref<128x256xbf16, #tpu.memory_space<vmem>>, vector<128x256xbf16>
    %cst_265 = arith.constant dense<0.000000e+00> : vector<4x256xf32>
    %275 = tpu.matmul %273, %274, %cst_265 {dimension_numbers = #tpu.dot_dimension_numbers<[1], [0], [0], [1], [0, 0, 1, 1], [], []>} : vector<4x128xbf16>, vector<128x256xbf16>, vector<4x256xf32> -> vector<4x256xf32>
    %c0_266 = arith.constant 0 : index
    %c0_267 = arith.constant 0 : index
    %276 = vector.load %arg33[%c0_266, %c0_267] : memref<1x256xf32, #tpu.memory_space<vmem>>, vector<1x256xf32>
    %277 = vector.broadcast %276 : vector<1x256xf32> to vector<4x256xf32>
    %278 = arith.mulf %275, %277 : vector<4x256xf32>
    %c0_268 = arith.constant 0 : index
    %c0_269 = arith.constant 0 : index
    %279 = vector.load %arg34[%c0_268, %c0_269] : memref<1x256xf32, #tpu.memory_space<vmem>>, vector<1x256xf32>
    %280 = vector.broadcast %279 : vector<1x256xf32> to vector<4x256xf32>
    %281 = arith.addf %278, %280 : vector<4x256xf32>
    %c0_270 = arith.constant 0 : index
    %c0_271 = arith.constant 0 : index
    %282 = vector.load %arg61[%c0_270, %c0_271] : memref<4x256xf32, #tpu.memory_space<vmem>>, vector<4x256xf32>
    tpu.vector_store %arg61[%c0_270, %c0_271], %281 {strides = array<i32>} : memref<4x256xf32, #tpu.memory_space<vmem>>, vector<4x256xf32>,
    %cst_272 = arith.constant 0.000000e+00 : f32
    %283 = vector.broadcast %cst_272 : f32 to vector<6x256xf32>
    %c0_273 = arith.constant 0 : index
    %c0_274 = arith.constant 0 : index
    %284 = vector.load %arg62[%c0_273, %c0_274] : memref<6x256xf32, #tpu.memory_space<vmem>>, vector<6x256xf32>
    tpu.vector_store %arg62[%c0_273, %c0_274], %283 {strides = array<i32>} : memref<6x256xf32, #tpu.memory_space<vmem>>, vector<6x256xf32>,
    %c0_275 = arith.constant 0 : index
    %c0_276 = arith.constant 0 : index
    %285 = tpu.strided_load %arg60[%c0_275, %c0_276] {strides = array<i32: 2, 1>} : memref<10x128xf32, #tpu.memory_space<vmem>>, vector<4x128xf32>
    %286 = arith.truncf %285 : vector<4x128xf32> to vector<4x128xbf16>
    %c0_277 = arith.constant 0 : index
    %c0_278 = arith.constant 0 : index
    %287 = vector.load %arg35[%c0_277, %c0_278] : memref<384x256xbf16, #tpu.memory_space<vmem>>, vector<128x256xbf16>
    %cst_279 = arith.constant dense<0.000000e+00> : vector<4x256xf32>
    %288 = tpu.matmul %286, %287, %cst_279 {dimension_numbers = #tpu.dot_dimension_numbers<[1], [0], [0], [1], [0, 0, 1, 1], [], []>} : vector<4x128xbf16>, vector<128x256xbf16>, vector<4x256xf32> -> vector<4x256xf32>
    %c1_280 = arith.constant 1 : index
    %c0_281 = arith.constant 0 : index
    %289 = tpu.strided_load %arg60[%c1_280, %c0_281] {strides = array<i32: 2, 1>} : memref<10x128xf32, #tpu.memory_space<vmem>>, vector<4x128xf32>
    %290 = arith.truncf %289 : vector<4x128xf32> to vector<4x128xbf16>
    %c128_282 = arith.constant 128 : index
    %c0_283 = arith.constant 0 : index
    %291 = vector.load %arg35[%c128_282, %c0_283] : memref<384x256xbf16, #tpu.memory_space<vmem>>, vector<128x256xbf16>
    %cst_284 = arith.constant dense<0.000000e+00> : vector<4x256xf32>
    %292 = tpu.matmul %290, %291, %cst_284 {dimension_numbers = #tpu.dot_dimension_numbers<[1], [0], [0], [1], [0, 0, 1, 1], [], []>} : vector<4x128xbf16>, vector<128x256xbf16>, vector<4x256xf32> -> vector<4x256xf32>
    %293 = arith.addf %288, %292 : vector<4x256xf32>
    %c2_285 = arith.constant 2 : index
    %c0_286 = arith.constant 0 : index
    %294 = tpu.strided_load %arg60[%c2_285, %c0_286] {strides = array<i32: 2, 1>} : memref<10x128xf32, #tpu.memory_space<vmem>>, vector<4x128xf32>
    %295 = arith.truncf %294 : vector<4x128xf32> to vector<4x128xbf16>
    %c256_287 = arith.constant 256 : index
    %c0_288 = arith.constant 0 : index
    %296 = vector.load %arg35[%c256_287, %c0_288] : memref<384x256xbf16, #tpu.memory_space<vmem>>, vector<128x256xbf16>
    %cst_289 = arith.constant dense<0.000000e+00> : vector<4x256xf32>
    %297 = tpu.matmul %295, %296, %cst_289 {dimension_numbers = #tpu.dot_dimension_numbers<[1], [0], [0], [1], [0, 0, 1, 1], [], []>} : vector<4x128xbf16>, vector<128x256xbf16>, vector<4x256xf32> -> vector<4x256xf32>
    %298 = arith.addf %293, %297 : vector<4x256xf32>
    %c0_290 = arith.constant 0 : index
    %c0_291 = arith.constant 0 : index
    %299 = vector.load %arg36[%c0_290, %c0_291] : memref<1x256xf32, #tpu.memory_space<vmem>>, vector<1x256xf32>
    %300 = vector.broadcast %299 : vector<1x256xf32> to vector<4x256xf32>
    %301 = arith.mulf %298, %300 : vector<4x256xf32>
    %c0_292 = arith.constant 0 : index
    %c0_293 = arith.constant 0 : index
    %302 = vector.load %arg37[%c0_292, %c0_293] : memref<1x256xf32, #tpu.memory_space<vmem>>, vector<1x256xf32>
    %303 = vector.broadcast %302 : vector<1x256xf32> to vector<4x256xf32>
    %304 = arith.addf %301, %303 : vector<4x256xf32>
    %cst_294 = arith.constant 0.000000e+00 : f32
    %305 = vector.broadcast %cst_294 : f32 to vector<4x256xf32>
    %306 = arith.maximumf %304, %305 : vector<4x256xf32>
    %c1_295 = arith.constant 1 : index
    %c0_296 = arith.constant 0 : index
    %307 = vector.load %arg62[%c1_295, %c0_296] : memref<6x256xf32, #tpu.memory_space<vmem>>, vector<4x256xf32>
    tpu.vector_store %arg62[%c1_295, %c0_296], %306 {strides = array<i32>} : memref<6x256xf32, #tpu.memory_space<vmem>>, vector<4x256xf32>,
    %cst_297 = arith.constant 0.000000e+00 : f32
    %308 = vector.broadcast %cst_297 : f32 to vector<6x256xf32>
    %c0_298 = arith.constant 0 : index
    %c0_299 = arith.constant 0 : index
    %309 = vector.load %arg63[%c0_298, %c0_299] : memref<6x256xf32, #tpu.memory_space<vmem>>, vector<6x256xf32>
    tpu.vector_store %arg63[%c0_298, %c0_299], %308 {strides = array<i32>} : memref<6x256xf32, #tpu.memory_space<vmem>>, vector<6x256xf32>,
    %c0_300 = arith.constant 0 : index
    %c0_301 = arith.constant 0 : index
    %310 = vector.load %arg62[%c0_300, %c0_301] : memref<6x256xf32, #tpu.memory_space<vmem>>, vector<4x256xf32>
    %311 = arith.truncf %310 : vector<4x256xf32> to vector<4x256xbf16>
    %c0_302 = arith.constant 0 : index
    %c0_303 = arith.constant 0 : index
    %312 = vector.load %arg38[%c0_302, %c0_303] : memref<768x256xbf16, #tpu.memory_space<vmem>>, vector<256x256xbf16>
    %cst_304 = arith.constant dense<0.000000e+00> : vector<4x256xf32>
    %313 = tpu.matmul %311, %312, %cst_304 {dimension_numbers = #tpu.dot_dimension_numbers<[1], [0], [0], [1], [0, 0, 1, 1], [], []>} : vector<4x256xbf16>, vector<256x256xbf16>, vector<4x256xf32> -> vector<4x256xf32>
    %c1_305 = arith.constant 1 : index
    %c0_306 = arith.constant 0 : index
    %314 = vector.load %arg62[%c1_305, %c0_306] : memref<6x256xf32, #tpu.memory_space<vmem>>, vector<4x256xf32>
    %315 = arith.truncf %314 : vector<4x256xf32> to vector<4x256xbf16>
    %c256_307 = arith.constant 256 : index
    %c0_308 = arith.constant 0 : index
    %316 = vector.load %arg38[%c256_307, %c0_308] : memref<768x256xbf16, #tpu.memory_space<vmem>>, vector<256x256xbf16>
    %cst_309 = arith.constant dense<0.000000e+00> : vector<4x256xf32>
    %317 = tpu.matmul %315, %316, %cst_309 {dimension_numbers = #tpu.dot_dimension_numbers<[1], [0], [0], [1], [0, 0, 1, 1], [], []>} : vector<4x256xbf16>, vector<256x256xbf16>, vector<4x256xf32> -> vector<4x256xf32>
    %318 = arith.addf %313, %317 : vector<4x256xf32>
    %c2_310 = arith.constant 2 : index
    %c0_311 = arith.constant 0 : index
    %319 = vector.load %arg62[%c2_310, %c0_311] : memref<6x256xf32, #tpu.memory_space<vmem>>, vector<4x256xf32>
    %320 = arith.truncf %319 : vector<4x256xf32> to vector<4x256xbf16>
    %c512_312 = arith.constant 512 : index
    %c0_313 = arith.constant 0 : index
    %321 = vector.load %arg38[%c512_312, %c0_313] : memref<768x256xbf16, #tpu.memory_space<vmem>>, vector<256x256xbf16>
    %cst_314 = arith.constant dense<0.000000e+00> : vector<4x256xf32>
    %322 = tpu.matmul %320, %321, %cst_314 {dimension_numbers = #tpu.dot_dimension_numbers<[1], [0], [0], [1], [0, 0, 1, 1], [], []>} : vector<4x256xbf16>, vector<256x256xbf16>, vector<4x256xf32> -> vector<4x256xf32>
    %323 = arith.addf %318, %322 : vector<4x256xf32>
    %c0_315 = arith.constant 0 : index
    %c0_316 = arith.constant 0 : index
    %324 = vector.load %arg39[%c0_315, %c0_316] : memref<1x256xf32, #tpu.memory_space<vmem>>, vector<1x256xf32>
    %325 = vector.broadcast %324 : vector<1x256xf32> to vector<4x256xf32>
    %326 = arith.mulf %323, %325 : vector<4x256xf32>
    %c0_317 = arith.constant 0 : index
    %c0_318 = arith.constant 0 : index
    %327 = vector.load %arg40[%c0_317, %c0_318] : memref<1x256xf32, #tpu.memory_space<vmem>>, vector<1x256xf32>
    %328 = vector.broadcast %327 : vector<1x256xf32> to vector<4x256xf32>
    %329 = arith.addf %326, %328 : vector<4x256xf32>
    %c0_319 = arith.constant 0 : index
    %c0_320 = arith.constant 0 : index
    %330 = vector.load %arg61[%c0_319, %c0_320] : memref<4x256xf32, #tpu.memory_space<vmem>>, vector<4x256xf32>
    %331 = arith.addf %329, %330 : vector<4x256xf32>
    %cst_321 = arith.constant 0.000000e+00 : f32
    %332 = vector.broadcast %cst_321 : f32 to vector<4x256xf32>
    %333 = arith.maximumf %331, %332 : vector<4x256xf32>
    %c1_322 = arith.constant 1 : index
    %c0_323 = arith.constant 0 : index
    %334 = vector.load %arg63[%c1_322, %c0_323] : memref<6x256xf32, #tpu.memory_space<vmem>>, vector<4x256xf32>
    tpu.vector_store %arg63[%c1_322, %c0_323], %333 {strides = array<i32>} : memref<6x256xf32, #tpu.memory_space<vmem>>, vector<4x256xf32>,
    %cst_324 = arith.constant 0.000000e+00 : f32
    %335 = vector.broadcast %cst_324 : f32 to vector<6x256xf32>
    %c0_325 = arith.constant 0 : index
    %c0_326 = arith.constant 0 : index
    %336 = vector.load %arg64[%c0_325, %c0_326] : memref<6x256xf32, #tpu.memory_space<vmem>>, vector<6x256xf32>
    tpu.vector_store %arg64[%c0_325, %c0_326], %335 {strides = array<i32>} : memref<6x256xf32, #tpu.memory_space<vmem>>, vector<6x256xf32>,
    %c0_327 = arith.constant 0 : index
    %c0_328 = arith.constant 0 : index
    %337 = vector.load %arg63[%c0_327, %c0_328] : memref<6x256xf32, #tpu.memory_space<vmem>>, vector<4x256xf32>
    %338 = arith.truncf %337 : vector<4x256xf32> to vector<4x256xbf16>
    %c0_329 = arith.constant 0 : index
    %c0_330 = arith.constant 0 : index
    %339 = vector.load %arg41[%c0_329, %c0_330] : memref<768x256xbf16, #tpu.memory_space<vmem>>, vector<256x256xbf16>
    %cst_331 = arith.constant dense<0.000000e+00> : vector<4x256xf32>
    %340 = tpu.matmul %338, %339, %cst_331 {dimension_numbers = #tpu.dot_dimension_numbers<[1], [0], [0], [1], [0, 0, 1, 1], [], []>} : vector<4x256xbf16>, vector<256x256xbf16>, vector<4x256xf32> -> vector<4x256xf32>
    %c1_332 = arith.constant 1 : index
    %c0_333 = arith.constant 0 : index
    %341 = vector.load %arg63[%c1_332, %c0_333] : memref<6x256xf32, #tpu.memory_space<vmem>>, vector<4x256xf32>
    %342 = arith.truncf %341 : vector<4x256xf32> to vector<4x256xbf16>
    %c256_334 = arith.constant 256 : index
    %c0_335 = arith.constant 0 : index
    %343 = vector.load %arg41[%c256_334, %c0_335] : memref<768x256xbf16, #tpu.memory_space<vmem>>, vector<256x256xbf16>
    %cst_336 = arith.constant dense<0.000000e+00> : vector<4x256xf32>
    %344 = tpu.matmul %342, %343, %cst_336 {dimension_numbers = #tpu.dot_dimension_numbers<[1], [0], [0], [1], [0, 0, 1, 1], [], []>} : vector<4x256xbf16>, vector<256x256xbf16>, vector<4x256xf32> -> vector<4x256xf32>
    %345 = arith.addf %340, %344 : vector<4x256xf32>
    %c2_337 = arith.constant 2 : index
    %c0_338 = arith.constant 0 : index
    %346 = vector.load %arg63[%c2_337, %c0_338] : memref<6x256xf32, #tpu.memory_space<vmem>>, vector<4x256xf32>
    %347 = arith.truncf %346 : vector<4x256xf32> to vector<4x256xbf16>
    %c512_339 = arith.constant 512 : index
    %c0_340 = arith.constant 0 : index
    %348 = vector.load %arg41[%c512_339, %c0_340] : memref<768x256xbf16, #tpu.memory_space<vmem>>, vector<256x256xbf16>
    %cst_341 = arith.constant dense<0.000000e+00> : vector<4x256xf32>
    %349 = tpu.matmul %347, %348, %cst_341 {dimension_numbers = #tpu.dot_dimension_numbers<[1], [0], [0], [1], [0, 0, 1, 1], [], []>} : vector<4x256xbf16>, vector<256x256xbf16>, vector<4x256xf32> -> vector<4x256xf32>
    %350 = arith.addf %345, %349 : vector<4x256xf32>
    %c0_342 = arith.constant 0 : index
    %c0_343 = arith.constant 0 : index
    %351 = vector.load %arg42[%c0_342, %c0_343] : memref<1x256xf32, #tpu.memory_space<vmem>>, vector<1x256xf32>
    %352 = vector.broadcast %351 : vector<1x256xf32> to vector<4x256xf32>
    %353 = arith.mulf %350, %352 : vector<4x256xf32>
    %c0_344 = arith.constant 0 : index
    %c0_345 = arith.constant 0 : index
    %354 = vector.load %arg43[%c0_344, %c0_345] : memref<1x256xf32, #tpu.memory_space<vmem>>, vector<1x256xf32>
    %355 = vector.broadcast %354 : vector<1x256xf32> to vector<4x256xf32>
    %356 = arith.addf %353, %355 : vector<4x256xf32>
    %cst_346 = arith.constant 0.000000e+00 : f32
    %357 = vector.broadcast %cst_346 : f32 to vector<4x256xf32>
    %358 = arith.maximumf %356, %357 : vector<4x256xf32>
    %c1_347 = arith.constant 1 : index
    %c0_348 = arith.constant 0 : index
    %359 = vector.load %arg64[%c1_347, %c0_348] : memref<6x256xf32, #tpu.memory_space<vmem>>, vector<4x256xf32>
    tpu.vector_store %arg64[%c1_347, %c0_348], %358 {strides = array<i32>} : memref<6x256xf32, #tpu.memory_space<vmem>>, vector<4x256xf32>,
    %c0_349 = arith.constant 0 : index
    %c0_350 = arith.constant 0 : index
    %360 = vector.load %arg64[%c0_349, %c0_350] : memref<6x256xf32, #tpu.memory_space<vmem>>, vector<4x256xf32>
    %361 = arith.truncf %360 : vector<4x256xf32> to vector<4x256xbf16>
    %c0_351 = arith.constant 0 : index
    %c0_352 = arith.constant 0 : index
    %362 = vector.load %arg44[%c0_351, %c0_352] : memref<768x256xbf16, #tpu.memory_space<vmem>>, vector<256x256xbf16>
    %cst_353 = arith.constant dense<0.000000e+00> : vector<4x256xf32>
    %363 = tpu.matmul %361, %362, %cst_353 {dimension_numbers = #tpu.dot_dimension_numbers<[1], [0], [0], [1], [0, 0, 1, 1], [], []>} : vector<4x256xbf16>, vector<256x256xbf16>, vector<4x256xf32> -> vector<4x256xf32>
    %c1_354 = arith.constant 1 : index
    %c0_355 = arith.constant 0 : index
    %364 = vector.load %arg64[%c1_354, %c0_355] : memref<6x256xf32, #tpu.memory_space<vmem>>, vector<4x256xf32>
    %365 = arith.truncf %364 : vector<4x256xf32> to vector<4x256xbf16>
    %c256_356 = arith.constant 256 : index
    %c0_357 = arith.constant 0 : index
    %366 = vector.load %arg44[%c256_356, %c0_357] : memref<768x256xbf16, #tpu.memory_space<vmem>>, vector<256x256xbf16>
    %cst_358 = arith.constant dense<0.000000e+00> : vector<4x256xf32>
    %367 = tpu.matmul %365, %366, %cst_358 {dimension_numbers = #tpu.dot_dimension_numbers<[1], [0], [0], [1], [0, 0, 1, 1], [], []>} : vector<4x256xbf16>, vector<256x256xbf16>, vector<4x256xf32> -> vector<4x256xf32>
    %368 = arith.addf %363, %367 : vector<4x256xf32>
    %c2_359 = arith.constant 2 : index
    %c0_360 = arith.constant 0 : index
    %369 = vector.load %arg64[%c2_359, %c0_360] : memref<6x256xf32, #tpu.memory_space<vmem>>, vector<4x256xf32>
    %370 = arith.truncf %369 : vector<4x256xf32> to vector<4x256xbf16>
    %c512_361 = arith.constant 512 : index
    %c0_362 = arith.constant 0 : index
    %371 = vector.load %arg44[%c512_361, %c0_362] : memref<768x256xbf16, #tpu.memory_space<vmem>>, vector<256x256xbf16>
    %cst_363 = arith.constant dense<0.000000e+00> : vector<4x256xf32>
    %372 = tpu.matmul %370, %371, %cst_363 {dimension_numbers = #tpu.dot_dimension_numbers<[1], [0], [0], [1], [0, 0, 1, 1], [], []>} : vector<4x256xbf16>, vector<256x256xbf16>, vector<4x256xf32> -> vector<4x256xf32>
    %373 = arith.addf %368, %372 : vector<4x256xf32>
    %c0_364 = arith.constant 0 : index
    %c0_365 = arith.constant 0 : index
    %374 = vector.load %arg45[%c0_364, %c0_365] : memref<1x256xf32, #tpu.memory_space<vmem>>, vector<1x256xf32>
    %375 = vector.broadcast %374 : vector<1x256xf32> to vector<4x256xf32>
    %376 = arith.mulf %373, %375 : vector<4x256xf32>
    %c0_366 = arith.constant 0 : index
    %c0_367 = arith.constant 0 : index
    %377 = vector.load %arg46[%c0_366, %c0_367] : memref<1x256xf32, #tpu.memory_space<vmem>>, vector<1x256xf32>
    %378 = vector.broadcast %377 : vector<1x256xf32> to vector<4x256xf32>
    %379 = arith.addf %376, %378 : vector<4x256xf32>
    %c1_368 = arith.constant 1 : index
    %c0_369 = arith.constant 0 : index
    %380 = vector.load %arg63[%c1_368, %c0_369] : memref<6x256xf32, #tpu.memory_space<vmem>>, vector<4x256xf32>
    %381 = arith.addf %379, %380 : vector<4x256xf32>
    %cst_370 = arith.constant 0.000000e+00 : f32
    %382 = vector.broadcast %cst_370 : f32 to vector<4x256xf32>
    %383 = arith.maximumf %381, %382 : vector<4x256xf32>
    %c0_371 = arith.constant 0 : index
    %c0_372 = arith.constant 0 : index
    %384 = vector.load %arg65[%c0_371, %c0_372] : memref<4x256xf32, #tpu.memory_space<vmem>>, vector<4x256xf32>
    tpu.vector_store %arg65[%c0_371, %c0_372], %383 {strides = array<i32>} : memref<4x256xf32, #tpu.memory_space<vmem>>, vector<4x256xf32>,
    %c0_373 = arith.constant 0 : index
    %c0_374 = arith.constant 0 : index
    %385 = vector.load %arg65[%c0_373, %c0_374] : memref<4x256xf32, #tpu.memory_space<vmem>>, vector<4x256xf32>
    %cst_375 = arith.constant dense<0.000000e+00> : vector<256xf32>
    %386 = vector.multi_reduction <add>, %385, %cst_375 [0] : vector<4x256xf32> to vector<256xf32>
    %387 = vector.shape_cast %386 : vector<256xf32> to vector<1x256xf32>
    %cst_376 = arith.constant 4.000000e+00 : f32
    %388 = vector.broadcast %cst_376 : f32 to vector<1x256xf32>
    %389 = arith.divf %387, %388 : vector<1x256xf32>
    %390 = arith.truncf %389 : vector<1x256xf32> to vector<1x256xbf16>
    %c0_377 = arith.constant 0 : index
    %c0_378 = arith.constant 0 : index
    %391 = vector.load %arg47[%c0_377, %c0_378] : memref<256x128xbf16, #tpu.memory_space<vmem>>, vector<256x128xbf16>
    %cst_379 = arith.constant dense<0.000000e+00> : vector<1x128xf32>
    %392 = tpu.matmul %390, %391, %cst_379 {dimension_numbers = #tpu.dot_dimension_numbers<[1], [0], [0], [1], [0, 0, 1, 1], [], []>} : vector<1x256xbf16>, vector<256x128xbf16>, vector<1x128xf32> -> vector<1x128xf32>
    %c0_380 = arith.constant 0 : index
    %c0_381 = arith.constant 0 : index
    %393 = vector.load %arg48[%c0_380, %c0_381] : memref<1x128xf32, #tpu.memory_space<vmem>>, vector<1x128xf32>
    %394 = arith.addf %392, %393 : vector<1x128xf32>
    %395 = arith.negf %394 : vector<1x128xf32>
    %396 = math.exp %395 : vector<1x128xf32>
    %cst_382 = arith.constant 1.000000e+00 : f32
    %397 = vector.broadcast %cst_382 : f32 to vector<1x128xf32>
    %398 = arith.addf %397, %396 : vector<1x128xf32>
    %399 = arith.divf %397, %398 : vector<1x128xf32>
    %400 = vector.shape_cast %399 : vector<1x128xf32> to vector<1x128xf32>
    %401 = vector.broadcast %400 : vector<1x128xf32> to vector<8x128xf32>
    %c0_383 = arith.constant 0 : index
    %c0_384 = arith.constant 0 : index
    %402 = vector.load %arg49[%c0_383, %c0_384] : memref<8x128xf32, #tpu.memory_space<vmem>>, vector<8x128xf32>
    tpu.vector_store %arg49[%c0_383, %c0_384], %401 {strides = array<i32>} : memref<8x128xf32, #tpu.memory_space<vmem>>, vector<8x128xf32>,
    return
  }
  func.func @transform_0(%arg0: i32) -> (i32, i32) {
    %c0_i32 = arith.constant 0 : i32
    %c0_i32_0 = arith.constant 0 : i32
    return %arg0, %c0_i32 : i32, i32
  }
  func.func @transform_1(%arg0: i32) -> (i32, i32) {
    %c0_i32 = arith.constant 0 : i32
    %c0_i32_0 = arith.constant 0 : i32
    %c0_i32_1 = arith.constant 0 : i32
    return %c0_i32, %c0_i32_0 : i32, i32
  }
  func.func @transform_2(%arg0: i32) -> (i32, i32) {
    %c0_i32 = arith.constant 0 : i32
    %c0_i32_0 = arith.constant 0 : i32
    %c0_i32_1 = arith.constant 0 : i32
    return %c0_i32, %c0_i32_0 : i32, i32
  }
  func.func @transform_3(%arg0: i32) -> (i32, i32) {
    %c0_i32 = arith.constant 0 : i32
    %c0_i32_0 = arith.constant 0 : i32
    %c0_i32_1 = arith.constant 0 : i32
    return %c0_i32, %c0_i32_0 : i32, i32
  }
  func.func @transform_4(%arg0: i32) -> (i32, i32) {
    %c0_i32 = arith.constant 0 : i32
    %c0_i32_0 = arith.constant 0 : i32
    %c0_i32_1 = arith.constant 0 : i32
    return %c0_i32, %c0_i32_0 : i32, i32
  }
  func.func @transform_5(%arg0: i32) -> (i32, i32) {
    %c0_i32 = arith.constant 0 : i32
    %c0_i32_0 = arith.constant 0 : i32
    %c0_i32_1 = arith.constant 0 : i32
    return %c0_i32, %c0_i32_0 : i32, i32
  }
  func.func @transform_6(%arg0: i32) -> (i32, i32) {
    %c0_i32 = arith.constant 0 : i32
    %c0_i32_0 = arith.constant 0 : i32
    %c0_i32_1 = arith.constant 0 : i32
    return %c0_i32, %c0_i32_0 : i32, i32
  }
  func.func @transform_7(%arg0: i32) -> (i32, i32) {
    %c0_i32 = arith.constant 0 : i32
    %c0_i32_0 = arith.constant 0 : i32
    %c0_i32_1 = arith.constant 0 : i32
    return %c0_i32, %c0_i32_0 : i32, i32
  }
  func.func @transform_8(%arg0: i32) -> (i32, i32) {
    %c0_i32 = arith.constant 0 : i32
    %c0_i32_0 = arith.constant 0 : i32
    %c0_i32_1 = arith.constant 0 : i32
    return %c0_i32, %c0_i32_0 : i32, i32
  }
  func.func @transform_9(%arg0: i32) -> (i32, i32) {
    %c0_i32 = arith.constant 0 : i32
    %c0_i32_0 = arith.constant 0 : i32
    %c0_i32_1 = arith.constant 0 : i32
    return %c0_i32, %c0_i32_0 : i32, i32
  }
  func.func @transform_10(%arg0: i32) -> (i32, i32) {
    %c0_i32 = arith.constant 0 : i32
    %c0_i32_0 = arith.constant 0 : i32
    %c0_i32_1 = arith.constant 0 : i32
    return %c0_i32, %c0_i32_0 : i32, i32
  }
  func.func @transform_11(%arg0: i32) -> (i32, i32) {
    %c0_i32 = arith.constant 0 : i32
    %c0_i32_0 = arith.constant 0 : i32
    %c0_i32_1 = arith.constant 0 : i32
    return %c0_i32, %c0_i32_0 : i32, i32
  }
  func.func @transform_12(%arg0: i32) -> (i32, i32) {
    %c0_i32 = arith.constant 0 : i32
    %c0_i32_0 = arith.constant 0 : i32
    %c0_i32_1 = arith.constant 0 : i32
    return %c0_i32, %c0_i32_0 : i32, i32
  }
  func.func @transform_13(%arg0: i32) -> (i32, i32) {
    %c0_i32 = arith.constant 0 : i32
    %c0_i32_0 = arith.constant 0 : i32
    %c0_i32_1 = arith.constant 0 : i32
    return %c0_i32, %c0_i32_0 : i32, i32
  }
  func.func @transform_14(%arg0: i32) -> (i32, i32) {
    %c0_i32 = arith.constant 0 : i32
    %c0_i32_0 = arith.constant 0 : i32
    %c0_i32_1 = arith.constant 0 : i32
    return %c0_i32, %c0_i32_0 : i32, i32
  }
  func.func @transform_15(%arg0: i32) -> (i32, i32) {
    %c0_i32 = arith.constant 0 : i32
    %c0_i32_0 = arith.constant 0 : i32
    %c0_i32_1 = arith.constant 0 : i32
    return %c0_i32, %c0_i32_0 : i32, i32
  }
  func.func @transform_16(%arg0: i32) -> (i32, i32) {
    %c0_i32 = arith.constant 0 : i32
    %c0_i32_0 = arith.constant 0 : i32
    %c0_i32_1 = arith.constant 0 : i32
    return %c0_i32, %c0_i32_0 : i32, i32
  }
  func.func @transform_17(%arg0: i32) -> (i32, i32) {
    %c0_i32 = arith.constant 0 : i32
    %c0_i32_0 = arith.constant 0 : i32
    %c0_i32_1 = arith.constant 0 : i32
    return %c0_i32, %c0_i32_0 : i32, i32
  }
  func.func @transform_18(%arg0: i32) -> (i32, i32) {
    %c0_i32 = arith.constant 0 : i32
    %c0_i32_0 = arith.constant 0 : i32
    %c0_i32_1 = arith.constant 0 : i32
    return %c0_i32, %c0_i32_0 : i32, i32
  }
  func.func @transform_19(%arg0: i32) -> (i32, i32) {
    %c0_i32 = arith.constant 0 : i32
    %c0_i32_0 = arith.constant 0 : i32
    %c0_i32_1 = arith.constant 0 : i32
    return %c0_i32, %c0_i32_0 : i32, i32
  }
  func.func @transform_20(%arg0: i32) -> (i32, i32) {
    %c0_i32 = arith.constant 0 : i32
    %c0_i32_0 = arith.constant 0 : i32
    %c0_i32_1 = arith.constant 0 : i32
    return %c0_i32, %c0_i32_0 : i32, i32
  }
  func.func @transform_21(%arg0: i32) -> (i32, i32) {
    %c0_i32 = arith.constant 0 : i32
    %c0_i32_0 = arith.constant 0 : i32
    %c0_i32_1 = arith.constant 0 : i32
    return %c0_i32, %c0_i32_0 : i32, i32
  }
  func.func @transform_22(%arg0: i32) -> (i32, i32) {
    %c0_i32 = arith.constant 0 : i32
    %c0_i32_0 = arith.constant 0 : i32
    %c0_i32_1 = arith.constant 0 : i32
    return %c0_i32, %c0_i32_0 : i32, i32
  }
  func.func @transform_23(%arg0: i32) -> (i32, i32) {
    %c0_i32 = arith.constant 0 : i32
    %c0_i32_0 = arith.constant 0 : i32
    %c0_i32_1 = arith.constant 0 : i32
    return %c0_i32, %c0_i32_0 : i32, i32
  }
  func.func @transform_24(%arg0: i32) -> (i32, i32) {
    %c0_i32 = arith.constant 0 : i32
    %c0_i32_0 = arith.constant 0 : i32
    %c0_i32_1 = arith.constant 0 : i32
    return %c0_i32, %c0_i32_0 : i32, i32
  }
  func.func @transform_25(%arg0: i32) -> (i32, i32) {
    %c0_i32 = arith.constant 0 : i32
    %c0_i32_0 = arith.constant 0 : i32
    %c0_i32_1 = arith.constant 0 : i32
    return %c0_i32, %c0_i32_0 : i32, i32
  }
  func.func @transform_26(%arg0: i32) -> (i32, i32) {
    %c0_i32 = arith.constant 0 : i32
    %c0_i32_0 = arith.constant 0 : i32
    %c0_i32_1 = arith.constant 0 : i32
    return %c0_i32, %c0_i32_0 : i32, i32
  }
  func.func @transform_27(%arg0: i32) -> (i32, i32) {
    %c0_i32 = arith.constant 0 : i32
    %c0_i32_0 = arith.constant 0 : i32
    %c0_i32_1 = arith.constant 0 : i32
    return %c0_i32, %c0_i32_0 : i32, i32
  }
  func.func @transform_28(%arg0: i32) -> (i32, i32) {
    %c0_i32 = arith.constant 0 : i32
    %c0_i32_0 = arith.constant 0 : i32
    %c0_i32_1 = arith.constant 0 : i32
    return %c0_i32, %c0_i32_0 : i32, i32
  }
  func.func @transform_29(%arg0: i32) -> (i32, i32) {
    %c0_i32 = arith.constant 0 : i32
    %c0_i32_0 = arith.constant 0 : i32
    %c0_i32_1 = arith.constant 0 : i32
    return %c0_i32, %c0_i32_0 : i32, i32
  }
  func.func @transform_30(%arg0: i32) -> (i32, i32) {
    %c0_i32 = arith.constant 0 : i32
    %c0_i32_0 = arith.constant 0 : i32
    %c0_i32_1 = arith.constant 0 : i32
    return %c0_i32, %c0_i32_0 : i32, i32
  }
  func.func @transform_31(%arg0: i32) -> (i32, i32) {
    %c0_i32 = arith.constant 0 : i32
    %c0_i32_0 = arith.constant 0 : i32
    %c0_i32_1 = arith.constant 0 : i32
    return %c0_i32, %c0_i32_0 : i32, i32
  }
  func.func @transform_32(%arg0: i32) -> (i32, i32) {
    %c0_i32 = arith.constant 0 : i32
    %c0_i32_0 = arith.constant 0 : i32
    %c0_i32_1 = arith.constant 0 : i32
    return %c0_i32, %c0_i32_0 : i32, i32
  }
  func.func @transform_33(%arg0: i32) -> (i32, i32) {
    %c0_i32 = arith.constant 0 : i32
    %c0_i32_0 = arith.constant 0 : i32
    %c0_i32_1 = arith.constant 0 : i32
    return %c0_i32, %c0_i32_0 : i32, i32
  }
  func.func @transform_34(%arg0: i32) -> (i32, i32) {
    %c0_i32 = arith.constant 0 : i32
    %c0_i32_0 = arith.constant 0 : i32
    %c0_i32_1 = arith.constant 0 : i32
    return %c0_i32, %c0_i32_0 : i32, i32
  }
  func.func @transform_35(%arg0: i32) -> (i32, i32) {
    %c0_i32 = arith.constant 0 : i32
    %c0_i32_0 = arith.constant 0 : i32
    %c0_i32_1 = arith.constant 0 : i32
    return %c0_i32, %c0_i32_0 : i32, i32
  }
  func.func @transform_36(%arg0: i32) -> (i32, i32) {
    %c0_i32 = arith.constant 0 : i32
    %c0_i32_0 = arith.constant 0 : i32
    %c0_i32_1 = arith.constant 0 : i32
    return %c0_i32, %c0_i32_0 : i32, i32
  }
  func.func @transform_37(%arg0: i32) -> (i32, i32) {
    %c0_i32 = arith.constant 0 : i32
    %c0_i32_0 = arith.constant 0 : i32
    %c0_i32_1 = arith.constant 0 : i32
    return %c0_i32, %c0_i32_0 : i32, i32
  }
  func.func @transform_38(%arg0: i32) -> (i32, i32) {
    %c0_i32 = arith.constant 0 : i32
    %c0_i32_0 = arith.constant 0 : i32
    %c0_i32_1 = arith.constant 0 : i32
    return %c0_i32, %c0_i32_0 : i32, i32
  }
  func.func @transform_39(%arg0: i32) -> (i32, i32) {
    %c0_i32 = arith.constant 0 : i32
    %c0_i32_0 = arith.constant 0 : i32
    %c0_i32_1 = arith.constant 0 : i32
    return %c0_i32, %c0_i32_0 : i32, i32
  }
  func.func @transform_40(%arg0: i32) -> (i32, i32) {
    %c0_i32 = arith.constant 0 : i32
    %c0_i32_0 = arith.constant 0 : i32
    %c0_i32_1 = arith.constant 0 : i32
    return %c0_i32, %c0_i32_0 : i32, i32
  }
  func.func @transform_41(%arg0: i32) -> (i32, i32) {
    %c0_i32 = arith.constant 0 : i32
    %c0_i32_0 = arith.constant 0 : i32
    %c0_i32_1 = arith.constant 0 : i32
    return %c0_i32, %c0_i32_0 : i32, i32
  }
  func.func @transform_42(%arg0: i32) -> (i32, i32) {
    %c0_i32 = arith.constant 0 : i32
    %c0_i32_0 = arith.constant 0 : i32
    %c0_i32_1 = arith.constant 0 : i32
    return %c0_i32, %c0_i32_0 : i32, i32
  }
  func.func @transform_43(%arg0: i32) -> (i32, i32) {
    %c0_i32 = arith.constant 0 : i32
    %c0_i32_0 = arith.constant 0 : i32
    %c0_i32_1 = arith.constant 0 : i32
    return %c0_i32, %c0_i32_0 : i32, i32
  }
  func.func @transform_44(%arg0: i32) -> (i32, i32) {
    %c0_i32 = arith.constant 0 : i32
    %c0_i32_0 = arith.constant 0 : i32
    %c0_i32_1 = arith.constant 0 : i32
    return %c0_i32, %c0_i32_0 : i32, i32
  }
  func.func @transform_45(%arg0: i32) -> (i32, i32) {
    %c0_i32 = arith.constant 0 : i32
    %c0_i32_0 = arith.constant 0 : i32
    %c0_i32_1 = arith.constant 0 : i32
    return %c0_i32, %c0_i32_0 : i32, i32
  }
  func.func @transform_46(%arg0: i32) -> (i32, i32) {
    %c0_i32 = arith.constant 0 : i32
    %c0_i32_0 = arith.constant 0 : i32
    %c0_i32_1 = arith.constant 0 : i32
    return %c0_i32, %c0_i32_0 : i32, i32
  }
  func.func @transform_47(%arg0: i32) -> (i32, i32) {
    %c0_i32 = arith.constant 0 : i32
    %c0_i32_0 = arith.constant 0 : i32
    %c0_i32_1 = arith.constant 0 : i32
    return %c0_i32, %c0_i32_0 : i32, i32
  }
  func.func @transform_48(%arg0: i32) -> (i32, i32) {
    %c0_i32 = arith.constant 0 : i32
    %c0_i32_0 = arith.constant 0 : i32
    return %arg0, %c0_i32 : i32, i32
  }
}

</mosaic_0001>

<bundles_post_ra>
// kernel: forward.1
= control target key start
LH: loop header
LB: loop body
LE: loop exit
PB: predicated region body
PF: predicated region fallthrough
CT: control target
= control target key end

     0   :  { %s12515_s6 = smov 1   ;;  %s12516_s10 = smov 2   ;;  %s13814_s0 = inlined_call_operand.smem [shape: u32[49], index: -1, kind: input, shape index: {}] }
   0x1   :  { %s12601_s5 = sld [smem:[%s13814_s0]]   ;;  %s12517_s14 = smov 3  }
   0x2   :  { %s12606_s9 = sld [smem:[%s13814_s0 + %s12515_s6]]   ;;  %s12518_s18 = smov 4  }
   0x3   :  { %s12611_s13 = sld [smem:[%s13814_s0 + %s12516_s10]]   ;;  %s12519_s22 = smov 5  }
   0x4   :  { %s12616_s17 = sld [smem:[%s13814_s0 + %s12517_s14]]   ;;  %s12520_s26 = smov 6  }
   0x5   :  { %s12621_s21 = sld [smem:[%s13814_s0 + %s12518_s18]]   ;;  %s12521_s30 = smov 7  }
   0x6   :  { %s12626_s25 = sld [smem:[%s13814_s0 + %s12519_s22]]   ;;  %s12522_s4 = smov 8  }
   0x7   :  { %13827 = sst [smem:[#allocation65_spill]] %s12601_s5  ;;  %s12523_s10 = smov 9  }
   0x8   :  { %s12631_s29 = sld [smem:[%s13814_s0 + %s12520_s26]]   ;;  %s12524_s15 = smov 10  }
   0x9   :  { %13828 = sst [smem:[#allocation66_spill]] %s12611_s13  ;;  %s12525_s20 = smov 11  }
   0xa   :  { %s12636_s3 = sld [smem:[%s13814_s0 + %s12521_s30]]   ;;  %s12526_s26 = smov 12  }
   0xb   :  { %s12641_s8 = sld [smem:[%s13814_s0 + %s12522_s4]]   ;;  %s12527_s1 = smov 13  }
   0xc   :  { %s12646_s14 = sld [smem:[%s13814_s0 + %s12523_s10]]   ;;  %s12528_s7 = smov 14  }
   0xd   :  { %s12651_s19 = sld [smem:[%s13814_s0 + %s12524_s15]]   ;;  %s12529_s15 = smov 15  }
   0xe   :  { %s12656_s24 = sld [smem:[%s13814_s0 + %s12525_s20]]   ;;  %s12530_s22 = smov 16  }
   0xf   :  { %s12661_s30 = sld [smem:[%s13814_s0 + %s12526_s26]]   ;;  %s12531_s28 = smov 17  }
  0x10   :  { %13829 = sst [smem:[#allocation67_spill]] %s12636_s3 }
  0x11   :  { %13830 = sst [smem:[#allocation68_spill]] %s12641_s8 }
  0x12   :  { %13831 = sst [smem:[#allocation69_spill]] %s12646_s14 }
  0x13   :  { %13832 = sst [smem:[#allocation70_spill]] %s12651_s19 }
  0x14   :  { %13833 = sst [smem:[#allocation71_spill]] %s12656_s24 }
  0x15   :  { %s12666_s6 = sld [smem:[%s13814_s0 + %s12527_s1]]  }
  0x16   :  { %s12671_s12 = sld [smem:[%s13814_s0 + %s12528_s7]]   ;;  %s12532_s7 = smov 18  }
  0x17   :  { %s12676_s20 = sld [smem:[%s13814_s0 + %s12529_s15]]   ;;  %s12533_s15 = smov 19  }
  0x18   :  { %s12681_s27 = sld [smem:[%s13814_s0 + %s12530_s22]]   ;;  %s12534_s22 = smov 20  }
  0x19   :  { %s12686_s4 = sld [smem:[%s13814_s0 + %s12531_s28]]   ;;  %s12535_s28 = smov 21  }
  0x1a   :  { %s12691_s5 = sld [smem:[%s13814_s0 + %s12532_s7]]   ;;  %s12536_s7 = smov 22  }
  0x1b   :  { %13834 = sst [smem:[#allocation72_spill]] %s12666_s6 }
  0x1c   :  { %s12701_s6 = sld [smem:[%s13814_s0 + %s12534_s22]]   ;;  %s12538_s22 = smov 24  }
  0x1d   :  { %13835 = sst [smem:[#allocation73_spill]] %s12676_s20 }
  0x1e   :  { %s12696_s20 = sld [smem:[%s13814_s0 + %s12533_s15]]   ;;  %s12537_s15 = smov 23  }
  0x1f   :  { %13836 = sst [smem:[#allocation74_spill]] %s12686_s4 }
  0x20   :  { %13837 = sst [smem:[#allocation75_spill]] %s12691_s5 }
  0x21   :  { %s12706_s4 = sld [smem:[%s13814_s0 + %s12535_s28]]   ;;  %s12539_s28 = smov 25  }
  0x22   :  { %13838 = sst [smem:[#allocation76_spill]] %s12701_s6 }
  0x23   :  { %s12711_s5 = sld [smem:[%s13814_s0 + %s12536_s7]]   ;;  %s12540_s7 = smov 26  }
  0x24   :  { %s12716_s24 = sld [smem:[%s13814_s0 + %s12537_s15]]   ;;  %s12541_s15 = smov 27  }
  0x25   :  { %s12721_s6 = sld [smem:[%s13814_s0 + %s12538_s22]]   ;;  %s12542_s22 = smov 28  }
  0x27   :  { %13839 = sst [smem:[#allocation77_spill]] %s12706_s4 }
  0x28   :  { %s12726_s4 = sld [smem:[%s13814_s0 + %s12539_s28]]   ;;  %s12543_s28 = smov 29  }
  0x29   :  { %13840 = sst [smem:[#allocation78_spill]] %s12711_s5 }
  0x2a   :  { %13841 = sst [smem:[#allocation79_spill]] %s12716_s24 }
  0x2b   :  { %13842 = sst [smem:[#allocation80_spill]] %s12721_s6 }
  0x2c   :  { %s12731_s5 = sld [smem:[%s13814_s0 + %s12540_s7]]   ;;  %s12544_s7 = smov 30  }
  0x2d   :  { %s12736_s24 = sld [smem:[%s13814_s0 + %s12541_s15]]   ;;  %s12545_s15 = smov 31  }
  0x2e   :  { %13843 = sst [smem:[#allocation81_spill]] %s12726_s4 }
  0x2f   :  { %s12741_s6 = sld [smem:[%s13814_s0 + %s12542_s22]]   ;;  %s12546_s22 = smov 32  }
  0x30   :  { %s12746_s14 = sld [smem:[%s13814_s0 + %s12543_s28]]   ;;  %s12547_s28 = smov 33  }
  0x32   :  { %13844 = sst [smem:[#allocation82_spill]] %s12731_s5 }
  0x33   :  { %13845 = sst [smem:[#allocation83_spill]] %s12736_s24 }
  0x34   :  { %s12751_s5 = sld [smem:[%s13814_s0 + %s12544_s7]]   ;;  %s12548_s7 = smov 34  }
  0x35   :  { %13846 = sst [smem:[#allocation84_spill]] %s12741_s6 }
  0x36   :  { %13847 = sst [smem:[#allocation85_spill]] %s12746_s14 }
  0x37   :  { %s12756_s24 = sld [smem:[%s13814_s0 + %s12545_s15]]   ;;  %s12549_s15 = smov 35  }
  0x38   :  { %s12761_s6 = sld [smem:[%s13814_s0 + %s12546_s22]]   ;;  %s12550_s22 = smov 36  }
  0x39   :  { %s12766_s14 = sld [smem:[%s13814_s0 + %s12547_s28]]   ;;  %s12551_s28 = smov 37  }
  0x3a   :  { %13848 = sst [smem:[#allocation86_spill]] %s12751_s5 }
  0x3b   :  { %s12771_s5 = sld [smem:[%s13814_s0 + %s12548_s7]]   ;;  %s12552_s7 = smov 38  }
  0x3c   :  { %s12791_s3 = sld [smem:[%s13814_s0 + %s12552_s7]]   ;;  %s12556_s7 = smov 42  }
  0x3d   :  { %13849 = sst [smem:[#allocation87_spill]] %s12756_s24 }
  0x3e   :  { %13850 = sst [smem:[#allocation88_spill]] %s12761_s6 }
  0x3f   :  { %13851 = sst [smem:[#allocation89_spill]] %s12766_s14 }
  0x40   :  { %s12776_s24 = sld [smem:[%s13814_s0 + %s12549_s15]]   ;;  %s12553_s15 = smov 39  }
  0x41   :  { %s12781_s6 = sld [smem:[%s13814_s0 + %s12550_s22]]   ;;  %s12554_s22 = smov 40  }
  0x42   :  { %s12786_s14 = sld [smem:[%s13814_s0 + %s12551_s28]]   ;;  %s12555_s28 = smov 41  }
  0x43   :  { %13855 = sst [smem:[#allocation93_spill]] %s12791_s3 }
  0x44   :  { %s12811_s3 = sld [smem:[%s13814_s0 + %s12556_s7]]   ;;  %s12560_s7 = smov 46  }
  0x46   :  { %13852 = sst [smem:[#allocation90_spill]] %s12776_s24 }
  0x47   :  { %13853 = sst [smem:[#allocation91_spill]] %s12781_s6 }
  0x48   :  { %13854 = sst [smem:[#allocation92_spill]] %s12786_s14 }
  0x49   :  { %s12796_s24 = sld [smem:[%s13814_s0 + %s12553_s15]]   ;;  %s12557_s15 = smov 43  }
  0x4a   :  { %s12801_s6 = sld [smem:[%s13814_s0 + %s12554_s22]]   ;;  %s12558_s22 = smov 44  }
  0x4b   :  { %s12806_s14 = sld [smem:[%s13814_s0 + %s12555_s28]]   ;;  %s12559_s28 = smov 45  }
  0x4c   :  { %13859 = sst [smem:[#allocation97_spill]] %s12811_s3 }
  0x4d   :  { %s12831_s3 = sld [smem:[%s13814_s0 + %s12560_s7]]  }
  0x4f   :  { %13856 = sst [smem:[#allocation94_spill]] %s12796_s24 }
  0x50   :  { %13857 = sst [smem:[#allocation95_spill]] %s12801_s6 }
  0x51   :  { %13858 = sst [smem:[#allocation96_spill]] %s12806_s14 }
  0x52   :  { %s12816_s24 = sld [smem:[%s13814_s0 + %s12557_s15]]   ;;  %s12561_s15 = smov 47  }
  0x53   :  { %s12821_s6 = sld [smem:[%s13814_s0 + %s12558_s22]]   ;;  %s12562_s22 = smov 48  }
  0x54   :  { %s12826_s14 = sld [smem:[%s13814_s0 + %s12559_s28]]  }
  0x58   :  { %13860 = sst [smem:[#allocation98_spill]] %s12816_s24 }
  0x59   :  { %13861 = sst [smem:[#allocation99_spill]] %s12821_s6 }
  0x5a   :  { %s12836_s24 = sld [smem:[%s13814_s0 + %s12561_s15]]  }
  0x5b   :  { %s12841_s6 = sld [smem:[%s13814_s0 + %s12562_s22]]  }
  0x5c   :  { %102 = vsyncpa [#allocation19], 0 }
  0x5d   :  { %103 = vsyncpa [#allocation21], 0 }
  0x5e   :  { %104 = vsyncpa [#allocation24], 0 }
  0x5f   :  { %105 = vsyncpa [#allocation27], 0 }
  0x60   :  { %106 = vsyncpa [#allocation30], 0 }
  0x61   :  { %107 = vsyncpa [#allocation33], 0 }
  0x62   :  { %108 = vsyncpa [#allocation36], 0 }
  0x63   :  { %109 = vsyncpa [#allocation39], 0 }
  0x64   :  { %110 = vsyncpa [#allocation42], 0 }
  0x65   :  { %111 = vsyncpa [#allocation45], 0 }
  0x66   :  { %112 = vsyncpa [#allocation48], 0 }
  0x67   :  { %113 = vsyncpa [#allocation51], 0  ;;  %s12843_s28 = smov 0  }
  0x68 LB: > { %s12563_s0 = smov [#allocation20]   ;;  %s12849_s2 = sadd.s32 4294967295, %s12513_s28   ;;  %s12513_s28 = sphi %s12843_s28, %s119_s28  }
  0x69   : > { %s1189_s1 = sshll.u32 %s12563_s0, 4  ;;  %p9077_p0 = scmp.ge.s32.totalorder %s12513_s28, 1  ;;  %s1190_s1 = int_to_ptr.vmem [resolvable:$true] %s1189_s1 }
  0x6a   : > { %p1163_p1 = scmp.lt.s32.totalorder %s12513_s28, 3  ;;  %p13819_p2 = scmp.eq.s32.totalorder %s12849_s2, 0 }
  0x6b   : > { %s12564_s10 = smov [#allocation23]   ;;  %s12565_s16 = smov [#allocation26]  }
  0x6c   : > { %p12854_p3 = pnand %p9077_p0, %p1163_p1  ;;  %s1210_s11 = sshll.u32 %s12564_s10, 4  ;;  %s12860_s11 = int_to_ptr.vmem [resolvable:$true] %s1210_s11 }
  0x6d   : > { %s1235_s18 = sshll.u32 %s12565_s16, 4  ;;  %s12566_s22 = smov [#allocation29]   ;;  %s12868_s18 = int_to_ptr.vmem [resolvable:$true] %s1235_s18 }
  0x6e   : > { %s13862_s7 = scalar_select %p12854_p3, 1, 0 }
  0x6f   : > { %p10853_p4 = pneg %p12854_p3  ;;  %s12870_s23 = sshll.u32 %s12566_s22, 4  ;;  %s1260_s23 = int_to_ptr.vmem [resolvable:$true] %s12870_s23 }
  0x70   : > { %s11872_s0 = scalar_lea.vmem %s1190_s1, 16  ;;  %s11879_s10 = scalar_lea.vmem %s1190_s1, 32 }
  0x71   : > { %p12864_p5 = pnand %p13819_p2, %p10853_p4  ;;  %p11873_p7 = scmp.ne.s32.totalorder %s1190_s1, %s11872_s0 }
  0x72   : > { %p11880_p10 = scmp.lt.s32.totalorder %s1190_s1, %s1190_s1  ;;  %p11881_p11 = scmp.lt.s32.totalorder %s11879_s10, %s11872_s0 }
  0x73   : > { %p12874_p6 = pneg %p12864_p5 }
  0x74   : > { %p11882_p12 = por %p11881_p11, %p11880_p10 }
  0x75   : > { %p11875_p8 = pnand %p11873_p7, %p12874_p6 }
  0x77   : > { %p11876_p9 = pneg %p11875_p8 }
  0x79   : > { %p11883_p13 = pnand %p11882_p12, %p11876_p9 }
  0x7b   : > { %11886 = shalt.err (!%p11883_p13)
}
  0x7c   : > { %s13865_s13 = sld [smem:[#allocation66_spill]]  ;;  %s11898_s16 = scalar_lea.vmem %s12860_s11, 3072 }
  0x7d   : > { %p11899_p0 = scmp.ne.s32.totalorder %s12860_s11, %s11898_s16  ;;  %p11906_p7 = scmp.lt.s32.totalorder %s12860_s11, %s12860_s11 }
  0x7e   : > { %p11907_p8 = scmp.lt.s32.totalorder %s11898_s16, %s11898_s16 }
  0x7f   : > { %p11901_p1 = pnand %p11899_p0, %p12874_p6 }
  0x80   : > { %p11908_p2 = por %p11907_p8, %p11906_p7 }
  0x81   : > { %p11902_p4 = pneg %p11901_p1 }
  0x82   : > { %10859 = dma.hbm_to_vmem [thread:$0]  (!%p12864_p5), %s13865_s13, 16, %s1190_s1, [#allocation21]  }
  0x83   : > { %p11909_p10 = pnand %p11908_p2, %p11902_p4 }
  0x85   : > { %11912 = shalt.err (!%p11909_p10)
}
  0x86   : > { %s13820_s22 = smov 64   ;;  %s13822_s1 = smov 4  }
  0x87   : > { %10865 = dma.hbm_to_vmem [thread:$0]  (!%p12864_p5), %s12621_s21, 3072, %s12860_s11, [#allocation24], %s13820_s22, %s13820_s22, %s13822_s1  }
  0x88   : > { %s11924_s0 = scalar_lea.vmem %s12868_s18, 16  ;;  %s11931_s10 = scalar_lea.vmem %s12868_s18, 32 }
  0x89   : > { %p11925_p9 = scmp.ne.s32.totalorder %s12868_s18, %s11924_s0  ;;  %p11932_p12 = scmp.lt.s32.totalorder %s12868_s18, %s12868_s18 }
  0x8a   : > { %p11933_p13 = scmp.lt.s32.totalorder %s11931_s10, %s11924_s0 }
  0x8b   : > { %p11927_p2 = pnand %p11925_p9, %p12874_p6 }
  0x8c   : > { %p11934_p0 = por %p11933_p13, %p11932_p12 }
  0x8d   : > { %p11928_p11 = pneg %p11927_p2 }
  0x8f   : > { %p11935_p1 = pnand %p11934_p0, %p11928_p11 }
  0x91   : > { %11938 = shalt.err (!%p11935_p1)
}
  0x92   : > { %10871 = dma.hbm_to_vmem [thread:$0]  (!%p12864_p5), %s12631_s29, 16, %s12868_s18, [#allocation27]  }
  0x93   : > { %s11950_s11 = scalar_lea.vmem %s1260_s23, 16  ;;  %s11957_s16 = scalar_lea.vmem %s1260_s23, 32 }
  0x94   : > { %p11951_p4 = scmp.ne.s32.totalorder %s1260_s23, %s11950_s11  ;;  %p11958_p10 = scmp.lt.s32.totalorder %s1260_s23, %s1260_s23 }
  0x95   : > { %p11959_p9 = scmp.lt.s32.totalorder %s11957_s16, %s11950_s11 }
  0x96   : > { %p11953_p7 = pnand %p11951_p4, %p12874_p6 }
  0x97   : > { %p11960_p2 = por %p11959_p9, %p11958_p10 }
  0x98   : > { %p11954_p8 = pneg %p11953_p7 }
  0x9a   : > { %p11961_p12 = pnand %p11960_p2, %p11954_p8 }
  0x9c   : > { %11964 = shalt.err (!%p11961_p12)
}
  0x9d   : > { %s13866_s8 = sld [smem:[#allocation68_spill]]  ;;  %s12569_s0 = smov [#allocation32]  }
  0x9e   : > { %s1280_s10 = sshll.u32 %s12569_s0, 4  ;;  %s12570_s18 = smov [#allocation35]   ;;  %s1281_s10 = int_to_ptr.vmem [resolvable:$true] %s1280_s10 }
  0x9f   : > { %s1305_s22 = sshll.u32 %s12570_s18, 4  ;;  %s11976_s1 = scalar_lea.vmem %s1281_s10, 3072  ;;  %s1306_s22 = int_to_ptr.vmem [resolvable:$true] %s1305_s22 }
  0xa0   : > { %p11977_p11 = scmp.ne.s32.totalorder %s1281_s10, %s11976_s1  ;;  %p11984_p1 = scmp.lt.s32.totalorder %s1281_s10, %s1281_s10 }
  0xa1   : > { %p11985_p4 = scmp.lt.s32.totalorder %s11976_s1, %s11976_s1 }
  0xa2   : > { %p11979_p13 = pnand %p11977_p11, %p12874_p6 }
  0xa3   : > { %10877 = dma.hbm_to_vmem [thread:$0]  (!%p12864_p5), %s13866_s8, 16, %s1260_s23, [#allocation30]  }
  0xa4   : > { %p11980_p0 = pneg %p11979_p13  ;;  %p11986_p7 = por %p11985_p4, %p11984_p1 }
  0xa6   : > { %p11987_p8 = pnand %p11986_p7, %p11980_p0 }
  0xa8   : > { %11990 = shalt.err (!%p11987_p8)
}
  0xa9   : > { %s13867_s11 = smov 4   ;;  %s13868_s16 = smov 64  }
  0xaa   : > { %s13869_s19 = sld [smem:[#allocation70_spill]]  ;;  %s12002_s23 = scalar_lea.vmem %s1306_s22, 16 }
  0xab   : > { %p12003_p10 = scmp.ne.s32.totalorder %s1306_s22, %s12002_s23  ;;  %s12009_s0 = scalar_lea.vmem %s1306_s22, 32 }
  0xac   : > { %p12010_p12 = scmp.lt.s32.totalorder %s1306_s22, %s1306_s22  ;;  %p12011_p11 = scmp.lt.s32.totalorder %s12009_s0, %s12002_s23 }
  0xad   : > { %p12005_p9 = pnand %p12003_p10, %p12874_p6 }
  0xae   : > { %p12012_p13 = por %p12011_p11, %p12010_p12 }
  0xaf   : > { %p12006_p2 = pneg %p12005_p9 }
  0xb0   : > { %10883 = dma.hbm_to_vmem [thread:$0]  (!%p12864_p5), %s13869_s19, 3072, %s1281_s10, [#allocation33], %s13868_s16, %s13868_s16, %s13867_s11  }
  0xb1   : > { %p12013_p0 = pnand %p12012_p13, %p12006_p2 }
  0xb3   : > { %12016 = shalt.err (!%p12013_p0)
}
  0xb4   : > { %10889 = dma.hbm_to_vmem [thread:$0]  (!%p12864_p5), %s12661_s30, 16, %s1306_s22, [#allocation36]  }
  0xb5   : > { %s12571_s1 = smov [#allocation38]   ;;  %s12572_s10 = smov [#allocation41]  }
  0xb6   : > { %s1329_s18 = sshll.u32 %s12571_s1, 4  ;;  %s1350_s8 = sshll.u32 %s12572_s10, 4  ;;  %s1330_s18 = int_to_ptr.vmem [resolvable:$true] %s1329_s18  ;;  %s1351_s8 = int_to_ptr.vmem [resolvable:$true] %s1350_s8 }
  0xb7   : > { %s12028_s13 = scalar_lea.vmem %s1330_s18, 16  ;;  %s12035_s19 = scalar_lea.vmem %s1330_s18, 32 }
  0xb8   : > { %p12029_p1 = scmp.ne.s32.totalorder %s1330_s18, %s12028_s13  ;;  %p12036_p8 = scmp.lt.s32.totalorder %s1330_s18, %s1330_s18 }
  0xb9   : > { %p12037_p10 = scmp.lt.s32.totalorder %s12035_s19, %s12028_s13 }
  0xba   : > { %p12031_p4 = pnand %p12029_p1, %p12874_p6 }
  0xbb   : > { %p12038_p9 = por %p12037_p10, %p12036_p8 }
  0xbc   : > { %p12032_p7 = pneg %p12031_p4 }
  0xbe   : > { %p12039_p2 = pnand %p12038_p9, %p12032_p7 }
  0xc0   : > { %12042 = shalt.err (!%p12039_p2)
}
  0xc1   : > { %10895 = dma.hbm_to_vmem [thread:$0]  (!%p12864_p5), %s12671_s12, 16, %s1330_s18, [#allocation39]  }
  0xc2   : > { %s12054_s22 = scalar_lea.vmem %s1351_s8, 1024  ;;  %p12062_p0 = scmp.lt.s32.totalorder %s1351_s8, %s1351_s8 }
  0xc3   : > { %p12055_p12 = scmp.ne.s32.totalorder %s1351_s8, %s12054_s22  ;;  %p12063_p1 = scmp.lt.s32.totalorder %s12054_s22, %s12054_s22 }
  0xc5   : > { %p12057_p11 = pnand %p12055_p12, %p12874_p6  ;;  %p12064_p4 = por %p12063_p1, %p12062_p0 }
  0xc7   : > { %p12058_p13 = pneg %p12057_p11 }
  0xc9   : > { %p12065_p3 = pnand %p12064_p4, %p12058_p13 }
  0xcb   : > { %12068 = shalt.err (!%p12065_p3)
}
  0xcc   : > { %10901 = dma.hbm_to_vmem [thread:$0]  (!%p12864_p5), %s12681_s27, 1024, %s1351_s8, [#allocation42], %s13868_s16, %s13868_s16, %s13867_s11  }
  0xcd   : > { %s12573_s13 = smov [#allocation44]   ;;  %s12574_s23 = smov [#allocation47]  }
  0xce   : > { %s1377_s19 = sshll.u32 %s12573_s13, 4  ;;  %s1415_s0 = sshll.u32 %s12574_s23, 4  ;;  %s1378_s19 = int_to_ptr.vmem [resolvable:$true] %s1377_s19  ;;  %s1416_s0 = int_to_ptr.vmem [resolvable:$true] %s1415_s0 }
  0xcf   : > { %s12080_s1 = scalar_lea.vmem %s1378_s19, 3072  ;;  %p12088_p9 = scmp.lt.s32.totalorder %s1378_s19, %s1378_s19 }
  0xd0   : > { %p12081_p7 = scmp.ne.s32.totalorder %s1378_s19, %s12080_s1  ;;  %p12089_p3 = scmp.lt.s32.totalorder %s12080_s1, %s12080_s1 }
  0xd2   : > { %p12083_p8 = pnand %p12081_p7, %p12874_p6  ;;  %p12090_p2 = por %p12089_p3, %p12088_p9 }
  0xd4   : > { %p12084_p10 = pneg %p12083_p8 }
  0xd6   : > { %p12091_p12 = pnand %p12090_p2, %p12084_p10 }
  0xd8   : > { %12094 = shalt.err (!%p12091_p12)
}
  0xd9   : > { %10907 = dma.hbm_to_vmem [thread:$0]  (!%p12864_p5), %s12696_s20, 3072, %s1378_s19, [#allocation45], %s13868_s16, %s13868_s16, %s13867_s11  }
  0xda   : > { %s12106_s8 = scalar_lea.vmem %s1416_s0, 3072  ;;  %p12114_p1 = scmp.lt.s32.totalorder %s1416_s0, %s1416_s0 }
  0xdb   : > { %p12107_p11 = scmp.ne.s32.totalorder %s1416_s0, %s12106_s8  ;;  %p12115_p4 = scmp.lt.s32.totalorder %s12106_s8, %s12106_s8 }
  0xdd   : > { %p12109_p13 = pnand %p12107_p11, %p12874_p6  ;;  %p12116_p7 = por %p12115_p4, %p12114_p1 }
  0xdf   : > { %p12110_p0 = pneg %p12109_p13 }
  0xe1   : > { %p12117_p8 = pnand %p12116_p7, %p12110_p0 }
  0xe3   : > { %12120 = shalt.err (!%p12117_p8)
}
  0xe4   : > { %s13870_s4 = sld [smem:[#allocation81_spill]]  ;;  %s12575_s18 = smov [#allocation50]  }
  0xe5   : > { %s1462_s10 = sshll.u32 %s12575_s18, 4  ;;  %s12576_s22 = smov [#allocation18]   ;;  %s1463_s10 = int_to_ptr.vmem [resolvable:$true] %s1462_s10 }
  0xe6   : > { %s1175_s13 = sshll.u32 %s12576_s22, 4  ;;  %s12132_s19 = scalar_lea.vmem %s1463_s10, 6144  ;;  %s1176_s13 = int_to_ptr.vmem [resolvable:$true] %s1175_s13 }
  0xe7   : > { %p12133_p10 = scmp.ne.s32.totalorder %s1463_s10, %s12132_s19  ;;  %p12140_p2 = scmp.lt.s32.totalorder %s1463_s10, %s1463_s10 }
  0xe8   : > { %p12141_p12 = scmp.lt.s32.totalorder %s12132_s19, %s12132_s19 }
  0xe9   : > { %p12135_p9 = pnand %p12133_p10, %p12874_p6 }
  0xea   : > { %10913 = dma.hbm_to_vmem [thread:$0]  (!%p12864_p5), %s13870_s4, 3072, %s1416_s0, [#allocation48], %s13868_s16, %s13868_s16, %s13867_s11  }
  0xeb   : > { %p12136_p3 = pneg %p12135_p9  ;;  %p12142_p11 = por %p12141_p12, %p12140_p2 }
  0xed   : > { %p12143_p13 = pnand %p12142_p11, %p12136_p3 }
  0xef   : > { %12146 = shalt.err (!%p12143_p13)
}
  0xf0   : > { %s13825_s23 = smov 128   ;;  %s13826_s0 = smov 8  }
  0xf1   : > { %10919 = dma.hbm_to_vmem [thread:$0]  (!%p12864_p5), %s12771_s5, 6144, %s1463_s10, [#allocation51], %s13825_s23, %s13825_s23, %s13826_s0  }
  0xf2   : > { %s12158_s1 = scalar_lea.vmem %s1176_s13, 7168  ;;  %p12166_p7 = scmp.lt.s32.totalorder %s1176_s13, %s1176_s13 }
  0xf3   : > { %p12159_p0 = scmp.ne.s32.totalorder %s1176_s13, %s12158_s1  ;;  %p12167_p8 = scmp.lt.s32.totalorder %s12158_s1, %s12158_s1 }
  0xf5   : > { %p12161_p1 = pnand %p12159_p0, %p12874_p6  ;;  %p12168_p10 = por %p12167_p8, %p12166_p7 }
  0xf7   : > { %p12162_p4 = pneg %p12161_p1 }
  0xf9   : > { %p12169_p9 = pnand %p12168_p10, %p12162_p4 }
  0xfb   : > { %12172 = shalt.err (!%p12169_p9)
}
  0xfc   : > { %10856 = dma.hbm_to_vmem [thread:$0]  (!%p12864_p5), %s12606_s9, 7168, %s1176_s13, [#allocation19], %s13868_s16, %s13868_s16, %s13867_s11  }
  0xfd   : > { %s12579_s8 = smov [#allocation22]   ;;  %s12580_s10 = smov [#allocation25]  }
  0xfe   : > { %s1200_s18 = sshll.u32 %s12579_s8, 4  ;;  %s1224_s22 = sshll.u32 %s12580_s10, 4  ;;  %s1201_s18 = int_to_ptr.vmem [resolvable:$true] %s1200_s18  ;;  %s1225_s22 = int_to_ptr.vmem [resolvable:$true] %s1224_s22 }
  0xff   : > { %s12184_s19 = scalar_lea.vmem %s1201_s18, 16  ;;  %s12191_s1 = scalar_lea.vmem %s1201_s18, 32 }
 0x100   : > { %p12185_p3 = scmp.ne.s32.totalorder %s1201_s18, %s12184_s19  ;;  %p12192_p11 = scmp.lt.s32.totalorder %s1201_s18, %s1201_s18 }
 0x101   : > { %p12193_p13 = scmp.lt.s32.totalorder %s12191_s1, %s12184_s19 }
 0x102   : > { %p12187_p2 = pnand %p12185_p3, %p12874_p6 }
 0x103   : > { %p12194_p0 = por %p12193_p13, %p12192_p11 }
 0x104   : > { %p12188_p12 = pneg %p12187_p2 }
 0x106   : > { %p12195_p1 = pnand %p12194_p0, %p12188_p12 }
 0x108   : > { %12198 = shalt.err (!%p12195_p1)
}
 0x109   : > { %10862 = dma.hbm_to_vmem [thread:$0]  (!%p12864_p5), %s12616_s17, 16, %s1201_s18, [#allocation21]  }
 0x10a   : > { %s12210_s13 = scalar_lea.vmem %s1225_s22, 16  ;;  %s12217_s8 = scalar_lea.vmem %s1225_s22, 32 }
 0x10b   : > { %p12211_p4 = scmp.ne.s32.totalorder %s1225_s22, %s12210_s13  ;;  %p12218_p10 = scmp.lt.s32.totalorder %s1225_s22, %s1225_s22 }
 0x10c   : > { %p12219_p9 = scmp.lt.s32.totalorder %s12217_s8, %s12210_s13 }
 0x10d   : > { %p12213_p7 = pnand %p12211_p4, %p12874_p6 }
 0x10e   : > { %p12220_p3 = por %p12219_p9, %p12218_p10 }
 0x10f   : > { %p12214_p8 = pneg %p12213_p7 }
 0x111   : > { %p12221_p2 = pnand %p12220_p3, %p12214_p8 }
 0x113   : > { %12224 = shalt.err (!%p12221_p2)
}
 0x114   : > { %10868 = dma.hbm_to_vmem [thread:$0]  (!%p12864_p5), %s12626_s25, 16, %s1225_s22, [#allocation24]  }
 0x115   : > { %s12581_s10 = smov [#allocation28]   ;;  %s12582_s18 = smov [#allocation31]  }
 0x116   : > { %s1245_s19 = sshll.u32 %s12581_s10, 4  ;;  %s1270_s1 = sshll.u32 %s12582_s18, 4  ;;  %s1246_s19 = int_to_ptr.vmem [resolvable:$true] %s1245_s19  ;;  %s1271_s1 = int_to_ptr.vmem [resolvable:$true] %s1270_s1 }
 0x117   : > { %s12236_s23 = scalar_lea.vmem %s1246_s19, 3072  ;;  %p12244_p0 = scmp.lt.s32.totalorder %s1246_s19, %s1246_s19 }
 0x118   : > { %p12237_p12 = scmp.ne.s32.totalorder %s1246_s19, %s12236_s23  ;;  %p12245_p1 = scmp.lt.s32.totalorder %s12236_s23, %s12236_s23 }
 0x11a   : > { %p12239_p11 = pnand %p12237_p12, %p12874_p6  ;;  %p12246_p4 = por %p12245_p1, %p12244_p0 }
 0x11c   : > { %p12240_p13 = pneg %p12239_p11 }
 0x11e   : > { %p12247_p7 = pnand %p12246_p4, %p12240_p13 }
 0x120   : > { %12250 = shalt.err (!%p12247_p7)
}
 0x121   : > { %s13871_s22 = sld [smem:[#allocation67_spill]]  ;;  %s12262_s13 = scalar_lea.vmem %s1271_s1, 16 }
 0x122   : > { %p12263_p8 = scmp.ne.s32.totalorder %s1271_s1, %s12262_s13  ;;  %s12269_s8 = scalar_lea.vmem %s1271_s1, 32 }
 0x123   : > { %p12270_p3 = scmp.lt.s32.totalorder %s1271_s1, %s1271_s1  ;;  %p12271_p2 = scmp.lt.s32.totalorder %s12269_s8, %s12262_s13 }
 0x124   : > { %p12265_p10 = pnand %p12263_p8, %p12874_p6 }
 0x125   : > { %p12272_p12 = por %p12271_p2, %p12270_p3 }
 0x126   : > { %p12266_p9 = pneg %p12265_p10 }
 0x127   : > { %10874 = dma.hbm_to_vmem [thread:$0]  (!%p12864_p5), %s13871_s22, 3072, %s1246_s19, [#allocation27], %s13868_s16, %s13868_s16, %s13867_s11  }
 0x128   : > { %p12273_p11 = pnand %p12272_p12, %p12266_p9 }
 0x12a   : > { %12276 = shalt.err (!%p12273_p11)
}
 0x12b   : > { %s13872_s23 = sld [smem:[#allocation69_spill]]  ;;  %s12583_s10 = smov [#allocation34]  }
 0x12c   : > { %s1294_s18 = sshll.u32 %s12583_s10, 4  ;;  %s12584_s19 = smov [#allocation37]   ;;  %s1295_s18 = int_to_ptr.vmem [resolvable:$true] %s1294_s18 }
 0x12d   : > { %s1315_s22 = sshll.u32 %s12584_s19, 4  ;;  %s12288_s0 = scalar_lea.vmem %s1295_s18, 16  ;;  %s1316_s22 = int_to_ptr.vmem [resolvable:$true] %s1315_s22 }
 0x12e   : > { %p12289_p13 = scmp.ne.s32.totalorder %s1295_s18, %s12288_s0  ;;  %s12295_s4 = scalar_lea.vmem %s1295_s18, 32 }
 0x12f   : > { %p12296_p4 = scmp.lt.s32.totalorder %s1295_s18, %s1295_s18  ;;  %p12297_p7 = scmp.lt.s32.totalorder %s12295_s4, %s12288_s0 }
 0x130   : > { %p12291_p0 = pnand %p12289_p13, %p12874_p6 }
 0x131   : > { %10880 = dma.hbm_to_vmem [thread:$0]  (!%p12864_p5), %s13872_s23, 16, %s1271_s1, [#allocation30]  }
 0x132   : > { %p12292_p1 = pneg %p12291_p0  ;;  %p12298_p8 = por %p12297_p7, %p12296_p4 }
 0x134   : > { %p12299_p10 = pnand %p12298_p8, %p12292_p1 }
 0x136   : > { %12302 = shalt.err (!%p12299_p10)
}
 0x137   : > { %s13873_s13 = sld [smem:[#allocation71_spill]]  ;;  %s12314_s1 = scalar_lea.vmem %s1316_s22, 3072 }
 0x138   : > { %p12315_p9 = scmp.ne.s32.totalorder %s1316_s22, %s12314_s1  ;;  %p12322_p12 = scmp.lt.s32.totalorder %s1316_s22, %s1316_s22 }
 0x139   : > { %p12323_p11 = scmp.lt.s32.totalorder %s12314_s1, %s12314_s1 }
 0x13a   : > { %p12317_p3 = pnand %p12315_p9, %p12874_p6 }
 0x13b   : > { %p12324_p13 = por %p12323_p11, %p12322_p12 }
 0x13c   : > { %p12318_p2 = pneg %p12317_p3 }
 0x13d   : > { %10886 = dma.hbm_to_vmem [thread:$0]  (!%p12864_p5), %s13873_s13, 16, %s1295_s18, [#allocation33]  }
 0x13e   : > { %p12325_p0 = pnand %p12324_p13, %p12318_p2 }
 0x140   : > { %12328 = shalt.err (!%p12325_p0)
}
 0x141   : > { %s13874_s4 = sld [smem:[#allocation72_spill]]  ;;  %s12585_s0 = smov [#allocation40]  }
 0x142   : > { %s1340_s8 = sshll.u32 %s12585_s0, 4  ;;  %s12586_s23 = smov [#allocation43]   ;;  %s1341_s8 = int_to_ptr.vmem [resolvable:$true] %s1340_s8 }
 0x143   : > { %s1364_s10 = sshll.u32 %s12586_s23, 4  ;;  %s12340_s18 = scalar_lea.vmem %s1341_s8, 16  ;;  %s1365_s10 = int_to_ptr.vmem [resolvable:$true] %s1364_s10 }
 0x144   : > { %p12341_p1 = scmp.ne.s32.totalorder %s1341_s8, %s12340_s18  ;;  %s12347_s19 = scalar_lea.vmem %s1341_s8, 32 }
 0x145   : > { %p12348_p8 = scmp.lt.s32.totalorder %s1341_s8, %s1341_s8  ;;  %p12349_p10 = scmp.lt.s32.totalorder %s12347_s19, %s12340_s18 }
 0x146   : > { %p12343_p4 = pnand %p12341_p1, %p12874_p6 }
 0x147   : > { %10892 = dma.hbm_to_vmem [thread:$0]  (!%p12864_p5), %s13874_s4, 3072, %s1316_s22, [#allocation36], %s13868_s16, %s13868_s16, %s13867_s11  }
 0x148   : > { %p12344_p7 = pneg %p12343_p4  ;;  %p12350_p9 = por %p12349_p10, %p12348_p8 }
 0x14a   : > { %p12351_p3 = pnand %p12350_p9, %p12344_p7 }
 0x14c   : > { %12354 = shalt.err (!%p12351_p3)
}
 0x14d   : > { %s13875_s13 = sld [smem:[#allocation73_spill]]  ;;  %s12366_s22 = scalar_lea.vmem %s1365_s10, 16 }
 0x14e   : > { %p12367_p2 = scmp.ne.s32.totalorder %s1365_s10, %s12366_s22  ;;  %s12373_s1 = scalar_lea.vmem %s1365_s10, 32 }
 0x14f   : > { %p12374_p13 = scmp.lt.s32.totalorder %s1365_s10, %s1365_s10  ;;  %p12375_p0 = scmp.lt.s32.totalorder %s12373_s1, %s12366_s22 }
 0x150   : > { %p12369_p12 = pnand %p12367_p2, %p12874_p6 }
 0x151   : > { %p12376_p1 = por %p12375_p0, %p12374_p13 }
 0x152   : > { %p12370_p11 = pneg %p12369_p12 }
 0x153   : > { %10898 = dma.hbm_to_vmem [thread:$0]  (!%p12864_p5), %s13875_s13, 16, %s1341_s8, [#allocation39]  }
 0x154   : > { %p12377_p4 = pnand %p12376_p1, %p12370_p11 }
 0x156   : > { %12380 = shalt.err (!%p12377_p4)
}
 0x157   : > { %s13876_s4 = sld [smem:[#allocation74_spill]]  ;;  %s12587_s0 = smov [#allocation46]  }
 0x158   : > { %s1396_s23 = sshll.u32 %s12587_s0, 4  ;;  %s12588_s8 = smov [#allocation49]   ;;  %s1397_s23 = int_to_ptr.vmem [resolvable:$true] %s1396_s23 }
 0x159   : > { %s1443_s18 = sshll.u32 %s12588_s8, 4  ;;  %s12392_s19 = scalar_lea.vmem %s1397_s23, 3072  ;;  %s1444_s18 = int_to_ptr.vmem [resolvable:$true] %s1443_s18 }
 0x15a   : > { %p12393_p7 = scmp.ne.s32.totalorder %s1397_s23, %s12392_s19  ;;  %p12400_p9 = scmp.lt.s32.totalorder %s1397_s23, %s1397_s23 }
 0x15b   : > { %p12401_p3 = scmp.lt.s32.totalorder %s12392_s19, %s12392_s19 }
 0x15c   : > { %p12395_p8 = pnand %p12393_p7, %p12874_p6 }
 0x15d   : > { %10904 = dma.hbm_to_vmem [thread:$0]  (!%p12864_p5), %s13876_s4, 16, %s1365_s10, [#allocation42]  }
 0x15e   : > { %p12396_p10 = pneg %p12395_p8  ;;  %p12402_p2 = por %p12401_p3, %p12400_p9 }
 0x160   : > { %p12403_p12 = pnand %p12402_p2, %p12396_p10 }
 0x162   : > { %12406 = shalt.err (!%p12403_p12)
}
 0x163   : > { %s13877_s10 = sld [smem:[#allocation78_spill]]  ;;  %s12418_s13 = scalar_lea.vmem %s1444_s18, 2048 }
 0x164   : > { %p12419_p11 = scmp.ne.s32.totalorder %s1444_s18, %s12418_s13  ;;  %p12426_p1 = scmp.lt.s32.totalorder %s1444_s18, %s1444_s18 }
 0x165   : > { %p12427_p4 = scmp.lt.s32.totalorder %s12418_s13, %s12418_s13 }
 0x166   : > { %p12421_p13 = pnand %p12419_p11, %p12874_p6 }
 0x167   : > { %p12428_p7 = por %p12427_p4, %p12426_p1 }
 0x168   : > { %p12422_p0 = pneg %p12421_p13 }
 0x169   : > { %10910 = dma.hbm_to_vmem [thread:$0]  (!%p12864_p5), %s13877_s10, 3072, %s1397_s23, [#allocation45], %s13868_s16, %s13868_s16, %s13867_s11  }
 0x16a   : > { %p12429_p8 = pnand %p12428_p7, %p12422_p0 }
 0x16c   : > { %12432 = shalt.err (!%p12429_p8)
}
 0x16d   : > { %s13878_s22 = smov 8   ;;  %s13879_s1 = smov 128  }
 0x16e   : > { %s13880_s4 = sld [smem:[#allocation87_spill]]  ;;  %s12589_s0 = smov [#allocation52]  }
 0x16f   : > { %s1508_s23 = sshll.u32 %s12589_s0, 4  ;;  %s1509_s23 = int_to_ptr.vmem [resolvable:$true] %s1508_s23 }
 0x170   : > { %s12444_s8 = scalar_lea.vmem %s1509_s23, 2048  ;;  %p12452_p2 = scmp.lt.s32.totalorder %s1509_s23, %s1509_s23 }
 0x171   : > { %p12445_p10 = scmp.ne.s32.totalorder %s1509_s23, %s12444_s8  ;;  %p12453_p12 = scmp.lt.s32.totalorder %s12444_s8, %s12444_s8 }
 0x173   : > { %p12447_p9 = pnand %p12445_p10, %p12874_p6  ;;  %p12454_p11 = por %p12453_p12, %p12452_p2 }
 0x174   : > { %10916 = dma.hbm_to_vmem [thread:$0]  (!%p12864_p5), %s13880_s4, 2048, %s1444_s18, [#allocation48], %s13879_s1, %s13879_s1, %s13878_s22  }
 0x175   : > { %p12448_p3 = pneg %p12447_p9 }
 0x177   : > { %p12455_p13 = pnand %p12454_p11, %p12448_p3 }
 0x179   : > { %12458 = shalt.err (!%p12455_p13)
}
 0x17a   : > { %10922 = dma.hbm_to_vmem [thread:$0]  (!%p12864_p5), %s12831_s3, 2048, %s1509_s23, [#allocation51], %s13868_s16, %s13868_s16, %s13867_s11  }
 0x17b   : > { %p13881_p0 = scmp.ne.s32.totalorder %s13862_s7, 0 }
 0x17c   : > { %p13882_p1 = scmp.eq.s32.totalorder (!%p13881_p0), %s12849_s2, 0 }
 0x17d   : > { %1536 = sbr.rel (%p13881_p0) target bundleno = 4049 (0xfd1), region = 212 }
 0x182   : > { %12464 = dma.done.wait (%p13882_p1), [#allocation19], 7168   ;;  %p13883_p6 = pmov %p13882_p1 }
 0x183   : > { %p13884_p4 = pmov %p13882_p1 }
 0x184   : > { %12466 = vsyncadd (%p13883_p6), [#allocation19], 4294960128 }
 0x185   : > { %12468 = dma.done.wait (%p13884_p4), [#allocation21], 32   ;;  %p13885_p7 = pmov %p13882_p1 }
 0x186   : > { %p13886_p8 = pmov %p13882_p1 }
 0x187   : > { %12470 = vsyncadd (%p13885_p7), [#allocation21], 4294967264 }
 0x188   : > { %12472 = dma.done.wait (%p13886_p8), [#allocation24], 3088   ;;  %p13887_p5 = pmov %p13882_p1 }
 0x189   : > { %p13888_p10 = pmov %p13882_p1 }
 0x18a   : > { %12474 = vsyncadd (%p13887_p5), [#allocation24], 4294964208 }
 0x18b   : > { %12476 = dma.done.wait (%p13888_p10), [#allocation27], 3088   ;;  %p13889_p9 = pmov %p13882_p1 }
 0x18c   : > { %p13890_p3 = pmov %p13882_p1 }
 0x18d   : > { %12478 = vsyncadd (%p13889_p9), [#allocation27], 4294964208 }
 0x18e   : > { %12480 = dma.done.wait (%p13890_p3), [#allocation30], 32   ;;  %p13891_p2 = pmov %p13882_p1 }
 0x18f   : > { %p13892_p12 = pmov %p13882_p1 }
 0x190   : > { %12482 = vsyncadd (%p13891_p2), [#allocation30], 4294967264 }
 0x191   : > { %12484 = dma.done.wait (%p13892_p12), [#allocation33], 3088   ;;  %p13893_p11 = pmov %p13882_p1 }
 0x192   : > { %p13894_p13 = pmov %p13882_p1 }
 0x193   : > { %12486 = vsyncadd (%p13893_p11), [#allocation33], 4294964208 }
 0x194   : > { %12488 = dma.done.wait (%p13894_p13), [#allocation36], 3088   ;;  %p13895_p0 = pmov %p13882_p1 }
 0x196   : > { %12490 = vsyncadd (%p13895_p0), [#allocation36], 4294964208  ;;  %p13896_p1 = pmov %p13895_p0 }
 0x197   : > { %p13897_p6 = pmov %p13895_p0 }
 0x198   : > { %12492 = dma.done.wait (%p13896_p1), [#allocation39], 32  }
 0x199   : > { %12494 = vsyncadd (%p13897_p6), [#allocation39], 4294967264  ;;  %p13898_p4 = pmov %p13895_p0 }
 0x19a   : > { %p13899_p7 = pmov %p13895_p0 }
 0x19b   : > { %12496 = dma.done.wait (%p13898_p4), [#allocation42], 1040  }
 0x19c   : > { %12498 = vsyncadd (%p13899_p7), [#allocation42], 4294966256  ;;  %p13900_p8 = pmov %p13895_p0 }
 0x19d   : > { %p13901_p5 = pmov %p13895_p0 }
 0x19e   : > { %12500 = dma.done.wait (%p13900_p8), [#allocation45], 6144  }
 0x19f   : > { %12502 = vsyncadd (%p13901_p5), [#allocation45], 4294961152  ;;  %p13902_p10 = pmov %p13895_p0 }
 0x1a0   : > { %p13903_p9 = pmov %p13895_p0 }
 0x1a1   : > { %12504 = dma.done.wait (%p13902_p10), [#allocation48], 5120  }
 0x1a2   : > { %12506 = vsyncadd (%p13903_p9), [#allocation48], 4294962176  ;;  %p13904_p3 = pmov %p13895_p0 }
 0x1a3   : > { %p13905_p2 = pmov %p13895_p0 }
 0x1a4   : > { %12508 = dma.done.wait (%p13904_p3), [#allocation51], 8192  }
 0x1a5   : > { %12510 = vsyncadd (%p13905_p2), [#allocation51], 4294959104  ;;  %s1737_s7 = smul.u32 9, %s12849_s2  ;;  %v11055_v0 = vld [vmem:[#allocation18 + $0x78] sm:$0xff]   ;;  %v11057_v2 = vld [vmem:[#allocation18 + $0x70] sm:$0xff]   ;;  %s13906_s15 = sld [smem:[#allocation65_spill]] }
 0x1a6   : > { %v11056_v1 = vld [vmem:[#allocation18 + $0x38] sm:$0xff]   ;;  %10121 = vmatprep.subr.bf16.mxu0 %v11055_v0  ;;  %v11058_v3 = vld [vmem:[#allocation18 + $0x30] sm:$0xff]   ;;  %v11059_v4 = vld [vmem:[#allocation18 + $0x68] sm:$0xff]   ;;  %vm12591_vm0 = vmmov 0   ;;  %s13907_s16 = sld [smem:[#allocation76_spill]]  ;;  %vm8553_vm1 = vcmask 1043456  }
 0x1a7   : > { %p1738_p12 = scmp.lt.s32.totalorder %s1737_s7, 17  ;;  %10141 = vmatprep.subr.bf16.mxu1 %v11056_v1  ;;  %10122 = vmatpush3.bf16.msra.mxu0 %v11055_v0  ;;  %v11060_v5 = vld [vmem:[#allocation18 + $0x28] sm:$0xff]   ;;  %v11061_v6 = vld [vmem:[#allocation18 + $0x60] sm:$0xff]   ;;  %v11063_v8 = vld [vmem:[#allocation18 + $0x58] sm:$0xff]   ;;  %s13908_s18 = sld [smem:[#allocation77_spill]] }
 0x1a8   : > { %10142 = vmatpush3.bf16.msra.mxu1 %v11056_v1  ;;  %10123 = vmatprep.subr.bf16.mxu0 %v11057_v2  ;;  %v11062_v7 = vld [vmem:[#allocation18 + $0x20] sm:$0xff]   ;;  %v11064_v9 = vld [vmem:[#allocation18 + $0x18] sm:$0xff]   ;;  %v11065_v10 = vld [vmem:[#allocation18 + $0x50] sm:$0xff]   ;;  %s13909_s19 = sld [smem:[#allocation79_spill]]  ;;  %p1743_p11 = scmp.lt.s32.totalorder %s12849_s2, 1 }
 0x1a9   : > { %10143 = vmatprep.subr.bf16.mxu1 %v11058_v3  ;;  %s13930_s7 = smov (!%p1738_p12, %s1737_s7), 17  ;;  %v11066_v14 = vld [vmem:[#allocation18 + $0x10] sm:$0xff]   ;;  %v11067_v18 = vld [vmem:[#allocation18 + $0x48] sm:$0xff]   ;;  %v11069_v20 = vld [vmem:[#allocation18 + $0x40] sm:$0xff]   ;;  %s13910_s10 = sld [smem:[#allocation75_spill]] }
 0x1aa   : > { %s9126_s26 = sshll.u32 %s13930_s7, 3  ;;  %v11068_v19 = vld [vmem:[#allocation18 + $0x8] sm:$0xff]   ;;  %v11070_v21 = vld [vmem:[#allocation18] sm:$0xff]   ;;  %v11071_v26 = vld [vmem:[#allocation18 + $0xb8] sm:$0xff]   ;;  %s13911_s13 = sld [smem:[#allocation80_spill]] }
 0x1ab   : > { %10124 = vmatpush3.bf16.msra.mxu0 %v11057_v2  ;;  %s13093_s11 = scalar_lea.vmem %s13906_s15, %s9126_s26  ;;  %v11072_v27 = vld [vmem:[#allocation18 + $0xf8] sm:$0xff]   ;;  %v11073_v30 = vld [vmem:[#allocation18 + $0xb0] sm:$0xff]   ;;  %v11075_v34 = vld [vmem:[#allocation18 + $0xa8] sm:$0xff]   ;;  %s13912_s22 = sld [smem:[#allocation84_spill]] }
 0x1ac   : > { %10144 = vmatpush3.bf16.msra.mxu1 %v11058_v3  ;;  %10125 = vmatprep.subr.bf16.mxu0 %v11059_v4  ;;  %v9131_v11 = vld [vmem:[%s13093_s11 + $0x1] ss:$2 sm:$0xff]  ;;  %v9132_v12 = vld [vmem:[%s13093_s11 + $0x11] ss:$2 sm:$0xff]  ;;  %v1753_v13 = vld [vmem:[%s13093_s11] ss:$2 sm:$0xff] }
 0x1ad   : > { %10145 = vmatprep.subr.bf16.mxu1 %v11060_v5  ;;  %v1786_v15 = vpack.c.bf16 %v9132_v12, %v9131_v11  ;;  %v9128_v16 = vld [vmem:[%s13093_s11 + $0x10] ss:$2 sm:$0xff]  ;;  %v9133_v22 = vld [vmem:[%s13093_s11 + $0x21] ss:$2 sm:$0xff]  ;;  %v9134_v23 = vld [vmem:[%s13093_s11 + $0x31] ss:$2 sm:$0xff] }
 0x1ae   : > { %v1760_v17 = vpack.c.bf16 %v9128_v16, %v1753_v13  ;;  %v9129_v24 = vld [vmem:[%s13093_s11 + $0x20] ss:$2 sm:$0xff]  ;;  %v9130_v25 = vld [vmem:[%s13093_s11 + $0x30] ss:$2 sm:$0xff]  ;;  %v1787_v28 = vpack.c.bf16 %v9134_v23, %v9133_v22  ;;  %v9163_v37 = vld [vmem:[%s13093_s11 + $0x3] ss:$2 sm:$0xff] }
 0x1af   : > { %10126 = vmatpush3.bf16.msra.mxu0 %v11059_v4  ;;  %10137 = vmatprep.mubr.bf16.mxu0 %v1786_v15  ;;  %v1761_v29 = vpack.c.bf16 %v9130_v25, %v9129_v24  ;;  %v11074_v31 = vld [vmem:[#allocation18 + $0xf0] sm:$0xff]   ;;  %v9151_v32 = vld [vmem:[%s13093_s11 + $0x2] ss:$2 sm:$0xff]  ;;  %v9165_v53 = vld [vmem:[%s13093_s11 + $0x23] ss:$2 sm:$0xff]  ;;  %s13913_s1 = sld [smem:[#allocation82_spill]] }
 0x1b0   : > { %10146 = vmatpush3.bf16.msra.mxu1 %v11060_v5  ;;  %10127 = vmatprep.subr.bf16.mxu0 %v11061_v6  ;;  %v9152_v33 = vld [vmem:[%s13093_s11 + $0x12] ss:$2 sm:$0xff]  ;;  %v9164_v38 = vld [vmem:[%s13093_s11 + $0x13] ss:$2 sm:$0xff]  ;;  %v11077_v40 = vld [vmem:[#allocation18 + $0xa0] sm:$0xff]   ;;  %s13914_s4 = sld [smem:[#allocation83_spill]] }
 0x1b1   : > { %10147 = vmatprep.subr.bf16.mxu1 %v11062_v7  ;;  %10157 = vmatprep.mubr.bf16.mxu1 %v1760_v17  ;;  %v2006_v35 = vpack.c.bf16 %v9152_v33, %v9151_v32  ;;  %v11076_v36 = vld [vmem:[#allocation18 + $0xe8] sm:$0xff]   ;;  %v2133_v39 = vpack.c.bf16 %v9164_v38, %v9163_v37  ;;  %v11078_v41 = vld [vmem:[#allocation18 + $0xe0] sm:$0xff]   ;;  %v11079_v42 = vld [vmem:[#allocation18 + $0x98] sm:$0xff]   ;;  %s13915_s0 = sld [smem:[#allocation85_spill]]  ;;  %s13932_s2 = smov (!%p1743_p11, %s12849_s2), 1 }
 0x1b2   : > { %v11080_v43 = vld [vmem:[#allocation18 + $0xd8] sm:$0xff]   ;;  %v11081_v44 = vld [vmem:[#allocation18 + $0x90] sm:$0xff]   ;;  %v11083_v46 = vld [vmem:[#allocation18 + $0x88] sm:$0xff]   ;;  %s13916_s23 = sld [smem:[#allocation86_spill]] }
 0x1b3   : > { %10128 = vmatpush3.bf16.msra.mxu0 %v11061_v6  ;;  %v11082_v45 = vld [vmem:[#allocation18 + $0xd0] sm:$0xff]   ;;  %v11084_v47 = vld [vmem:[#allocation18 + $0xc8] sm:$0xff]   ;;  %v11085_v48 = vld [vmem:[#allocation18 + $0x80] sm:$0xff]   ;;  %s13917_s8 = sld [smem:[#allocation92_spill]] }
 0x1b4   : > { %10148 = vmatpush3.bf16.msra.mxu1 %v11062_v7  ;;  %10129 = vmatprep.subr.bf16.mxu0 %v11063_v8  ;;  %v11086_v49 = vld [vmem:[#allocation18 + $0xc0] sm:$0xff]   ;;  %v9154_v51 = vld [vmem:[%s13093_s11 + $0x32] ss:$2 sm:$0xff]  ;;  %v9166_v54 = vld [vmem:[%s13093_s11 + $0x33] ss:$2 sm:$0xff]  ;;  %s13918_s7 = sld [smem:[#allocation88_spill]] }
 0x1b5   : > { %10149 = vmatprep.subr.bf16.mxu1 %v11064_v9  ;;  %v9153_v50 = vld [vmem:[%s13093_s11 + $0x22] ss:$2 sm:$0xff]  ;;  %v9187_v59 = vld [vmem:[%s13093_s11 + $0x5] ss:$2 sm:$0xff]  ;;  %v2134_v60 = vpack.c.bf16 %v9166_v54, %v9165_v53  ;;  %v9188_v61 = vld [vmem:[%s13093_s11 + $0x15] ss:$2 sm:$0xff] }
 0x1b6   : > { %v11087_v52 = vld [vmem:[#allocation18 + $0x138] sm:$0xff]   ;;  %v2007_v58 = vpack.c.bf16 %v9154_v51, %v9153_v50  ;;  %v11089_v62 = vld [vmem:[#allocation18 + $0x130] sm:$0xff]   ;;  %v11091_v1 = vld [vmem:[#allocation18 + $0x128] sm:$0xff]   ;;  %v2387_v2 = vpack.c.bf16 %v9188_v61, %v9187_v59  ;;  %s13919_s15 = sld [smem:[#allocation89_spill]] }
 0x1b7   : > { %10130 = vmatpush3.bf16.msra.mxu0 %v11063_v8  ;;  %v11088_v55 = vld [vmem:[#allocation18 + $0x178] sm:$0xff]   ;;  %v11090_v63 = vld [vmem:[#allocation18 + $0x170] sm:$0xff]   ;;  %v11092_v3 = vld [vmem:[#allocation18 + $0x168] sm:$0xff]   ;;  %s13920_s26 = sld [smem:[#allocation90_spill]] }
 0x1b8   : > { %10150 = vmatpush3.bf16.msra.mxu1 %v11064_v9  ;;  %10131 = vmatprep.subr.bf16.mxu0 %v11065_v10  ;;  %v9175_v56 = vld [vmem:[%s13093_s11 + $0x4] ss:$2 sm:$0xff]  ;;  %v9176_v57 = vld [vmem:[%s13093_s11 + $0x14] ss:$2 sm:$0xff]  ;;  %v9189_v17 = vld [vmem:[%s13093_s11 + $0x25] ss:$2 sm:$0xff] }
 0x1b9   : > { %10151 = vmatprep.subr.bf16.mxu1 %v11066_v14  ;;  %v2260_v0 = vpack.c.bf16 %v9176_v57, %v9175_v56  ;;  %v11093_v4 = vld [vmem:[#allocation18 + $0x120] sm:$0xff]   ;;  %v11095_v6 = vld [vmem:[#allocation18 + $0x118] sm:$0xff]   ;;  %v11097_v8 = vld [vmem:[#allocation18 + $0x110] sm:$0xff]  }
 0x1ba   : > { %v11094_v5 = vld [vmem:[#allocation18 + $0x160] sm:$0xff]   ;;  %v11096_v7 = vld [vmem:[#allocation18 + $0x158] sm:$0xff]   ;;  %v11098_v9 = vld [vmem:[#allocation18 + $0x150] sm:$0xff]  }
 0x1bb   : > { %10132 = vmatpush3.bf16.msra.mxu0 %v11065_v10  ;;  %v11099_v10 = vld [vmem:[#allocation18 + $0x108] sm:$0xff]   ;;  %v11101_v12 = vld [vmem:[#allocation18 + $0x100] sm:$0xff]   ;;  %v11103_v16 = vld [vmem:[#allocation18 + $0x1b8] sm:$0xff]  }
 0x1bc   : > { %10152 = vmatpush3.bf16.msra.mxu1 %v11066_v14  ;;  %10133 = vmatprep.subr.bf16.mxu0 %v11067_v18  ;;  %v11100_v11 = vld [vmem:[#allocation18 + $0x148] sm:$0xff]   ;;  %v11102_v13 = vld [vmem:[#allocation18 + $0x140] sm:$0xff]   ;;  %v11104_v22 = vld [vmem:[#allocation18 + $0x1b0] sm:$0xff]  }
 0x1bd   : > { %10153 = vmatprep.subr.bf16.mxu1 %v11068_v19  ;;  %v9177_v14 = vld [vmem:[%s13093_s11 + $0x24] ss:$2 sm:$0xff]  ;;  %v9178_v15 = vld [vmem:[%s13093_s11 + $0x34] ss:$2 sm:$0xff] }
 0x1be   : > { %v11105_v25 = vld [vmem:[#allocation18 + $0x1a8] sm:$0xff]   ;;  %v11112_v38 = vld [vmem:[#allocation23 + $0x38] sm:$0xff]  }
 0x1bf   : > { %10134 = vmatpush3.bf16.msra.mxu0 %v11067_v18  ;;  %v9190_v18 = vld [vmem:[%s13093_s11 + $0x35] ss:$2 sm:$0xff]  ;;  %v9202_v32 = vld [vmem:[%s13093_s11 + $0x36] ss:$2 sm:$0xff]  ;;  %v11126_v50 = vld [vmem:[#allocation23] sm:$0xff]  }
 0x1c0   : > { %10154 = vmatpush3.bf16.msra.mxu1 %v11068_v19  ;;  %10135 = vmatprep.subr.bf16.mxu0 %v11069_v20  ;;  %v9199_v19 = vld [vmem:[%s13093_s11 + $0x6] ss:$2 sm:$0xff]  ;;  %v2388_v23 = vpack.c.bf16 %v9190_v18, %v9189_v17 }
 0x1c1   : > { %10155 = vmatprep.subr.bf16.mxu1 %v11070_v21  ;;  %v11115_v37 = vld [vmem:[#allocation23 + $0x68] sm:$0xff]  }
 0x1c3   : > { %10136 = vmatpush3.bf16.msra.mxu0 %v11069_v20  ;;  %v9200_v20 = vld [vmem:[%s13093_s11 + $0x16] ss:$2 sm:$0xff] }
 0x1c4   : > { %10156 = vmatpush3.bf16.msra.mxu1 %v11070_v21  ;;  %10161 = vmatprep.subr.bf16.mxu0 %v11071_v26  ;;  %v2261_v21 = vpack.c.bf16 %v9178_v15, %v9177_v14  ;;  %v2514_v24 = vpack.c.bf16 %v9200_v20, %v9199_v19 }
 0x1c5   : > { %10181 = vmatprep.subr.bf16.mxu1 %v11072_v27 }
 0x1c6   : > { %10138 = vmatmul.mubr.bf16.vlgmr.msra.gmra.mxu0 %v1787_v28  ;;  %v11108_v28 = vld [vmem:[#allocation18 + $0x190] sm:$0xff]  }
 0x1c7   : > { %10158 = vmatmul.mubr.bf16.vlgmr.msra.gmra.mxu1 %v1761_v29  ;;  %10162 = vmatpush3.bf16.msra.mxu0 %v11071_v26  ;;  %v11106_v26 = vld [vmem:[#allocation18 + $0x1a0] sm:$0xff]   ;;  %v11109_v29 = vld [vmem:[#allocation18 + $0x188] sm:$0xff]  }
 0x1c8   : > { %10182 = vmatpush3.bf16.msra.mxu1 %v11072_v27  ;;  %10163 = vmatprep.subr.bf16.mxu0 %v11073_v30  ;;  %v11107_v27 = vld [vmem:[#allocation18 + $0x198] sm:$0xff]  }
 0x1c9   : > { %10183 = vmatprep.subr.bf16.mxu1 %v11074_v31  ;;  %10177 = vmatprep.mubr.bf16.mxu0 %v2006_v35  ;;  %v11111_v35 = vld [vmem:[#allocation23 + $0x78] sm:$0xff]  }
 0x1ca   : > { %10197 = vmatprep.mubr.bf16.mxu1 %v2133_v39  ;;  %v11117_v39 = vld [vmem:[#allocation23 + $0x60] sm:$0xff]  }
 0x1cb   : > { %10164 = vmatpush3.bf16.msra.mxu0 %v11073_v30  ;;  %v11110_v30 = vld [vmem:[#allocation18 + $0x180] sm:$0xff]  }
 0x1cc   : > { %10184 = vmatpush3.bf16.msra.mxu1 %v11074_v31  ;;  %10165 = vmatprep.subr.bf16.mxu0 %v11075_v34  ;;  %v9201_v31 = vld [vmem:[%s13093_s11 + $0x26] ss:$2 sm:$0xff]  ;;  %s13921_s11 = sld [smem:[#allocation91_spill]] }
 0x1cd   : > { %10185 = vmatprep.subr.bf16.mxu1 %v11076_v36  ;;  %v2515_v33 = vpack.c.bf16 %v9202_v32, %v9201_v31 }
 0x1cf   : > { %10166 = vmatpush3.bf16.msra.mxu0 %v11075_v34  ;;  %v12590_v34 = vmov 0.0  }
 0x1d0   : > { %10186 = vmatpush3.bf16.msra.mxu1 %v11076_v36  ;;  %10167 = vmatprep.subr.bf16.mxu0 %v11077_v40  ;;  %1750 = vst [vmem:[#allocation2 + $0x10] sm:$0xff] %v12590_v34  ;;  %1751 = vst [vmem:[#allocation2 + $0x18] sm:$0xff] %v12590_v34  ;;  %v11113_v36 = vld [vmem:[#allocation23 + $0x70] sm:$0xff]  }
 0x1d1   : > { %10187 = vmatprep.subr.bf16.mxu1 %v11078_v41  ;;  %1748 = vst [vmem:[#allocation2] sm:$0xff] %v12590_v34  ;;  %1749 = vst [vmem:[#allocation2 + $0x8] sm:$0xff] %v12590_v34 }
 0x1d2   : > { %1752 = vst [vmem:[#allocation2 + $0x20] sm:$0x3] %v12590_v34  ;;  %2663 = vst [vmem:[#allocation3] sm:$0xff] %v12590_v34 }
 0x1d3   : > { %10168 = vmatpush3.bf16.msra.mxu0 %v11077_v40  ;;  %2664 = vst [vmem:[#allocation3 + $0x8] sm:$0xff] %v12590_v34  ;;  %2665 = vst [vmem:[#allocation3 + $0x10] sm:$0x3] %v12590_v34  ;;  %v11114_v40 = vld [vmem:[#allocation23 + $0x30] sm:$0xff]  }
 0x1d4   : > { %10188 = vmatpush3.bf16.msra.mxu1 %v11078_v41  ;;  %10169 = vmatprep.subr.bf16.mxu0 %v11079_v42  ;;  %2683 = vst [vmem:[#allocation4] sm:$0xff] %v12590_v34  ;;  %2684 = vst [vmem:[#allocation4 + $0x8] sm:$0xff] %v12590_v34  ;;  %v11119_v41 = vld [vmem:[#allocation23 + $0x58] sm:$0xff]  }
 0x1d5   : > { %10189 = vmatprep.subr.bf16.mxu1 %v11080_v43  ;;  %2685 = vst [vmem:[#allocation4 + $0x10] sm:$0x3] %v12590_v34  ;;  %3034 = vst [vmem:[#allocation5] sm:$0xff] %v12590_v34 }
 0x1d6   : > { %3035 = vst [vmem:[#allocation5 + $0x8] sm:$0xff] %v12590_v34  ;;  %3036 = vst [vmem:[#allocation5 + $0x10] sm:$0x3] %v12590_v34 }
 0x1d7   : > { %10170 = vmatpush3.bf16.msra.mxu0 %v11079_v42  ;;  %3389 = vst [vmem:[#allocation6] sm:$0xff] %v12590_v34  ;;  %3390 = vst [vmem:[#allocation6 + $0x8] sm:$0xff] %v12590_v34  ;;  %v11116_v42 = vld [vmem:[#allocation23 + $0x28] sm:$0xff]  }
 0x1d8   : > { %10190 = vmatpush3.bf16.msra.mxu1 %v11080_v43  ;;  %10171 = vmatprep.subr.bf16.mxu0 %v11081_v44  ;;  %3391 = vst [vmem:[#allocation6 + $0x10] sm:$0x3] %v12590_v34  ;;  %3740 = vst [vmem:[#allocation7] sm:$0xff] %v12590_v34  ;;  %v11121_v43 = vld [vmem:[#allocation23 + $0x50] sm:$0xff]  }
 0x1d9   : > { %10191 = vmatprep.subr.bf16.mxu1 %v11082_v45  ;;  %3741 = vst [vmem:[#allocation7 + $0x8] sm:$0xff] %v12590_v34  ;;  %3742 = vst [vmem:[#allocation7 + $0x10] sm:$0x3] %v12590_v34 }
 0x1da   : > { %4219 = vst [vmem:[#allocation9] sm:$0xff] %v12590_v34  ;;  %4220 = vst [vmem:[#allocation9 + $0x8] sm:$0x3] %v12590_v34 }
 0x1db   : > { %10172 = vmatpush3.bf16.msra.mxu0 %v11081_v44  ;;  %4559 = vst [vmem:[#allocation10] sm:$0xff] %v12590_v34  ;;  %4560 = vst [vmem:[#allocation10 + $0x8] sm:$0x3] %v12590_v34  ;;  %v11118_v44 = vld [vmem:[#allocation23 + $0x20] sm:$0xff]  }
 0x1dc   : > { %10192 = vmatpush3.bf16.msra.mxu1 %v11082_v45  ;;  %10173 = vmatprep.subr.bf16.mxu0 %v11083_v46  ;;  %4900 = vst [vmem:[#allocation11] sm:$0xff] %v12590_v34  ;;  %4901 = vst [vmem:[#allocation11 + $0x8] sm:$0x3] %v12590_v34  ;;  %v11123_v45 = vld [vmem:[#allocation23 + $0x48] sm:$0xff]  }
 0x1dd   : > { %10193 = vmatprep.subr.bf16.mxu1 %v11084_v47  ;;  %5239 = vst [vmem:[#allocation12] sm:$0xff] %v12590_v34  ;;  %5240 = vst [vmem:[#allocation12 + $0x8] sm:$0x3] %v12590_v34 }
 0x1de   : > { %5753 = vst [vmem:[#allocation14] sm:$0x3f] %v12590_v34  ;;  %5754 = vst [vmem:[#allocation14 + $0x8] sm:$0x3f] %v12590_v34 }
 0x1df   : > { %10174 = vmatpush3.bf16.msra.mxu0 %v11083_v46  ;;  %6213 = vst [vmem:[#allocation15 + $0x8] sm:$0x3f] %v12590_v34  ;;  %6214 = vst [vmem:[#allocation15] sm:$0x3f] %v12590_v34  ;;  %v11120_v46 = vld [vmem:[#allocation23 + $0x18] sm:$0xff]  }
 0x1e0   : > { %10194 = vmatpush3.bf16.msra.mxu1 %v11084_v47  ;;  %10175 = vmatprep.subr.bf16.mxu0 %v11085_v48  ;;  %6994 = vst [vmem:[#allocation16 + $0x8] sm:$0x3f] %v12590_v34  ;;  %6995 = vst [vmem:[#allocation16] sm:$0x3f] %v12590_v34  ;;  %v11125_v47 = vld [vmem:[#allocation23 + $0x40] sm:$0xff]  }
 0x1e1   : > { %10195 = vmatprep.subr.bf16.mxu1 %v11086_v49 }
 0x1e3   : > { %10176 = vmatpush3.bf16.msra.mxu0 %v11085_v48  ;;  %v11122_v48 = vld [vmem:[#allocation23 + $0x10] sm:$0xff]  }
 0x1e4   : > { %10196 = vmatpush3.bf16.msra.mxu1 %v11086_v49  ;;  %10201 = vmatprep.subr.bf16.mxu0 %v11087_v52  ;;  %v11124_v49 = vld [vmem:[#allocation23 + $0x8] sm:$0xff]  }
 0x1e5   : > { %10221 = vmatprep.subr.bf16.mxu1 %v11088_v55 }
 0x1e6   : > { %10178 = vmatmul.mubr.bf16.vlgmr.msra.gmra.mxu0 %v2007_v58 }
 0x1e7   : > { %10202 = vmatpush3.bf16.msra.mxu0 %v11087_v52  ;;  %10198 = vmatmul.mubr.bf16.vlgmr.msra.gmra.mxu1 %v2134_v60 }
 0x1e8   : > { %10222 = vmatpush3.bf16.msra.mxu1 %v11088_v55  ;;  %10203 = vmatprep.subr.bf16.mxu0 %v11089_v62 }
 0x1e9   : > { %10223 = vmatprep.subr.bf16.mxu1 %v11090_v63  ;;  %10217 = vmatprep.mubr.bf16.mxu0 %v2260_v0 }
 0x1ea   : > { %10237 = vmatprep.mubr.bf16.mxu1 %v2387_v2 }
 0x1eb   : > { %10204 = vmatpush3.bf16.msra.mxu0 %v11089_v62 }
 0x1ec   : > { %10224 = vmatpush3.bf16.msra.mxu1 %v11090_v63  ;;  %10205 = vmatprep.subr.bf16.mxu0 %v11091_v1 }
 0x1ed   : > { %10225 = vmatprep.subr.bf16.mxu1 %v11092_v3 }
 0x1ef   : > { %10206 = vmatpush3.bf16.msra.mxu0 %v11091_v1 }
 0x1f0   : > { %10226 = vmatpush3.bf16.msra.mxu1 %v11092_v3  ;;  %10207 = vmatprep.subr.bf16.mxu0 %v11093_v4 }
 0x1f1   : > { %10227 = vmatprep.subr.bf16.mxu1 %v11094_v5 }
 0x1f3   : > { %10208 = vmatpush3.bf16.msra.mxu0 %v11093_v4 }
 0x1f4   : > { %10228 = vmatpush3.bf16.msra.mxu1 %v11094_v5  ;;  %10209 = vmatprep.subr.bf16.mxu0 %v11095_v6 }
 0x1f5   : > { %10229 = vmatprep.subr.bf16.mxu1 %v11096_v7 }
 0x1f7   : > { %10210 = vmatpush3.bf16.msra.mxu0 %v11095_v6 }
 0x1f8   : > { %10230 = vmatpush3.bf16.msra.mxu1 %v11096_v7  ;;  %10211 = vmatprep.subr.bf16.mxu0 %v11097_v8 }
 0x1f9   : > { %10231 = vmatprep.subr.bf16.mxu1 %v11098_v9 }
 0x1fb   : > { %10212 = vmatpush3.bf16.msra.mxu0 %v11097_v8 }
 0x1fc   : > { %10232 = vmatpush3.bf16.msra.mxu1 %v11098_v9  ;;  %10213 = vmatprep.subr.bf16.mxu0 %v11099_v10 }
 0x1fd   : > { %10233 = vmatprep.subr.bf16.mxu1 %v11100_v11 }
 0x1ff   : > { %10214 = vmatpush3.bf16.msra.mxu0 %v11099_v10 }
 0x200   : > { %10234 = vmatpush3.bf16.msra.mxu1 %v11100_v11  ;;  %10215 = vmatprep.subr.bf16.mxu0 %v11101_v12 }
 0x201   : > { %10235 = vmatprep.subr.bf16.mxu1 %v11102_v13 }
 0x203   : > { %10216 = vmatpush3.bf16.msra.mxu0 %v11101_v12 }
 0x204   : > { %10236 = vmatpush3.bf16.msra.mxu1 %v11102_v13  ;;  %10241 = vmatprep.subr.bf16.mxu0 %v11103_v16 }
 0x205   : > { %10261 = vmatprep.subr.bf16.mxu1 %v12590_v34 }
 0x206   : > { %10218 = vmatmul.mubr.bf16.vlgmr.msra.gmra.mxu0 %v2261_v21 }
 0x207   : > { %10242 = vmatpush3.bf16.msra.mxu0 %v11103_v16  ;;  %10238 = vmatmul.mubr.bf16.vlgmr.msra.gmra.mxu1 %v2388_v23  ;;  %v9211_v23 = vld [vmem:[#allocation20] ss:$0 sm:$0xff] }
 0x208   : > { %10243 = vmatprep.subr.bf16.mxu0 %v11104_v22  ;;  %10257 = vmatprep.mubr.bf16.mxu0 %v2514_v24 }
 0x209   : > { %10262 = vmatpush3.bf16.msra.mxu1 %v11111_v35  ;;  %10277 = vmatprep.mubr.msk.bf16.mxu1 %vm12591_vm0, %v12590_v34 }
 0x20a   : > { %10263 = vmatprep.subr.bf16.mxu1 %v12590_v34 }
 0x20b   : > { %10244 = vmatpush3.bf16.msra.mxu0 %v11104_v22 }
 0x20c   : > { %10245 = vmatprep.subr.bf16.mxu0 %v11105_v25 }
 0x20d   : > { %10264 = vmatpush3.bf16.msra.mxu1 %v11113_v36 }
 0x20e   : > { %10265 = vmatprep.subr.bf16.mxu1 %v12590_v34 }
 0x20f   : > { %10246 = vmatpush3.bf16.msra.mxu0 %v11105_v25 }
 0x210   : > { %10247 = vmatprep.subr.bf16.mxu0 %v11106_v26 }
 0x211   : > { %10266 = vmatpush3.bf16.msra.mxu1 %v11115_v37 }
 0x212   : > { %10267 = vmatprep.subr.bf16.mxu1 %v12590_v34 }
 0x213   : > { %10248 = vmatpush3.bf16.msra.mxu0 %v11106_v26 }
 0x214   : > { %10249 = vmatprep.subr.bf16.mxu0 %v11107_v27 }
 0x215   : > { %10268 = vmatpush3.bf16.msra.mxu1 %v11117_v39 }
 0x216   : > { %10269 = vmatprep.subr.bf16.mxu1 %v12590_v34 }
 0x217   : > { %10250 = vmatpush3.bf16.msra.mxu0 %v11107_v27 }
 0x218   : > { %10251 = vmatprep.subr.bf16.mxu0 %v11108_v28 }
 0x219   : > { %10270 = vmatpush3.bf16.msra.mxu1 %v11119_v41 }
 0x21a   : > { %10271 = vmatprep.subr.bf16.mxu1 %v12590_v34 }
 0x21b   : > { %10252 = vmatpush3.bf16.msra.mxu0 %v11108_v28  ;;  %v9212_v28 = vld [vmem:[#allocation22] ss:$0 sm:$0xff] }
 0x21c   : > { %10253 = vmatprep.subr.bf16.mxu0 %v11109_v29 }
 0x21d   : > { %10272 = vmatpush3.bf16.msra.mxu1 %v11121_v43 }
 0x21e   : > { %10273 = vmatprep.subr.bf16.mxu1 %v12590_v34 }
 0x21f   : > { %10254 = vmatpush3.bf16.msra.mxu0 %v11109_v29 }
 0x220   : > { %10255 = vmatprep.subr.bf16.mxu0 %v11110_v30 }
 0x221   : > { %10274 = vmatpush3.bf16.msra.mxu1 %v11123_v45 }
 0x222   : > { %10275 = vmatprep.subr.bf16.mxu1 %v12590_v34 }
 0x223   : > { %10256 = vmatpush3.bf16.msra.mxu0 %v11110_v30 }
 0x224   : > { %10281 = vmatprep.subr.bf16.mxu0 %v12590_v34 }
 0x225   : > { %10276 = vmatpush3.bf16.msra.mxu1 %v11125_v47 }
 0x226   : > { %10258 = vmatmul.mubr.bf16.vlgmr.msra.gmra.mxu0 %v2515_v33  ;;  %10301 = vmatprep.subr.bf16.mxu1 %v12590_v34 }
 0x227   : > { %10282 = vmatpush3.bf16.msra.mxu0 %v11112_v38  ;;  %10297 = vmatprep.mubr.msk.bf16.mxu0 %vm12591_vm0, %v12590_v34 }
 0x228   : > { %10283 = vmatprep.subr.bf16.mxu0 %v12590_v34 }
 0x22b   : > { %10284 = vmatpush3.bf16.msra.mxu0 %v11114_v40 }
 0x22c   : > { %10285 = vmatprep.subr.bf16.mxu0 %v12590_v34 }
 0x22f   : > { %10286 = vmatpush3.bf16.msra.mxu0 %v11116_v42 }
 0x230   : > { %10287 = vmatprep.subr.bf16.mxu0 %v12590_v34 }
 0x233   : > { %10288 = vmatpush3.bf16.msra.mxu0 %v11118_v44 }
 0x234   : > { %10289 = vmatprep.subr.bf16.mxu0 %v12590_v34 }
 0x237   : > { %10290 = vmatpush3.bf16.msra.mxu0 %v11120_v46 }
 0x238   : > { %10291 = vmatprep.subr.bf16.mxu0 %v12590_v34 }
 0x23b   : > { %10292 = vmatpush3.bf16.msra.mxu0 %v11122_v48 }
 0x23c   : > { %10293 = vmatprep.subr.bf16.mxu0 %v12590_v34 }
 0x23f   : > { %10294 = vmatpush3.bf16.msra.mxu0 %v11124_v49 }
 0x240   : > { %10295 = vmatprep.subr.bf16.mxu0 %v12590_v34 }
 0x243   : > { %10296 = vmatpush3.bf16.msra.mxu0 %v11126_v50 }
 0x244   : > { %10321 = vmatprep.subr.bf16.mxu0 %v12590_v34 }
 0x286   : > { %v10139_v51 = vpop.f32.mrf.mxu0 }
 0x287   : > { %v10159_v52 = vpop.f32.mrf.mxu1 }
 0x288   : > { %v1886_v53 = vpop.f32.mrf.mxu0  ;;  %v1992_v3 = vadd.f32 %v10159_v52, %v10139_v51 }
 0x289   : > { %v1983_v54 = vpop.f32.mrf.mxu1 }
 0x28a   : > { %v10140_v55 = vpop.f32.mrf.mxu0  ;;  %v1984_v5 = vadd.f32 %v1983_v54, %v1886_v53 }
 0x28b   : > { %v10160_v56 = vpop.f32.mrf.mxu1 }
 0x28c   : > { %v1889_v57 = vpop.f32.mrf.mxu0  ;;  %v1995_v9 = vadd.f32 %v10160_v56, %v10140_v55 }
 0x28d   : > { %v1986_v59 = vpop.f32.mrf.mxu1 }
 0x28e   : > { %v1987_v11 = vadd.f32 %v1986_v59, %v1889_v57 }
 0x2a6   : > { %v10179_v58 = vpop.f32.mrf.mxu0 }
 0x2a7   : > { %v10199_v61 = vpop.f32.mrf.mxu1  ;;  %v2123_v6 = vadd.f32 %v10179_v58, %v1992_v3 }
 0x2a8   : > { %v2106_v60 = vpop.f32.mrf.mxu0 }
 0x2a9   : > { %v2233_v63 = vpop.f32.mrf.mxu1  ;;  %v2121_v10 = vadd.f32 %v2106_v60, %v1984_v5  ;;  %v2250_v12 = vadd.f32 %v10199_v61, %v2123_v6  ;;  %v11129_v5 = vld [vmem:[#allocation23 + $0xa8] sm:$0xff]  }
 0x2aa   : > { %v10180_v62 = vpop.f32.mrf.mxu0 }
 0x2ab   : > { %v10200_v1 = vpop.f32.mrf.mxu1  ;;  %v2124_v13 = vadd.f32 %v10180_v62, %v1995_v9  ;;  %v2248_v16 = vadd.f32 %v2233_v63, %v2121_v10  ;;  %v11127_v63 = vld [vmem:[#allocation23 + $0xb8] sm:$0xff]   ;;  %v11132_v9 = vld [vmem:[#allocation23 + $0x90] sm:$0xff]   ;;  %v11133_v10 = vld [vmem:[#allocation23 + $0x88] sm:$0xff]  }
 0x2ac   : > { %v2109_v0 = vpop.f32.mrf.mxu0 }
 0x2ad   : > { %v2236_v4 = vpop.f32.mrf.mxu1  ;;  %v2122_v17 = vadd.f32 %v2109_v0, %v1987_v11  ;;  %v2251_v19 = vadd.f32 %v10200_v1, %v2124_v13  ;;  %v11128_v1 = vld [vmem:[#allocation23 + $0xb0] sm:$0xff]   ;;  %v11134_v11 = vld [vmem:[#allocation23 + $0x80] sm:$0xff]  }
 0x2af   : > { %v2249_v24 = vadd.f32 %v2236_v4, %v2122_v17  ;;  %v11137_v17 = vld [vmem:[#allocation28 + $0x70] sm:$0xff]  }
 0x2c6   : > { %v10219_v2 = vpop.f32.mrf.mxu0 }
 0x2c7   : > { %v10239_v8 = vpop.f32.mrf.mxu1  ;;  %v2377_v18 = vadd.f32 %v10219_v2, %v2250_v12  ;;  %v13187_v2 = vld [vmem:[#allocation4] sm:$0xff] }
 0x2c8   : > { %v2360_v7 = vpop.f32.mrf.mxu0 }
 0x2c9   : > { %v2487_v15 = vpop.f32.mrf.mxu1  ;;  %v2375_v20 = vadd.f32 %v2360_v7, %v2248_v16  ;;  %v2504_v25 = vadd.f32 %v10239_v8, %v2377_v18  ;;  %v11130_v7 = vld [vmem:[#allocation23 + $0xa0] sm:$0xff]   ;;  %v11131_v8 = vld [vmem:[#allocation23 + $0x98] sm:$0xff]  }
 0x2ca   : > { %v10220_v14 = vpop.f32.mrf.mxu0  ;;  %v11136_v16 = vld [vmem:[#allocation28 + $0x38] sm:$0xff]   ;;  %v11138_v18 = vld [vmem:[#allocation28 + $0x30] sm:$0xff]  }
 0x2cb   : > { %v10240_v22 = vpop.f32.mrf.mxu1  ;;  %v2378_v26 = vadd.f32 %v10220_v14, %v2251_v19  ;;  %v2502_v29 = vadd.f32 %v2487_v15, %v2375_v20  ;;  %v11135_v15 = vld [vmem:[#allocation28 + $0x78] sm:$0xff]   ;;  %v11139_v19 = vld [vmem:[#allocation28 + $0x68] sm:$0xff]   ;;  %v11141_v20 = vld [vmem:[#allocation28 + $0x60] sm:$0xff]  }
 0x2cc   : > { %v2363_v21 = vpop.f32.mrf.mxu0 }
 0x2cd   : > { %v2376_v30 = vadd.f32 %v2363_v21, %v2249_v24  ;;  %v2490_v32 = vpop.f32.mrf.mxu1  ;;  %v2505_v34 = vadd.f32 %v10240_v22, %v2378_v26  ;;  %v11143_v21 = vld [vmem:[#allocation28 + $0x58] sm:$0xff]   ;;  %v11140_v22 = vld [vmem:[#allocation28 + $0x28] sm:$0xff]   ;;  %v11142_v24 = vld [vmem:[#allocation28 + $0x20] sm:$0xff]  }
 0x2ce   : > { %v11144_v26 = vld [vmem:[#allocation28 + $0x18] sm:$0xff]  }
 0x2cf   : > { %v2503_v38 = vadd.f32 %v2490_v32, %v2376_v30  ;;  %v11150_v30 = vld [vmem:[#allocation28] sm:$0xff]  }
 0x2e6   : > { %v10259_v27 = vpop.f32.mrf.mxu0 }
 0x2e7   : > { %v2631_v31 = vadd.f32 %v10259_v27, %v2504_v25  ;;  %v11147_v25 = vld [vmem:[#allocation28 + $0x48] sm:$0xff]   ;;  %v11149_v27 = vld [vmem:[#allocation28 + $0x40] sm:$0xff]  }
 0x2e8   : > { %v2614_v33 = vpop.f32.mrf.mxu0 }
 0x2e9   : > { %v2642_v35 = vmul.f32 %v9211_v23, %v2631_v31  ;;  %v2629_v36 = vadd.f32 %v2614_v33, %v2502_v29  ;;  %v11148_v29 = vld [vmem:[#allocation28 + $0x8] sm:$0xff]  }
 0x2ea   : > { %v10260_v37 = vpop.f32.mrf.mxu0 }
 0x2eb   : > { %v2653_v39 = vadd.f32 %v9212_v28, %v2642_v35  ;;  %v2640_v40 = vmul.f32 %v9211_v23, %v2629_v36  ;;  %v2632_v41 = vadd.f32 %v10260_v37, %v2505_v34 }
 0x2ec   : > { %v2617_v42 = vpop.f32.mrf.mxu0 }
 0x2ed   : > { %v2657_v43 = vmax.f32 %v2653_v39, 0.0  ;;  %v2651_v44 = vadd.f32 %v9212_v28, %v2640_v40  ;;  %v2643_v45 = vmul.f32 %v9211_v23, %v2632_v41  ;;  %v2630_v46 = vadd.f32 %v2617_v42, %v2503_v38  ;;  %v9237_v41 = vld [vmem:[#allocation25] ss:$0 sm:$0xff] }
 0x2ef   : > { %2661 = vst [vmem:[#allocation2 + $0x11] sm:$0xff] %v2657_v43  ;;  %v2655_v47 = vmax.f32 %v2651_v44, 0.0  ;;  %v2654_v48 = vadd.f32 %v9212_v28, %v2643_v45  ;;  %v2641_v49 = vmul.f32 %v9211_v23, %v2630_v46  ;;  %v11145_v23 = vld [vmem:[#allocation28 + $0x50] sm:$0xff]   ;;  %v9238_v43 = vld [vmem:[#allocation26] ss:$0 sm:$0xff] }
 0x2f1   : > { %2659 = vst [vmem:[#allocation2 + $0x1] sm:$0xff] %v2655_v47  ;;  %v2658_v50 = vmax.f32 %v2654_v48, 0.0  ;;  %v2652_v51 = vadd.f32 %v9212_v28, %v2641_v49  ;;  %v11146_v28 = vld [vmem:[#allocation28 + $0x10] sm:$0xff]  }
 0x2f3   : > { %2662 = vst [vmem:[#allocation2 + $0x19] sm:$0xff] %v2658_v50  ;;  %v2656_v52 = vmax.f32 %v2652_v51, 0.0 }
 0x2f5   : > { %2660 = vst [vmem:[#allocation2 + $0x9] sm:$0xff] %v2656_v52 }
 0x2fa   : > { %v2672_v53 = vld [vmem:[#allocation2 + $0x11] ss:$2 sm:$0xff]  ;;  %v2678_v59 = vld [vmem:[#allocation2 + $0x12] ss:$2 sm:$0xff] }
 0x2fc   : > { %v2666_v54 = vld [vmem:[#allocation2] ss:$2 sm:$0xff]  ;;  %v2668_v55 = vld [vmem:[#allocation2 + $0x10] ss:$2 sm:$0xff]  ;;  %v2670_v56 = vld [vmem:[#allocation2 + $0x1] ss:$2 sm:$0xff] }
 0x2fd   : > { %v2673_v57 = vmax.f32 %v2666_v54, %v2670_v56  ;;  %v2674_v58 = vmax.f32 %v2668_v55, %v2672_v53  ;;  %v2676_v60 = vld [vmem:[#allocation2 + $0x2] ss:$2 sm:$0xff] }
 0x2fe   : > { %v11151_v55 = vld [vmem:[#allocation28 + $0xb8] sm:$0xff]  }
 0x2ff   : > { %v13179_v61 = vmax.f32 %v2673_v57, %v2676_v60  ;;  %v13181_v62 = vmax.f32 %v2674_v58, %v2678_v59  ;;  %v11152_v57 = vld [vmem:[#allocation28 + $0xb0] sm:$0xff]   ;;  %v11153_v60 = vld [vmem:[#allocation28 + $0xa8] sm:$0xff]  }
 0x301   : > { %2681 = vst [vmem:[#allocation3 + $0x1] sm:$0xff] %v13179_v61  ;;  %2682 = vst [vmem:[#allocation3 + $0x9] sm:$0xff] %v13181_v62  ;;  %v2707_v0 = vpack.c.bf16 %v13181_v62, %v13179_v61 }
 0x303   : > { %10278 = vmatmul.mubr.bf16.vlgmr.msra.gmra.mxu1 %v2707_v0  ;;  %v11154_v0 = vld [vmem:[#allocation28 + $0xa0] sm:$0xff]  }
 0x304   : > { %10302 = vmatpush3.bf16.msra.mxu1 %v11127_v63  ;;  %10317 = vmatprep.mubr.msk.bf16.mxu1 %vm12591_vm0, %v13187_v2 }
 0x305   : > { %10303 = vmatprep.subr.bf16.mxu1 %v13187_v2 }
 0x308   : > { %v2686_v3 = vld [vmem:[#allocation3] sm:$0xff]  ;;  %v2687_v4 = vld [vmem:[#allocation3 + $0x8] sm:$0xff]  ;;  %10304 = vmatpush3.bf16.msra.mxu1 %v11128_v1 }
 0x309   : > { %v2688_v6 = vpack.c.bf16 %v2687_v4, %v2686_v3  ;;  %10305 = vmatprep.subr.bf16.mxu1 %v13187_v2  ;;  %v2902_v12 = vld [vmem:[#allocation3 + $0x2] sm:$0xff]  ;;  %v2903_v13 = vld [vmem:[#allocation3 + $0xa] sm:$0xff]  ;;  %v11157_v4 = vld [vmem:[#allocation28 + $0x88] sm:$0xff]  }
 0x30a   : > { %v2904_v14 = vpack.c.bf16 %v2903_v13, %v2902_v12  ;;  %v11155_v1 = vld [vmem:[#allocation28 + $0x98] sm:$0xff]   ;;  %v11156_v3 = vld [vmem:[#allocation28 + $0x90] sm:$0xff]  }
 0x30b   : > { %10298 = vmatmul.mubr.bf16.vlgmr.msra.gmra.mxu0 %v2688_v6  ;;  %v11162_v12 = vld [vmem:[#allocation32 + $0x30] sm:$0xff]   ;;  %v11163_v13 = vld [vmem:[#allocation32 + $0x68] sm:$0xff]  }
 0x30c   : > { %10306 = vmatpush3.bf16.msra.mxu1 %v11129_v5  ;;  %10337 = vmatprep.mubr.msk.bf16.mxu0 %vm12591_vm0, %v13187_v2  ;;  %v11158_v5 = vld [vmem:[#allocation28 + $0x80] sm:$0xff]  }
 0x30d   : > { %10307 = vmatprep.subr.bf16.mxu1 %v13187_v2  ;;  %10322 = vmatpush3.bf16.msra.mxu0 %v11135_v15  ;;  %v11167_v15 = vld [vmem:[#allocation32 + $0x58] sm:$0xff]  }
 0x30e   : > { %10323 = vmatprep.subr.bf16.mxu0 %v13187_v2 }
 0x310   : > { %10308 = vmatpush3.bf16.msra.mxu1 %v11130_v7 }
 0x311   : > { %10309 = vmatprep.subr.bf16.mxu1 %v13187_v2  ;;  %10324 = vmatpush3.bf16.msra.mxu0 %v11137_v17  ;;  %v11169_v17 = vld [vmem:[#allocation32 + $0x50] sm:$0xff]  }
 0x312   : > { %10325 = vmatprep.subr.bf16.mxu0 %v13187_v2 }
 0x314   : > { %10310 = vmatpush3.bf16.msra.mxu1 %v11131_v8 }
 0x315   : > { %10311 = vmatprep.subr.bf16.mxu1 %v13187_v2  ;;  %10326 = vmatpush3.bf16.msra.mxu0 %v11139_v19  ;;  %v11171_v19 = vld [vmem:[#allocation32 + $0x48] sm:$0xff]  }
 0x316   : > { %10327 = vmatprep.subr.bf16.mxu0 %v13187_v2 }
 0x318   : > { %10312 = vmatpush3.bf16.msra.mxu1 %v11132_v9  ;;  %v11159_v9 = vld [vmem:[#allocation32 + $0x78] sm:$0xff]  }
 0x319   : > { %10313 = vmatprep.subr.bf16.mxu1 %v13187_v2  ;;  %10328 = vmatpush3.bf16.msra.mxu0 %v11141_v20  ;;  %v11168_v20 = vld [vmem:[#allocation32 + $0x18] sm:$0xff]  }
 0x31a   : > { %10329 = vmatprep.subr.bf16.mxu0 %v13187_v2 }
 0x31c   : > { %10314 = vmatpush3.bf16.msra.mxu1 %v11133_v10  ;;  %v11160_v10 = vld [vmem:[#allocation32 + $0x38] sm:$0xff]  }
 0x31d   : > { %10315 = vmatprep.subr.bf16.mxu1 %v13187_v2  ;;  %10330 = vmatpush3.bf16.msra.mxu0 %v11143_v21  ;;  %v11173_v21 = vld [vmem:[#allocation32 + $0x40] sm:$0xff]  }
 0x31e   : > { %10331 = vmatprep.subr.bf16.mxu0 %v13187_v2 }
 0x320   : > { %10316 = vmatpush3.bf16.msra.mxu1 %v11134_v11  ;;  %v11161_v11 = vld [vmem:[#allocation32 + $0x70] sm:$0xff]  }
 0x321   : > { %10341 = vmatprep.subr.bf16.mxu1 %v13187_v2  ;;  %10332 = vmatpush3.bf16.msra.mxu0 %v11145_v23  ;;  %v11172_v23 = vld [vmem:[#allocation32 + $0x8] sm:$0xff]  }
 0x322   : > { %10333 = vmatprep.subr.bf16.mxu0 %v13187_v2 }
 0x323   : > { %10318 = vmatmul.mubr.bf16.vlgmr.msra.gmra.mxu1 %v2904_v14  ;;  %v11165_v14 = vld [vmem:[#allocation32 + $0x60] sm:$0xff]  }
 0x324   : > { %10357 = vmatprep.mubr.msk.bf16.mxu1 %vm12591_vm0, %v13187_v2  ;;  %10342 = vmatpush3.bf16.msra.mxu1 %v11136_v16  ;;  %v11164_v16 = vld [vmem:[#allocation32 + $0x28] sm:$0xff]  }
 0x325   : > { %10343 = vmatprep.subr.bf16.mxu1 %v13187_v2  ;;  %10334 = vmatpush3.bf16.msra.mxu0 %v11147_v25 }
 0x326   : > { %10335 = vmatprep.subr.bf16.mxu0 %v13187_v2 }
 0x328   : > { %10344 = vmatpush3.bf16.msra.mxu1 %v11138_v18  ;;  %v11166_v18 = vld [vmem:[#allocation32 + $0x20] sm:$0xff]  }
 0x329   : > { %10345 = vmatprep.subr.bf16.mxu1 %v13187_v2  ;;  %10336 = vmatpush3.bf16.msra.mxu0 %v11149_v27 }
 0x32a   : > { %10361 = vmatprep.subr.bf16.mxu0 %v13187_v2 }
 0x32c   : > { %10346 = vmatpush3.bf16.msra.mxu1 %v11140_v22  ;;  %v11170_v22 = vld [vmem:[#allocation32 + $0x10] sm:$0xff]  }
 0x32d   : > { %10347 = vmatprep.subr.bf16.mxu1 %v13187_v2 }
 0x330   : > { %10348 = vmatpush3.bf16.msra.mxu1 %v11142_v24  ;;  %v11174_v24 = vld [vmem:[#allocation32] sm:$0xff]  }
 0x331   : > { %10349 = vmatprep.subr.bf16.mxu1 %v13187_v2 }
 0x334   : > { %10350 = vmatpush3.bf16.msra.mxu1 %v11144_v26 }
 0x335   : > { %10351 = vmatprep.subr.bf16.mxu1 %v13187_v2 }
 0x338   : > { %10352 = vmatpush3.bf16.msra.mxu1 %v11146_v28 }
 0x339   : > { %10353 = vmatprep.subr.bf16.mxu1 %v13187_v2 }
 0x33c   : > { %10354 = vmatpush3.bf16.msra.mxu1 %v11148_v29 }
 0x33d   : > { %10355 = vmatprep.subr.bf16.mxu1 %v13187_v2 }
 0x340   : > { %10356 = vmatpush3.bf16.msra.mxu1 %v11150_v30 }
 0x341   : > { %10381 = vmatprep.subr.bf16.mxu1 %v13187_v2 }
 0x3c3   : > { %v2806_v31 = vpop.f32.mrf.mxu1 }
 0x3c5   : > { %v10279_v32 = vpop.f32.mrf.mxu1 }
 0x3c7   : > { %v2809_v33 = vpop.f32.mrf.mxu1 }
 0x3c9   : > { %v10280_v34 = vpop.f32.mrf.mxu1 }
 0x3cb   : > { %v2895_v35 = vpop.f32.mrf.mxu0 }
 0x3cc   : > { %v2896_v39 = vadd.f32 %v2895_v35, %v2806_v31  ;;  %v9263_v35 = vld [vmem:[#allocation29] ss:$0 sm:$0xff] }
 0x3cd   : > { %v10299_v36 = vpop.f32.mrf.mxu0 }
 0x3cf   : > { %v2898_v37 = vpop.f32.mrf.mxu0 }
 0x3d0   : > { %v2899_v45 = vadd.f32 %v2898_v37, %v2809_v33  ;;  %v9264_v37 = vld [vmem:[#allocation31] ss:$0 sm:$0xff] }
 0x3d1   : > { %v10300_v38 = vpop.f32.mrf.mxu0 }
 0x3e3   : > { %v3003_v40 = vpop.f32.mrf.mxu1 }
 0x3e4   : > { %v3010_v42 = vadd.f32 %v3003_v40, %v2896_v39 }
 0x3e5   : > { %v10319_v44 = vpop.f32.mrf.mxu1 }
 0x3e6   : > { %v3019_v46 = vmul.f32 %v9237_v41, %v3010_v42 }
 0x3e7   : > { %v3006_v47 = vpop.f32.mrf.mxu1 }
 0x3e8   : > { %v3028_v48 = vadd.f32 %v9238_v43, %v3019_v46  ;;  %v3011_v49 = vadd.f32 %v3006_v47, %v2899_v45 }
 0x3e9   : > { %v10320_v50 = vpop.f32.mrf.mxu1 }
 0x3ea   : > { %v3030_v51 = vmax.f32 %v3028_v48, 0.0  ;;  %v3020_v52 = vmul.f32 %v9237_v41, %v3011_v49 }
 0x3ec   : > { %3032 = vst [vmem:[#allocation4 + $0x1] sm:$0xff] %v3030_v51  ;;  %v3029_v53 = vadd.f32 %v9238_v43, %v3020_v52 }
 0x3ee   : > { %v3031_v54 = vmax.f32 %v3029_v53, 0.0  ;;  %v11176_v53 = vld [vmem:[#allocation32 + $0xb0] sm:$0xff]  }
 0x3f0   : > { %3033 = vst [vmem:[#allocation4 + $0x9] sm:$0xff] %v3031_v54  ;;  %v3058_v56 = vpack.c.bf16 %v3031_v54, %v3030_v51  ;;  %v11175_v51 = vld [vmem:[#allocation32 + $0xb8] sm:$0xff]  }
 0x3f2   : > { %10338 = vmatmul.mubr.bf16.vlgmr.msra.gmra.mxu0 %v3058_v56  ;;  %v11178_v56 = vld [vmem:[#allocation32 + $0xa0] sm:$0xff]  }
 0x3f3   : > { %10362 = vmatpush3.bf16.msra.mxu0 %v11151_v55  ;;  %10377 = vmatprep.mubr.msk.bf16.mxu0 %vm12591_vm0, %v13187_v2  ;;  %v3037_v58 = vld [vmem:[#allocation4] sm:$0xff] }
 0x3f4   : > { %10363 = vmatprep.subr.bf16.mxu0 %v13187_v2 }
 0x3f7   : > { %v3038_v59 = vld [vmem:[#allocation4 + $0x8] sm:$0xff]  ;;  %10364 = vmatpush3.bf16.msra.mxu0 %v11152_v57  ;;  %v11179_v57 = vld [vmem:[#allocation32 + $0x98] sm:$0xff]  }
 0x3f8   : > { %v3039_v63 = vpack.c.bf16 %v3038_v59, %v3037_v58  ;;  %10365 = vmatprep.subr.bf16.mxu0 %v13187_v2  ;;  %v3253_v6 = vld [vmem:[#allocation4 + $0x2] sm:$0xff]  ;;  %v3254_v7 = vld [vmem:[#allocation4 + $0xa] sm:$0xff] }
 0x3f9   : > { %v3255_v8 = vpack.c.bf16 %v3254_v7, %v3253_v6  ;;  %v11180_v58 = vld [vmem:[#allocation32 + $0x90] sm:$0xff]   ;;  %v11181_v59 = vld [vmem:[#allocation32 + $0x88] sm:$0xff]  }
 0x3fa   : > { %10358 = vmatmul.mubr.bf16.vlgmr.msra.gmra.mxu1 %v3039_v63  ;;  %v11186_v6 = vld [vmem:[#allocation37 + $0x30] sm:$0xff]   ;;  %v11187_v7 = vld [vmem:[#allocation37 + $0x68] sm:$0xff]  }
 0x3fb   : > { %10366 = vmatpush3.bf16.msra.mxu0 %v11153_v60  ;;  %10397 = vmatprep.mubr.msk.bf16.mxu1 %vm12591_vm0, %v13187_v2  ;;  %v11182_v60 = vld [vmem:[#allocation32 + $0x80] sm:$0xff]  }
 0x3fc   : > { %10367 = vmatprep.subr.bf16.mxu0 %v13187_v2  ;;  %10382 = vmatpush3.bf16.msra.mxu1 %v11159_v9  ;;  %v11191_v9 = vld [vmem:[#allocation37 + $0x58] sm:$0xff]  }
 0x3fd   : > { %10383 = vmatprep.subr.bf16.mxu1 %v13187_v2 }
 0x3ff   : > { %10368 = vmatpush3.bf16.msra.mxu0 %v11154_v0 }
 0x400   : > { %10369 = vmatprep.subr.bf16.mxu0 %v13187_v2  ;;  %10384 = vmatpush3.bf16.msra.mxu1 %v11161_v11  ;;  %v11193_v11 = vld [vmem:[#allocation37 + $0x50] sm:$0xff]  }
 0x401   : > { %10385 = vmatprep.subr.bf16.mxu1 %v13187_v2 }
 0x403   : > { %10370 = vmatpush3.bf16.msra.mxu0 %v11155_v1 }
 0x404   : > { %10371 = vmatprep.subr.bf16.mxu0 %v13187_v2  ;;  %10386 = vmatpush3.bf16.msra.mxu1 %v11163_v13  ;;  %v11195_v13 = vld [vmem:[#allocation37 + $0x48] sm:$0xff]  }
 0x405   : > { %10387 = vmatprep.subr.bf16.mxu1 %v13187_v2 }
 0x407   : > { %10372 = vmatpush3.bf16.msra.mxu0 %v11156_v3  ;;  %v11183_v3 = vld [vmem:[#allocation37 + $0x78] sm:$0xff]  }
 0x408   : > { %10373 = vmatprep.subr.bf16.mxu0 %v13187_v2  ;;  %10388 = vmatpush3.bf16.msra.mxu1 %v11165_v14  ;;  %v11192_v14 = vld [vmem:[#allocation37 + $0x18] sm:$0xff]  }
 0x409   : > { %10389 = vmatprep.subr.bf16.mxu1 %v13187_v2 }
 0x40b   : > { %10374 = vmatpush3.bf16.msra.mxu0 %v11157_v4  ;;  %v11184_v4 = vld [vmem:[#allocation37 + $0x38] sm:$0xff]  }
 0x40c   : > { %10375 = vmatprep.subr.bf16.mxu0 %v13187_v2  ;;  %10390 = vmatpush3.bf16.msra.mxu1 %v11167_v15  ;;  %v11197_v15 = vld [vmem:[#allocation37 + $0x40] sm:$0xff]  }
 0x40d   : > { %10391 = vmatprep.subr.bf16.mxu1 %v13187_v2 }
 0x40f   : > { %10376 = vmatpush3.bf16.msra.mxu0 %v11158_v5  ;;  %v11185_v5 = vld [vmem:[#allocation37 + $0x70] sm:$0xff]  }
 0x410   : > { %10401 = vmatprep.subr.bf16.mxu0 %v13187_v2  ;;  %10392 = vmatpush3.bf16.msra.mxu1 %v11169_v17  ;;  %v11196_v17 = vld [vmem:[#allocation37 + $0x8] sm:$0xff]  }
 0x411   : > { %10393 = vmatprep.subr.bf16.mxu1 %v13187_v2 }
 0x412   : > { %10378 = vmatmul.mubr.bf16.vlgmr.msra.gmra.mxu0 %v3255_v8  ;;  %v11189_v8 = vld [vmem:[#allocation37 + $0x60] sm:$0xff]  }
 0x413   : > { %10417 = vmatprep.mubr.msk.bf16.mxu0 %vm12591_vm0, %v13187_v2  ;;  %10402 = vmatpush3.bf16.msra.mxu0 %v11160_v10  ;;  %v11188_v10 = vld [vmem:[#allocation37 + $0x28] sm:$0xff]  }
 0x414   : > { %10403 = vmatprep.subr.bf16.mxu0 %v13187_v2  ;;  %10394 = vmatpush3.bf16.msra.mxu1 %v11171_v19 }
 0x415   : > { %10395 = vmatprep.subr.bf16.mxu1 %v13187_v2 }
 0x417   : > { %10404 = vmatpush3.bf16.msra.mxu0 %v11162_v12  ;;  %v11190_v12 = vld [vmem:[#allocation37 + $0x20] sm:$0xff]  }
 0x418   : > { %10405 = vmatprep.subr.bf16.mxu0 %v13187_v2  ;;  %10396 = vmatpush3.bf16.msra.mxu1 %v11173_v21 }
 0x419   : > { %10421 = vmatprep.subr.bf16.mxu1 %v13187_v2 }
 0x41b   : > { %10406 = vmatpush3.bf16.msra.mxu0 %v11164_v16  ;;  %v11194_v16 = vld [vmem:[#allocation37 + $0x10] sm:$0xff]  }
 0x41c   : > { %10407 = vmatprep.subr.bf16.mxu0 %v13187_v2 }
 0x41f   : > { %10408 = vmatpush3.bf16.msra.mxu0 %v11166_v18  ;;  %v11198_v18 = vld [vmem:[#allocation37] sm:$0xff]  }
 0x420   : > { %10409 = vmatprep.subr.bf16.mxu0 %v13187_v2 }
 0x423   : > { %10410 = vmatpush3.bf16.msra.mxu0 %v11168_v20 }
 0x424   : > { %10411 = vmatprep.subr.bf16.mxu0 %v13187_v2 }
 0x427   : > { %10412 = vmatpush3.bf16.msra.mxu0 %v11170_v22 }
 0x428   : > { %10413 = vmatprep.subr.bf16.mxu0 %v13187_v2 }
 0x42b   : > { %10414 = vmatpush3.bf16.msra.mxu0 %v11172_v23 }
 0x42c   : > { %10415 = vmatprep.subr.bf16.mxu0 %v13187_v2 }
 0x42f   : > { %10416 = vmatpush3.bf16.msra.mxu0 %v11174_v24 }
 0x430   : > { %10441 = vmatprep.subr.bf16.mxu0 %v13187_v2 }
 0x4b2   : > { %v3157_v25 = vpop.f32.mrf.mxu0 }
 0x4b4   : > { %v10339_v26 = vpop.f32.mrf.mxu0 }
 0x4b6   : > { %v3160_v27 = vpop.f32.mrf.mxu0 }
 0x4b8   : > { %v10340_v28 = vpop.f32.mrf.mxu0 }
 0x4ba   : > { %v3246_v29 = vpop.f32.mrf.mxu1 }
 0x4bb   : > { %v3247_v33 = vadd.f32 %v3246_v29, %v3157_v25  ;;  %v9289_v29 = vld [vmem:[#allocation34] ss:$0 sm:$0xff] }
 0x4bc   : > { %v10359_v30 = vpop.f32.mrf.mxu1 }
 0x4be   : > { %v3249_v31 = vpop.f32.mrf.mxu1 }
 0x4bf   : > { %v3250_v39 = vadd.f32 %v3249_v31, %v3160_v27  ;;  %v9290_v31 = vld [vmem:[#allocation35] ss:$0 sm:$0xff] }
 0x4c0   : > { %v10360_v32 = vpop.f32.mrf.mxu1 }
 0x4d2   : > { %v3354_v34 = vpop.f32.mrf.mxu0 }
 0x4d3   : > { %v3361_v36 = vadd.f32 %v3354_v34, %v3247_v33 }
 0x4d4   : > { %v10379_v38 = vpop.f32.mrf.mxu0 }
 0x4d5   : > { %v3370_v40 = vmul.f32 %v9263_v35, %v3361_v36 }
 0x4d6   : > { %v3357_v41 = vpop.f32.mrf.mxu0 }
 0x4d7   : > { %v3379_v42 = vadd.f32 %v9264_v37, %v3370_v40  ;;  %v3362_v43 = vadd.f32 %v3357_v41, %v3250_v39 }
 0x4d8   : > { %v10380_v44 = vpop.f32.mrf.mxu0 }
 0x4d9   : > { %v3383_v45 = vadd.f32 %v3379_v42, %v13179_v61  ;;  %v3371_v46 = vmul.f32 %v9263_v35, %v3362_v43  ;;  %v11199_v43 = vld [vmem:[#allocation37 + $0xb8] sm:$0xff]  }
 0x4db   : > { %v13250_v47 = vmax.f32 %v3383_v45, 0.0  ;;  %v3380_v48 = vadd.f32 %v9264_v37, %v3371_v46  ;;  %v11200_v45 = vld [vmem:[#allocation37 + $0xb0] sm:$0xff]  }
 0x4dd   : > { %3387 = vst [vmem:[#allocation5 + $0x1] sm:$0xff] %v13250_v47  ;;  %v3384_v49 = vadd.f32 %v3380_v48, %v13181_v62  ;;  %v11177_v62 = vld [vmem:[#allocation32 + $0xa8] sm:$0xff]  }
 0x4df   : > { %v13254_v50 = vmax.f32 %v3384_v49, 0.0  ;;  %v11201_v49 = vld [vmem:[#allocation37 + $0xa8] sm:$0xff]  }
 0x4e1   : > { %3388 = vst [vmem:[#allocation5 + $0x9] sm:$0xff] %v13254_v50  ;;  %v3413_v52 = vpack.c.bf16 %v13254_v50, %v13250_v47 }
 0x4e3   : > { %10398 = vmatmul.mubr.bf16.vlgmr.msra.gmra.mxu1 %v3413_v52  ;;  %v11202_v52 = vld [vmem:[#allocation37 + $0xa0] sm:$0xff]  }
 0x4e4   : > { %10422 = vmatpush3.bf16.msra.mxu1 %v11175_v51  ;;  %10437 = vmatprep.mubr.msk.bf16.mxu1 %vm12591_vm0, %v13187_v2  ;;  %v3392_v61 = vld [vmem:[#allocation5] sm:$0xff] }
 0x4e5   : > { %10423 = vmatprep.subr.bf16.mxu1 %v13187_v2 }
 0x4e8   : > { %v3393_v54 = vld [vmem:[#allocation5 + $0x8] sm:$0xff]  ;;  %10424 = vmatpush3.bf16.msra.mxu1 %v11176_v53  ;;  %v11203_v53 = vld [vmem:[#allocation37 + $0x98] sm:$0xff]  }
 0x4e9   : > { %v3394_v55 = vpack.c.bf16 %v3393_v54, %v3392_v61  ;;  %10425 = vmatprep.subr.bf16.mxu1 %v13187_v2  ;;  %v3608_v63 = vld [vmem:[#allocation5 + $0x2] sm:$0xff]  ;;  %v3609_v0 = vld [vmem:[#allocation5 + $0xa] sm:$0xff]  ;;  %v11204_v61 = vld [vmem:[#allocation37 + $0x90] sm:$0xff]  }
 0x4ea   : > { %v3610_v1 = vpack.c.bf16 %v3609_v0, %v3608_v63  ;;  %v11205_v54 = vld [vmem:[#allocation37 + $0x88] sm:$0xff]   ;;  %v11210_v63 = vld [vmem:[#allocation44 + $0x70] sm:$0xff]  }
 0x4eb   : > { %10418 = vmatmul.mubr.bf16.vlgmr.msra.gmra.mxu0 %v3394_v55  ;;  %v11211_v0 = vld [vmem:[#allocation41 + $0x28] sm:$0xff]  }
 0x4ec   : > { %10426 = vmatpush3.bf16.msra.mxu1 %v11177_v62  ;;  %10457 = vmatprep.mubr.msk.bf16.mxu0 %vm12591_vm0, %v13187_v2  ;;  %v11206_v62 = vld [vmem:[#allocation37 + $0x80] sm:$0xff]  }
 0x4ed   : > { %10427 = vmatprep.subr.bf16.mxu1 %v13187_v2  ;;  %10442 = vmatpush3.bf16.msra.mxu0 %v11183_v3  ;;  %v11213_v3 = vld [vmem:[#allocation41 + $0x20] sm:$0xff]  }
 0x4ee   : > { %10443 = vmatprep.subr.bf16.mxu0 %v13187_v2 }
 0x4f0   : > { %10428 = vmatpush3.bf16.msra.mxu1 %v11178_v56 }
 0x4f1   : > { %10429 = vmatprep.subr.bf16.mxu1 %v13187_v2  ;;  %10444 = vmatpush3.bf16.msra.mxu0 %v11185_v5  ;;  %v11215_v5 = vld [vmem:[#allocation41 + $0x18] sm:$0xff]  }
 0x4f2   : > { %10445 = vmatprep.subr.bf16.mxu0 %v13187_v2 }
 0x4f4   : > { %10430 = vmatpush3.bf16.msra.mxu1 %v11179_v57 }
 0x4f5   : > { %10431 = vmatprep.subr.bf16.mxu1 %v13187_v2  ;;  %10446 = vmatpush3.bf16.msra.mxu0 %v11187_v7  ;;  %v11217_v7 = vld [vmem:[#allocation41 + $0x10] sm:$0xff]  }
 0x4f6   : > { %10447 = vmatprep.subr.bf16.mxu0 %v13187_v2 }
 0x4f8   : > { %10432 = vmatpush3.bf16.msra.mxu1 %v11180_v58  ;;  %v11207_v58 = vld [vmem:[#allocation41 + $0x38] sm:$0xff]  }
 0x4f9   : > { %10433 = vmatprep.subr.bf16.mxu1 %v13187_v2  ;;  %10448 = vmatpush3.bf16.msra.mxu0 %v11189_v8  ;;  %v11218_v8 = vld [vmem:[#allocation44 + $0x50] sm:$0xff]  }
 0x4fa   : > { %10449 = vmatprep.subr.bf16.mxu0 %v13187_v2 }
 0x4fc   : > { %10434 = vmatpush3.bf16.msra.mxu1 %v11181_v59  ;;  %v11208_v59 = vld [vmem:[#allocation44 + $0x78] sm:$0xff]  }
 0x4fd   : > { %10435 = vmatprep.subr.bf16.mxu1 %v13187_v2  ;;  %10450 = vmatpush3.bf16.msra.mxu0 %v11191_v9  ;;  %v11219_v9 = vld [vmem:[#allocation41 + $0x8] sm:$0xff]  }
 0x4fe   : > { %10451 = vmatprep.subr.bf16.mxu0 %v13187_v2 }
 0x500   : > { %10436 = vmatpush3.bf16.msra.mxu1 %v11182_v60  ;;  %v11209_v60 = vld [vmem:[#allocation41 + $0x30] sm:$0xff]  }
 0x501   : > { %10461 = vmatprep.subr.bf16.mxu1 %v13187_v2  ;;  %10452 = vmatpush3.bf16.msra.mxu0 %v11193_v11  ;;  %v11221_v11 = vld [vmem:[#allocation41] sm:$0xff]  }
 0x502   : > { %10453 = vmatprep.subr.bf16.mxu0 %v13187_v2 }
 0x503   : > { %10438 = vmatmul.mubr.bf16.vlgmr.msra.gmra.mxu1 %v3610_v1  ;;  %v11212_v1 = vld [vmem:[#allocation44 + $0x68] sm:$0xff]  }
 0x504   : > { %10477 = vmatprep.mubr.msk.bf16.mxu1 %vm12591_vm0, %v13187_v2  ;;  %10462 = vmatpush3.bf16.msra.mxu1 %v11184_v4  ;;  %v11214_v4 = vld [vmem:[#allocation44 + $0x60] sm:$0xff]  }
 0x505   : > { %10463 = vmatprep.subr.bf16.mxu1 %v13187_v2  ;;  %10454 = vmatpush3.bf16.msra.mxu0 %v11195_v13 }
 0x506   : > { %10455 = vmatprep.subr.bf16.mxu0 %v13187_v2 }
 0x508   : > { %10464 = vmatpush3.bf16.msra.mxu1 %v11186_v6  ;;  %v11216_v6 = vld [vmem:[#allocation44 + $0x58] sm:$0xff]  }
 0x509   : > { %10465 = vmatprep.subr.bf16.mxu1 %v13187_v2  ;;  %10456 = vmatpush3.bf16.msra.mxu0 %v11197_v15 }
 0x50a   : > { %10481 = vmatprep.subr.bf16.mxu0 %v13187_v2 }
 0x50c   : > { %10466 = vmatpush3.bf16.msra.mxu1 %v11188_v10  ;;  %v11220_v10 = vld [vmem:[#allocation44 + $0x48] sm:$0xff]  }
 0x50d   : > { %10467 = vmatprep.subr.bf16.mxu1 %v13187_v2 }
 0x510   : > { %10468 = vmatpush3.bf16.msra.mxu1 %v11190_v12  ;;  %v11222_v12 = vld [vmem:[#allocation44 + $0x40] sm:$0xff]  }
 0x511   : > { %10469 = vmatprep.subr.bf16.mxu1 %v13187_v2 }
 0x514   : > { %10470 = vmatpush3.bf16.msra.mxu1 %v11192_v14 }
 0x515   : > { %10471 = vmatprep.subr.bf16.mxu1 %v13187_v2 }
 0x518   : > { %10472 = vmatpush3.bf16.msra.mxu1 %v11194_v16 }
 0x519   : > { %10473 = vmatprep.subr.bf16.mxu1 %v13187_v2 }
 0x51c   : > { %10474 = vmatpush3.bf16.msra.mxu1 %v11196_v17 }
 0x51d   : > { %10475 = vmatprep.subr.bf16.mxu1 %v13187_v2 }
 0x520   : > { %10476 = vmatpush3.bf16.msra.mxu1 %v11198_v18 }
 0x521   : > { %10501 = vmatprep.subr.bf16.mxu1 %v13187_v2 }
 0x5a3   : > { %v3512_v19 = vpop.f32.mrf.mxu1 }
 0x5a5   : > { %v10399_v20 = vpop.f32.mrf.mxu1 }
 0x5a7   : > { %v3515_v21 = vpop.f32.mrf.mxu1 }
 0x5a9   : > { %v10400_v22 = vpop.f32.mrf.mxu1 }
 0x5ab   : > { %v3601_v23 = vpop.f32.mrf.mxu0 }
 0x5ac   : > { %v3602_v27 = vadd.f32 %v3601_v23, %v3512_v19  ;;  %v9315_v23 = vld [vmem:[#allocation38] ss:$0 sm:$0xff] }
 0x5ad   : > { %v10419_v24 = vpop.f32.mrf.mxu0 }
 0x5af   : > { %v3604_v25 = vpop.f32.mrf.mxu0 }
 0x5b0   : > { %v3605_v33 = vadd.f32 %v3604_v25, %v3515_v21  ;;  %v9316_v25 = vld [vmem:[#allocation40] ss:$0 sm:$0xff] }
 0x5b1   : > { %v10420_v26 = vpop.f32.mrf.mxu0 }
 0x5c3   : > { %v3709_v28 = vpop.f32.mrf.mxu1 }
 0x5c4   : > { %v3716_v30 = vadd.f32 %v3709_v28, %v3602_v27 }
 0x5c5   : > { %v10439_v32 = vpop.f32.mrf.mxu1 }
 0x5c6   : > { %v3725_v34 = vmul.f32 %v9289_v29, %v3716_v30 }
 0x5c7   : > { %v3712_v35 = vpop.f32.mrf.mxu1 }
 0x5c8   : > { %v3734_v36 = vadd.f32 %v9290_v31, %v3725_v34  ;;  %v3717_v37 = vadd.f32 %v3712_v35, %v3605_v33 }
 0x5c9   : > { %v10440_v38 = vpop.f32.mrf.mxu1 }
 0x5ca   : > { %v3736_v39 = vmax.f32 %v3734_v36, 0.0  ;;  %v3726_v40 = vmul.f32 %v9289_v29, %v3717_v37 }
 0x5cc   : > { %3738 = vst [vmem:[#allocation6 + $0x1] sm:$0xff] %v3736_v39  ;;  %v3735_v41 = vadd.f32 %v9290_v31, %v3726_v40 }
 0x5ce   : > { %v3737_v42 = vmax.f32 %v3735_v41, 0.0 }
 0x5d0   : > { %3739 = vst [vmem:[#allocation6 + $0x9] sm:$0xff] %v3737_v42  ;;  %v3764_v44 = vpack.c.bf16 %v3737_v42, %v3736_v39  ;;  %v11223_v39 = vld [vmem:[#allocation44 + $0x38] sm:$0xff]  }
 0x5d1   : > { %v11224_v42 = vld [vmem:[#allocation44 + $0xb8] sm:$0xff]  }
 0x5d2   : > { %10458 = vmatmul.mubr.bf16.vlgmr.msra.gmra.mxu0 %v3764_v44 }
 0x5d3   : > { %10482 = vmatpush3.bf16.msra.mxu0 %v11199_v43  ;;  %10497 = vmatprep.mubr.msk.bf16.mxu0 %vm12591_vm0, %v13187_v2  ;;  %v3743_v46 = vld [vmem:[#allocation6] sm:$0xff] }
 0x5d4   : > { %10483 = vmatprep.subr.bf16.mxu0 %v13187_v2 }
 0x5d7   : > { %v3744_v48 = vld [vmem:[#allocation6 + $0x8] sm:$0xff]  ;;  %10484 = vmatpush3.bf16.msra.mxu0 %v11200_v45 }
 0x5d8   : > { %v3745_v51 = vpack.c.bf16 %v3744_v48, %v3743_v46  ;;  %10485 = vmatprep.subr.bf16.mxu0 %v13187_v2  ;;  %v3959_v55 = vld [vmem:[#allocation6 + $0x2] sm:$0xff]  ;;  %v3960_v56 = vld [vmem:[#allocation6 + $0xa] sm:$0xff]  ;;  %v11229_v48 = vld [vmem:[#allocation44 + $0x20] sm:$0xff]  }
 0x5d9   : > { %v3961_v57 = vpack.c.bf16 %v3960_v56, %v3959_v55  ;;  %v11225_v45 = vld [vmem:[#allocation44 + $0x30] sm:$0xff]   ;;  %v11228_v46 = vld [vmem:[#allocation44 + $0xa8] sm:$0xff]   ;;  %v11237_v55 = vld [vmem:[#allocation44] sm:$0xff]  }
 0x5da   : > { %10478 = vmatmul.mubr.bf16.vlgmr.msra.gmra.mxu1 %v3745_v51  ;;  %v11231_v51 = vld [vmem:[#allocation44 + $0x18] sm:$0xff]   ;;  %v11238_v56 = vld [vmem:[#allocation44 + $0x80] sm:$0xff]  }
 0x5db   : > { %10486 = vmatpush3.bf16.msra.mxu0 %v11201_v49  ;;  %10517 = vmatprep.mubr.msk.bf16.mxu1 %vm12591_vm0, %v13187_v2  ;;  %v11230_v49 = vld [vmem:[#allocation44 + $0xa0] sm:$0xff]  }
 0x5dc   : > { %10487 = vmatprep.subr.bf16.mxu0 %v13187_v2  ;;  %10502 = vmatpush3.bf16.msra.mxu1 %v11207_v58 }
 0x5dd   : > { %10503 = vmatprep.subr.bf16.mxu1 %v13187_v2 }
 0x5df   : > { %10488 = vmatpush3.bf16.msra.mxu0 %v11202_v52  ;;  %v11232_v52 = vld [vmem:[#allocation44 + $0x98] sm:$0xff]  }
 0x5e0   : > { %10489 = vmatprep.subr.bf16.mxu0 %v13187_v2  ;;  %10504 = vmatpush3.bf16.msra.mxu1 %v11209_v60 }
 0x5e1   : > { %10505 = vmatprep.subr.bf16.mxu1 %v13187_v2 }
 0x5e3   : > { %10490 = vmatpush3.bf16.msra.mxu0 %v11203_v53  ;;  %v11233_v53 = vld [vmem:[#allocation44 + $0x10] sm:$0xff]  }
 0x5e4   : > { %10491 = vmatprep.subr.bf16.mxu0 %v13187_v2  ;;  %10506 = vmatpush3.bf16.msra.mxu1 %v11211_v0  ;;  %v11240_v0 = vld [vmem:[#allocation46 + $0x38] sm:$0xff]  }
 0x5e5   : > { %10507 = vmatprep.subr.bf16.mxu1 %v13187_v2 }
 0x5e7   : > { %10492 = vmatpush3.bf16.msra.mxu0 %v11204_v61  ;;  %v11234_v61 = vld [vmem:[#allocation44 + $0x90] sm:$0xff]  }
 0x5e8   : > { %10493 = vmatprep.subr.bf16.mxu0 %v13187_v2  ;;  %10508 = vmatpush3.bf16.msra.mxu1 %v11213_v3  ;;  %v11242_v3 = vld [vmem:[#allocation46 + $0x30] sm:$0xff]  }
 0x5e9   : > { %10509 = vmatprep.subr.bf16.mxu1 %v13187_v2 }
 0x5eb   : > { %10494 = vmatpush3.bf16.msra.mxu0 %v11205_v54  ;;  %v11235_v54 = vld [vmem:[#allocation44 + $0x8] sm:$0xff]  }
 0x5ec   : > { %10495 = vmatprep.subr.bf16.mxu0 %v13187_v2  ;;  %10510 = vmatpush3.bf16.msra.mxu1 %v11215_v5  ;;  %v11243_v5 = vld [vmem:[#allocation46 + $0x68] sm:$0xff]  }
 0x5ed   : > { %10511 = vmatprep.subr.bf16.mxu1 %v13187_v2 }
 0x5ef   : > { %10496 = vmatpush3.bf16.msra.mxu0 %v11206_v62  ;;  %v11236_v62 = vld [vmem:[#allocation44 + $0x88] sm:$0xff]  }
 0x5f0   : > { %10521 = vmatprep.subr.bf16.mxu0 %v13187_v2  ;;  %10512 = vmatpush3.bf16.msra.mxu1 %v11217_v7  ;;  %v11247_v7 = vld [vmem:[#allocation46 + $0x58] sm:$0xff]  }
 0x5f1   : > { %10513 = vmatprep.subr.bf16.mxu1 %v13187_v2 }
 0x5f2   : > { %10498 = vmatmul.mubr.bf16.vlgmr.msra.gmra.mxu0 %v3961_v57 }
 0x5f3   : > { %10537 = vmatprep.mubr.msk.bf16.mxu0 %vm12591_vm0, %v13187_v2  ;;  %10522 = vmatpush3.bf16.msra.mxu0 %v11208_v59 }
 0x5f4   : > { %10523 = vmatprep.subr.bf16.mxu0 %v13187_v2  ;;  %10514 = vmatpush3.bf16.msra.mxu1 %v11219_v9  ;;  %v11246_v9 = vld [vmem:[#allocation46 + $0x20] sm:$0xff]  }
 0x5f5   : > { %10515 = vmatprep.subr.bf16.mxu1 %v13187_v2 }
 0x5f7   : > { %10524 = vmatpush3.bf16.msra.mxu0 %v11210_v63  ;;  %v11239_v63 = vld [vmem:[#allocation46 + $0x78] sm:$0xff]  }
 0x5f8   : > { %10525 = vmatprep.subr.bf16.mxu0 %v13187_v2  ;;  %10516 = vmatpush3.bf16.msra.mxu1 %v11221_v11  ;;  %v11248_v11 = vld [vmem:[#allocation46 + $0x18] sm:$0xff]  }
 0x5f9   : > { %10541 = vmatprep.subr.bf16.mxu1 %v13187_v2 }
 0x5fb   : > { %10526 = vmatpush3.bf16.msra.mxu0 %v11212_v1  ;;  %v11241_v1 = vld [vmem:[#allocation46 + $0x70] sm:$0xff]  }
 0x5fc   : > { %10527 = vmatprep.subr.bf16.mxu0 %v13187_v2 }
 0x5ff   : > { %10528 = vmatpush3.bf16.msra.mxu0 %v11214_v4  ;;  %v13345_v4 = vld [vmem:[#allocation9] sm:$0xff] }
 0x600   : > { %10529 = vmatprep.subr.bf16.mxu0 %v13187_v2 }
 0x603   : > { %10530 = vmatpush3.bf16.msra.mxu0 %v11216_v6  ;;  %v11244_v6 = vld [vmem:[#allocation46 + $0x28] sm:$0xff]  }
 0x604   : > { %10531 = vmatprep.subr.bf16.mxu0 %v13187_v2 }
 0x607   : > { %10532 = vmatpush3.bf16.msra.mxu0 %v11218_v8  ;;  %v11249_v8 = vld [vmem:[#allocation46 + $0x50] sm:$0xff]  }
 0x608   : > { %10533 = vmatprep.subr.bf16.mxu0 %v13187_v2 }
 0x60b   : > { %10534 = vmatpush3.bf16.msra.mxu0 %v11220_v10  ;;  %v11251_v10 = vld [vmem:[#allocation46 + $0x48] sm:$0xff]  }
 0x60c   : > { %10535 = vmatprep.subr.bf16.mxu0 %v13187_v2 }
 0x60f   : > { %10536 = vmatpush3.bf16.msra.mxu0 %v11222_v12  ;;  %v11253_v12 = vld [vmem:[#allocation46 + $0x40] sm:$0xff]  }
 0x610   : > { %10561 = vmatprep.subr.bf16.mxu0 %v13187_v2 }
 0x692   : > { %v3863_v13 = vpop.f32.mrf.mxu0 }
 0x694   : > { %v10459_v14 = vpop.f32.mrf.mxu0 }
 0x695   : > { %v11252_v14 = vld [vmem:[#allocation46 + $0x8] sm:$0xff]  }
 0x696   : > { %v3866_v15 = vpop.f32.mrf.mxu0 }
 0x698   : > { %v10460_v16 = vpop.f32.mrf.mxu0 }
 0x69a   : > { %v3952_v17 = vpop.f32.mrf.mxu1 }
 0x69b   : > { %v3953_v21 = vadd.f32 %v3952_v17, %v3863_v13  ;;  %v11250_v13 = vld [vmem:[#allocation46 + $0x10] sm:$0xff]  }
 0x69c   : > { %v10479_v18 = vpop.f32.mrf.mxu1 }
 0x69e   : > { %v3955_v19 = vpop.f32.mrf.mxu1 }
 0x69f   : > { %v3956_v27 = vadd.f32 %v3955_v19, %v3866_v15  ;;  %v11254_v15 = vld [vmem:[#allocation46] sm:$0xff]  }
 0x6a0   : > { %v10480_v20 = vpop.f32.mrf.mxu1 }
 0x6b2   : > { %v4060_v22 = vpop.f32.mrf.mxu0 }
 0x6b3   : > { %v4067_v24 = vadd.f32 %v4060_v22, %v3953_v21 }
 0x6b4   : > { %v10499_v26 = vpop.f32.mrf.mxu0 }
 0x6b5   : > { %v4076_v28 = vmul.f32 %v9315_v23, %v4067_v24 }
 0x6b6   : > { %v4063_v29 = vpop.f32.mrf.mxu0 }
 0x6b7   : > { %v4085_v30 = vadd.f32 %v9316_v25, %v4076_v28  ;;  %v4068_v31 = vadd.f32 %v4063_v29, %v3956_v27  ;;  %v9351_v27 = vld [vmem:[%s13907_s16] ss:$0 sm:$0xff]  ;;  %s13922_s16 = sld [smem:[#allocation95_spill]] }
 0x6b8   : > { %v10500_v32 = vpop.f32.mrf.mxu0 }
 0x6b9   : > { %v4089_v33 = vadd.f32 %v4085_v30, %v13250_v47  ;;  %v4077_v34 = vmul.f32 %v9315_v23, %v4068_v31  ;;  %v11226_v47 = vld [vmem:[#allocation44 + $0xb0] sm:$0xff]   ;;  %v9352_v31 = vld [vmem:[%s13908_s18] ss:$0 sm:$0xff]  ;;  %s13923_s18 = sld [smem:[#allocation93_spill]] }
 0x6bb   : > { %v4091_v35 = vmax.f32 %v4089_v33, 0.0  ;;  %v4086_v36 = vadd.f32 %v9316_v25, %v4077_v34 }
 0x6bd   : > { %4093 = vst [vmem:[#allocation7 + $0x1] sm:$0xff] %v4091_v35  ;;  %v4090_v37 = vadd.f32 %v4086_v36, %v13254_v50  ;;  %v11227_v50 = vld [vmem:[#allocation44 + $0x28] sm:$0xff]  }
 0x6bf   : > { %v4092_v38 = vmax.f32 %v4090_v37, 0.0 }
 0x6c1   : > { %4094 = vst [vmem:[#allocation7 + $0x9] sm:$0xff] %v4092_v38 }
 0x6c8   : > { %v4096_v40 = vld [vmem:[#allocation7 + $0x1] ss:$2 sm:$0xff]  ;;  %v4221_v57 = vld [vmem:[#allocation7] ss:$2 sm:$0xff] }
 0x6c9   : > { %v4239_v41 = vld [vmem:[#allocation7 + $0x1] ss:$2 sm:$0xff]  ;;  %v4097_v43 = vpack.c.bf16 %v4096_v40, %v4096_v40  ;;  %v4434_v58 = vld [vmem:[#allocation7 + $0x2] ss:$2 sm:$0xff]  ;;  %v4222_v59 = vpack.c.bf16 %v4221_v57, %v4221_v57  ;;  %v11271_v57 = vld [vmem:[#allocation47 + $0x58] sm:$0xff]  }
 0x6ca   : > { %v4240_v44 = vpack.c.bf16 %v4239_v41, %v4239_v41  ;;  %v4435_v60 = vpack.c.bf16 %v4434_v58, %v4434_v58  ;;  %v11256_v41 = vld [vmem:[#allocation46 + $0xb0] sm:$0xff]  }
 0x6cb   : > { %10518 = vmatmul.mubr.bf16.vlgmr.msra.gmra.mxu1 %v4097_v43  ;;  %v11257_v43 = vld [vmem:[#allocation46 + $0xa8] sm:$0xff]   ;;  %v11273_v58 = vld [vmem:[#allocation47 + $0x50] sm:$0xff]  }
 0x6cc   : > { %10538 = vmatmul.mubr.bf16.vlgmr.msra.gmra.mxu0 %v4240_v44  ;;  %10542 = vmatpush3.bf16.msra.mxu1 %v11223_v39  ;;  %v11255_v39 = vld [vmem:[#allocation46 + $0xb8] sm:$0xff]  }
 0x6cd   : > { %10562 = vmatpush3.bf16.msra.mxu0 %v11224_v42  ;;  %10543 = vmatprep.subr.bf16.mxu1 %v13187_v2 }
 0x6ce   : > { %10563 = vmatprep.subr.bf16.mxu0 %v13187_v2  ;;  %10557 = vmatprep.mubr.msk.bf16.mxu1 %vm12591_vm0, %v13187_v2 }
 0x6cf   : > { %10577 = vmatprep.mubr.msk.bf16.mxu0 %vm12591_vm0, %v13187_v2 }
 0x6d0   : > { %10544 = vmatpush3.bf16.msra.mxu1 %v11225_v45  ;;  %v11258_v45 = vld [vmem:[#allocation46 + $0xa0] sm:$0xff]  }
 0x6d1   : > { %10564 = vmatpush3.bf16.msra.mxu0 %v11226_v47  ;;  %10545 = vmatprep.subr.bf16.mxu1 %v13187_v2  ;;  %v11259_v47 = vld [vmem:[#allocation46 + $0x98] sm:$0xff]  }
 0x6d2   : > { %10565 = vmatprep.subr.bf16.mxu0 %v13187_v2 }
 0x6d4   : > { %10546 = vmatpush3.bf16.msra.mxu1 %v11227_v50  ;;  %v11260_v50 = vld [vmem:[#allocation46 + $0x90] sm:$0xff]  }
 0x6d5   : > { %10566 = vmatpush3.bf16.msra.mxu0 %v11228_v46  ;;  %10547 = vmatprep.subr.bf16.mxu1 %v13187_v2  ;;  %v11261_v46 = vld [vmem:[#allocation46 + $0x88] sm:$0xff]  }
 0x6d6   : > { %10567 = vmatprep.subr.bf16.mxu0 %v13187_v2 }
 0x6d8   : > { %10548 = vmatpush3.bf16.msra.mxu1 %v11229_v48  ;;  %v11262_v48 = vld [vmem:[#allocation46 + $0x80] sm:$0xff]  }
 0x6d9   : > { %10568 = vmatpush3.bf16.msra.mxu0 %v11230_v49  ;;  %10549 = vmatprep.subr.bf16.mxu1 %v13187_v2 }
 0x6da   : > { %10569 = vmatprep.subr.bf16.mxu0 %v13187_v2 }
 0x6dc   : > { %10550 = vmatpush3.bf16.msra.mxu1 %v11231_v51 }
 0x6dd   : > { %10570 = vmatpush3.bf16.msra.mxu0 %v11232_v52  ;;  %10551 = vmatprep.subr.bf16.mxu1 %v13187_v2  ;;  %v11263_v52 = vld [vmem:[#allocation47 + $0x78] sm:$0xff]  }
 0x6de   : > { %10571 = vmatprep.subr.bf16.mxu0 %v13187_v2 }
 0x6e0   : > { %10552 = vmatpush3.bf16.msra.mxu1 %v11233_v53  ;;  %v11264_v53 = vld [vmem:[#allocation47 + $0x38] sm:$0xff]  }
 0x6e1   : > { %10572 = vmatpush3.bf16.msra.mxu0 %v11234_v61  ;;  %10553 = vmatprep.subr.bf16.mxu1 %v13187_v2  ;;  %v11265_v61 = vld [vmem:[#allocation47 + $0x70] sm:$0xff]  }
 0x6e2   : > { %10573 = vmatprep.subr.bf16.mxu0 %v13187_v2 }
 0x6e4   : > { %10554 = vmatpush3.bf16.msra.mxu1 %v11235_v54  ;;  %v11266_v54 = vld [vmem:[#allocation47 + $0x30] sm:$0xff]  }
 0x6e5   : > { %10574 = vmatpush3.bf16.msra.mxu0 %v11236_v62  ;;  %10555 = vmatprep.subr.bf16.mxu1 %v13187_v2  ;;  %v11267_v62 = vld [vmem:[#allocation47 + $0x68] sm:$0xff]  }
 0x6e6   : > { %10575 = vmatprep.subr.bf16.mxu0 %v13187_v2 }
 0x6e8   : > { %10556 = vmatpush3.bf16.msra.mxu1 %v11237_v55  ;;  %v11268_v55 = vld [vmem:[#allocation47 + $0x28] sm:$0xff]  }
 0x6e9   : > { %10576 = vmatpush3.bf16.msra.mxu0 %v11238_v56  ;;  %10581 = vmatprep.subr.bf16.mxu1 %v13187_v2  ;;  %v11269_v56 = vld [vmem:[#allocation47 + $0x60] sm:$0xff]  }
 0x6ea   : > { %10601 = vmatprep.subr.bf16.mxu0 %v13187_v2 }
 0x6eb   : > { %10558 = vmatmul.mubr.bf16.vlgmr.msra.gmra.mxu1 %v4222_v59  ;;  %v11270_v59 = vld [vmem:[#allocation47 + $0x20] sm:$0xff]  }
 0x6ec   : > { %10578 = vmatmul.mubr.bf16.vlgmr.msra.gmra.mxu0 %v4435_v60  ;;  %10597 = vmatprep.mubr.msk.bf16.mxu1 %vm12591_vm0, %v13187_v2  ;;  %v11275_v60 = vld [vmem:[#allocation47 + $0x48] sm:$0xff]  }
 0x6ed   : > { %10617 = vmatprep.mubr.msk.bf16.mxu0 %vm12591_vm0, %v13187_v2  ;;  %10582 = vmatpush3.bf16.msra.mxu1 %v11239_v63  ;;  %v11245_v2 = vld [vmem:[#allocation46 + $0x60] sm:$0xff]   ;;  %v11272_v63 = vld [vmem:[#allocation47 + $0x18] sm:$0xff]  }
 0x6ee   : > { %10602 = vmatpush3.bf16.msra.mxu0 %v11240_v0  ;;  %10583 = vmatprep.subr.bf16.mxu1 %v13345_v4  ;;  %v11277_v0 = vld [vmem:[#allocation47 + $0x40] sm:$0xff]  }
 0x6ef   : > { %10603 = vmatprep.subr.bf16.mxu0 %v13345_v4 }
 0x6f1   : > { %10584 = vmatpush3.bf16.msra.mxu1 %v11241_v1  ;;  %v11274_v1 = vld [vmem:[#allocation47 + $0x10] sm:$0xff]  }
 0x6f2   : > { %10604 = vmatpush3.bf16.msra.mxu0 %v11242_v3  ;;  %10585 = vmatprep.subr.bf16.mxu1 %v13345_v4  ;;  %v11276_v3 = vld [vmem:[#allocation47 + $0x8] sm:$0xff]  }
 0x6f3   : > { %10605 = vmatprep.subr.bf16.mxu0 %v13345_v4 }
 0x6f5   : > { %10586 = vmatpush3.bf16.msra.mxu1 %v11243_v5  ;;  %v11278_v5 = vld [vmem:[#allocation47] sm:$0xff]  }
 0x6f6   : > { %10606 = vmatpush3.bf16.msra.mxu0 %v11244_v6  ;;  %10587 = vmatprep.subr.bf16.mxu1 %v13345_v4 }
 0x6f7   : > { %10607 = vmatprep.subr.bf16.mxu0 %v13345_v4 }
 0x6f9   : > { %10588 = vmatpush3.bf16.msra.mxu1 %v11245_v2 }
 0x6fa   : > { %10589 = vmatprep.subr.bf16.mxu1 %v13345_v4  ;;  %10608 = vmatpush3.bf16.msra.mxu0 %v11246_v9 }
 0x6fb   : > { %10609 = vmatprep.subr.bf16.mxu0 %v13345_v4 }
 0x6fd   : > { %10590 = vmatpush3.bf16.msra.mxu1 %v11247_v7 }
 0x6fe   : > { %10591 = vmatprep.subr.bf16.mxu1 %v13345_v4  ;;  %10610 = vmatpush3.bf16.msra.mxu0 %v11248_v11 }
 0x6ff   : > { %10611 = vmatprep.subr.bf16.mxu0 %v13345_v4 }
 0x701   : > { %10592 = vmatpush3.bf16.msra.mxu1 %v11249_v8 }
 0x702   : > { %10593 = vmatprep.subr.bf16.mxu1 %v13345_v4  ;;  %10612 = vmatpush3.bf16.msra.mxu0 %v11250_v13  ;;  %v9325_v13 = vld [vmem:[#allocation43] ss:$0 sm:$0xff] }
 0x703   : > { %10613 = vmatprep.subr.bf16.mxu0 %v13345_v4 }
 0x705   : > { %10594 = vmatpush3.bf16.msra.mxu1 %v11251_v10 }
 0x706   : > { %10595 = vmatprep.subr.bf16.mxu1 %v13345_v4  ;;  %10614 = vmatpush3.bf16.msra.mxu0 %v11252_v14 }
 0x707   : > { %10615 = vmatprep.subr.bf16.mxu0 %v13345_v4 }
 0x709   : > { %10596 = vmatpush3.bf16.msra.mxu1 %v11253_v12 }
 0x70a   : > { %10621 = vmatprep.subr.bf16.mxu1 %v13345_v4  ;;  %10616 = vmatpush3.bf16.msra.mxu0 %v11254_v15 }
 0x70b   : > { %10641 = vmatprep.subr.bf16.mxu0 %v13345_v4 }
 0x78b   : > { %v13363_v16 = vpop.f32.mrf.mxu1 }
 0x78c   : > { %v4339_v17 = vpop.f32.mrf.mxu0 }
 0x78d   : > { %v10519_v18 = vpop.f32.mrf.mxu1 }
 0x78e   : > { %v10539_v19 = vpop.f32.mrf.mxu0  ;;  %v4209_v18 = vmul.f32 %v9325_v13, %v13363_v16  ;;  %v11280_v16 = vld [vmem:[#allocation47 + $0xb0] sm:$0xff]  }
 0x78f   : > { %v4199_v20 = vpop.f32.mrf.mxu1 }
 0x790   : > { %v4342_v21 = vpop.f32.mrf.mxu0  ;;  %v9326_v20 = vld [vmem:[%s13910_s10] ss:$0 sm:$0xff]  ;;  %s13925_s10 = sld [smem:[#allocation98_spill]] }
 0x791   : > { %v10520_v22 = vpop.f32.mrf.mxu1  ;;  %v9378_v21 = vld [vmem:[%s13911_s13] ss:$0 sm:$0xff]  ;;  %s13926_s13 = sld [smem:[#allocation96_spill]] }
 0x792   : > { %v10540_v23 = vpop.f32.mrf.mxu0 }
 0x7ab   : > { %v4427_v24 = vpop.f32.mrf.mxu1 }
 0x7ac   : > { %v4534_v25 = vpop.f32.mrf.mxu0  ;;  %v4428_v26 = vadd.f32 %v4427_v24, %v4339_v17  ;;  %v9377_v17 = vld [vmem:[%s13909_s19] ss:$0 sm:$0xff]  ;;  %s13924_s19 = sld [smem:[#allocation94_spill]] }
 0x7ad   : > { %v10559_v28 = vpop.f32.mrf.mxu1 }
 0x7ae   : > { %v10579_v29 = vpop.f32.mrf.mxu0  ;;  %v4540_v30 = vadd.f32 %v4534_v25, %v4428_v26  ;;  %v4217_v25 = vadd.f32 %v9326_v20, %v4209_v18 }
 0x7af   : > { %v4430_v32 = vpop.f32.mrf.mxu1 }
 0x7b0   : > { %v4537_v33 = vpop.f32.mrf.mxu0  ;;  %v4548_v34 = vmul.f32 %v9351_v27, %v4540_v30  ;;  %v11279_v30 = vld [vmem:[#allocation47 + $0xb8] sm:$0xff]  }
 0x7b1   : > { %v10560_v35 = vpop.f32.mrf.mxu1  ;;  %v11281_v33 = vld [vmem:[#allocation47 + $0xa8] sm:$0xff]  }
 0x7b2   : > { %v10580_v36 = vpop.f32.mrf.mxu0  ;;  %v4556_v37 = vadd.f32 %v9352_v31, %v4548_v34  ;;  %v11282_v35 = vld [vmem:[#allocation47 + $0xa0] sm:$0xff]  }
 0x7b3   : > { %v11283_v36 = vld [vmem:[#allocation47 + $0x98] sm:$0xff]  }
 0x7b4   : > { %v4557_v38 = vmax.f32 %v4556_v37, 0.0  ;;  %v11284_v37 = vld [vmem:[#allocation47 + $0x90] sm:$0xff]  }
 0x7b6   : > { %4558 = vst [vmem:[#allocation9 + $0x1] sm:$0xff] %v4557_v38  ;;  %v4580_v40 = vpack.c.bf16 %v4557_v38, %v4557_v38  ;;  %v11285_v38 = vld [vmem:[#allocation47 + $0x88] sm:$0xff]  }
 0x7b8   : > { %10598 = vmatmul.mubr.bf16.vlgmr.msra.gmra.mxu1 %v4580_v40 }
 0x7b9   : > { %10622 = vmatpush3.bf16.msra.mxu1 %v11255_v39  ;;  %10637 = vmatprep.mubr.msk.bf16.mxu1 %vm12591_vm0, %v13345_v4  ;;  %v11286_v39 = vld [vmem:[#allocation47 + $0x80] sm:$0xff]  }
 0x7ba   : > { %10623 = vmatprep.subr.bf16.mxu1 %v13345_v4 }
 0x7bd   : > { %v4561_v42 = vld [vmem:[#allocation9] sm:$0xff]  ;;  %10624 = vmatpush3.bf16.msra.mxu1 %v11256_v41 }
 0x7be   : > { %v4562_v44 = vpack.c.bf16 %v4561_v42, %v4561_v42  ;;  %10625 = vmatprep.subr.bf16.mxu1 %v13345_v4  ;;  %v4773_v49 = vld [vmem:[#allocation9 + $0x2] sm:$0xff] }
 0x7bf   : > { %v4774_v51 = vpack.c.bf16 %v4773_v49, %v4773_v49  ;;  %v11287_v42 = vld [vmem:[%s13912_s22 + $0x78] sm:$0xff]   ;;  %v11297_v49 = vld [vmem:[%s13912_s22 + $0x50] sm:$0xff]  }
 0x7c0   : > { %10618 = vmatmul.mubr.bf16.vlgmr.msra.gmra.mxu0 %v4562_v44  ;;  %v11288_v44 = vld [vmem:[%s13912_s22 + $0x38] sm:$0xff]  }
 0x7c1   : > { %10626 = vmatpush3.bf16.msra.mxu1 %v11257_v43  ;;  %10657 = vmatprep.mubr.msk.bf16.mxu0 %vm12591_vm0, %v13345_v4  ;;  %v11289_v43 = vld [vmem:[%s13912_s22 + $0x70] sm:$0xff]  }
 0x7c2   : > { %10627 = vmatprep.subr.bf16.mxu1 %v13345_v4  ;;  %10642 = vmatpush3.bf16.msra.mxu0 %v11263_v52  ;;  %v11299_v52 = vld [vmem:[%s13912_s22 + $0x48] sm:$0xff]  }
 0x7c3   : > { %10643 = vmatprep.subr.bf16.mxu0 %v13345_v4 }
 0x7c5   : > { %10628 = vmatpush3.bf16.msra.mxu1 %v11258_v45  ;;  %v11291_v45 = vld [vmem:[%s13912_s22 + $0x68] sm:$0xff]  }
 0x7c6   : > { %10629 = vmatprep.subr.bf16.mxu1 %v13345_v4  ;;  %10644 = vmatpush3.bf16.msra.mxu0 %v11265_v61  ;;  %v11301_v61 = vld [vmem:[%s13912_s22 + $0x40] sm:$0xff]  }
 0x7c7   : > { %10645 = vmatprep.subr.bf16.mxu0 %v13345_v4 }
 0x7c9   : > { %10630 = vmatpush3.bf16.msra.mxu1 %v11259_v47  ;;  %v11290_v47 = vld [vmem:[%s13912_s22 + $0x30] sm:$0xff]  }
 0x7ca   : > { %10631 = vmatprep.subr.bf16.mxu1 %v13345_v4  ;;  %10646 = vmatpush3.bf16.msra.mxu0 %v11267_v62  ;;  %v11300_v62 = vld [vmem:[%s13912_s22 + $0x8] sm:$0xff]  }
 0x7cb   : > { %10647 = vmatprep.subr.bf16.mxu0 %v13345_v4 }
 0x7cd   : > { %10632 = vmatpush3.bf16.msra.mxu1 %v11260_v50  ;;  %v11293_v50 = vld [vmem:[%s13912_s22 + $0x60] sm:$0xff]  }
 0x7ce   : > { %10633 = vmatprep.subr.bf16.mxu1 %v13345_v4  ;;  %10648 = vmatpush3.bf16.msra.mxu0 %v11269_v56 }
 0x7cf   : > { %10649 = vmatprep.subr.bf16.mxu0 %v13345_v4 }
 0x7d1   : > { %10634 = vmatpush3.bf16.msra.mxu1 %v11261_v46  ;;  %v11292_v46 = vld [vmem:[%s13912_s22 + $0x28] sm:$0xff]  }
 0x7d2   : > { %10635 = vmatprep.subr.bf16.mxu1 %v13345_v4  ;;  %10650 = vmatpush3.bf16.msra.mxu0 %v11271_v57 }
 0x7d3   : > { %10651 = vmatprep.subr.bf16.mxu0 %v13345_v4 }
 0x7d5   : > { %10636 = vmatpush3.bf16.msra.mxu1 %v11262_v48  ;;  %v11295_v48 = vld [vmem:[%s13912_s22 + $0x58] sm:$0xff]  }
 0x7d6   : > { %10661 = vmatprep.subr.bf16.mxu1 %v13345_v4  ;;  %10652 = vmatpush3.bf16.msra.mxu0 %v11273_v58 }
 0x7d7   : > { %10653 = vmatprep.subr.bf16.mxu0 %v13345_v4 }
 0x7d8   : > { %10638 = vmatmul.mubr.bf16.vlgmr.msra.gmra.mxu1 %v4774_v51  ;;  %v11294_v51 = vld [vmem:[%s13912_s22 + $0x20] sm:$0xff]  }
 0x7d9   : > { %10677 = vmatprep.mubr.msk.bf16.mxu1 %vm12591_vm0, %v13345_v4  ;;  %10662 = vmatpush3.bf16.msra.mxu1 %v11264_v53  ;;  %v11296_v53 = vld [vmem:[%s13912_s22 + $0x18] sm:$0xff]  }
 0x7da   : > { %10663 = vmatprep.subr.bf16.mxu1 %v13345_v4  ;;  %10654 = vmatpush3.bf16.msra.mxu0 %v11275_v60 }
 0x7db   : > { %10655 = vmatprep.subr.bf16.mxu0 %v13345_v4 }
 0x7dd   : > { %10664 = vmatpush3.bf16.msra.mxu1 %v11266_v54  ;;  %v11298_v54 = vld [vmem:[%s13912_s22 + $0x10] sm:$0xff]  }
 0x7de   : > { %10665 = vmatprep.subr.bf16.mxu1 %v13345_v4  ;;  %10656 = vmatpush3.bf16.msra.mxu0 %v11277_v0 }
 0x7df   : > { %10681 = vmatprep.subr.bf16.mxu0 %v13345_v4 }
 0x7e1   : > { %10666 = vmatpush3.bf16.msra.mxu1 %v11268_v55  ;;  %v11302_v55 = vld [vmem:[%s13912_s22] sm:$0xff]  }
 0x7e2   : > { %10667 = vmatprep.subr.bf16.mxu1 %v13345_v4 }
 0x7e5   : > { %10668 = vmatpush3.bf16.msra.mxu1 %v11270_v59 }
 0x7e6   : > { %10669 = vmatprep.subr.bf16.mxu1 %v13345_v4 }
 0x7e9   : > { %10670 = vmatpush3.bf16.msra.mxu1 %v11272_v63 }
 0x7ea   : > { %10671 = vmatprep.subr.bf16.mxu1 %v13345_v4 }
 0x7ed   : > { %10672 = vmatpush3.bf16.msra.mxu1 %v11274_v1 }
 0x7ee   : > { %10673 = vmatprep.subr.bf16.mxu1 %v13345_v4 }
 0x7f1   : > { %10674 = vmatpush3.bf16.msra.mxu1 %v11276_v3 }
 0x7f2   : > { %10675 = vmatprep.subr.bf16.mxu1 %v13345_v4 }
 0x7f5   : > { %10676 = vmatpush3.bf16.msra.mxu1 %v11278_v5 }
 0x7f6   : > { %10701 = vmatprep.subr.bf16.mxu1 %v13345_v4 }
 0x878   : > { %v4679_v6 = vpop.f32.mrf.mxu1 }
 0x87a   : > { %v10599_v2 = vpop.f32.mrf.mxu1 }
 0x87c   : > { %v4682_v7 = vpop.f32.mrf.mxu1 }
 0x87d   : > { %v9404_v7 = vld [vmem:[%s13914_s4] ss:$0 sm:$0xff]  ;;  %s13928_s4 = sld [smem:[#allocation99_spill]] }
 0x87e   : > { %v10600_v8 = vpop.f32.mrf.mxu1 }
 0x880   : > { %v4767_v9 = vpop.f32.mrf.mxu0 }
 0x881   : > { %v4768_v14 = vadd.f32 %v4767_v9, %v4679_v6  ;;  %v9403_v6 = vld [vmem:[%s13913_s1] ss:$0 sm:$0xff]  ;;  %s13927_s1 = sld [smem:[#allocation97_spill]] }
 0x882   : > { %v10619_v10 = vpop.f32.mrf.mxu0 }
 0x884   : > { %v4770_v11 = vpop.f32.mrf.mxu0 }
 0x886   : > { %v10620_v12 = vpop.f32.mrf.mxu0 }
 0x898   : > { %v4873_v15 = vpop.f32.mrf.mxu1 }
 0x899   : > { %v4879_v19 = vadd.f32 %v4873_v15, %v4768_v14  ;;  %v11303_v14 = vld [vmem:[%s13912_s22 + $0xb8] sm:$0xff]  }
 0x89a   : > { %v10639_v22 = vpop.f32.mrf.mxu1 }
 0x89b   : > { %v4887_v23 = vmul.f32 %v9377_v17, %v4879_v19  ;;  %v11304_v17 = vld [vmem:[%s13912_s22 + $0xb0] sm:$0xff]   ;;  %v11305_v19 = vld [vmem:[%s13912_s22 + $0xa8] sm:$0xff]   ;;  %v11307_v22 = vld [vmem:[%s13912_s22 + $0x98] sm:$0xff]  }
 0x89c   : > { %v4876_v24 = vpop.f32.mrf.mxu1 }
 0x89d   : > { %v4895_v26 = vadd.f32 %v9378_v21, %v4887_v23  ;;  %v11306_v21 = vld [vmem:[%s13912_s22 + $0xa0] sm:$0xff]   ;;  %v11308_v23 = vld [vmem:[%s13912_s22 + $0x90] sm:$0xff]   ;;  %v11309_v24 = vld [vmem:[%s13912_s22 + $0x88] sm:$0xff]  }
 0x89e   : > { %v10640_v27 = vpop.f32.mrf.mxu1 }
 0x89f   : > { %v4897_v28 = vadd.f32 %v4895_v26, %v4217_v25  ;;  %v11310_v25 = vld [vmem:[%s13912_s22 + $0x80] sm:$0xff]  }
 0x8a1   : > { %v13401_v29 = vmax.f32 %v4897_v28, 0.0  ;;  %v11311_v28 = vld [vmem:[#allocation49 + $0x70] ss:$8 sps:$4 sm:$0xff]  }
 0x8a3   : > { %4899 = vst [vmem:[#allocation10 + $0x1] sm:$0xff] %v13401_v29  ;;  %v4921_v31 = vpack.c.bf16 %v13401_v29, %v13401_v29 }
 0x8a5   : > { %10658 = vmatmul.mubr.bf16.vlgmr.msra.gmra.mxu0 %v4921_v31  ;;  %v11314_v31 = vld [vmem:[#allocation50 + $0xf0] ss:$8 sps:$4 sm:$0xff]  }
 0x8a6   : > { %10682 = vmatpush3.bf16.msra.mxu0 %v11279_v30  ;;  %10697 = vmatprep.mubr.msk.bf16.mxu0 %vm12591_vm0, %v13345_v4  ;;  %v11313_v30 = vld [vmem:[#allocation49 + $0x74] ss:$8 sps:$4 sm:$0xff]  }
 0x8a7   : > { %10683 = vmatprep.subr.bf16.mxu0 %v13345_v4 }
 0x8aa   : > { %v4902_v32 = vld [vmem:[#allocation10] sm:$0xff]  ;;  %10684 = vmatpush3.bf16.msra.mxu0 %v11280_v16  ;;  %v11316_v16 = vld [vmem:[#allocation50 + $0xf4] ss:$8 sps:$4 sm:$0xff]  }
 0x8ab   : > { %v4903_v34 = vpack.c.bf16 %v4902_v32, %v4902_v32  ;;  %10685 = vmatprep.subr.bf16.mxu0 %v13345_v4  ;;  %v5114_v40 = vld [vmem:[#allocation10 + $0x2] sm:$0xff] }
 0x8ac   : > { %v5115_v41 = vpack.c.bf16 %v5114_v40, %v5114_v40  ;;  %v11319_v32 = vld [vmem:[#allocation49 + $0x64] ss:$8 sps:$4 sm:$0xff]  }
 0x8ad   : > { %10678 = vmatmul.mubr.bf16.vlgmr.msra.gmra.mxu1 %v4903_v34  ;;  %v11317_v34 = vld [vmem:[#allocation49 + $0x60] ss:$8 sps:$4 sm:$0xff]   ;;  %v11334_v40 = vld [vmem:[#allocation50 + $0xc4] ss:$8 sps:$4 sm:$0xff]  }
 0x8ae   : > { %10686 = vmatpush3.bf16.msra.mxu0 %v11281_v33  ;;  %10717 = vmatprep.mubr.msk.bf16.mxu1 %vm12591_vm0, %v13345_v4  ;;  %v11322_v33 = vld [vmem:[#allocation50 + $0xe4] ss:$8 sps:$4 sm:$0xff]  }
 0x8af   : > { %10687 = vmatprep.subr.bf16.mxu0 %v13345_v4  ;;  %10702 = vmatpush3.bf16.msra.mxu1 %v11287_v42  ;;  %v11332_v42 = vld [vmem:[#allocation50 + $0xc0] ss:$8 sps:$4 sm:$0xff]  }
 0x8b0   : > { %10703 = vmatprep.subr.bf16.mxu1 %v13345_v4 }
 0x8b2   : > { %10688 = vmatpush3.bf16.msra.mxu0 %v11282_v35  ;;  %v11320_v35 = vld [vmem:[#allocation50 + $0xe0] ss:$8 sps:$4 sm:$0xff]  }
 0x8b3   : > { %10689 = vmatprep.subr.bf16.mxu0 %v13345_v4  ;;  %10704 = vmatpush3.bf16.msra.mxu1 %v11289_v43  ;;  %v11337_v43 = vld [vmem:[#allocation49 + $0x34] ss:$8 sps:$4 sm:$0xff]  }
 0x8b4   : > { %10705 = vmatprep.subr.bf16.mxu1 %v13345_v4 }
 0x8b6   : > { %10690 = vmatpush3.bf16.msra.mxu0 %v11283_v36  ;;  %v11325_v36 = vld [vmem:[#allocation49 + $0x54] ss:$8 sps:$4 sm:$0xff]  }
 0x8b7   : > { %10691 = vmatprep.subr.bf16.mxu0 %v13345_v4  ;;  %10706 = vmatpush3.bf16.msra.mxu1 %v11291_v45  ;;  %v11335_v45 = vld [vmem:[#allocation49 + $0x30] ss:$8 sps:$4 sm:$0xff]  }
 0x8b8   : > { %10707 = vmatprep.subr.bf16.mxu1 %v13345_v4 }
 0x8ba   : > { %10692 = vmatpush3.bf16.msra.mxu0 %v11284_v37  ;;  %v11323_v37 = vld [vmem:[#allocation49 + $0x50] ss:$8 sps:$4 sm:$0xff]  }
 0x8bb   : > { %10693 = vmatprep.subr.bf16.mxu0 %v13345_v4  ;;  %10708 = vmatpush3.bf16.msra.mxu1 %v11293_v50  ;;  %v11343_v50 = vld [vmem:[#allocation49 + $0x24] ss:$8 sps:$4 sm:$0xff]  }
 0x8bc   : > { %10709 = vmatprep.subr.bf16.mxu1 %v13345_v4 }
 0x8be   : > { %10694 = vmatpush3.bf16.msra.mxu0 %v11285_v38  ;;  %v11326_v38 = vld [vmem:[#allocation50 + $0xd0] ss:$8 sps:$4 sm:$0xff]  }
 0x8bf   : > { %10695 = vmatprep.subr.bf16.mxu0 %v13345_v4  ;;  %10710 = vmatpush3.bf16.msra.mxu1 %v11295_v48  ;;  %v11341_v48 = vld [vmem:[#allocation49 + $0x20] ss:$8 sps:$4 sm:$0xff]  }
 0x8c0   : > { %10711 = vmatprep.subr.bf16.mxu1 %v13345_v4 }
 0x8c2   : > { %10696 = vmatpush3.bf16.msra.mxu0 %v11286_v39  ;;  %v11331_v39 = vld [vmem:[#allocation49 + $0x44] ss:$8 sps:$4 sm:$0xff]  }
 0x8c3   : > { %10721 = vmatprep.subr.bf16.mxu0 %v13345_v4  ;;  %10712 = vmatpush3.bf16.msra.mxu1 %v11297_v49  ;;  %v11344_v49 = vld [vmem:[#allocation50 + $0xa0] ss:$8 sps:$4 sm:$0xff]  }
 0x8c4   : > { %10713 = vmatprep.subr.bf16.mxu1 %v13345_v4 }
 0x8c5   : > { %10698 = vmatmul.mubr.bf16.vlgmr.msra.gmra.mxu0 %v5115_v41  ;;  %v11329_v41 = vld [vmem:[#allocation49 + $0x40] ss:$8 sps:$4 sm:$0xff]  }
 0x8c6   : > { %10737 = vmatprep.mubr.msk.bf16.mxu0 %vm12591_vm0, %v13345_v4  ;;  %10722 = vmatpush3.bf16.msra.mxu0 %v11288_v44  ;;  %v11340_v44 = vld [vmem:[#allocation50 + $0xb4] ss:$8 sps:$4 sm:$0xff]  }
 0x8c7   : > { %10723 = vmatprep.subr.bf16.mxu0 %v13345_v4  ;;  %10714 = vmatpush3.bf16.msra.mxu1 %v11299_v52  ;;  %v11352_v52 = vld [vmem:[#allocation50 + $0x94] ss:$8 sps:$4 sm:$0xff]  }
 0x8c8   : > { %10715 = vmatprep.subr.bf16.mxu1 %v13345_v4 }
 0x8ca   : > { %10724 = vmatpush3.bf16.msra.mxu0 %v11290_v47  ;;  %v11338_v47 = vld [vmem:[#allocation50 + $0xb0] ss:$8 sps:$4 sm:$0xff]  }
 0x8cb   : > { %10725 = vmatprep.subr.bf16.mxu0 %v13345_v4  ;;  %10716 = vmatpush3.bf16.msra.mxu1 %v11301_v61  ;;  %v11350_v61 = vld [vmem:[#allocation50 + $0x90] ss:$8 sps:$4 sm:$0xff]  }
 0x8cc   : > { %10741 = vmatprep.subr.bf16.mxu1 %v13345_v4 }
 0x8ce   : > { %10726 = vmatpush3.bf16.msra.mxu0 %v11292_v46  ;;  %v11346_v46 = vld [vmem:[#allocation50 + $0xa4] ss:$8 sps:$4 sm:$0xff]  }
 0x8cf   : > { %10727 = vmatprep.subr.bf16.mxu0 %v13345_v4 }
 0x8d2   : > { %10728 = vmatpush3.bf16.msra.mxu0 %v11294_v51  ;;  %v11349_v51 = vld [vmem:[#allocation49 + $0x14] ss:$8 sps:$4 sm:$0xff]  }
 0x8d3   : > { %10729 = vmatprep.subr.bf16.mxu0 %v13345_v4 }
 0x8d6   : > { %10730 = vmatpush3.bf16.msra.mxu0 %v11296_v53  ;;  %v11347_v53 = vld [vmem:[#allocation49 + $0x10] ss:$8 sps:$4 sm:$0xff]  }
 0x8d7   : > { %10731 = vmatprep.subr.bf16.mxu0 %v13345_v4 }
 0x8da   : > { %10732 = vmatpush3.bf16.msra.mxu0 %v11298_v54  ;;  %v11355_v54 = vld [vmem:[#allocation49 + $0x4] ss:$8 sps:$4 sm:$0xff]  }
 0x8db   : > { %10733 = vmatprep.subr.bf16.mxu0 %v13345_v4 }
 0x8de   : > { %10734 = vmatpush3.bf16.msra.mxu0 %v11300_v62  ;;  %v11358_v62 = vld [vmem:[#allocation50 + $0x84] ss:$8 sps:$4 sm:$0xff]  }
 0x8df   : > { %10735 = vmatprep.subr.bf16.mxu0 %v13345_v4 }
 0x8e2   : > { %10736 = vmatpush3.bf16.msra.mxu0 %v11302_v55  ;;  %v11353_v55 = vld [vmem:[#allocation49] ss:$8 sps:$4 sm:$0xff]  }
 0x8e3   : > { %5679 = vmatprep.subr.bf16.mxu0 %v11313_v30  ;;  %v11368_v30 = vld [vmem:[#allocation50 + $0x160] ss:$8 sps:$4 sm:$0xff]  }
 0x965   : > { %v5020_v56 = vpop.f32.mrf.mxu0 }
 0x967   : > { %v10659_v57 = vpop.f32.mrf.mxu0 }
 0x968   : > { %v11361_v57 = vld [vmem:[#allocation50 + $0x74] ss:$8 sps:$4 sm:$0xff]  }
 0x969   : > { %v5023_v58 = vpop.f32.mrf.mxu0 }
 0x96a   : > { %v11364_v58 = vld [vmem:[#allocation50 + $0x174] ss:$8 sps:$4 sm:$0xff]  }
 0x96b   : > { %v10660_v59 = vpop.f32.mrf.mxu0 }
 0x96c   : > { %v12592_v59 = vmov 0  }
 0x96d   : > { %v5108_v60 = vpop.f32.mrf.mxu1 }
 0x96e   : > { %v5109_v3 = vadd.f32 %v5108_v60, %v5020_v56  ;;  %v11356_v56 = vld [vmem:[#allocation50 + $0x80] ss:$8 sps:$4 sm:$0xff]  }
 0x96f   : > { %v10679_v63 = vpop.f32.mrf.mxu1 }
 0x971   : > { %v5111_v0 = vpop.f32.mrf.mxu1 }
 0x973   : > { %v10680_v1 = vpop.f32.mrf.mxu1 }
 0x985   : > { %v5214_v5 = vpop.f32.mrf.mxu0 }
 0x986   : > { %v5220_v2 = vadd.f32 %v5214_v5, %v5109_v3 }
 0x987   : > { %v10699_v8 = vpop.f32.mrf.mxu0 }
 0x988   : > { %v5228_v9 = vmul.f32 %v9403_v6, %v5220_v2 }
 0x989   : > { %v5217_v10 = vpop.f32.mrf.mxu0 }
 0x98a   : > { %v5236_v11 = vadd.f32 %v9404_v7, %v5228_v9  ;;  %v9429_v9 = vld [vmem:[%s13915_s0] ss:$0 sm:$0xff]  ;;  %s9127_s0 = sshll.u32 %s13932_s2, 3 }
 0x98b   : > { %v10700_v12 = vpop.f32.mrf.mxu0 }
 0x98c   : > { %v5237_v13 = vmax.f32 %v5236_v11, 0.0  ;;  %v9430_v11 = vld [vmem:[%s13916_s23] ss:$0 sm:$0xff]  ;;  %s1746_s23 = scalar_lea.vmem %s12841_s6, %s9127_s0 }
 0x98e   : > { %5238 = vst [vmem:[#allocation11 + $0x1] sm:$0xff] %v5237_v13  ;;  %v5260_v15 = vpack.c.bf16 %v5237_v13, %v5237_v13 }
 0x990   : > { %10718 = vmatmul.mubr.bf16.vlgmr.msra.gmra.mxu1 %v5260_v15 }
 0x991   : > { %10742 = vmatpush3.bf16.msra.mxu1 %v11303_v14  ;;  %10757 = vmatprep.mubr.msk.bf16.mxu1 %vm12591_vm0, %v13345_v4 }
 0x992   : > { %10743 = vmatprep.subr.bf16.mxu1 %v13345_v4 }
 0x995   : > { %v5241_v18 = vld [vmem:[#allocation11] sm:$0xff]  ;;  %10744 = vmatpush3.bf16.msra.mxu1 %v11304_v17 }
 0x996   : > { %v5242_v20 = vpack.c.bf16 %v5241_v18, %v5241_v18  ;;  %10745 = vmatprep.subr.bf16.mxu1 %v13345_v4  ;;  %v5453_v26 = vld [vmem:[#allocation11 + $0x2] sm:$0xff] }
 0x997   : > { %v5454_v27 = vpack.c.bf16 %v5453_v26, %v5453_v26  ;;  %v11367_v26 = vld [vmem:[#allocation50 + $0x64] ss:$8 sps:$4 sm:$0xff]  }
 0x998   : > { %10738 = vmatmul.mubr.bf16.vlgmr.msra.gmra.mxu0 %v5242_v20  ;;  %v11359_v20 = vld [vmem:[#allocation50 + $0x70] ss:$8 sps:$4 sm:$0xff]  }
 0x999   : > { %10746 = vmatpush3.bf16.msra.mxu1 %v11305_v19  ;;  %5680 = vmatpush1.bf16.msra.mxu0 %v11311_v28  ;;  %v11365_v28 = vld [vmem:[#allocation50 + $0x60] ss:$8 sps:$4 sm:$0xff]  }
 0x99a   : > { %10747 = vmatprep.subr.bf16.mxu1 %v13345_v4  ;;  %5681 = vmatprep.subr.bf16.mxu0 %v11319_v32  ;;  %v11374_v32 = vld [vmem:[#allocation50 + $0x150] ss:$8 sps:$4 sm:$0xff]  }
 0x99b   : > { %5711 = vmatprep.mubr.bf16.mxu0 %v12592_v59 }
 0x99d   : > { %10748 = vmatpush3.bf16.msra.mxu1 %v11306_v21  ;;  %5682 = vmatpush1.bf16.msra.mxu0 %v11317_v34  ;;  %v11362_v21 = vld [vmem:[#allocation50 + $0x170] ss:$8 sps:$4 sm:$0xff]   ;;  %v11382_v34 = vld [vmem:[#allocation50 + $0x144] ss:$8 sps:$4 sm:$0xff]  }
 0x99e   : > { %10749 = vmatprep.subr.bf16.mxu1 %v13345_v4  ;;  %5683 = vmatprep.subr.bf16.mxu0 %v11325_v36  ;;  %v11380_v36 = vld [vmem:[#allocation50 + $0x140] ss:$8 sps:$4 sm:$0xff]  }
 0x9a1   : > { %10750 = vmatpush3.bf16.msra.mxu1 %v11307_v22  ;;  %5684 = vmatpush1.bf16.msra.mxu0 %v11323_v37  ;;  %v11388_v37 = vld [vmem:[#allocation50 + $0x134] ss:$8 sps:$4 sm:$0xff]  }
 0x9a2   : > { %10751 = vmatprep.subr.bf16.mxu1 %v13345_v4  ;;  %5685 = vmatprep.subr.bf16.mxu0 %v11331_v39  ;;  %v11386_v39 = vld [vmem:[#allocation50 + $0x130] ss:$8 sps:$4 sm:$0xff]  }
 0x9a5   : > { %10752 = vmatpush3.bf16.msra.mxu1 %v11308_v23  ;;  %5686 = vmatpush1.bf16.msra.mxu0 %v11329_v41  ;;  %v11394_v41 = vld [vmem:[#allocation50 + $0x124] ss:$8 sps:$4 sm:$0xff]  }
 0x9a6   : > { %10753 = vmatprep.subr.bf16.mxu1 %v13345_v4  ;;  %5687 = vmatprep.subr.bf16.mxu0 %v11337_v43  ;;  %v11392_v43 = vld [vmem:[#allocation50 + $0x120] ss:$8 sps:$4 sm:$0xff]  }
 0x9a9   : > { %10754 = vmatpush3.bf16.msra.mxu1 %v11309_v24  ;;  %5688 = vmatpush1.bf16.msra.mxu0 %v11335_v45  ;;  %v11400_v45 = vld [vmem:[#allocation50 + $0x114] ss:$8 sps:$4 sm:$0xff]  }
 0x9aa   : > { %10755 = vmatprep.subr.bf16.mxu1 %v13345_v4  ;;  %v11328_v4 = vld [vmem:[#allocation50 + $0xd4] ss:$8 sps:$4 sm:$0xff]   ;;  %5689 = vmatprep.subr.bf16.mxu0 %v11343_v50  ;;  %v11398_v50 = vld [vmem:[#allocation50 + $0x110] ss:$8 sps:$4 sm:$0xff]  }
 0x9ad   : > { %10756 = vmatpush3.bf16.msra.mxu1 %v11310_v25  ;;  %5690 = vmatpush1.bf16.msra.mxu0 %v11341_v48  ;;  %v11406_v48 = vld [vmem:[#allocation50 + $0x104] ss:$8 sps:$4 sm:$0xff]  }
 0x9ae   : > { %5871 = vmatprep.subr.bf16.mxu1 %v11316_v16  ;;  %5691 = vmatprep.subr.bf16.mxu0 %v11349_v51  ;;  %v11371_v16 = vld [vmem:[#allocation50 + $0x50] ss:$8 sps:$4 sm:$0xff]   ;;  %v11404_v51 = vld [vmem:[#allocation50 + $0x100] ss:$8 sps:$4 sm:$0xff]  }
 0x9b0   : > { %10758 = vmatmul.mubr.bf16.vlgmr.msra.gmra.mxu1 %v5454_v27  ;;  %v11370_v27 = vld [vmem:[#allocation50 + $0x164] ss:$8 sps:$4 sm:$0xff]  }
 0x9b1   : > { %5872 = vmatpush1.bf16.msra.mxu1 %v11314_v31  ;;  %5692 = vmatpush1.bf16.msra.mxu0 %v11347_v53  ;;  %v11373_v31 = vld [vmem:[#allocation50 + $0x54] ss:$8 sps:$4 sm:$0xff]  }
 0x9b2   : > { %5873 = vmatprep.subr.bf16.mxu1 %v11322_v33  ;;  %5693 = vmatprep.subr.bf16.mxu0 %v11355_v54  ;;  %v11379_v33 = vld [vmem:[#allocation50 + $0x44] ss:$8 sps:$4 sm:$0xff]   ;;  %v11415_v53 = vld [vmem:[%s13917_s8 + $0x174] ss:$8 sps:$4 sm:$0xff]  }
 0x9b3   : > { %5903 = vmatprep.mubr.bf16.mxu1 %v12592_v59 }
 0x9b5   : > { %5874 = vmatpush1.bf16.msra.mxu1 %v11320_v35  ;;  %5694 = vmatpush1.bf16.msra.mxu0 %v11353_v55  ;;  %v11377_v35 = vld [vmem:[#allocation50 + $0x40] ss:$8 sps:$4 sm:$0xff]   ;;  %v11413_v55 = vld [vmem:[%s13917_s8 + $0x170] ss:$8 sps:$4 sm:$0xff]  }
 0x9b6   : > { %5875 = vmatprep.subr.bf16.mxu1 %v11328_v4  ;;  %5992 = vmatprep.subr.bf16.mxu0 %v11361_v57  ;;  %v11385_v4 = vld [vmem:[#allocation50 + $0x34] ss:$8 sps:$4 sm:$0xff]  }
 0x9b9   : > { %5876 = vmatpush1.bf16.msra.mxu1 %v11326_v38  ;;  %v11383_v38 = vld [vmem:[#allocation50 + $0x30] ss:$8 sps:$4 sm:$0xff]  }
 0x9ba   : > { %5877 = vmatprep.subr.bf16.mxu1 %v11334_v40  ;;  %v11391_v40 = vld [vmem:[#allocation50 + $0x24] ss:$8 sps:$4 sm:$0xff]  }
 0x9bd   : > { %5878 = vmatpush1.bf16.msra.mxu1 %v11332_v42  ;;  %v11389_v42 = vld [vmem:[#allocation50 + $0x20] ss:$8 sps:$4 sm:$0xff]  }
 0x9be   : > { %5879 = vmatprep.subr.bf16.mxu1 %v11340_v44  ;;  %v11397_v44 = vld [vmem:[#allocation50 + $0x14] ss:$8 sps:$4 sm:$0xff]  }
 0x9c1   : > { %5880 = vmatpush1.bf16.msra.mxu1 %v11338_v47  ;;  %v11395_v47 = vld [vmem:[#allocation50 + $0x10] ss:$8 sps:$4 sm:$0xff]  }
 0x9c2   : > { %5881 = vmatprep.subr.bf16.mxu1 %v11346_v46  ;;  %v11403_v46 = vld [vmem:[#allocation50 + $0x4] ss:$8 sps:$4 sm:$0xff]  }
 0x9c5   : > { %5882 = vmatpush1.bf16.msra.mxu1 %v11344_v49  ;;  %v11401_v49 = vld [vmem:[#allocation50] ss:$8 sps:$4 sm:$0xff]  }
 0x9c6   : > { %5883 = vmatprep.subr.bf16.mxu1 %v11352_v52  ;;  %v11409_v52 = vld [vmem:[%s13917_s8 + $0x74] ss:$8 sps:$4 sm:$0xff]  }
 0x9c9   : > { %5884 = vmatpush1.bf16.msra.mxu1 %v11350_v61 }
 0x9ca   : > { %5885 = vmatprep.subr.bf16.mxu1 %v11358_v62  ;;  %v11407_v62 = vld [vmem:[%s13917_s8 + $0x70] ss:$8 sps:$4 sm:$0xff]  }
 0x9cd   : > { %5886 = vmatpush1.bf16.msra.mxu1 %v11356_v56 }
 0x9ce   : > { %6132 = vmatprep.subr.bf16.mxu1 %v11364_v58  ;;  %v11412_v58 = vld [vmem:[%s13917_s8 + $0x64] ss:$8 sps:$4 sm:$0xff]  }
 0xa50   : > { %v5359_v60 = vpop.f32.mrf.mxu1 }
 0xa52   : > { %v10719_v63 = vpop.f32.mrf.mxu1 }
 0xa53   : > { %v11416_v63 = vld [vmem:[%s13917_s8 + $0x50] ss:$8 sps:$4 sm:$0xff]  }
 0xa54   : > { %v5362_v0 = vpop.f32.mrf.mxu1 }
 0xa55   : > { %v11421_v0 = vld [vmem:[%s13917_s8 + $0x164] ss:$8 sps:$4 sm:$0xff]  }
 0xa56   : > { %v10720_v1 = vpop.f32.mrf.mxu1 }
 0xa57   : > { %v11419_v1 = vld [vmem:[%s13917_s8 + $0x160] ss:$8 sps:$4 sm:$0xff]  }
 0xa58   : > { %v5447_v3 = vpop.f32.mrf.mxu0 }
 0xa59   : > { %v5448_v7 = vadd.f32 %v5447_v3, %v5359_v60  ;;  %v11418_v60 = vld [vmem:[%s13917_s8 + $0x54] ss:$8 sps:$4 sm:$0xff]   ;;  %v11424_v3 = vld [vmem:[%s13917_s8 + $0x44] ss:$8 sps:$4 sm:$0xff]  }
 0xa5a   : > { %v10739_v5 = vpop.f32.mrf.mxu0 }
 0xa5b   : > { %v11422_v5 = vld [vmem:[%s13917_s8 + $0x40] ss:$8 sps:$4 sm:$0xff]  }
 0xa5c   : > { %v5450_v6 = vpop.f32.mrf.mxu0 }
 0xa5d   : > { %v11427_v6 = vld [vmem:[%s13917_s8 + $0x154] ss:$8 sps:$4 sm:$0xff]  }
 0xa5e   : > { %v10740_v2 = vpop.f32.mrf.mxu0 }
 0xa5f   : > { %v11425_v2 = vld [vmem:[%s13917_s8 + $0x150] ss:$8 sps:$4 sm:$0xff]  }
 0xa70   : > { %v5553_v8 = vpop.f32.mrf.mxu1 }
 0xa71   : > { %v5559_v10 = vadd.f32 %v5553_v8, %v5448_v7  ;;  %v11428_v7 = vld [vmem:[%s13917_s8 + $0x30] ss:$8 sps:$4 sm:$0xff]   ;;  %v11430_v8 = vld [vmem:[%s13917_s8 + $0x34] ss:$8 sps:$4 sm:$0xff]  }
 0xa72   : > { %v10759_v12 = vpop.f32.mrf.mxu1 }
 0xa73   : > { %v5567_v13 = vmul.f32 %v9429_v9, %v5559_v10  ;;  %v11431_v9 = vld [vmem:[%s13917_s8 + $0x140] ss:$8 sps:$4 sm:$0xff]   ;;  %v11433_v10 = vld [vmem:[%s13917_s8 + $0x144] ss:$8 sps:$4 sm:$0xff]   ;;  %v11439_v12 = vld [vmem:[%s13917_s8 + $0x134] ss:$8 sps:$4 sm:$0xff]  }
 0xa74   : > { %v5556_v14 = vpop.f32.mrf.mxu1 }
 0xa75   : > { %v5575_v15 = vadd.f32 %v9430_v11, %v5567_v13  ;;  %v11436_v11 = vld [vmem:[%s13917_s8 + $0x24] ss:$8 sps:$4 sm:$0xff]   ;;  %v11434_v13 = vld [vmem:[%s13917_s8 + $0x20] ss:$8 sps:$4 sm:$0xff]   ;;  %v11437_v14 = vld [vmem:[%s13917_s8 + $0x130] ss:$8 sps:$4 sm:$0xff]  }
 0xa76   : > { %v10760_v17 = vpop.f32.mrf.mxu1 }
 0xa77   : > { %v5577_v18 = vadd.f32 %v5575_v15, %v13401_v29  ;;  %v11376_v29 = vld [vmem:[#allocation50 + $0x154] ss:$8 sps:$4 sm:$0xff]   ;;  %v11445_v17 = vld [vmem:[%s13917_s8 + $0x124] ss:$8 sps:$4 sm:$0xff]  }
 0xa78   : > { %v11442_v15 = vld [vmem:[%s13917_s8 + $0x14] ss:$8 sps:$4 sm:$0xff]  }
 0xa79   : > { %v5578_v19 = vmax.f32 %v5577_v18, 0.0  ;;  %v11440_v18 = vld [vmem:[%s13917_s8 + $0x10] ss:$8 sps:$4 sm:$0xff]  }
 0xa7b   : > { %5579 = vst [vmem:[#allocation12 + $0x1] sm:$0xff] %v5578_v19  ;;  %v11443_v19 = vld [vmem:[%s13917_s8 + $0x120] ss:$8 sps:$4 sm:$0xff]  }
 0xa82   : > { %v5581_v22 = vld [vmem:[#allocation12 + $0x1] ss:$2 sm:$0xf]  ;;  %v5755_v61 = vld [vmem:[#allocation12] ss:$2 sm:$0xf] }
 0xa83   : > { %v5773_v23 = vld [vmem:[#allocation12 + $0x1] ss:$2 sm:$0xf]  ;;  %v5582_v24 = vpack.c.bf16 %v5581_v22, %v5581_v22  ;;  %v6034_v54 = vld [vmem:[#allocation12 + $0x2] ss:$2 sm:$0xf]  ;;  %v5756_v56 = vpack.c.bf16 %v5755_v61, %v5755_v61 }
 0xa84   : > { %v5774_v25 = vpack.c.bf16 %v5773_v23, %v5773_v23  ;;  %v6035_v57 = vpack.c.bf16 %v6034_v54, %v6034_v54  ;;  %v11446_v22 = vld [vmem:[%s13917_s8] ss:$8 sps:$4 sm:$0xff]   ;;  %v11449_v23 = vld [vmem:[%s13917_s8 + $0x110] ss:$8 sps:$4 sm:$0xff]   ;;  %v11502_v61 = vld [vmem:[%s13917_s8 + $0x184] ss:$8 sps:$4 sm:$0xff]  }
 0xa85   : > { %5712 = vmatmul.mubr.bf16.vlgmr.msra.gmra.mxu0 %v5582_v24  ;;  %v11454_v24 = vld [vmem:[%s13917_s8 + $0xf4] ss:$8 sps:$4 sm:$0xff]   ;;  %v11500_v54 = vld [vmem:[%s13917_s8 + $0x180] ss:$8 sps:$4 sm:$0xff]  }
 0xa86   : > { %5904 = vmatmul.mubr.bf16.vlgmr.msra.gmra.mxu1 %v5774_v25  ;;  %5993 = vmatpush1.bf16.msra.mxu0 %v11359_v20  ;;  %v11448_v20 = vld [vmem:[%s13917_s8 + $0x4] ss:$8 sps:$4 sm:$0xff]  }
 0xa87   : > { %6133 = vmatpush1.bf16.msra.mxu1 %v11362_v21  ;;  %5994 = vmatprep.subr.bf16.mxu0 %v11367_v26  ;;  %v11451_v21 = vld [vmem:[%s13917_s8 + $0x114] ss:$8 sps:$4 sm:$0xff]   ;;  %v11457_v25 = vld [vmem:[%s13917_s8 + $0x104] ss:$8 sps:$4 sm:$0xff]   ;;  %v11452_v26 = vld [vmem:[%s13917_s8 + $0xf0] ss:$8 sps:$4 sm:$0xff]  }
 0xa88   : > { %6134 = vmatprep.subr.bf16.mxu1 %v11370_v27  ;;  %6024 = vmatprep.mubr.bf16.mxu0 %v12592_v59  ;;  %v11455_v27 = vld [vmem:[%s13917_s8 + $0x100] ss:$8 sps:$4 sm:$0xff]  }
 0xa89   : > { %6164 = vmatprep.mubr.bf16.mxu1 %v12592_v59  ;;  %v11410_v59 = vld [vmem:[%s13917_s8 + $0x60] ss:$8 sps:$4 sm:$0xff]  }
 0xa8a   : > { %5995 = vmatpush1.bf16.msra.mxu0 %v11365_v28  ;;  %v11460_v28 = vld [vmem:[%s13917_s8 + $0xe4] ss:$8 sps:$4 sm:$0xff]  }
 0xa8b   : > { %6135 = vmatpush1.bf16.msra.mxu1 %v11368_v30  ;;  %5996 = vmatprep.subr.bf16.mxu0 %v11373_v31  ;;  %v11463_v30 = vld [vmem:[%s13917_s8 + $0x1f4] ss:$8 sps:$4 sm:$0xff]   ;;  %v11458_v31 = vld [vmem:[%s13917_s8 + $0xe0] ss:$8 sps:$4 sm:$0xff]  }
 0xa8c   : > { %6136 = vmatprep.subr.bf16.mxu1 %v11376_v29  ;;  %v11461_v29 = vld [vmem:[%s13917_s8 + $0x1f0] ss:$8 sps:$4 sm:$0xff]  }
 0xa8e   : > { %5997 = vmatpush1.bf16.msra.mxu0 %v11371_v16  ;;  %v11466_v16 = vld [vmem:[%s13917_s8 + $0xd4] ss:$8 sps:$4 sm:$0xff]  }
 0xa8f   : > { %6137 = vmatpush1.bf16.msra.mxu1 %v11374_v32  ;;  %5998 = vmatprep.subr.bf16.mxu0 %v11379_v33  ;;  %v11464_v32 = vld [vmem:[%s13917_s8 + $0xd0] ss:$8 sps:$4 sm:$0xff]   ;;  %v11469_v33 = vld [vmem:[%s13917_s8 + $0x1e4] ss:$8 sps:$4 sm:$0xff]  }
 0xa90   : > { %6138 = vmatprep.subr.bf16.mxu1 %v11382_v34  ;;  %v11467_v34 = vld [vmem:[%s13917_s8 + $0x1e0] ss:$8 sps:$4 sm:$0xff]  }
 0xa92   : > { %5999 = vmatpush1.bf16.msra.mxu0 %v11377_v35  ;;  %v11472_v35 = vld [vmem:[%s13917_s8 + $0xc4] ss:$8 sps:$4 sm:$0xff]  }
 0xa93   : > { %6139 = vmatpush1.bf16.msra.mxu1 %v11380_v36  ;;  %6000 = vmatprep.subr.bf16.mxu0 %v11385_v4  ;;  %v11470_v36 = vld [vmem:[%s13917_s8 + $0xc0] ss:$8 sps:$4 sm:$0xff]   ;;  %v11475_v4 = vld [vmem:[%s13917_s8 + $0x1d4] ss:$8 sps:$4 sm:$0xff]  }
 0xa94   : > { %6140 = vmatprep.subr.bf16.mxu1 %v11388_v37  ;;  %v11473_v37 = vld [vmem:[%s13917_s8 + $0x1d0] ss:$8 sps:$4 sm:$0xff]  }
 0xa96   : > { %6001 = vmatpush1.bf16.msra.mxu0 %v11383_v38  ;;  %v11478_v38 = vld [vmem:[%s13917_s8 + $0xb4] ss:$8 sps:$4 sm:$0xff]  }
 0xa97   : > { %6141 = vmatpush1.bf16.msra.mxu1 %v11386_v39  ;;  %6002 = vmatprep.subr.bf16.mxu0 %v11391_v40  ;;  %v11476_v39 = vld [vmem:[%s13917_s8 + $0xb0] ss:$8 sps:$4 sm:$0xff]   ;;  %v11481_v40 = vld [vmem:[%s13917_s8 + $0x1c4] ss:$8 sps:$4 sm:$0xff]  }
 0xa98   : > { %6142 = vmatprep.subr.bf16.mxu1 %v11394_v41  ;;  %v11479_v41 = vld [vmem:[%s13917_s8 + $0x1c0] ss:$8 sps:$4 sm:$0xff]  }
 0xa9a   : > { %6003 = vmatpush1.bf16.msra.mxu0 %v11389_v42  ;;  %v11484_v42 = vld [vmem:[%s13917_s8 + $0xa4] ss:$8 sps:$4 sm:$0xff]  }
 0xa9b   : > { %6143 = vmatpush1.bf16.msra.mxu1 %v11392_v43  ;;  %6004 = vmatprep.subr.bf16.mxu0 %v11397_v44  ;;  %v11482_v43 = vld [vmem:[%s13917_s8 + $0xa0] ss:$8 sps:$4 sm:$0xff]   ;;  %v11487_v44 = vld [vmem:[%s13917_s8 + $0x1b4] ss:$8 sps:$4 sm:$0xff]  }
 0xa9c   : > { %6144 = vmatprep.subr.bf16.mxu1 %v11400_v45  ;;  %v11485_v45 = vld [vmem:[%s13917_s8 + $0x1b0] ss:$8 sps:$4 sm:$0xff]  }
 0xa9e   : > { %6005 = vmatpush1.bf16.msra.mxu0 %v11395_v47  ;;  %v11488_v47 = vld [vmem:[%s13917_s8 + $0x90] ss:$8 sps:$4 sm:$0xff]  }
 0xa9f   : > { %6145 = vmatpush1.bf16.msra.mxu1 %v11398_v50  ;;  %6006 = vmatprep.subr.bf16.mxu0 %v11403_v46  ;;  %v11490_v50 = vld [vmem:[%s13917_s8 + $0x94] ss:$8 sps:$4 sm:$0xff]   ;;  %v11491_v46 = vld [vmem:[%s13917_s8 + $0x1a0] ss:$8 sps:$4 sm:$0xff]  }
 0xaa0   : > { %6146 = vmatprep.subr.bf16.mxu1 %v11406_v48  ;;  %v11493_v48 = vld [vmem:[%s13917_s8 + $0x1a4] ss:$8 sps:$4 sm:$0xff]  }
 0xaa2   : > { %6007 = vmatpush1.bf16.msra.mxu0 %v11401_v49  ;;  %v11496_v49 = vld [vmem:[%s13917_s8 + $0x84] ss:$8 sps:$4 sm:$0xff]  }
 0xaa3   : > { %6147 = vmatpush1.bf16.msra.mxu1 %v11404_v51  ;;  %6463 = vmatprep.subr.bf16.mxu0 %v11415_v53  ;;  %v11499_v51 = vld [vmem:[%s13917_s8 + $0x194] ss:$8 sps:$4 sm:$0xff]   ;;  %v11497_v53 = vld [vmem:[%s13917_s8 + $0x190] ss:$8 sps:$4 sm:$0xff]  }
 0xaa4   : > { %6664 = vmatprep.subr.bf16.mxu1 %v11409_v52  ;;  %v11494_v52 = vld [vmem:[%s13917_s8 + $0x80] ss:$8 sps:$4 sm:$0xff]  }
 0xaa5   : > { %6025 = vmatmul.mubr.bf16.vlgmr.msra.gmra.mxu0 %v5756_v56 }
 0xaa6   : > { %6165 = vmatmul.mubr.bf16.vlgmr.msra.gmra.mxu1 %v6035_v57  ;;  %6464 = vmatpush1.bf16.msra.mxu0 %v11413_v55  ;;  %v5722_v55 = vlaneseq }
 0xaa7   : > { %6665 = vmatpush1.bf16.msra.mxu1 %v11407_v62  ;;  %6465 = vmatprep.subr.bf16.mxu0 %v11421_v0  ;;  %v11505_v62 = vld [vmem:[%s13917_s8 + $0x274] ss:$8 sps:$4 sm:$0xff]  }
 0xaa8   : > { %6666 = vmatprep.subr.bf16.mxu1 %v11412_v58  ;;  %v5723_v56 = vshrl.u32 %v5722_v55, 7  ;;  %v5720_v58 = vld [vmem:[%s13918_s7] sm:$0x3] }
 0xaaa   : > { %6466 = vmatpush1.bf16.msra.mxu0 %v11419_v1  ;;  %v13538_v57 = vsub.s32 0, %v5723_v56 }
 0xaab   : > { %6667 = vmatpush1.bf16.msra.mxu1 %v11410_v59  ;;  %6467 = vmatprep.subr.bf16.mxu0 %v11427_v6  ;;  %v13541_v59 = vsub.s32 1, %v5723_v56 }
 0xaac   : > { %6668 = vmatprep.subr.bf16.mxu1 %v11418_v60  ;;  %v5725_v60 = vrot.slane %v5720_v58, %v13538_v57 }
 0xaad   : > { %v5729_v0 = vrot.slane %v5720_v58, %v13541_v59  ;;  %v11503_v58 = vld [vmem:[%s13917_s8 + $0x270] ss:$8 sps:$4 sm:$0xff]  }
 0xaae   : > { %6468 = vmatpush1.bf16.msra.mxu0 %v11425_v2 }
 0xaaf   : > { %6669 = vmatpush1.bf16.msra.mxu1 %v11416_v63  ;;  %6469 = vmatprep.subr.bf16.mxu0 %v11433_v10  ;;  %v5734_v63 = vld [vmem:[%s13919_s15] sm:$0x3] }
 0xab0   : > { %6670 = vmatprep.subr.bf16.mxu1 %v11424_v3  ;;  %v5739_v6 = vrot.slane %v5734_v63, %v13538_v57  ;;  %v5743_v2 = vrot.slane %v5734_v63, %v13541_v59  ;;  %v11508_v63 = vld [vmem:[%s13917_s8 + $0x264] ss:$8 sps:$4 sm:$0xff]  }
 0xab2   : > { %6470 = vmatpush1.bf16.msra.mxu0 %v11431_v9 }
 0xab3   : > { %6671 = vmatpush1.bf16.msra.mxu1 %v11422_v5  ;;  %6471 = vmatprep.subr.bf16.mxu0 %v11439_v12 }
 0xab4   : > { %6672 = vmatprep.subr.bf16.mxu1 %v11430_v8 }
 0xab6   : > { %6472 = vmatpush1.bf16.msra.mxu0 %v11437_v14 }
 0xab7   : > { %6673 = vmatpush1.bf16.msra.mxu1 %v11428_v7  ;;  %6473 = vmatprep.subr.bf16.mxu0 %v11445_v17 }
 0xab8   : > { %6674 = vmatprep.subr.bf16.mxu1 %v11436_v11 }
 0xaba   : > { %6474 = vmatpush1.bf16.msra.mxu0 %v11443_v19 }
 0xabb   : > { %6675 = vmatpush1.bf16.msra.mxu1 %v11434_v13  ;;  %6475 = vmatprep.subr.bf16.mxu0 %v11451_v21  ;;  %v6189_v21 = vld [vmem:[%s13921_s11] sm:$0x3] }
 0xabc   : > { %6676 = vmatprep.subr.bf16.mxu1 %v11442_v15 }
 0xabe   : > { %6476 = vmatpush1.bf16.msra.mxu0 %v11449_v23 }
 0xabf   : > { %6677 = vmatpush1.bf16.msra.mxu1 %v11440_v18  ;;  %6477 = vmatprep.subr.bf16.mxu0 %v11457_v25  ;;  %v6175_v18 = vld [vmem:[%s13920_s26] sm:$0x3] }
 0xac0   : > { %6678 = vmatprep.subr.bf16.mxu1 %v11448_v20  ;;  %v6180_v23 = vrot.slane %v6175_v18, %v13538_v57 }
 0xac2   : > { %6478 = vmatpush1.bf16.msra.mxu0 %v11455_v27  ;;  %v6194_v27 = vrot.slane %v6189_v21, %v13538_v57 }
 0xac3   : > { %6679 = vmatpush1.bf16.msra.mxu1 %v11446_v22  ;;  %6479 = vmatprep.subr.bf16.mxu0 %v11463_v30  ;;  %v6184_v30 = vrot.slane %v6175_v18, %v13541_v59  ;;  %v11524_v18 = vld [vmem:[%s13917_s8 + $0x200] ss:$8 sps:$4 sm:$0xff]  }
 0xac4   : > { %6680 = vmatprep.subr.bf16.mxu1 %v11454_v24 }
 0xac6   : > { %6480 = vmatpush2.bf16.msra.mxu0 %v11461_v29 }
 0xac7   : > { %6681 = vmatpush2.bf16.msra.mxu1 %v11452_v26  ;;  %6481 = vmatprep.subr.bf16.mxu0 %v11469_v33  ;;  %v6198_v33 = vrot.slane %v6189_v21, %v13541_v59  ;;  %v11532_v21 = vld [vmem:[%s13917_s8 + $0x2e4] ss:$8 sps:$4 sm:$0xff]  }
 0xac8   : > { %6682 = vmatprep.subr.bf16.mxu1 %v11460_v28 }
 0xaca   : > { %6482 = vmatpush2.bf16.msra.mxu0 %v11467_v34 }
 0xacb   : > { %6683 = vmatpush2.bf16.msra.mxu1 %v11458_v31  ;;  %6483 = vmatprep.subr.bf16.mxu0 %v11475_v4 }
 0xacc   : > { %6684 = vmatprep.subr.bf16.mxu1 %v11466_v16 }
 0xace   : > { %6484 = vmatpush2.bf16.msra.mxu0 %v11473_v37 }
 0xacf   : > { %6685 = vmatpush2.bf16.msra.mxu1 %v11464_v32  ;;  %6485 = vmatprep.subr.bf16.mxu0 %v11481_v40 }
 0xad0   : > { %6686 = vmatprep.subr.bf16.mxu1 %v11472_v35 }
 0xad2   : > { %6486 = vmatpush2.bf16.msra.mxu0 %v11479_v41 }
 0xad3   : > { %6687 = vmatpush2.bf16.msra.mxu1 %v11470_v36  ;;  %6487 = vmatprep.subr.bf16.mxu0 %v11487_v44 }
 0xad4   : > { %6688 = vmatprep.subr.bf16.mxu1 %v11478_v38 }
 0xad6   : > { %6488 = vmatpush2.bf16.msra.mxu0 %v11485_v45 }
 0xad7   : > { %6689 = vmatpush2.bf16.msra.mxu1 %v11476_v39  ;;  %6489 = vmatprep.subr.bf16.mxu0 %v11493_v48 }
 0xad8   : > { %6690 = vmatprep.subr.bf16.mxu1 %v11484_v42 }
 0xada   : > { %6490 = vmatpush2.bf16.msra.mxu0 %v11491_v46 }
 0xadb   : > { %6691 = vmatpush2.bf16.msra.mxu1 %v11482_v43  ;;  %6491 = vmatprep.subr.bf16.mxu0 %v11499_v51 }
 0xadc   : > { %6692 = vmatprep.subr.bf16.mxu1 %v11490_v50 }
 0xade   : > { %6492 = vmatpush2.bf16.msra.mxu0 %v11497_v53 }
 0xadf   : > { %6693 = vmatpush2.bf16.msra.mxu1 %v11488_v47  ;;  %6493 = vmatprep.subr.bf16.mxu0 %v11502_v61 }
 0xae0   : > { %6694 = vmatprep.subr.bf16.mxu1 %v11496_v49 }
 0xae2   : > { %6494 = vmatpush2.bf16.msra.mxu0 %v11500_v54 }
 0xae3   : > { %6695 = vmatpush2.bf16.msra.mxu1 %v11494_v52  ;;  %6907 = vmatprep.subr.bf16.mxu0 %v11505_v62 }
 0xb45   : > { %v5713_v1 = vpop.f32.mrf.mxu0 }
 0xb46   : > { %v5905_v3 = vpop.f32.mrf.mxu1  ;;  %v5732_v5 = vmul.f32 %v5725_v60, %v5713_v1  ;;  %v11506_v1 = vld [vmem:[%s13917_s8 + $0x260] ss:$8 sps:$4 sm:$0xff]  }
 0xb47   : > { %v5715_v7 = vpop.f32.mrf.mxu0 }
 0xb48   : > { %v5907_v8 = vpop.f32.mrf.mxu1  ;;  %v5733_v9 = vmul.f32 %v5729_v0, %v5715_v7  ;;  %v13548_v12 = vadd.f32 %v5739_v6, %v5732_v5  ;;  %v11509_v5 = vld [vmem:[%s13917_s8 + $0x250] ss:$8 sps:$4 sm:$0xff]   ;;  %v11514_v6 = vld [vmem:[%s13917_s8 + $0x244] ss:$8 sps:$4 sm:$0xff]   ;;  %v11517_v7 = vld [vmem:[%s13917_s8 + $0x234] ss:$8 sps:$4 sm:$0xff]  }
 0xb49   : > { %v5717_v10 = vpop.f32.mrf.mxu0 }
 0xb4a   : > { %v5909_v11 = vpop.f32.mrf.mxu1  ;;  %v13550_v13 = vadd.f32 %v5743_v2, %v5733_v9  ;;  %v11512_v2 = vld [vmem:[%s13917_s8 + $0x240] ss:$8 sps:$4 sm:$0xff]   ;;  %v11520_v9 = vld [vmem:[%s13917_s8 + $0x224] ss:$8 sps:$4 sm:$0xff]  }
 0xb4b   : > { %v5718_v14 = vpop.f32.mrf.mxu0  ;;  %v11518_v10 = vld [vmem:[%s13917_s8 + $0x220] ss:$8 sps:$4 sm:$0xff]   ;;  %v11523_v11 = vld [vmem:[%s13917_s8 + $0x214] ss:$8 sps:$4 sm:$0xff]  }
 0xb4c   : > { %v5910_v15 = vpop.f32.mrf.mxu1  ;;  %v5750_v17 = vcombine.low %v13548_v12, %v13550_v13  ;;  %v11521_v14 = vld [vmem:[%s13917_s8 + $0x210] ss:$8 sps:$4 sm:$0xff]  }
 0xb4d   : > { %v11526_v15 = vld [vmem:[%s13917_s8 + $0x204] ss:$8 sps:$4 sm:$0xff]  }
 0xb65   : > { %v6026_v19 = vpop.f32.mrf.mxu0 }
 0xb66   : > { %v6166_v20 = vpop.f32.mrf.mxu1  ;;  %v6027_v22 = vadd.f32 %v6026_v19, %v5905_v3  ;;  %v11511_v3 = vld [vmem:[%s13917_s8 + $0x254] ss:$8 sps:$4 sm:$0xff]  }
 0xb67   : > { %v6028_v24 = vpop.f32.mrf.mxu0  ;;  %v11529_v19 = vld [vmem:[%s13917_s8 + $0x2f4] ss:$8 sps:$4 sm:$0xff]  }
 0xb68   : > { %v6168_v25 = vpop.f32.mrf.mxu1  ;;  %v6173_v26 = vadd.f32 %v6166_v20, %v6027_v22  ;;  %v6029_v28 = vadd.f32 %v6028_v24, %v5907_v8  ;;  %v11515_v8 = vld [vmem:[%s13917_s8 + $0x230] ss:$8 sps:$4 sm:$0xff]   ;;  %v11530_v22 = vld [vmem:[%s13917_s8 + $0x2e0] ss:$8 sps:$4 sm:$0xff]  }
 0xb69   : > { %v6030_v31 = vpop.f32.mrf.mxu0  ;;  %v11527_v20 = vld [vmem:[%s13917_s8 + $0x2f0] ss:$8 sps:$4 sm:$0xff]  }
 0xb6a   : > { %v6170_v29 = vpop.f32.mrf.mxu1  ;;  %v6187_v16 = vmul.f32 %v6180_v23, %v6173_v26  ;;  %v6174_v32 = vadd.f32 %v6168_v25, %v6029_v28  ;;  %v11535_v23 = vld [vmem:[%s13917_s8 + $0x2d4] ss:$8 sps:$4 sm:$0xff]   ;;  %v11533_v24 = vld [vmem:[%s13917_s8 + $0x2d0] ss:$8 sps:$4 sm:$0xff]   ;;  %v11538_v25 = vld [vmem:[%s13917_s8 + $0x2c4] ss:$8 sps:$4 sm:$0xff]  }
 0xb6b   : > { %v6031_v34 = vpop.f32.mrf.mxu0  ;;  %v11536_v26 = vld [vmem:[%s13917_s8 + $0x2c0] ss:$8 sps:$4 sm:$0xff]   ;;  %v11539_v28 = vld [vmem:[%s13917_s8 + $0x2b0] ss:$8 sps:$4 sm:$0xff]   ;;  %v11547_v29 = vld [vmem:[%s13917_s8 + $0x294] ss:$8 sps:$4 sm:$0xff]  }
 0xb6c   : > { %v6171_v35 = vpop.f32.mrf.mxu1  ;;  %v6201_v36 = vadd.f32 %v6194_v27, %v6187_v16  ;;  %v6188_v4 = vmul.f32 %v6184_v30, %v6174_v32  ;;  %v11541_v27 = vld [vmem:[%s13917_s8 + $0x2b4] ss:$8 sps:$4 sm:$0xff]   ;;  %v11544_v30 = vld [vmem:[%s13917_s8 + $0x2a4] ss:$8 sps:$4 sm:$0xff]   ;;  %v11542_v31 = vld [vmem:[%s13917_s8 + $0x2a0] ss:$8 sps:$4 sm:$0xff]  }
 0xb6d   : > { %v11545_v16 = vld [vmem:[%s13917_s8 + $0x290] ss:$8 sps:$4 sm:$0xff]   ;;  %v11550_v32 = vld [vmem:[%s13917_s8 + $0x284] ss:$8 sps:$4 sm:$0xff]   ;;  %v11548_v34 = vld [vmem:[%s13917_s8 + $0x280] ss:$8 sps:$4 sm:$0xff]  }
 0xb6e   : > { %v6203_v37 = vmax.f32 %v6201_v36, 0.0  ;;  %v6202_v38 = vadd.f32 %v6198_v33, %v6188_v4  ;;  %v11551_v4 = vld [vmem:[%s13922_s16 + $0x70] ss:$8 sps:$4 sm:$0xff]  }
 0xb70   : > { %v6207_v39 = vrot.slane %v6203_v37, 7  ;;  %v6204_v40 = vmax.f32 %v6202_v38, 0.0  ;;  %v11553_v37 = vld [vmem:[%s13922_s16 + $0x74] ss:$8 sps:$4 sm:$0xff]   ;;  %v11556_v38 = vld [vmem:[%s13922_s16 + $0x64] ss:$8 sps:$4 sm:$0xff]  }
 0xb72   : > { %6211 = vst [vmem:[#allocation14] sm:$0x1e] %v6207_v39  ;;  %v6208_v41 = vrot.slane %v6204_v40, 7  ;;  %v11557_v39 = vld [vmem:[%s13922_s16 + $0x170] ss:$8 sps:$4 sm:$0xff]  }
 0xb73   : > { %v11559_v40 = vld [vmem:[%s13922_s16 + $0x174] ss:$8 sps:$4 sm:$0xff]  }
 0xb74   : > { %6212 = vst [vmem:[#allocation14 + $0x8] sm:$0x1e] %v6208_v41  ;;  %v11554_v41 = vld [vmem:[%s13922_s16 + $0x60] ss:$8 sps:$4 sm:$0xff]   ;;  %7244 = vmatprep.subr.bf16.mxu1 %v11559_v40 }
 0xb75   : > { %v11644_v40 = vld [vmem:[%s13922_s16 + $0x180] ss:$8 sps:$4 sm:$0xff]  }
 0xb79   : > { %v6251_v42 = vld [vmem:[#allocation14] sm:$0x1e] }
 0xb7a   : > { %v6215_v43 = vld [vmem:[#allocation14] sm:$0xf]  ;;  %v6253_v44 = vpack.c.bf16 %v6251_v42, %v6251_v42  ;;  %v11565_v42 = vld [vmem:[%s13922_s16 + $0x164] ss:$8 sps:$4 sm:$0xff]  }
 0xb7b   : > { %v6216_v45 = vld [vmem:[#allocation14 + $0x8] sm:$0xf]  ;;  %v6217_v49 = vpack.c.bf16 %v6215_v43, %v6215_v43  ;;  %v6705_v33 = vld [vmem:[#allocation14] sm:$0x3c] }
 0xb7c   : > { %v6252_v47 = vld [vmem:[#allocation14 + $0x8] sm:$0x1e]  ;;  %v6218_v50 = vpack.c.bf16 %v6216_v45, %v6216_v45  ;;  %v6290_v48 = vshll.u32 %v6253_v44, 16  ;;  %v6288_v55 = vshrl.u32 %v6253_v44, 16  ;;  %v6707_v35 = vpack.c.bf16 %v6705_v33, %v6705_v33  ;;  %v11562_v43 = vld [vmem:[%s13922_s16 + $0x54] ss:$8 sps:$4 sm:$0xff]  }
 0xb7d   : > { %v6254_v46 = vpack.c.bf16 %v6252_v47, %v6252_v47  ;;  %v6706_v51 = vld [vmem:[#allocation14 + $0x8] sm:$0x3c]  ;;  %v11571_v45 = vld [vmem:[%s13922_s16 + $0x154] ss:$8 sps:$4 sm:$0xff]   ;;  %v11560_v47 = vld [vmem:[%s13922_s16 + $0x50] ss:$8 sps:$4 sm:$0xff]  }
 0xb7e   : > { %6696 = vmatprep.mubr.bf16.mxu1 %v6218_v50  ;;  %v6292_v53 = vrot.slane %v6290_v48, 1  ;;  %v6708_v62 = vpack.c.bf16 %v6706_v51, %v6706_v51  ;;  %v6743_v36 = vrot.slane %v6707_v35, 1  ;;  %v11563_v44 = vld [vmem:[%s13922_s16 + $0x160] ss:$8 sps:$4 sm:$0xff]   ;;  %v11568_v50 = vld [vmem:[%s13922_s16 + $0x44] ss:$8 sps:$4 sm:$0xff]  }
 0xb7f   : > { %v6297_v52 = vshll.u32 %v6254_v46, 16  ;;  %6697 = vmatmul.mubr.bf16.vlgmr.msra.gmra.mxu1 %v6217_v49  ;;  %v6295_v61 = vshrl.u32 %v6254_v46, 16  ;;  %v11569_v46 = vld [vmem:[%s13922_s16 + $0x150] ss:$8 sps:$4 sm:$0xff]   ;;  %v11577_v48 = vld [vmem:[%s13922_s16 + $0x144] ss:$8 sps:$4 sm:$0xff]  }
 0xb80   : > { %v6293_v60 = vor.u32 %v6292_v53, %v6288_v55  ;;  %v6744_v0 = vrot.slane %v6708_v62, 1  ;;  %7245 = vmatpush1.bf16.msra.mxu1 %v11557_v39  ;;  %v11566_v49 = vld [vmem:[%s13922_s16 + $0x40] ss:$8 sps:$4 sm:$0xff]   ;;  %v11574_v51 = vld [vmem:[%s13922_s16 + $0x34] ss:$8 sps:$4 sm:$0xff]  }
 0xb81   : > { %v6299_v54 = vrot.slane %v6297_v52, 1  ;;  %7246 = vmatprep.subr.bf16.mxu1 %v11565_v42  ;;  %v11575_v52 = vld [vmem:[%s13922_s16 + $0x140] ss:$8 sps:$4 sm:$0xff]   ;;  %v11583_v53 = vld [vmem:[%s13922_s16 + $0x134] ss:$8 sps:$4 sm:$0xff]  }
 0xb82   : > { %v11581_v62 = vld [vmem:[%s13922_s16 + $0x130] ss:$8 sps:$4 sm:$0xff]   ;;  %v11589_v55 = vld [vmem:[%s13922_s16 + $0x124] ss:$8 sps:$4 sm:$0xff]   ;;  %v11634_v33 = vld [vmem:[%s13922_s16 + $0x94] ss:$8 sps:$4 sm:$0xff]  }
 0xb83   : > { %v6300_v56 = vor.u32 %v6299_v54, %v6295_v61  ;;  %v11572_v61 = vld [vmem:[%s13922_s16 + $0x30] ss:$8 sps:$4 sm:$0xff]   ;;  %v11580_v54 = vld [vmem:[%s13922_s16 + $0x24] ss:$8 sps:$4 sm:$0xff]  }
 0xb84   : > { %7247 = vmatpush1.bf16.msra.mxu1 %v11563_v44  ;;  %v11637_v35 = vld [vmem:[%s13922_s16 + $0x1a4] ss:$8 sps:$4 sm:$0xff]  }
 0xb85   : > { %6495 = vmatprep.mubr.bf16.mxu0 %v6300_v56  ;;  %7248 = vmatprep.subr.bf16.mxu1 %v11571_v45  ;;  %v11578_v56 = vld [vmem:[%s13922_s16 + $0x20] ss:$8 sps:$4 sm:$0xff]   ;;  %v11646_v39 = vld [vmem:[%s13922_s16 + $0x184] ss:$8 sps:$4 sm:$0xff]  }
 0xb86   : > { %6496 = vmatmul.mubr.bf16.vlgmr.msra.gmra.mxu0 %v6293_v60  ;;  %v11587_v60 = vld [vmem:[%s13922_s16 + $0x120] ss:$8 sps:$4 sm:$0xff]  }
 0xb87   : > { %6908 = vmatpush1.bf16.msra.mxu0 %v11503_v58  ;;  %6939 = vmatprep.mubr.bf16.mxu0 %v6744_v0  ;;  %v11586_v58 = vld [vmem:[%s13922_s16 + $0x14] ss:$8 sps:$4 sm:$0xff]   ;;  %v11584_v0 = vld [vmem:[%s13922_s16 + $0x10] ss:$8 sps:$4 sm:$0xff]  }
 0xb88   : > { %6909 = vmatprep.subr.bf16.mxu0 %v11508_v63  ;;  %7249 = vmatpush1.bf16.msra.mxu1 %v11569_v46  ;;  %v11595_v63 = vld [vmem:[%s13922_s16 + $0x114] ss:$8 sps:$4 sm:$0xff]  }
 0xb89   : > { %7250 = vmatprep.subr.bf16.mxu1 %v11577_v48 }
 0xb8b   : > { %6910 = vmatpush1.bf16.msra.mxu0 %v11506_v1  ;;  %v11592_v1 = vld [vmem:[%s13922_s16 + $0x4] ss:$8 sps:$4 sm:$0xff]  }
 0xb8c   : > { %6911 = vmatprep.subr.bf16.mxu0 %v11511_v3  ;;  %7251 = vmatpush1.bf16.msra.mxu1 %v11575_v52  ;;  %v11593_v3 = vld [vmem:[%s13922_s16 + $0x110] ss:$8 sps:$4 sm:$0xff]  }
 0xb8d   : > { %7252 = vmatprep.subr.bf16.mxu1 %v11583_v53 }
 0xb8f   : > { %6912 = vmatpush1.bf16.msra.mxu0 %v11509_v5  ;;  %v11601_v5 = vld [vmem:[%s13922_s16 + $0x104] ss:$8 sps:$4 sm:$0xff]  }
 0xb90   : > { %6913 = vmatprep.subr.bf16.mxu0 %v11514_v6  ;;  %7253 = vmatpush1.bf16.msra.mxu1 %v11581_v62  ;;  %v11590_v6 = vld [vmem:[%s13922_s16] ss:$8 sps:$4 sm:$0xff]  }
 0xb91   : > { %7254 = vmatprep.subr.bf16.mxu1 %v11589_v55 }
 0xb93   : > { %6914 = vmatpush1.bf16.msra.mxu0 %v11512_v2  ;;  %v11598_v2 = vld [vmem:[%s13922_s16 + $0xf4] ss:$8 sps:$4 sm:$0xff]  }
 0xb94   : > { %6915 = vmatprep.subr.bf16.mxu0 %v11517_v7  ;;  %7255 = vmatpush1.bf16.msra.mxu1 %v11587_v60  ;;  %v11599_v7 = vld [vmem:[%s13922_s16 + $0x100] ss:$8 sps:$4 sm:$0xff]  }
 0xb95   : > { %7256 = vmatprep.subr.bf16.mxu1 %v11595_v63 }
 0xb97   : > { %6916 = vmatpush1.bf16.msra.mxu0 %v11515_v8  ;;  %v11607_v8 = vld [vmem:[%s13922_s16 + $0x1f4] ss:$8 sps:$4 sm:$0xff]  }
 0xb98   : > { %6917 = vmatprep.subr.bf16.mxu0 %v11520_v9  ;;  %7257 = vmatpush1.bf16.msra.mxu1 %v11593_v3  ;;  %v11596_v9 = vld [vmem:[%s13922_s16 + $0xf0] ss:$8 sps:$4 sm:$0xff]  }
 0xb99   : > { %7258 = vmatprep.subr.bf16.mxu1 %v11601_v5 }
 0xb9b   : > { %6918 = vmatpush1.bf16.msra.mxu0 %v11518_v10  ;;  %v11604_v10 = vld [vmem:[%s13922_s16 + $0xe4] ss:$8 sps:$4 sm:$0xff]  }
 0xb9c   : > { %6919 = vmatprep.subr.bf16.mxu0 %v11523_v11  ;;  %7259 = vmatpush1.bf16.msra.mxu1 %v11599_v7  ;;  %v11605_v11 = vld [vmem:[%s13922_s16 + $0x1f0] ss:$8 sps:$4 sm:$0xff]  }
 0xb9d   : > { %7260 = vmatprep.subr.bf16.mxu1 %v11607_v8 }
 0xb9f   : > { %6920 = vmatpush1.bf16.msra.mxu0 %v11521_v14  ;;  %v11602_v14 = vld [vmem:[%s13922_s16 + $0xe0] ss:$8 sps:$4 sm:$0xff]  }
 0xba0   : > { %6921 = vmatprep.subr.bf16.mxu0 %v11526_v15  ;;  %7261 = vmatpush2.bf16.msra.mxu1 %v11605_v11  ;;  %v11610_v15 = vld [vmem:[%s13922_s16 + $0xd4] ss:$8 sps:$4 sm:$0xff]  }
 0xba3   : > { %6922 = vmatpush1.bf16.msra.mxu0 %v11524_v18  ;;  %v11608_v18 = vld [vmem:[%s13922_s16 + $0xd0] ss:$8 sps:$4 sm:$0xff]  }
 0xba4   : > { %6923 = vmatprep.subr.bf16.mxu0 %v11529_v19  ;;  %v11613_v19 = vld [vmem:[%s13922_s16 + $0x1e4] ss:$8 sps:$4 sm:$0xff]  }
 0xba5   : > { %7262 = vmatprep.subr.bf16.mxu1 %v11613_v19 }
 0xba7   : > { %6924 = vmatpush2.bf16.msra.mxu0 %v11527_v20  ;;  %v11611_v20 = vld [vmem:[%s13922_s16 + $0x1e0] ss:$8 sps:$4 sm:$0xff]  }
 0xba8   : > { %6925 = vmatprep.subr.bf16.mxu0 %v11532_v21  ;;  %7263 = vmatpush2.bf16.msra.mxu1 %v11611_v20  ;;  %v11616_v21 = vld [vmem:[%s13922_s16 + $0xc4] ss:$8 sps:$4 sm:$0xff]  }
 0xbab   : > { %6926 = vmatpush2.bf16.msra.mxu0 %v11530_v22  ;;  %v11614_v22 = vld [vmem:[%s13922_s16 + $0xc0] ss:$8 sps:$4 sm:$0xff]  }
 0xbac   : > { %6927 = vmatprep.subr.bf16.mxu0 %v11535_v23  ;;  %v11619_v23 = vld [vmem:[%s13922_s16 + $0x1d4] ss:$8 sps:$4 sm:$0xff]  }
 0xbad   : > { %7264 = vmatprep.subr.bf16.mxu1 %v11619_v23 }
 0xbaf   : > { %6928 = vmatpush2.bf16.msra.mxu0 %v11533_v24  ;;  %v11617_v24 = vld [vmem:[%s13922_s16 + $0x1d0] ss:$8 sps:$4 sm:$0xff]  }
 0xbb0   : > { %6929 = vmatprep.subr.bf16.mxu0 %v11538_v25  ;;  %7265 = vmatpush2.bf16.msra.mxu1 %v11617_v24  ;;  %v11622_v25 = vld [vmem:[%s13922_s16 + $0xb4] ss:$8 sps:$4 sm:$0xff]  }
 0xbb3   : > { %6930 = vmatpush2.bf16.msra.mxu0 %v11536_v26  ;;  %v11620_v26 = vld [vmem:[%s13922_s16 + $0xb0] ss:$8 sps:$4 sm:$0xff]  }
 0xbb4   : > { %6931 = vmatprep.subr.bf16.mxu0 %v11541_v27  ;;  %v11625_v27 = vld [vmem:[%s13922_s16 + $0x1c4] ss:$8 sps:$4 sm:$0xff]  }
 0xbb5   : > { %7266 = vmatprep.subr.bf16.mxu1 %v11625_v27 }
 0xbb7   : > { %6932 = vmatpush2.bf16.msra.mxu0 %v11539_v28  ;;  %v11623_v28 = vld [vmem:[%s13922_s16 + $0x1c0] ss:$8 sps:$4 sm:$0xff]  }
 0xbb8   : > { %6933 = vmatprep.subr.bf16.mxu0 %v11544_v30  ;;  %7267 = vmatpush2.bf16.msra.mxu1 %v11623_v28  ;;  %v11628_v30 = vld [vmem:[%s13922_s16 + $0xa4] ss:$8 sps:$4 sm:$0xff]  }
 0xbbb   : > { %6934 = vmatpush2.bf16.msra.mxu0 %v11542_v31  ;;  %v11626_v31 = vld [vmem:[%s13922_s16 + $0xa0] ss:$8 sps:$4 sm:$0xff]  }
 0xbbc   : > { %6935 = vmatprep.subr.bf16.mxu0 %v11547_v29  ;;  %v11631_v29 = vld [vmem:[%s13922_s16 + $0x1b4] ss:$8 sps:$4 sm:$0xff]  }
 0xbbd   : > { %7268 = vmatprep.subr.bf16.mxu1 %v11631_v29 }
 0xbbf   : > { %6936 = vmatpush2.bf16.msra.mxu0 %v11545_v16  ;;  %v11629_v16 = vld [vmem:[%s13922_s16 + $0x1b0] ss:$8 sps:$4 sm:$0xff]  }
 0xbc0   : > { %6937 = vmatprep.subr.bf16.mxu0 %v11550_v32  ;;  %v11632_v32 = vld [vmem:[%s13922_s16 + $0x90] ss:$8 sps:$4 sm:$0xff]   ;;  %7269 = vmatpush2.bf16.msra.mxu1 %v11629_v16 }
 0xbc1   : > { %7270 = vmatprep.subr.bf16.mxu1 %v11637_v35  ;;  %v11647_v16 = vld [vmem:[%s13922_s16 + $0x270] ss:$8 sps:$4 sm:$0xff]   ;;  %v11650_v35 = vld [vmem:[%s13922_s16 + $0x260] ss:$8 sps:$4 sm:$0xff]  }
 0xbc3   : > { %6938 = vmatpush2.bf16.msra.mxu0 %v11548_v34  ;;  %v11635_v34 = vld [vmem:[%s13922_s16 + $0x1a0] ss:$8 sps:$4 sm:$0xff]  }
 0xbc4   : > { %7445 = vmatprep.subr.bf16.mxu0 %v11553_v37  ;;  %v11638_v37 = vld [vmem:[%s13922_s16 + $0x80] ss:$8 sps:$4 sm:$0xff]   ;;  %7271 = vmatpush2.bf16.msra.mxu1 %v11635_v34 }
 0xbc6   : > { %6940 = vmatmul.mubr.bf16.vlgmr.msra.gmra.mxu0 %v6743_v36  ;;  %v11640_v36 = vld [vmem:[%s13922_s16 + $0x84] ss:$8 sps:$4 sm:$0xff]  }
 0xbc7   : > { %7446 = vmatpush1.bf16.msra.mxu0 %v11551_v4  ;;  %v11643_v4 = vld [vmem:[%s13922_s16 + $0x194] ss:$8 sps:$4 sm:$0xff]  }
 0xbc8   : > { %7447 = vmatprep.subr.bf16.mxu0 %v11556_v38  ;;  %v11641_v38 = vld [vmem:[%s13922_s16 + $0x190] ss:$8 sps:$4 sm:$0xff]   ;;  %7272 = vmatprep.subr.bf16.mxu1 %v11643_v4 }
 0xbc9   : > { %7273 = vmatpush2.bf16.msra.mxu1 %v11641_v38  ;;  %v11653_v4 = vld [vmem:[%s13922_s16 + $0x250] ss:$8 sps:$4 sm:$0xff]   ;;  %v11656_v38 = vld [vmem:[%s13922_s16 + $0x240] ss:$8 sps:$4 sm:$0xff]  }
 0xbca   : > { %7274 = vmatprep.subr.bf16.mxu1 %v11646_v39  ;;  %v11661_v39 = vld [vmem:[%s13922_s16 + $0x234] ss:$8 sps:$4 sm:$0xff]  }
 0xbcb   : > { %7448 = vmatpush1.bf16.msra.mxu0 %v11554_v41  ;;  %v11649_v41 = vld [vmem:[%s13922_s16 + $0x274] ss:$8 sps:$4 sm:$0xff]  }
 0xbcc   : > { %7449 = vmatprep.subr.bf16.mxu0 %v11562_v43 }
 0xbcd   : > { %7275 = vmatpush2.bf16.msra.mxu1 %v11644_v40  ;;  %v11659_v40 = vld [vmem:[%s13922_s16 + $0x230] ss:$8 sps:$4 sm:$0xff]  }
 0xbce   : > { %7688 = vmatprep.subr.bf16.mxu1 %v11649_v41  ;;  %v11664_v41 = vld [vmem:[%s13922_s16 + $0x224] ss:$8 sps:$4 sm:$0xff]  }
 0xbcf   : > { %7450 = vmatpush1.bf16.msra.mxu0 %v11560_v47 }
 0xbd0   : > { %7451 = vmatprep.subr.bf16.mxu0 %v11568_v50 }
 0xbd3   : > { %7452 = vmatpush1.bf16.msra.mxu0 %v11566_v49  ;;  %v6950_v49 = vld [vmem:[%s13923_s18] sm:$0x3] }
 0xbd4   : > { %7453 = vmatprep.subr.bf16.mxu0 %v11574_v51  ;;  %v6964_v51 = vld [vmem:[%s13924_s19] sm:$0x3]  ;;  %v6955_v53 = vrot.slane %v6950_v49, %v13538_v57 }
 0xbd5   : > { %v6969_v55 = vrot.slane %v6964_v51, %v13538_v57 }
 0xbd7   : > { %7454 = vmatpush1.bf16.msra.mxu0 %v11572_v61 }
 0xbd8   : > { %7455 = vmatprep.subr.bf16.mxu0 %v11580_v54 }
 0xbdb   : > { %7456 = vmatpush1.bf16.msra.mxu0 %v11578_v56  ;;  %v6959_v56 = vrot.slane %v6950_v49, %v13541_v59  ;;  %v11674_v49 = vld [vmem:[%s13922_s16 + $0x2e0] ss:$8 sps:$4 sm:$0xff]  }
 0xbdc   : > { %7457 = vmatprep.subr.bf16.mxu0 %v11586_v58 }
 0xbdf   : > { %7458 = vmatpush1.bf16.msra.mxu0 %v11584_v0  ;;  %v6973_v0 = vrot.slane %v6964_v51, %v13541_v59  ;;  %v11679_v51 = vld [vmem:[%s13922_s16 + $0x2d4] ss:$8 sps:$4 sm:$0xff]  }
 0xbe0   : > { %7459 = vmatprep.subr.bf16.mxu0 %v11592_v1 }
 0xbe3   : > { %7460 = vmatpush1.bf16.msra.mxu0 %v11590_v6 }
 0xbe4   : > { %7461 = vmatprep.subr.bf16.mxu0 %v11598_v2  ;;  %v9802_v2 = vcombine.low %v13550_v13, %v13550_v13 }
 0xbe7   : > { %7462 = vmatpush2.bf16.msra.mxu0 %v11596_v9 }
 0xbe8   : > { %7463 = vmatprep.subr.bf16.mxu0 %v11604_v10 }
 0xbeb   : > { %7464 = vmatpush2.bf16.msra.mxu0 %v11602_v14 }
 0xbec   : > { %7465 = vmatprep.subr.bf16.mxu0 %v11610_v15 }
 0xbef   : > { %7466 = vmatpush2.bf16.msra.mxu0 %v11608_v18 }
 0xbf0   : > { %7467 = vmatprep.subr.bf16.mxu0 %v11616_v21 }
 0xbf3   : > { %7468 = vmatpush2.bf16.msra.mxu0 %v11614_v22 }
 0xbf4   : > { %7469 = vmatprep.subr.bf16.mxu0 %v11622_v25 }
 0xbf7   : > { %7470 = vmatpush2.bf16.msra.mxu0 %v11620_v26 }
 0xbf8   : > { %7471 = vmatprep.subr.bf16.mxu0 %v11628_v30 }
 0xbfb   : > { %7472 = vmatpush2.bf16.msra.mxu0 %v11626_v31 }
 0xbfc   : > { %7473 = vmatprep.subr.bf16.mxu0 %v11634_v33  ;;  %v11652_v33 = vld [vmem:[%s13922_s16 + $0x264] ss:$8 sps:$4 sm:$0xff]  }
 0xbff   : > { %7474 = vmatpush2.bf16.msra.mxu0 %v11632_v32 }
 0xc00   : > { %7475 = vmatprep.subr.bf16.mxu0 %v11640_v36  ;;  %v11655_v36 = vld [vmem:[%s13922_s16 + $0x254] ss:$8 sps:$4 sm:$0xff]  }
 0xc03   : > { %7476 = vmatpush2.bf16.msra.mxu0 %v11638_v37  ;;  %v11658_v37 = vld [vmem:[%s13922_s16 + $0x244] ss:$8 sps:$4 sm:$0xff]  }
 0xc3f   : > { %v6698_v42 = vpop.f32.mrf.mxu1 }
 0xc41   : > { %v6700_v43 = vpop.f32.mrf.mxu1 }
 0xc43   : > { %v6702_v44 = vpop.f32.mrf.mxu1 }
 0xc44   : > { %v11665_v44 = vld [vmem:[%s13922_s16 + $0x210] ss:$8 sps:$4 sm:$0xff]  }
 0xc45   : > { %v6703_v47 = vpop.f32.mrf.mxu1 }
 0xc46   : > { %v6497_v45 = vpop.f32.mrf.mxu0  ;;  %v11668_v47 = vld [vmem:[%s13922_s16 + $0x200] ss:$8 sps:$4 sm:$0xff]  }
 0xc47   : > { %v6699_v52 = vadd.f32 %v6698_v42, %v6497_v45  ;;  %v11662_v42 = vld [vmem:[%s13922_s16 + $0x220] ss:$8 sps:$4 sm:$0xff]   ;;  %v11670_v45 = vld [vmem:[%s13922_s16 + $0x204] ss:$8 sps:$4 sm:$0xff]  }
 0xc48   : > { %v6499_v50 = vpop.f32.mrf.mxu0 }
 0xc49   : > { %v6701_v54 = vadd.f32 %v6700_v43, %v6499_v50  ;;  %v11667_v43 = vld [vmem:[%s13922_s16 + $0x214] ss:$8 sps:$4 sm:$0xff]  }
 0xc4a   : > { %v6501_v46 = vpop.f32.mrf.mxu0  ;;  %v11673_v50 = vld [vmem:[%s13922_s16 + $0x2f4] ss:$8 sps:$4 sm:$0xff]  }
 0xc4b   : > { %v11671_v46 = vld [vmem:[%s13922_s16 + $0x2f0] ss:$8 sps:$4 sm:$0xff]  }
 0xc4c   : > { %v6502_v48 = vpop.f32.mrf.mxu0 }
 0xc4d   : > { %v11676_v48 = vld [vmem:[%s13922_s16 + $0x2e4] ss:$8 sps:$4 sm:$0xff]  }
 0xc86   : > { %v6941_v61 = vpop.f32.mrf.mxu0 }
 0xc87   : > { %v6948_v62 = vadd.f32 %v6941_v61, %v6699_v52  ;;  %v11677_v52 = vld [vmem:[%s13922_s16 + $0x2d0] ss:$8 sps:$4 sm:$0xff]   ;;  %v11680_v61 = vld [vmem:[%s13922_s16 + $0x2c0] ss:$8 sps:$4 sm:$0xff]  }
 0xc88   : > { %v6943_v58 = vpop.f32.mrf.mxu0 }
 0xc89   : > { %v6962_v60 = vmul.f32 %v6955_v53, %v6948_v62  ;;  %v6949_v63 = vadd.f32 %v6943_v58, %v6701_v54  ;;  %v11682_v53 = vld [vmem:[%s13922_s16 + $0x2c4] ss:$8 sps:$4 sm:$0xff]   ;;  %v11685_v54 = vld [vmem:[%s13922_s16 + $0x2b4] ss:$8 sps:$4 sm:$0xff]   ;;  %v11683_v62 = vld [vmem:[%s13922_s16 + $0x2b0] ss:$8 sps:$4 sm:$0xff]  }
 0xc8a   : > { %v6945_v1 = vpop.f32.mrf.mxu0  ;;  %v11691_v58 = vld [vmem:[%s13922_s16 + $0x294] ss:$8 sps:$4 sm:$0xff]  }
 0xc8b   : > { %v6976_v3 = vadd.f32 %v6969_v55, %v6962_v60  ;;  %v6963_v5 = vmul.f32 %v6959_v56, %v6949_v63  ;;  %v11688_v55 = vld [vmem:[%s13922_s16 + $0x2a4] ss:$8 sps:$4 sm:$0xff]   ;;  %v11686_v56 = vld [vmem:[%s13922_s16 + $0x2a0] ss:$8 sps:$4 sm:$0xff]   ;;  %v11689_v60 = vld [vmem:[%s13922_s16 + $0x290] ss:$8 sps:$4 sm:$0xff]  }
 0xc8c   : > { %v6946_v6 = vpop.f32.mrf.mxu0  ;;  %v11694_v63 = vld [vmem:[%s13922_s16 + $0x284] ss:$8 sps:$4 sm:$0xff]   ;;  %v11692_v1 = vld [vmem:[%s13922_s16 + $0x280] ss:$8 sps:$4 sm:$0xff]  }
 0xc8d   : > { %v6982_v7 = vadd.f32 %v6976_v3, %v5750_v17  ;;  %v6977_v8 = vadd.f32 %v6973_v0, %v6963_v5  ;;  %v11695_v6 = vld [vmem:[%s13925_s10 + $0x70] ss:$8 sps:$4 sm:$0xff]  }
 0xc8f   : > { %v6984_v9 = vmax.f32 %v6982_v7, 0.0  ;;  %v6983_v10 = vadd.f32 %v9802_v2, %v6977_v8  ;;  %v11697_v2 = vld [vmem:[%s13925_s10 + $0x74] ss:$8 sps:$4 sm:$0xff]   ;;  %v11700_v7 = vld [vmem:[%s13925_s10 + $0x64] ss:$8 sps:$4 sm:$0xff]  }
 0xc90   : > { %v11701_v8 = vld [vmem:[%s13925_s10 + $0x170] ss:$8 sps:$4 sm:$0xff]  }
 0xc91   : > { %v6988_v11 = vrot.slane %v6984_v9, 7  ;;  %v6985_v14 = vmax.f32 %v6983_v10, 0.0  ;;  %v11703_v9 = vld [vmem:[%s13925_s10 + $0x174] ss:$8 sps:$4 sm:$0xff]   ;;  %v11698_v10 = vld [vmem:[%s13925_s10 + $0x60] ss:$8 sps:$4 sm:$0xff]  }
 0xc92   : > { %8017 = vmatprep.subr.bf16.mxu0 %v11703_v9 }
 0xc93   : > { %6992 = vst [vmem:[#allocation15 + $0x8] sm:$0x1e] %v6988_v11  ;;  %v6989_v15 = vrot.slane %v6985_v14, 7  ;;  %v11709_v11 = vld [vmem:[%s13925_s10 + $0x164] ss:$8 sps:$4 sm:$0xff]  }
 0xc94   : > { %v11706_v14 = vld [vmem:[%s13925_s10 + $0x54] ss:$8 sps:$4 sm:$0xff]  }
 0xc95   : > { %6993 = vst [vmem:[#allocation15] sm:$0x1e] %v6989_v15  ;;  %v11707_v15 = vld [vmem:[%s13925_s10 + $0x160] ss:$8 sps:$4 sm:$0xff]  }
 0xc9a   : > { %v7032_v18 = vld [vmem:[#allocation15 + $0x8] sm:$0x1e] }
 0xc9b   : > { %v6996_v19 = vld [vmem:[#allocation15 + $0x8] sm:$0xf]  ;;  %v7034_v20 = vpack.c.bf16 %v7032_v18, %v7032_v18  ;;  %v11715_v18 = vld [vmem:[%s13925_s10 + $0x154] ss:$8 sps:$4 sm:$0xff]  }
 0xc9c   : > { %v6997_v21 = vld [vmem:[#allocation15] sm:$0xf]  ;;  %v6998_v12 = vpack.c.bf16 %v6996_v19, %v6996_v19  ;;  %v7486_v0 = vld [vmem:[#allocation15 + $0x8] sm:$0x3c] }
 0xc9d   : > { %v7033_v22 = vld [vmem:[#allocation15] sm:$0x1e]  ;;  %v6999_v23 = vpack.c.bf16 %v6997_v21, %v6997_v21  ;;  %v7071_v25 = vshll.u32 %v7034_v20, 16  ;;  %v7069_v31 = vshrl.u32 %v7034_v20, 16  ;;  %v7488_v3 = vpack.c.bf16 %v7486_v0, %v7486_v0  ;;  %v11704_v19 = vld [vmem:[%s13925_s10 + $0x50] ss:$8 sps:$4 sm:$0xff]  }
 0xc9e   : > { %v7035_v24 = vpack.c.bf16 %v7033_v22, %v7033_v22  ;;  %v7487_v13 = vld [vmem:[#allocation15] sm:$0x3c]  ;;  %v11713_v21 = vld [vmem:[%s13925_s10 + $0x150] ss:$8 sps:$4 sm:$0xff]  }
 0xc9f   : > { %7477 = vmatprep.mubr.bf16.mxu0 %v6999_v23  ;;  %v7073_v26 = vrot.slane %v7071_v25, 1  ;;  %v7489_v30 = vpack.c.bf16 %v7487_v13, %v7487_v13  ;;  %v7524_v5 = vrot.slane %v7488_v3, 1  ;;  %v11712_v20 = vld [vmem:[%s13925_s10 + $0x44] ss:$8 sps:$4 sm:$0xff]   ;;  %v11710_v23 = vld [vmem:[%s13925_s10 + $0x40] ss:$8 sps:$4 sm:$0xff]  }
 0xca0   : > { %v7078_v17 = vshll.u32 %v7035_v24, 16  ;;  %7478 = vmatmul.mubr.bf16.vlgmr.msra.gmra.mxu0 %v6998_v12  ;;  %v7076_v27 = vshrl.u32 %v7035_v24, 16  ;;  %v11721_v22 = vld [vmem:[%s13925_s10 + $0x144] ss:$8 sps:$4 sm:$0xff]   ;;  %v11718_v24 = vld [vmem:[%s13925_s10 + $0x34] ss:$8 sps:$4 sm:$0xff]  }
 0xca1   : > { %v7074_v32 = vor.u32 %v7073_v26, %v7069_v31  ;;  %v7525_v34 = vrot.slane %v7489_v30, 1  ;;  %8018 = vmatpush1.bf16.msra.mxu0 %v11701_v8  ;;  %v11719_v25 = vld [vmem:[%s13925_s10 + $0x140] ss:$8 sps:$4 sm:$0xff]   ;;  %v11727_v12 = vld [vmem:[%s13925_s10 + $0x134] ss:$8 sps:$4 sm:$0xff]  }
 0xca2   : > { %v7080_v28 = vrot.slane %v7078_v17, 1  ;;  %8019 = vmatprep.subr.bf16.mxu0 %v11709_v11  ;;  %v11716_v13 = vld [vmem:[%s13925_s10 + $0x30] ss:$8 sps:$4 sm:$0xff]   ;;  %v11724_v17 = vld [vmem:[%s13925_s10 + $0x24] ss:$8 sps:$4 sm:$0xff]  }
 0xca3   : > { %v11725_v26 = vld [vmem:[%s13925_s10 + $0x130] ss:$8 sps:$4 sm:$0xff]   ;;  %v11730_v30 = vld [vmem:[%s13925_s10 + $0x14] ss:$8 sps:$4 sm:$0xff]   ;;  %v11731_v31 = vld [vmem:[%s13925_s10 + $0x120] ss:$8 sps:$4 sm:$0xff]  }
 0xca4   : > { %v7081_v29 = vor.u32 %v7080_v28, %v7076_v27  ;;  %v11733_v27 = vld [vmem:[%s13925_s10 + $0x124] ss:$8 sps:$4 sm:$0xff]   ;;  %v11722_v28 = vld [vmem:[%s13925_s10 + $0x20] ss:$8 sps:$4 sm:$0xff]  }
 0xca5   : > { %8020 = vmatpush1.bf16.msra.mxu0 %v11707_v15  ;;  %v11784_v0 = vld [vmem:[%s13925_s10 + $0x84] ss:$8 sps:$4 sm:$0xff]   ;;  %v11782_v3 = vld [vmem:[%s13925_s10 + $0x80] ss:$8 sps:$4 sm:$0xff]  }
 0xca6   : > { %7276 = vmatprep.mubr.bf16.mxu1 %v7081_v29  ;;  %8021 = vmatprep.subr.bf16.mxu0 %v11715_v18  ;;  %v11739_v29 = vld [vmem:[%s13925_s10 + $0x114] ss:$8 sps:$4 sm:$0xff]  }
 0xca7   : > { %7277 = vmatmul.mubr.bf16.vlgmr.msra.gmra.mxu1 %v7074_v32  ;;  %v11736_v32 = vld [vmem:[%s13925_s10 + $0x4] ss:$8 sps:$4 sm:$0xff]  }
 0xca8   : > { %7689 = vmatpush1.bf16.msra.mxu1 %v11647_v16  ;;  %7720 = vmatprep.mubr.bf16.mxu1 %v7525_v34  ;;  %v11728_v16 = vld [vmem:[%s13925_s10 + $0x10] ss:$8 sps:$4 sm:$0xff]   ;;  %v11745_v34 = vld [vmem:[%s13925_s10 + $0x104] ss:$8 sps:$4 sm:$0xff]  }
 0xca9   : > { %7690 = vmatprep.subr.bf16.mxu1 %v11652_v33  ;;  %8022 = vmatpush1.bf16.msra.mxu0 %v11713_v21  ;;  %v11737_v33 = vld [vmem:[%s13925_s10 + $0x110] ss:$8 sps:$4 sm:$0xff]   ;;  %v7745_v21 = vld [vmem:[%s13927_s1] sm:$0x3] }
 0xcaa   : > { %8023 = vmatprep.subr.bf16.mxu0 %v11721_v22 }
 0xcac   : > { %7691 = vmatpush1.bf16.msra.mxu1 %v11650_v35  ;;  %v11734_v35 = vld [vmem:[%s13925_s10] ss:$8 sps:$4 sm:$0xff]  }
 0xcad   : > { %7692 = vmatprep.subr.bf16.mxu1 %v11655_v36  ;;  %8024 = vmatpush1.bf16.msra.mxu0 %v11719_v25  ;;  %v11742_v36 = vld [vmem:[%s13925_s10 + $0xf4] ss:$8 sps:$4 sm:$0xff]  }
 0xcae   : > { %8025 = vmatprep.subr.bf16.mxu0 %v11727_v12 }
 0xcb0   : > { %7693 = vmatpush1.bf16.msra.mxu1 %v11653_v4  ;;  %v11743_v4 = vld [vmem:[%s13925_s10 + $0x100] ss:$8 sps:$4 sm:$0xff]  }
 0xcb1   : > { %7694 = vmatprep.subr.bf16.mxu1 %v11658_v37  ;;  %8026 = vmatpush1.bf16.msra.mxu0 %v11725_v26  ;;  %v11751_v37 = vld [vmem:[%s13925_s10 + $0x1f4] ss:$8 sps:$4 sm:$0xff]  }
 0xcb2   : > { %8027 = vmatprep.subr.bf16.mxu0 %v11733_v27 }
 0xcb4   : > { %7695 = vmatpush1.bf16.msra.mxu1 %v11656_v38  ;;  %v11740_v38 = vld [vmem:[%s13925_s10 + $0xf0] ss:$8 sps:$4 sm:$0xff]  }
 0xcb5   : > { %7696 = vmatprep.subr.bf16.mxu1 %v11661_v39  ;;  %8028 = vmatpush1.bf16.msra.mxu0 %v11731_v31  ;;  %v11748_v39 = vld [vmem:[%s13925_s10 + $0xe4] ss:$8 sps:$4 sm:$0xff]  }
 0xcb6   : > { %8029 = vmatprep.subr.bf16.mxu0 %v11739_v29 }
 0xcb8   : > { %7697 = vmatpush1.bf16.msra.mxu1 %v11659_v40  ;;  %v11749_v40 = vld [vmem:[%s13925_s10 + $0x1f0] ss:$8 sps:$4 sm:$0xff]  }
 0xcb9   : > { %7698 = vmatprep.subr.bf16.mxu1 %v11664_v41  ;;  %8030 = vmatpush1.bf16.msra.mxu0 %v11737_v33  ;;  %v11746_v41 = vld [vmem:[%s13925_s10 + $0xe0] ss:$8 sps:$4 sm:$0xff]  }
 0xcba   : > { %8031 = vmatprep.subr.bf16.mxu0 %v11745_v34 }
 0xcbc   : > { %7699 = vmatpush1.bf16.msra.mxu1 %v11662_v42  ;;  %v11754_v42 = vld [vmem:[%s13925_s10 + $0xd4] ss:$8 sps:$4 sm:$0xff]  }
 0xcbd   : > { %7700 = vmatprep.subr.bf16.mxu1 %v11667_v43  ;;  %8032 = vmatpush1.bf16.msra.mxu0 %v11743_v4  ;;  %v11752_v43 = vld [vmem:[%s13925_s10 + $0xd0] ss:$8 sps:$4 sm:$0xff]  }
 0xcbe   : > { %8033 = vmatprep.subr.bf16.mxu0 %v11751_v37 }
 0xcc0   : > { %7701 = vmatpush1.bf16.msra.mxu1 %v11665_v44  ;;  %v11757_v44 = vld [vmem:[%s13925_s10 + $0x1e4] ss:$8 sps:$4 sm:$0xff]  }
 0xcc1   : > { %7702 = vmatprep.subr.bf16.mxu1 %v11670_v45  ;;  %8034 = vmatpush2.bf16.msra.mxu0 %v11749_v40  ;;  %v11755_v45 = vld [vmem:[%s13925_s10 + $0x1e0] ss:$8 sps:$4 sm:$0xff]  }
 0xcc2   : > { %8035 = vmatprep.subr.bf16.mxu0 %v11757_v44 }
 0xcc4   : > { %7703 = vmatpush1.bf16.msra.mxu1 %v11668_v47  ;;  %v11760_v47 = vld [vmem:[%s13925_s10 + $0xc4] ss:$8 sps:$4 sm:$0xff]  }
 0xcc5   : > { %7704 = vmatprep.subr.bf16.mxu1 %v11673_v50  ;;  %8036 = vmatpush2.bf16.msra.mxu0 %v11755_v45  ;;  %v11758_v50 = vld [vmem:[%s13925_s10 + $0xc0] ss:$8 sps:$4 sm:$0xff]  }
 0xcc8   : > { %7705 = vmatpush2.bf16.msra.mxu1 %v11671_v46  ;;  %v11763_v46 = vld [vmem:[%s13925_s10 + $0x1d4] ss:$8 sps:$4 sm:$0xff]  }
 0xcc9   : > { %7706 = vmatprep.subr.bf16.mxu1 %v11676_v48  ;;  %v11761_v48 = vld [vmem:[%s13925_s10 + $0x1d0] ss:$8 sps:$4 sm:$0xff]   ;;  %8037 = vmatprep.subr.bf16.mxu0 %v11763_v46 }
 0xcca   : > { %8038 = vmatpush2.bf16.msra.mxu0 %v11761_v48 }
 0xccc   : > { %7707 = vmatpush2.bf16.msra.mxu1 %v11674_v49  ;;  %v11766_v49 = vld [vmem:[%s13925_s10 + $0xb4] ss:$8 sps:$4 sm:$0xff]  }
 0xccd   : > { %7708 = vmatprep.subr.bf16.mxu1 %v11679_v51  ;;  %v11764_v51 = vld [vmem:[%s13925_s10 + $0xb0] ss:$8 sps:$4 sm:$0xff]  }
 0xcd0   : > { %7709 = vmatpush2.bf16.msra.mxu1 %v11677_v52  ;;  %v11769_v52 = vld [vmem:[%s13925_s10 + $0x1c4] ss:$8 sps:$4 sm:$0xff]  }
 0xcd1   : > { %7710 = vmatprep.subr.bf16.mxu1 %v11682_v53  ;;  %v11767_v53 = vld [vmem:[%s13925_s10 + $0x1c0] ss:$8 sps:$4 sm:$0xff]   ;;  %8039 = vmatprep.subr.bf16.mxu0 %v11769_v52 }
 0xcd2   : > { %8040 = vmatpush2.bf16.msra.mxu0 %v11767_v53 }
 0xcd4   : > { %7711 = vmatpush2.bf16.msra.mxu1 %v11680_v61  ;;  %v11772_v61 = vld [vmem:[%s13925_s10 + $0xa4] ss:$8 sps:$4 sm:$0xff]  }
 0xcd5   : > { %7712 = vmatprep.subr.bf16.mxu1 %v11685_v54  ;;  %v11770_v54 = vld [vmem:[%s13925_s10 + $0xa0] ss:$8 sps:$4 sm:$0xff]  }
 0xcd8   : > { %7713 = vmatpush2.bf16.msra.mxu1 %v11683_v62  ;;  %v11775_v62 = vld [vmem:[%s13925_s10 + $0x1b4] ss:$8 sps:$4 sm:$0xff]  }
 0xcd9   : > { %7714 = vmatprep.subr.bf16.mxu1 %v11688_v55  ;;  %v11773_v55 = vld [vmem:[%s13925_s10 + $0x1b0] ss:$8 sps:$4 sm:$0xff]   ;;  %8041 = vmatprep.subr.bf16.mxu0 %v11775_v62  ;;  %v11796_v62 = vld [vmem:[%s13925_s10 + $0x264] ss:$8 sps:$4 sm:$0xff]  }
 0xcda   : > { %8042 = vmatpush2.bf16.msra.mxu0 %v11773_v55 }
 0xcdc   : > { %7715 = vmatpush2.bf16.msra.mxu1 %v11686_v56  ;;  %v11776_v56 = vld [vmem:[%s13925_s10 + $0x90] ss:$8 sps:$4 sm:$0xff]  }
 0xcdd   : > { %7716 = vmatprep.subr.bf16.mxu1 %v11691_v58  ;;  %v11778_v58 = vld [vmem:[%s13925_s10 + $0x94] ss:$8 sps:$4 sm:$0xff]  }
 0xce0   : > { %7717 = vmatpush2.bf16.msra.mxu1 %v11689_v60  ;;  %v11779_v60 = vld [vmem:[%s13925_s10 + $0x1a0] ss:$8 sps:$4 sm:$0xff]  }
 0xce1   : > { %7718 = vmatprep.subr.bf16.mxu1 %v11694_v63  ;;  %v11781_v63 = vld [vmem:[%s13925_s10 + $0x1a4] ss:$8 sps:$4 sm:$0xff]  }
 0xce2   : > { %8043 = vmatprep.subr.bf16.mxu0 %v11781_v63  ;;  %v11802_v63 = vld [vmem:[%s13925_s10 + $0x244] ss:$8 sps:$4 sm:$0xff]  }
 0xce3   : > { %8044 = vmatpush2.bf16.msra.mxu0 %v11779_v60  ;;  %v11797_v60 = vld [vmem:[%s13925_s10 + $0x250] ss:$8 sps:$4 sm:$0xff]  }
 0xce4   : > { %7719 = vmatpush2.bf16.msra.mxu1 %v11692_v1  ;;  %v11787_v1 = vld [vmem:[%s13925_s10 + $0x194] ss:$8 sps:$4 sm:$0xff]  }
 0xce5   : > { %8218 = vmatprep.subr.bf16.mxu1 %v11697_v2  ;;  %8045 = vmatprep.subr.bf16.mxu0 %v11787_v1  ;;  %v11788_v2 = vld [vmem:[%s13925_s10 + $0x180] ss:$8 sps:$4 sm:$0xff]   ;;  %v11805_v1 = vld [vmem:[%s13925_s10 + $0x234] ss:$8 sps:$4 sm:$0xff]  }
 0xce7   : > { %7721 = vmatmul.mubr.bf16.vlgmr.msra.gmra.mxu1 %v7524_v5  ;;  %v11785_v5 = vld [vmem:[%s13925_s10 + $0x190] ss:$8 sps:$4 sm:$0xff]  }
 0xce8   : > { %8219 = vmatpush1.bf16.msra.mxu1 %v11695_v6  ;;  %8046 = vmatpush2.bf16.msra.mxu0 %v11785_v5  ;;  %v11790_v6 = vld [vmem:[%s13925_s10 + $0x184] ss:$8 sps:$4 sm:$0xff]  }
 0xce9   : > { %8220 = vmatprep.subr.bf16.mxu1 %v11700_v7  ;;  %8047 = vmatprep.subr.bf16.mxu0 %v11790_v6  ;;  %v11793_v7 = vld [vmem:[%s13925_s10 + $0x274] ss:$8 sps:$4 sm:$0xff]   ;;  %v11808_v5 = vld [vmem:[%s13925_s10 + $0x224] ss:$8 sps:$4 sm:$0xff]   ;;  %v11806_v6 = vld [vmem:[%s13925_s10 + $0x220] ss:$8 sps:$4 sm:$0xff]  }
 0xcec   : > { %8221 = vmatpush1.bf16.msra.mxu1 %v11698_v10  ;;  %8048 = vmatpush2.bf16.msra.mxu0 %v11788_v2  ;;  %v11811_v2 = vld [vmem:[%s13925_s10 + $0x214] ss:$8 sps:$4 sm:$0xff]  }
 0xced   : > { %8222 = vmatprep.subr.bf16.mxu1 %v11706_v14  ;;  %8461 = vmatprep.subr.bf16.mxu0 %v11793_v7  ;;  %v11809_v7 = vld [vmem:[%s13925_s10 + $0x210] ss:$8 sps:$4 sm:$0xff]  }
 0xcf0   : > { %8223 = vmatpush1.bf16.msra.mxu1 %v11704_v19 }
 0xcf1   : > { %8224 = vmatprep.subr.bf16.mxu1 %v11712_v20  ;;  %v7731_v20 = vld [vmem:[%s13926_s13] sm:$0x3] }
 0xcf4   : > { %8225 = vmatpush1.bf16.msra.mxu1 %v11710_v23  ;;  %v7736_v23 = vrot.slane %v7731_v20, %v13538_v57 }
 0xcf5   : > { %8226 = vmatprep.subr.bf16.mxu1 %v11718_v24 }
 0xcf8   : > { %8227 = vmatpush1.bf16.msra.mxu1 %v11716_v13  ;;  %v7750_v13 = vrot.slane %v7745_v21, %v13538_v57 }
 0xcf9   : > { %8228 = vmatprep.subr.bf16.mxu1 %v11724_v17  ;;  %v7740_v17 = vrot.slane %v7731_v20, %v13541_v59  ;;  %v11826_v20 = vld [vmem:[%s13925_s10 + $0x2c4] ss:$8 sps:$4 sm:$0xff]  }
 0xcfc   : > { %8229 = vmatpush1.bf16.msra.mxu1 %v11722_v28 }
 0xcfd   : > { %8230 = vmatprep.subr.bf16.mxu1 %v11730_v30  ;;  %v7754_v30 = vrot.slane %v7745_v21, %v13541_v59  ;;  %v11824_v21 = vld [vmem:[%s13925_s10 + $0x2c0] ss:$8 sps:$4 sm:$0xff]  }
 0xd00   : > { %8231 = vmatpush1.bf16.msra.mxu1 %v11728_v16 }
 0xd01   : > { %8232 = vmatprep.subr.bf16.mxu1 %v11736_v32 }
 0xd04   : > { %8233 = vmatpush1.bf16.msra.mxu1 %v11734_v35 }
 0xd05   : > { %8234 = vmatprep.subr.bf16.mxu1 %v11742_v36 }
 0xd08   : > { %8235 = vmatpush2.bf16.msra.mxu1 %v11740_v38 }
 0xd09   : > { %8236 = vmatprep.subr.bf16.mxu1 %v11748_v39 }
 0xd0c   : > { %8237 = vmatpush2.bf16.msra.mxu1 %v11746_v41 }
 0xd0d   : > { %8238 = vmatprep.subr.bf16.mxu1 %v11754_v42 }
 0xd10   : > { %8239 = vmatpush2.bf16.msra.mxu1 %v11752_v43 }
 0xd11   : > { %8240 = vmatprep.subr.bf16.mxu1 %v11760_v47 }
 0xd14   : > { %8241 = vmatpush2.bf16.msra.mxu1 %v11758_v50 }
 0xd15   : > { %8242 = vmatprep.subr.bf16.mxu1 %v11766_v49 }
 0xd18   : > { %8243 = vmatpush2.bf16.msra.mxu1 %v11764_v51 }
 0xd19   : > { %8244 = vmatprep.subr.bf16.mxu1 %v11772_v61  ;;  %v11791_v61 = vld [vmem:[%s13925_s10 + $0x270] ss:$8 sps:$4 sm:$0xff]  }
 0xd1c   : > { %8245 = vmatpush2.bf16.msra.mxu1 %v11770_v54 }
 0xd1d   : > { %8246 = vmatprep.subr.bf16.mxu1 %v11778_v58  ;;  %v11799_v58 = vld [vmem:[%s13925_s10 + $0x254] ss:$8 sps:$4 sm:$0xff]  }
 0xd20   : > { %8247 = vmatpush2.bf16.msra.mxu1 %v11776_v56  ;;  %v11794_v56 = vld [vmem:[%s13925_s10 + $0x260] ss:$8 sps:$4 sm:$0xff]  }
 0xd21   : > { %8248 = vmatprep.subr.bf16.mxu1 %v11784_v0  ;;  %v11800_v0 = vld [vmem:[%s13925_s10 + $0x240] ss:$8 sps:$4 sm:$0xff]  }
 0xd24   : > { %8249 = vmatpush2.bf16.msra.mxu1 %v11782_v3  ;;  %v11803_v3 = vld [vmem:[%s13925_s10 + $0x230] ss:$8 sps:$4 sm:$0xff]  }
 0xd60   : > { %v7479_v8 = vpop.f32.mrf.mxu0 }
 0xd62   : > { %v7481_v9 = vpop.f32.mrf.mxu0 }
 0xd64   : > { %v7483_v10 = vpop.f32.mrf.mxu0 }
 0xd65   : > { %v11817_v10 = vld [vmem:[%s13925_s10 + $0x2f4] ss:$8 sps:$4 sm:$0xff]  }
 0xd66   : > { %v7484_v14 = vpop.f32.mrf.mxu0 }
 0xd67   : > { %v7278_v11 = vpop.f32.mrf.mxu1  ;;  %v11820_v14 = vld [vmem:[%s13925_s10 + $0x2e4] ss:$8 sps:$4 sm:$0xff]  }
 0xd68   : > { %v7480_v22 = vadd.f32 %v7479_v8, %v7278_v11  ;;  %v11814_v8 = vld [vmem:[%s13925_s10 + $0x204] ss:$8 sps:$4 sm:$0xff]   ;;  %v11815_v11 = vld [vmem:[%s13925_s10 + $0x2f0] ss:$8 sps:$4 sm:$0xff]  }
 0xd69   : > { %v7280_v15 = vpop.f32.mrf.mxu1 }
 0xd6a   : > { %v7482_v25 = vadd.f32 %v7481_v9, %v7280_v15  ;;  %v11812_v9 = vld [vmem:[%s13925_s10 + $0x200] ss:$8 sps:$4 sm:$0xff]  }
 0xd6b   : > { %v7282_v18 = vpop.f32.mrf.mxu1  ;;  %v11818_v15 = vld [vmem:[%s13925_s10 + $0x2e0] ss:$8 sps:$4 sm:$0xff]  }
 0xd6c   : > { %v11823_v18 = vld [vmem:[%s13925_s10 + $0x2d4] ss:$8 sps:$4 sm:$0xff]  }
 0xd6d   : > { %v7283_v19 = vpop.f32.mrf.mxu1 }
 0xd6e   : > { %v11821_v19 = vld [vmem:[%s13925_s10 + $0x2d0] ss:$8 sps:$4 sm:$0xff]  }
 0xda7   : > { %v7722_v24 = vpop.f32.mrf.mxu1 }
 0xda8   : > { %v7729_v12 = vadd.f32 %v7722_v24, %v7480_v22  ;;  %v11829_v22 = vld [vmem:[%s13925_s10 + $0x2b4] ss:$8 sps:$4 sm:$0xff]   ;;  %v11832_v24 = vld [vmem:[%s13925_s10 + $0x2a4] ss:$8 sps:$4 sm:$0xff]  }
 0xda9   : > { %v7724_v26 = vpop.f32.mrf.mxu1 }
 0xdaa   : > { %v7743_v27 = vmul.f32 %v7736_v23, %v7729_v12  ;;  %v7730_v28 = vadd.f32 %v7724_v26, %v7482_v25  ;;  %v11827_v23 = vld [vmem:[%s13925_s10 + $0x2b0] ss:$8 sps:$4 sm:$0xff]   ;;  %v11830_v25 = vld [vmem:[%s13925_s10 + $0x2a0] ss:$8 sps:$4 sm:$0xff]   ;;  %v11835_v12 = vld [vmem:[%s13925_s10 + $0x294] ss:$8 sps:$4 sm:$0xff]  }
 0xdab   : > { %v7726_v31 = vpop.f32.mrf.mxu1 }
 0xdac   : > { %v7757_v29 = vadd.f32 %v7750_v13, %v7743_v27  ;;  %v7744_v16 = vmul.f32 %v7740_v17, %v7730_v28  ;;  %v11833_v13 = vld [vmem:[%s13925_s10 + $0x290] ss:$8 sps:$4 sm:$0xff]   ;;  %v11838_v17 = vld [vmem:[%s13925_s10 + $0x284] ss:$8 sps:$4 sm:$0xff]   ;;  %v11836_v27 = vld [vmem:[%s13925_s10 + $0x280] ss:$8 sps:$4 sm:$0xff]  }
 0xdad   : > { %v7727_v32 = vpop.f32.mrf.mxu1  ;;  %v11839_v31 = vld [vmem:[#allocation52 + $0x78] sm:$0xff]  }
 0xdae   : > { %v7759_v33 = vmax.f32 %v7757_v29, 0.0  ;;  %v7758_v34 = vadd.f32 %v7754_v30, %v7744_v16  ;;  %v11840_v29 = vld [vmem:[#allocation52 + $0x38] sm:$0xff]   ;;  %10099 = vmatprep.subr.bf16.mxu1 %v11839_v31  ;;  %v11841_v16 = vld [vmem:[#allocation52 + $0x70] sm:$0xff]  }
 0xdaf   : > { %v11842_v32 = vld [vmem:[#allocation52 + $0x30] sm:$0xff]  }
 0xdb0   : > { %v7763_v35 = vrot.slane %v7759_v33, 7  ;;  %v7760_v36 = vmax.f32 %v7758_v34, 0.0  ;;  %v11843_v33 = vld [vmem:[#allocation52 + $0x68] sm:$0xff]  }
 0xdb1   : > { %v11844_v34 = vld [vmem:[#allocation52 + $0x28] sm:$0xff]  }
 0xdb2   : > { %7767 = vst [vmem:[#allocation16 + $0x8] sm:$0x1e] %v7763_v35  ;;  %v7764_v4 = vrot.slane %v7760_v36, 7  ;;  %v11845_v35 = vld [vmem:[#allocation52 + $0x60] sm:$0xff]  }
 0xdb3   : > { %v11846_v36 = vld [vmem:[#allocation52 + $0x20] sm:$0xff]  }
 0xdb4   : > { %7768 = vst [vmem:[#allocation16] sm:$0x1e] %v7764_v4  ;;  %v11847_v4 = vld [vmem:[#allocation52 + $0x58] sm:$0xff]  }
 0xdb9   : > { %v7805_v37 = vld [vmem:[#allocation16 + $0x8] sm:$0x1e] }
 0xdba   : > { %v7769_v38 = vld [vmem:[#allocation16 + $0x8] sm:$0xf]  ;;  %v7807_v39 = vpack.c.bf16 %v7805_v37, %v7805_v37  ;;  %v11848_v37 = vld [vmem:[#allocation52 + $0x18] sm:$0xff]  }
 0xdbb   : > { %v7770_v40 = vld [vmem:[#allocation16] sm:$0xf]  ;;  %v7771_v45 = vpack.c.bf16 %v7769_v38, %v7769_v38  ;;  %v8259_v26 = vld [vmem:[#allocation16 + $0x8] sm:$0x3c]  ;;  %v11849_v38 = vld [vmem:[#allocation52 + $0x50] sm:$0xff]  }
 0xdbc   : > { %v7806_v41 = vld [vmem:[#allocation16] sm:$0x1e]  ;;  %v7772_v42 = vpack.c.bf16 %v7770_v40, %v7770_v40  ;;  %v7844_v44 = vshll.u32 %v7807_v39, 16  ;;  %v7842_v52 = vshrl.u32 %v7807_v39, 16  ;;  %v8261_v28 = vpack.c.bf16 %v8259_v26, %v8259_v26  ;;  %v11850_v39 = vld [vmem:[#allocation52 + $0x10] sm:$0xff]   ;;  %v11851_v40 = vld [vmem:[#allocation52 + $0x48] sm:$0xff]  }
 0xdbd   : > { %v7808_v43 = vpack.c.bf16 %v7806_v41, %v7806_v41  ;;  %v8260_v47 = vld [vmem:[#allocation16] sm:$0x3c]  ;;  %v11852_v41 = vld [vmem:[#allocation52 + $0x8] sm:$0xff]  }
 0xdbe   : > { %8250 = vmatprep.mubr.bf16.mxu1 %v7772_v42  ;;  %v7846_v46 = vrot.slane %v7844_v44, 1  ;;  %v8262_v51 = vpack.c.bf16 %v8260_v47, %v8260_v47  ;;  %v8297_v30 = vrot.slane %v8261_v28, 1  ;;  %v11853_v42 = vld [vmem:[#allocation52 + $0x40] sm:$0xff]  }
 0xdbf   : > { %v7851_v50 = vshll.u32 %v7808_v43, 16  ;;  %8251 = vmatmul.mubr.bf16.vlgmr.msra.gmra.mxu1 %v7771_v45  ;;  %v7849_v48 = vshrl.u32 %v7808_v43, 16  ;;  %v11854_v43 = vld [vmem:[#allocation52] sm:$0xff]  }
 0xdc0   : > { %v7847_v54 = vor.u32 %v7846_v46, %v7842_v52  ;;  %v8298_v55 = vrot.slane %v8262_v51, 1  ;;  %10100 = vmatpush3.bf16.msra.mxu1 %v11840_v29 }
 0xdc1   : > { %v7853_v49 = vrot.slane %v7851_v50, 1  ;;  %10101 = vmatprep.subr.bf16.mxu1 %v11841_v16 }
 0xdc3   : > { %v7854_v53 = vor.u32 %v7853_v49, %v7849_v48 }
 0xdc4   : > { %10102 = vmatpush3.bf16.msra.mxu1 %v11842_v32 }
 0xdc5   : > { %8049 = vmatprep.mubr.bf16.mxu0 %v7854_v53  ;;  %10103 = vmatprep.subr.bf16.mxu1 %v11843_v33  ;;  %v8504_v53 = vld [vmem:[%s13928_s4] sm:$0x3] }
 0xdc6   : > { %8050 = vmatmul.mubr.bf16.vlgmr.msra.gmra.mxu0 %v7847_v54  ;;  %v8509_v54 = vrot.slane %v8504_v53, %v13538_v57 }
 0xdc7   : > { %8462 = vmatpush1.bf16.msra.mxu0 %v11791_v61  ;;  %8493 = vmatprep.mubr.bf16.mxu0 %v8298_v55  ;;  %v8518_v61 = vld [vmem:[%s12826_s14] sm:$0x3] }
 0xdc8   : > { %8463 = vmatprep.subr.bf16.mxu0 %v11796_v62  ;;  %10104 = vmatpush3.bf16.msra.mxu1 %v11844_v34 }
 0xdc9   : > { %10105 = vmatprep.subr.bf16.mxu1 %v11845_v35 }
 0xdcb   : > { %8464 = vmatpush1.bf16.msra.mxu0 %v11794_v56 }
 0xdcc   : > { %8465 = vmatprep.subr.bf16.mxu0 %v11799_v58  ;;  %10106 = vmatpush3.bf16.msra.mxu1 %v11846_v36  ;;  %v8523_v58 = vrot.slane %v8518_v61, %v13538_v57 }
 0xdcd   : > { %10107 = vmatprep.subr.bf16.mxu1 %v11847_v4  ;;  %v8605_v4 = vld [vmem:[%s12836_s24] sm:$0x1] }
 0xdcf   : > { %8466 = vmatpush1.bf16.msra.mxu0 %v11797_v60  ;;  %v8513_v60 = vrot.slane %v8504_v53, %v13541_v59 }
 0xdd0   : > { %8467 = vmatprep.subr.bf16.mxu0 %v11802_v63  ;;  %10108 = vmatpush3.bf16.msra.mxu1 %v11848_v37  ;;  %v8532_v63 = vld [vmem:[#allocation15 + $0x8] sm:$0x1e] }
 0xdd1   : > { %10109 = vmatprep.subr.bf16.mxu1 %v11849_v38 }
 0xdd3   : > { %8468 = vmatpush1.bf16.msra.mxu0 %v11800_v0 }
 0xdd4   : > { %8469 = vmatprep.subr.bf16.mxu0 %v11805_v1  ;;  %10110 = vmatpush3.bf16.msra.mxu1 %v11850_v39 }
 0xdd5   : > { %10111 = vmatprep.subr.bf16.mxu1 %v11851_v40 }
 0xdd7   : > { %8470 = vmatpush1.bf16.msra.mxu0 %v11803_v3 }
 0xdd8   : > { %8471 = vmatprep.subr.bf16.mxu0 %v11808_v5  ;;  %10112 = vmatpush3.bf16.msra.mxu1 %v11852_v41  ;;  %v8527_v5 = vrot.slane %v8518_v61, %v13541_v59 }
 0xdd9   : > { %10113 = vmatprep.subr.bf16.mxu1 %v11853_v42 }
 0xddb   : > { %8472 = vmatpush1.bf16.msra.mxu0 %v11806_v6  ;;  %v8533_v6 = vld [vmem:[#allocation15] sm:$0x1e] }
 0xddc   : > { %8473 = vmatprep.subr.bf16.mxu0 %v11811_v2  ;;  %10114 = vmatpush3.bf16.msra.mxu1 %v11854_v43 }
 0xddf   : > { %8474 = vmatpush1.bf16.msra.mxu0 %v11809_v7 }
 0xde0   : > { %8475 = vmatprep.subr.bf16.mxu0 %v11814_v8  ;;  %v8536_v8 = vrot.slane %v8532_v63, 1 }
 0xde3   : > { %8476 = vmatpush1.bf16.msra.mxu0 %v11812_v9 }
 0xde4   : > { %8477 = vmatprep.subr.bf16.mxu0 %v11817_v10 }
 0xde7   : > { %8478 = vmatpush2.bf16.msra.mxu0 %v11815_v11 }
 0xde8   : > { %8479 = vmatprep.subr.bf16.mxu0 %v11820_v14 }
 0xdeb   : > { %8480 = vmatpush2.bf16.msra.mxu0 %v11818_v15  ;;  %v8537_v15 = vrot.slane %v8533_v6, 1 }
 0xdec   : > { %8481 = vmatprep.subr.bf16.mxu0 %v11823_v18 }
 0xdef   : > { %8482 = vmatpush2.bf16.msra.mxu0 %v11821_v19 }
 0xdf0   : > { %8483 = vmatprep.subr.bf16.mxu0 %v11826_v20 }
 0xdf3   : > { %8484 = vmatpush2.bf16.msra.mxu0 %v11824_v21 }
 0xdf4   : > { %8485 = vmatprep.subr.bf16.mxu0 %v11829_v22 }
 0xdf7   : > { %8486 = vmatpush2.bf16.msra.mxu0 %v11827_v23 }
 0xdf8   : > { %8487 = vmatprep.subr.bf16.mxu0 %v11832_v24 }
 0xdfb   : > { %8488 = vmatpush2.bf16.msra.mxu0 %v11830_v25 }
 0xdfc   : > { %8489 = vmatprep.subr.bf16.mxu0 %v11835_v12 }
 0xdff   : > { %8490 = vmatpush2.bf16.msra.mxu0 %v11833_v13 }
 0xe00   : > { %8491 = vmatprep.subr.bf16.mxu0 %v11838_v17 }
 0xe03   : > { %8492 = vmatpush2.bf16.msra.mxu0 %v11836_v27 }
 0xe06   : > { %8494 = vmatmul.mubr.bf16.vlgmr.msra.gmra.mxu0 %v8297_v30 }
 0xe7f   : > { %v8252_v44 = vpop.f32.mrf.mxu1 }
 0xe81   : > { %v8254_v45 = vpop.f32.mrf.mxu1 }
 0xe83   : > { %v8256_v47 = vpop.f32.mrf.mxu1 }
 0xe85   : > { %v8257_v46 = vpop.f32.mrf.mxu1 }
 0xe86   : > { %v8051_v50 = vpop.f32.mrf.mxu0 }
 0xe87   : > { %v8253_v48 = vadd.f32 %v8252_v44, %v8051_v50 }
 0xe88   : > { %v8053_v49 = vpop.f32.mrf.mxu0 }
 0xe89   : > { %v8255_v55 = vadd.f32 %v8254_v45, %v8053_v49 }
 0xe8a   : > { %v8055_v51 = vpop.f32.mrf.mxu0 }
 0xe8c   : > { %v8056_v52 = vpop.f32.mrf.mxu0 }
 0xec6   : > { %v8495_v62 = vpop.f32.mrf.mxu0 }
 0xec7   : > { %v8502_v56 = vadd.f32 %v8495_v62, %v8253_v48 }
 0xec8   : > { %v8497_v0 = vpop.f32.mrf.mxu0 }
 0xec9   : > { %v8516_v1 = vmul.f32 %v8509_v54, %v8502_v56  ;;  %v8503_v3 = vadd.f32 %v8497_v0, %v8255_v55 }
 0xeca   : > { %v8499_v2 = vpop.f32.mrf.mxu0 }
 0xecb   : > { %v8530_v7 = vadd.f32 %v8523_v58, %v8516_v1  ;;  %v8517_v9 = vmul.f32 %v8513_v60, %v8503_v3 }
 0xecc   : > { %v8500_v10 = vpop.f32.mrf.mxu0 }
 0xecd   : > { %v8540_v11 = vadd.f32 %v8536_v8, %v8530_v7  ;;  %v8531_v14 = vadd.f32 %v8527_v5, %v8517_v9 }
 0xecf   : > { %v8541_v18 = vadd.f32 %v8537_v15, %v8531_v14  ;;  %v8542_v19 = vmax.f32 %v8540_v11, 0.0 }
 0xed1   : > { %v8543_v20 = vmax.f32 %v8541_v18, 0.0 }
 0xed3   : > { %v8546_v21 = vcombine.low %v8542_v19, %v8543_v20  ;;  %v9803_v22 = vcombine.low %v8543_v20, %v8543_v20 }
 0xed5   : > { %v8554_v23 = vsel %vm8553_vm1, %v8546_v21, 0.0  ;;  %v8561_v24 = vsel %vm8553_vm1, %v9803_v22, 0.0 }
 0xed6   : > { %v8555_v25 = vrot.slane %v8554_v23, 4  ;;  %v8562_v12 = vrot.slane %v8561_v24, 4 }
 0xed8   : > { %v8556_v59 = vadd.f32 %v8555_v25, %v8554_v23  ;;  %v8563_v13 = vadd.f32 %v8562_v12, %v8561_v24 }
 0xeda   : > { %v8564_v17 = vrot.slane %v8563_v13, 2  ;;  %v8557_v26 = vrot.slane %v8556_v59, 2 }
 0xedc   : > { %v8565_v27 = vadd.f32 %v8564_v17, %v8563_v13  ;;  %v8558_v28 = vadd.f32 %v8557_v26, %v8556_v59 }
 0xede   : > { %v8566_v30 = vrot.slane %v8565_v27, 1  ;;  %v8559_v31 = vrot.slane %v8558_v28, 1 }
 0xee0   : > { %v8567_v29 = vadd.f32 %v8566_v30, %v8565_v27  ;;  %v8560_v16 = vadd.f32 %v8559_v31, %v8558_v28 }
 0xee2   : > { %v8570_v32 = vmul.f32 0.25, %v8567_v29  ;;  %v8569_v33 = vmul.f32 0.25, %v8560_v16 }
 0xee4   : > { %v8572_v34 = vpack.c.bf16 %v8570_v32, %v8570_v32  ;;  %v8571_v35 = vpack.c.bf16 %v8569_v33, %v8569_v33 }
 0xee6   : > { %8734 = vmatprep.mubr.bf16.mxu1 %v8572_v34 }
 0xee7   : > { %8735 = vmatmul.mubr.bf16.vlgmr.msra.gmra.mxu1 %v8571_v35 }
 0xfa7   : > { %v10115_v36 = vpop.f32.mrf.mxu1 }
 0xfa9   : > { %v10116_v37 = vpop.f32.mrf.mxu1 }
 0xfaa   : > { %v10117_v38 = vadd.f32 %v10116_v37, %v10115_v36 }
 0xfab   : > { %v10118_v39 = vpop.f32.mrf.mxu1 }
 0xfac   : > { %v8737_v40 = vadd.f32 %v10117_v38, %v8605_v4 }
 0xfad   : > { %v10119_v41 = vpop.f32.mrf.mxu1 }
 0xfae   : > { %v9799_v42 = vmul.f32 -1.442695, %v8737_v40 }
 0xfb0   : > { %11855 = vpow2.f32 %v9799_v42 }
 0xfbd   : > { %v11856_v43 = vpop.eup %11855 }
 0xfbe   : > { %v8745_v44 = vadd.f32 1.0, %v11856_v43 }
 0xfc0   : > { %11857 = vrcp.f32 %v8745_v44 }
 0xfcd   : > { %v11858_v45 = vpop.eup %11857 }
 0xfce   : > { %v8751_v47 = vrot.slane %v11858_v45, %v13538_v57 }
 0xfd0   : > { %8752 = vst [vmem:[%s1746_s23] sm:$0xff] %v8751_v47 }
 0xfd1 PF: > { %s119_s28 = sadd.s32 1, %s12513_s28  }
 0xfd2   : > { %p116_p13 = scmp.ge.s32.totalorder %s119_s28, 4  }
 0xfd4   :  { %118 = sbr.rel (!%p116_p13) target bundleno = 104 (0x68), region = 419 }
 0xfd9   :  { %8772 = vsyncpa [#allocation19], 1 }
 0xfda   :  { %8774 = vsyncpa [#allocation19 + $0x1], 1 }
 0xfdb   :  { %8775 = vsyncpa [#allocation21], 1 }
 0xfdc   :  { %8776 = vsyncpa [#allocation24], 1 }
 0xfdd   :  { %8777 = vsyncpa [#allocation27], 1 }
 0xfde   :  { %8778 = vsyncpa [#allocation30], 1 }
 0xfdf   :  { %8779 = vsyncpa [#allocation33], 1 }
 0xfe0   :  { %8780 = vsyncpa [#allocation36], 1 }
 0xfe1   :  { %8781 = vsyncpa [#allocation39], 1 }
 0xfe2   :  { %8782 = vsyncpa [#allocation42], 1 }
 0xfe3   :  { %8783 = vsyncpa [#allocation45], 1 }
 0xfe4   :  { %8784 = vsyncpa [#allocation48], 1 }
 0xfe5   :  { %8785 = vsyncpa [#allocation51], 1 }

</bundles_post_ra>
